<compile_context>
chip_gen: v6e
topology: v6e:2x2x1
jax: 0.10.0
libtpu: 0.0.40
codegen_flags: <defaults>
</compile_context>

<pallas_src>
import functools

import jax
import jax.numpy as jnp
from jax.experimental import pallas as pl
from jax.experimental.pallas import tpu as pltpu

# ----------------------------- config ---------------------------------------
IN_FEATURES = 2
HIDDEN_FEATURES = 32
HIDDEN_LAYERS = 2          # number of *hidden* SineLayers (as in Siren.__init__)
OUT_FEATURES = 3
FIRST_OMEGA_0 = 30.0
HIDDEN_OMEGA_0 = 30.0
OUTERMOST_LINEAR = False   # PyTorch default

CHUNK = 512                # lanes per in-kernel sub-chunk (multiple of 128)
MAX_ROW_TILE = 8192        # upper bound on rows per grid step


# ----------------------------- fast sine -------------------------------------
# Cody-Waite split of pi (each term has few mantissa bits -> k * PI_x exact).
_INV_PI = 0.3183098861837907
_PI_A = 3.140625
_PI_B = 0.0009670257568359375
_PI_C = 6.2771141529083252e-07
# Odd Taylor coefficients for sin on [-pi/2, pi/2] (|err| < 1e-7).
_C3 = -0.16666666666666666
_C5 = 0.008333333333333333
_C7 = -0.0001984126984126984
_C9 = 2.7557319223985893e-06
_C11 = -2.505210838544172e-08


def _fast_sin(z):
    """f32 sine for bounded arguments (|z| <~ 1e4): single-step range
    reduction mod pi + degree-11 odd polynomial; ~1e-6 absolute error."""
    k = jnp.floor(z * _INV_PI + 0.5)          # round(z / pi)
    r = z - k * _PI_A
    r = r - k * _PI_B
    r = r - k * _PI_C                          # r in [-pi/2, pi/2]
    r2 = r * r
    p = _C11
    p = p * r2 + _C9
    p = p * r2 + _C7
    p = p * r2 + _C5
    p = p * r2 + _C3
    s = r + r * (r2 * p)
    parity = k - 2.0 * jnp.floor(0.5 * k)      # 0. or 1.
    return jnp.where(parity > 0.5, -s, s)      # sin(k*pi + r) = (-1)^k sin(r)


# ----------------------------- kernel ---------------------------------------
def siren_kernel(x_ref, *refs, num_layers, outermost_linear, chunk,
                 use_bf16_matmul):
    """refs = (w0, b0, w1, b1, ..., w_{L-1}, b_{L-1}, out_ref).

    Lane-dense transposed layout:
      x_ref  : (in_features, row_tile)
      w_l    : (out_l, in_l)   -- omega already folded in (except linear head)
      b_l    : (out_l, 1)      -- omega already folded in (except linear head)
      out_ref: (out_features, row_tile)
    """
    out_ref = refs[-1]
    wb_refs = refs[:-1]
    row_tile = x_ref.shape[-1]
    assert row_tile % chunk == 0
    n_chunks = row_tile // chunk

    # Hoist the tiny weight/bias loads out of the chunk loop.
    ws, bs = [], []
    for layer in range(num_layers):
        w = wb_refs[2 * layer][...]
        if use_bf16_matmul:
            w = w.astype(jnp.bfloat16)
        ws.append(w)
        bs.append(wb_refs[2 * layer + 1][...])

    # Independent per-chunk layer chains: matmul of chunk c+1 overlaps the
    # sine of chunk c, and chunk activations stay in vregs between layers.
    for c in range(n_chunks):
        cols = pl.ds(c * chunk, chunk)
        h = x_ref[:, cols]                                   # (in, chunk) f32
        for layer in range(num_layers):
            lhs = h.astype(jnp.bfloat16) if use_bf16_matmul else h
            z = jnp.dot(ws[layer], lhs,
                        preferred_element_type=jnp.float32) + bs[layer]
            if layer == num_layers - 1 and outermost_linear:
                h = z                                        # plain linear head
            else:
                h = _fast_sin(z)                             # SineLayer
        out_ref[:, cols] = h.astype(out_ref.dtype)


# ----------------------------- tiling helpers --------------------------------
def _round_up(x, m):
    return ((x + m - 1) // m) * m


def _choose_row_tile(n, *, max_tile=MAX_ROW_TILE, chunk=CHUNK):
    # >= 2 (ideally an even number of) grid steps so both v7x TensorCores get
    # balanced work; tile capped so per-step footprint stays comfortably under
    # VMEM on every generation (v7x: 64 MiB physical / 32 MiB scoped default).
    tiles = max(2, pl.cdiv(n, max_tile))
    if tiles % 2:
        tiles += 1
    return max(chunk, _round_up(pl.cdiv(n, tiles), chunk))


# ----------------------------- wrappers ---------------------------------------
def siren_forward_t(x_t, weights, biases, *, first_omega=FIRST_OMEGA_0,
                    hidden_omega=HIDDEN_OMEGA_0,
                    outermost_linear=OUTERMOST_LINEAR, row_tile=None,
                    chunk=CHUNK, use_bf16_matmul=False, vmem_limit_bytes=None):
    """Core (lane-dense) entry point.
       x_t: (in_features, N) f32.  Returns (out_features, N).
       weights[l]: (out_l, in_l) PyTorch nn.Linear layout; biases[l]: (out_l,)."""
    in_features, n = x_t.shape
    num_layers = len(weights)
    out_dim = weights[-1].shape[0]
    hidden = max(w.shape[0] for w in weights)

    if row_tile is None:
        row_tile = _choose_row_tile(n, chunk=chunk)
    row_tile = _round_up(row_tile, chunk)
    num_tiles = pl.cdiv(n, row_tile)
    n_pad = num_tiles * row_tile

    x_t = x_t.astype(jnp.float32)
    if n_pad != n:
        x_t = jnp.pad(x_t, ((0, 0), (0, n_pad - n)))

    # Fold omega into the tiny weights/biases once, outside the kernel.
    params = []
    for layer, (w, b) in enumerate(zip(weights, biases)):
        omega = first_omega if layer == 0 else hidden_omega
        is_linear_head = (layer == num_layers - 1) and outermost_linear
        scale = 1.0 if is_linear_head else omega
        params.append((scale * w).astype(jnp.float32))                    # (out, in)
        params.append((scale * jnp.asarray(b)).reshape(-1, 1)
                      .astype(jnp.float32))                               # (out, 1)

    # Coords/out tiled over the lane (row) axis; params resident (constant idx).
    x_spec = pl.BlockSpec((in_features, row_tile), lambda i: (0, i))
    o_spec = pl.BlockSpec((out_dim, row_tile), lambda i: (0, i))
    param_specs = [pl.BlockSpec(p.shape, lambda i: (0, 0)) for p in params]

    if vmem_limit_bytes is None:
        # Double-buffered I/O tiles + resident params + a few live chunk
        # intermediates, with 2x headroom; clamped to [16 MiB, 32 MiB] so it is
        # safe on v5e (16 MiB scoped default) and v7x (64 MiB physical).
        io_bytes = 2 * 4 * row_tile * (in_features + out_dim)
        chunk_bytes = 4 * (4 * hidden * chunk)
        param_bytes = sum(p.size * 4 for p in params)
        vmem_limit_bytes = min(32 * 1024 * 1024,
                               max(16 * 1024 * 1024,
                                   2 * (io_bytes + chunk_bytes + param_bytes)))

    kernel = functools.partial(
        siren_kernel,
        num_layers=num_layers,
        outermost_linear=outermost_linear,
        chunk=chunk,
        use_bf16_matmul=use_bf16_matmul,
    )

    out_t = pl.pallas_call(
        kernel,
        out_shape=jax.ShapeDtypeStruct((out_dim, n_pad), jnp.float32),
        grid_spec=pltpu.PrefetchScalarGridSpec(
            num_scalar_prefetch=0,
            grid=(num_tiles,),
            in_specs=[x_spec] + param_specs,
            out_specs=o_spec,
        ),
        compiler_params=pltpu.CompilerParams(
            dimension_semantics=("parallel",),
            vmem_limit_bytes=int(vmem_limit_bytes)),
    )(x_t, *params)

    return out_t[:, :n] if n_pad != n else out_t


def siren_forward(coords, weights, biases, **kwargs):
    """PyTorch-layout wrapper: coords (N, in_features) -> (N, out_features).

    NOTE: the transpose / pad / slice here are extra HBM passes outside the
    compute-bound kernel; callers with very large point clouds should keep the
    (features, N) layout end-to-end and call siren_forward_t directly."""
    out_t = siren_forward_t(coords.T, weights, biases, **kwargs)
    return out_t.T


# ----------------------------- param init ------------------------------------
def init_siren_params(key):
    """Deterministic init matching SineLayer.init_weights + nn.Linear bias init.
    Weights returned in PyTorch nn.Linear layout (out_features, in_features)."""
    dims = ([IN_FEATURES] + [HIDDEN_FEATURES] * (HIDDEN_LAYERS + 1)
            + [OUT_FEATURES])
    weights, biases = [], []
    num_layers = len(dims) - 1
    for layer in range(num_layers):
        fan_in, fan_out = dims[layer], dims[layer + 1]
        key, kw, kb = jax.random.split(key, 3)
        if layer == 0:
            bound_w = 1.0 / fan_in
        else:
            bound_w = jnp.sqrt(6.0 / fan_in) / HIDDEN_OMEGA_0
        w = jax.random.uniform(kw, (fan_out, fan_in), jnp.float32,
                               minval=-bound_w, maxval=bound_w)
        bound_b = 1.0 / jnp.sqrt(float(fan_in))
        b = jax.random.uniform(kb, (fan_out,), jnp.float32,
                               minval=-bound_b, maxval=bound_b)
        weights.append(w)
        biases.append(b)
    return weights, biases


# ----------------------------- reference (pure JAX) ---------------------------
def siren_ref(coords, weights, biases):
    """Faithful to the PyTorch module: sin(omega * (x @ W.T + b)) per SineLayer."""
    h = coords
    num_layers = len(weights)
    for layer in range(num_layers):
        z = h @ weights[layer].T + biases[layer]
        omega = FIRST_OMEGA_0 if layer == 0 else HIDDEN_OMEGA_0
        if layer == num_layers - 1 and OUTERMOST_LINEAR:
            h = z
        else:
            h = jnp.sin(omega * z)
    return h


# ----------------------------- main -------------------------------------------
if __name__ == "__main__":
    key = jax.random.PRNGKey(0)
    key, kc = jax.random.split(key)

    # N deliberately not a multiple of the tile: exercises the ragged tail,
    # the 2-tile (v7x-balanced) grid, and multi-chunk in-kernel iteration.
    N = 3000
    coords = jax.random.uniform(kc, (N, IN_FEATURES), jnp.float32,
                                minval=-1.0, maxval=1.0)

    weights, biases = init_siren_params(key)

    out = jax.block_until_ready(siren_forward(coords, weights, biases))
    ref = siren_ref(coords, weights, biases)

    assert out.shape == (N, OUT_FEATURES)
    # omega-folding reorders f32 arithmetic and the bounded-range sine differs
    # from jnp.sin by ~1e-6; 1e-3 is the right bound for these mathematically
    # identical f32 evaluations with omega=30 over 4 layers.
    assert jnp.allclose(out, ref, atol=1e-3, rtol=1e-3), \
        "mismatch vs JAX reference"

    print("KERNEL_OK")
</pallas_src>

<mosaic_0001>
module attributes {stable_mosaic.version = 11 : i64} {
  func.func @siren_kernel(%arg0: i32, %arg1: memref<2x1536xf32, #tpu.memory_space<vmem>>, %arg2: memref<32x2xf32, #tpu.memory_space<vmem>>, %arg3: memref<32x1xf32, #tpu.memory_space<vmem>>, %arg4: memref<32x32xf32, #tpu.memory_space<vmem>>, %arg5: memref<32x1xf32, #tpu.memory_space<vmem>>, %arg6: memref<32x32xf32, #tpu.memory_space<vmem>>, %arg7: memref<32x1xf32, #tpu.memory_space<vmem>>, %arg8: memref<3x32xf32, #tpu.memory_space<vmem>>, %arg9: memref<3x1xf32, #tpu.memory_space<vmem>>, %arg10: memref<3x1536xf32, #tpu.memory_space<vmem>>) attributes {dimension_semantics = [#tpu.dimension_semantics<parallel>], iteration_bounds = array<i64: 2>, scalar_prefetch = 0 : i64, scratch_operands = 0 : i64, tpu.core_type = #tpu.core_type<tc>, window_params = [{transform_indices = @transform_0, window_bounds = array<i64: 2, 1536>}, {pipeline_mode = #tpu.pipeline_mode<synchronous>, transform_indices = @transform_1, window_bounds = array<i64: 32, 2>}, {pipeline_mode = #tpu.pipeline_mode<synchronous>, transform_indices = @transform_2, window_bounds = array<i64: 32, 1>}, {pipeline_mode = #tpu.pipeline_mode<synchronous>, transform_indices = @transform_3, window_bounds = array<i64: 32, 32>}, {pipeline_mode = #tpu.pipeline_mode<synchronous>, transform_indices = @transform_4, window_bounds = array<i64: 32, 1>}, {pipeline_mode = #tpu.pipeline_mode<synchronous>, transform_indices = @transform_5, window_bounds = array<i64: 32, 32>}, {pipeline_mode = #tpu.pipeline_mode<synchronous>, transform_indices = @transform_6, window_bounds = array<i64: 32, 1>}, {pipeline_mode = #tpu.pipeline_mode<synchronous>, transform_indices = @transform_7, window_bounds = array<i64: 3, 32>}, {pipeline_mode = #tpu.pipeline_mode<synchronous>, transform_indices = @transform_8, window_bounds = array<i64: 3, 1>}, {transform_indices = @transform_9, window_bounds = array<i64: 3, 1536>}]} {
    %c0 = arith.constant 0 : index
    %c0_0 = arith.constant 0 : index
    %0 = vector.load %arg2[%c0, %c0_0] : memref<32x2xf32, #tpu.memory_space<vmem>>, vector<32x2xf32>
    %c0_1 = arith.constant 0 : index
    %c0_2 = arith.constant 0 : index
    %1 = vector.load %arg3[%c0_1, %c0_2] : memref<32x1xf32, #tpu.memory_space<vmem>>, vector<32x1xf32>
    %c0_3 = arith.constant 0 : index
    %c0_4 = arith.constant 0 : index
    %2 = vector.load %arg4[%c0_3, %c0_4] : memref<32x32xf32, #tpu.memory_space<vmem>>, vector<32x32xf32>
    %c0_5 = arith.constant 0 : index
    %c0_6 = arith.constant 0 : index
    %3 = vector.load %arg5[%c0_5, %c0_6] : memref<32x1xf32, #tpu.memory_space<vmem>>, vector<32x1xf32>
    %c0_7 = arith.constant 0 : index
    %c0_8 = arith.constant 0 : index
    %4 = vector.load %arg6[%c0_7, %c0_8] : memref<32x32xf32, #tpu.memory_space<vmem>>, vector<32x32xf32>
    %c0_9 = arith.constant 0 : index
    %c0_10 = arith.constant 0 : index
    %5 = vector.load %arg7[%c0_9, %c0_10] : memref<32x1xf32, #tpu.memory_space<vmem>>, vector<32x1xf32>
    %c0_11 = arith.constant 0 : index
    %c0_12 = arith.constant 0 : index
    %6 = vector.load %arg8[%c0_11, %c0_12] : memref<3x32xf32, #tpu.memory_space<vmem>>, vector<3x32xf32>
    %c0_13 = arith.constant 0 : index
    %c0_14 = arith.constant 0 : index
    %7 = vector.load %arg9[%c0_13, %c0_14] : memref<3x1xf32, #tpu.memory_space<vmem>>, vector<3x1xf32>
    %c0_15 = arith.constant 0 : index
    %c0_16 = arith.constant 0 : index
    %8 = vector.load %arg1[%c0_15, %c0_16] : memref<2x1536xf32, #tpu.memory_space<vmem>>, vector<2x512xf32>
    %cst = arith.constant dense<0.000000e+00> : vector<32x512xf32>
    %9 = tpu.matmul %0, %8, %cst {dimension_numbers = #tpu.dot_dimension_numbers<[1], [0], [0], [1], [0, 0, 1, 1], [], []>} : vector<32x2xf32>, vector<2x512xf32>, vector<32x512xf32> -> vector<32x512xf32>
    %10 = vector.broadcast %1 : vector<32x1xf32> to vector<32x512xf32>
    %11 = arith.addf %9, %10 : vector<32x512xf32>
    %cst_17 = arith.constant 0.318309873 : f32
    %12 = vector.broadcast %cst_17 : f32 to vector<32x512xf32>
    %13 = arith.mulf %11, %12 : vector<32x512xf32>
    %cst_18 = arith.constant 5.000000e-01 : f32
    %14 = vector.broadcast %cst_18 : f32 to vector<32x512xf32>
    %15 = arith.addf %13, %14 : vector<32x512xf32>
    %16 = math.floor %15 : vector<32x512xf32>
    %cst_19 = arith.constant 3.140625 : f32
    %17 = vector.broadcast %cst_19 : f32 to vector<32x512xf32>
    %18 = arith.mulf %16, %17 : vector<32x512xf32>
    %19 = arith.subf %11, %18 : vector<32x512xf32>
    %cst_20 = arith.constant 9.67025756E-4 : f32
    %20 = vector.broadcast %cst_20 : f32 to vector<32x512xf32>
    %21 = arith.mulf %16, %20 : vector<32x512xf32>
    %22 = arith.subf %19, %21 : vector<32x512xf32>
    %cst_21 = arith.constant 6.27711415E-7 : f32
    %23 = vector.broadcast %cst_21 : f32 to vector<32x512xf32>
    %24 = arith.mulf %16, %23 : vector<32x512xf32>
    %25 = arith.subf %22, %24 : vector<32x512xf32>
    %26 = arith.mulf %25, %25 : vector<32x512xf32>
    %cst_22 = arith.constant -2.50521079E-8 : f32
    %27 = vector.broadcast %cst_22 : f32 to vector<32x512xf32>
    %28 = arith.mulf %27, %26 : vector<32x512xf32>
    %cst_23 = arith.constant 2.75573188E-6 : f32
    %29 = vector.broadcast %cst_23 : f32 to vector<32x512xf32>
    %30 = arith.addf %28, %29 : vector<32x512xf32>
    %31 = arith.mulf %30, %26 : vector<32x512xf32>
    %cst_24 = arith.constant -1.98412701E-4 : f32
    %32 = vector.broadcast %cst_24 : f32 to vector<32x512xf32>
    %33 = arith.addf %31, %32 : vector<32x512xf32>
    %34 = arith.mulf %33, %26 : vector<32x512xf32>
    %cst_25 = arith.constant 0.00833333377 : f32
    %35 = vector.broadcast %cst_25 : f32 to vector<32x512xf32>
    %36 = arith.addf %34, %35 : vector<32x512xf32>
    %37 = arith.mulf %36, %26 : vector<32x512xf32>
    %cst_26 = arith.constant -0.166666672 : f32
    %38 = vector.broadcast %cst_26 : f32 to vector<32x512xf32>
    %39 = arith.addf %37, %38 : vector<32x512xf32>
    %40 = arith.mulf %26, %39 : vector<32x512xf32>
    %41 = arith.mulf %25, %40 : vector<32x512xf32>
    %42 = arith.addf %25, %41 : vector<32x512xf32>
    %cst_27 = arith.constant 5.000000e-01 : f32
    %43 = vector.broadcast %cst_27 : f32 to vector<32x512xf32>
    %44 = arith.mulf %43, %16 : vector<32x512xf32>
    %45 = math.floor %44 : vector<32x512xf32>
    %cst_28 = arith.constant 2.000000e+00 : f32
    %46 = vector.broadcast %cst_28 : f32 to vector<32x512xf32>
    %47 = arith.mulf %46, %45 : vector<32x512xf32>
    %48 = arith.subf %16, %47 : vector<32x512xf32>
    %cst_29 = arith.constant 5.000000e-01 : f32
    %49 = vector.broadcast %cst_29 : f32 to vector<32x512xf32>
    %50 = arith.cmpf ogt, %48, %49 : vector<32x512xf32>
    %cst_30 = arith.constant 0.000000e+00 : f32
    %51 = vector.broadcast %cst_30 : f32 to vector<32x512xf32>
    %52 = arith.subf %51, %42 : vector<32x512xf32>
    %53 = arith.select %50, %52, %42 : vector<32x512xi1>, vector<32x512xf32>
    %cst_31 = arith.constant dense<0.000000e+00> : vector<32x512xf32>
    %54 = tpu.matmul %2, %53, %cst_31 {dimension_numbers = #tpu.dot_dimension_numbers<[1], [0], [0], [1], [0, 0, 1, 1], [], []>} : vector<32x32xf32>, vector<32x512xf32>, vector<32x512xf32> -> vector<32x512xf32>
    %55 = vector.broadcast %3 : vector<32x1xf32> to vector<32x512xf32>
    %56 = arith.addf %54, %55 : vector<32x512xf32>
    %cst_32 = arith.constant 0.318309873 : f32
    %57 = vector.broadcast %cst_32 : f32 to vector<32x512xf32>
    %58 = arith.mulf %56, %57 : vector<32x512xf32>
    %cst_33 = arith.constant 5.000000e-01 : f32
    %59 = vector.broadcast %cst_33 : f32 to vector<32x512xf32>
    %60 = arith.addf %58, %59 : vector<32x512xf32>
    %61 = math.floor %60 : vector<32x512xf32>
    %cst_34 = arith.constant 3.140625 : f32
    %62 = vector.broadcast %cst_34 : f32 to vector<32x512xf32>
    %63 = arith.mulf %61, %62 : vector<32x512xf32>
    %64 = arith.subf %56, %63 : vector<32x512xf32>
    %cst_35 = arith.constant 9.67025756E-4 : f32
    %65 = vector.broadcast %cst_35 : f32 to vector<32x512xf32>
    %66 = arith.mulf %61, %65 : vector<32x512xf32>
    %67 = arith.subf %64, %66 : vector<32x512xf32>
    %cst_36 = arith.constant 6.27711415E-7 : f32
    %68 = vector.broadcast %cst_36 : f32 to vector<32x512xf32>
    %69 = arith.mulf %61, %68 : vector<32x512xf32>
    %70 = arith.subf %67, %69 : vector<32x512xf32>
    %71 = arith.mulf %70, %70 : vector<32x512xf32>
    %cst_37 = arith.constant -2.50521079E-8 : f32
    %72 = vector.broadcast %cst_37 : f32 to vector<32x512xf32>
    %73 = arith.mulf %72, %71 : vector<32x512xf32>
    %cst_38 = arith.constant 2.75573188E-6 : f32
    %74 = vector.broadcast %cst_38 : f32 to vector<32x512xf32>
    %75 = arith.addf %73, %74 : vector<32x512xf32>
    %76 = arith.mulf %75, %71 : vector<32x512xf32>
    %cst_39 = arith.constant -1.98412701E-4 : f32
    %77 = vector.broadcast %cst_39 : f32 to vector<32x512xf32>
    %78 = arith.addf %76, %77 : vector<32x512xf32>
    %79 = arith.mulf %78, %71 : vector<32x512xf32>
    %cst_40 = arith.constant 0.00833333377 : f32
    %80 = vector.broadcast %cst_40 : f32 to vector<32x512xf32>
    %81 = arith.addf %79, %80 : vector<32x512xf32>
    %82 = arith.mulf %81, %71 : vector<32x512xf32>
    %cst_41 = arith.constant -0.166666672 : f32
    %83 = vector.broadcast %cst_41 : f32 to vector<32x512xf32>
    %84 = arith.addf %82, %83 : vector<32x512xf32>
    %85 = arith.mulf %71, %84 : vector<32x512xf32>
    %86 = arith.mulf %70, %85 : vector<32x512xf32>
    %87 = arith.addf %70, %86 : vector<32x512xf32>
    %cst_42 = arith.constant 5.000000e-01 : f32
    %88 = vector.broadcast %cst_42 : f32 to vector<32x512xf32>
    %89 = arith.mulf %88, %61 : vector<32x512xf32>
    %90 = math.floor %89 : vector<32x512xf32>
    %cst_43 = arith.constant 2.000000e+00 : f32
    %91 = vector.broadcast %cst_43 : f32 to vector<32x512xf32>
    %92 = arith.mulf %91, %90 : vector<32x512xf32>
    %93 = arith.subf %61, %92 : vector<32x512xf32>
    %cst_44 = arith.constant 5.000000e-01 : f32
    %94 = vector.broadcast %cst_44 : f32 to vector<32x512xf32>
    %95 = arith.cmpf ogt, %93, %94 : vector<32x512xf32>
    %cst_45 = arith.constant 0.000000e+00 : f32
    %96 = vector.broadcast %cst_45 : f32 to vector<32x512xf32>
    %97 = arith.subf %96, %87 : vector<32x512xf32>
    %98 = arith.select %95, %97, %87 : vector<32x512xi1>, vector<32x512xf32>
    %cst_46 = arith.constant dense<0.000000e+00> : vector<32x512xf32>
    %99 = tpu.matmul %4, %98, %cst_46 {dimension_numbers = #tpu.dot_dimension_numbers<[1], [0], [0], [1], [0, 0, 1, 1], [], []>} : vector<32x32xf32>, vector<32x512xf32>, vector<32x512xf32> -> vector<32x512xf32>
    %100 = vector.broadcast %5 : vector<32x1xf32> to vector<32x512xf32>
    %101 = arith.addf %99, %100 : vector<32x512xf32>
    %cst_47 = arith.constant 0.318309873 : f32
    %102 = vector.broadcast %cst_47 : f32 to vector<32x512xf32>
    %103 = arith.mulf %101, %102 : vector<32x512xf32>
    %cst_48 = arith.constant 5.000000e-01 : f32
    %104 = vector.broadcast %cst_48 : f32 to vector<32x512xf32>
    %105 = arith.addf %103, %104 : vector<32x512xf32>
    %106 = math.floor %105 : vector<32x512xf32>
    %cst_49 = arith.constant 3.140625 : f32
    %107 = vector.broadcast %cst_49 : f32 to vector<32x512xf32>
    %108 = arith.mulf %106, %107 : vector<32x512xf32>
    %109 = arith.subf %101, %108 : vector<32x512xf32>
    %cst_50 = arith.constant 9.67025756E-4 : f32
    %110 = vector.broadcast %cst_50 : f32 to vector<32x512xf32>
    %111 = arith.mulf %106, %110 : vector<32x512xf32>
    %112 = arith.subf %109, %111 : vector<32x512xf32>
    %cst_51 = arith.constant 6.27711415E-7 : f32
    %113 = vector.broadcast %cst_51 : f32 to vector<32x512xf32>
    %114 = arith.mulf %106, %113 : vector<32x512xf32>
    %115 = arith.subf %112, %114 : vector<32x512xf32>
    %116 = arith.mulf %115, %115 : vector<32x512xf32>
    %cst_52 = arith.constant -2.50521079E-8 : f32
    %117 = vector.broadcast %cst_52 : f32 to vector<32x512xf32>
    %118 = arith.mulf %117, %116 : vector<32x512xf32>
    %cst_53 = arith.constant 2.75573188E-6 : f32
    %119 = vector.broadcast %cst_53 : f32 to vector<32x512xf32>
    %120 = arith.addf %118, %119 : vector<32x512xf32>
    %121 = arith.mulf %120, %116 : vector<32x512xf32>
    %cst_54 = arith.constant -1.98412701E-4 : f32
    %122 = vector.broadcast %cst_54 : f32 to vector<32x512xf32>
    %123 = arith.addf %121, %122 : vector<32x512xf32>
    %124 = arith.mulf %123, %116 : vector<32x512xf32>
    %cst_55 = arith.constant 0.00833333377 : f32
    %125 = vector.broadcast %cst_55 : f32 to vector<32x512xf32>
    %126 = arith.addf %124, %125 : vector<32x512xf32>
    %127 = arith.mulf %126, %116 : vector<32x512xf32>
    %cst_56 = arith.constant -0.166666672 : f32
    %128 = vector.broadcast %cst_56 : f32 to vector<32x512xf32>
    %129 = arith.addf %127, %128 : vector<32x512xf32>
    %130 = arith.mulf %116, %129 : vector<32x512xf32>
    %131 = arith.mulf %115, %130 : vector<32x512xf32>
    %132 = arith.addf %115, %131 : vector<32x512xf32>
    %cst_57 = arith.constant 5.000000e-01 : f32
    %133 = vector.broadcast %cst_57 : f32 to vector<32x512xf32>
    %134 = arith.mulf %133, %106 : vector<32x512xf32>
    %135 = math.floor %134 : vector<32x512xf32>
    %cst_58 = arith.constant 2.000000e+00 : f32
    %136 = vector.broadcast %cst_58 : f32 to vector<32x512xf32>
    %137 = arith.mulf %136, %135 : vector<32x512xf32>
    %138 = arith.subf %106, %137 : vector<32x512xf32>
    %cst_59 = arith.constant 5.000000e-01 : f32
    %139 = vector.broadcast %cst_59 : f32 to vector<32x512xf32>
    %140 = arith.cmpf ogt, %138, %139 : vector<32x512xf32>
    %cst_60 = arith.constant 0.000000e+00 : f32
    %141 = vector.broadcast %cst_60 : f32 to vector<32x512xf32>
    %142 = arith.subf %141, %132 : vector<32x512xf32>
    %143 = arith.select %140, %142, %132 : vector<32x512xi1>, vector<32x512xf32>
    %cst_61 = arith.constant dense<0.000000e+00> : vector<3x512xf32>
    %144 = tpu.matmul %6, %143, %cst_61 {dimension_numbers = #tpu.dot_dimension_numbers<[1], [0], [0], [1], [0, 0, 1, 1], [], []>} : vector<3x32xf32>, vector<32x512xf32>, vector<3x512xf32> -> vector<3x512xf32>
    %145 = vector.broadcast %7 : vector<3x1xf32> to vector<3x512xf32>
    %146 = arith.addf %144, %145 : vector<3x512xf32>
    %cst_62 = arith.constant 0.318309873 : f32
    %147 = vector.broadcast %cst_62 : f32 to vector<3x512xf32>
    %148 = arith.mulf %146, %147 : vector<3x512xf32>
    %cst_63 = arith.constant 5.000000e-01 : f32
    %149 = vector.broadcast %cst_63 : f32 to vector<3x512xf32>
    %150 = arith.addf %148, %149 : vector<3x512xf32>
    %151 = math.floor %150 : vector<3x512xf32>
    %cst_64 = arith.constant 3.140625 : f32
    %152 = vector.broadcast %cst_64 : f32 to vector<3x512xf32>
    %153 = arith.mulf %151, %152 : vector<3x512xf32>
    %154 = arith.subf %146, %153 : vector<3x512xf32>
    %cst_65 = arith.constant 9.67025756E-4 : f32
    %155 = vector.broadcast %cst_65 : f32 to vector<3x512xf32>
    %156 = arith.mulf %151, %155 : vector<3x512xf32>
    %157 = arith.subf %154, %156 : vector<3x512xf32>
    %cst_66 = arith.constant 6.27711415E-7 : f32
    %158 = vector.broadcast %cst_66 : f32 to vector<3x512xf32>
    %159 = arith.mulf %151, %158 : vector<3x512xf32>
    %160 = arith.subf %157, %159 : vector<3x512xf32>
    %161 = arith.mulf %160, %160 : vector<3x512xf32>
    %cst_67 = arith.constant -2.50521079E-8 : f32
    %162 = vector.broadcast %cst_67 : f32 to vector<3x512xf32>
    %163 = arith.mulf %162, %161 : vector<3x512xf32>
    %cst_68 = arith.constant 2.75573188E-6 : f32
    %164 = vector.broadcast %cst_68 : f32 to vector<3x512xf32>
    %165 = arith.addf %163, %164 : vector<3x512xf32>
    %166 = arith.mulf %165, %161 : vector<3x512xf32>
    %cst_69 = arith.constant -1.98412701E-4 : f32
    %167 = vector.broadcast %cst_69 : f32 to vector<3x512xf32>
    %168 = arith.addf %166, %167 : vector<3x512xf32>
    %169 = arith.mulf %168, %161 : vector<3x512xf32>
    %cst_70 = arith.constant 0.00833333377 : f32
    %170 = vector.broadcast %cst_70 : f32 to vector<3x512xf32>
    %171 = arith.addf %169, %170 : vector<3x512xf32>
    %172 = arith.mulf %171, %161 : vector<3x512xf32>
    %cst_71 = arith.constant -0.166666672 : f32
    %173 = vector.broadcast %cst_71 : f32 to vector<3x512xf32>
    %174 = arith.addf %172, %173 : vector<3x512xf32>
    %175 = arith.mulf %161, %174 : vector<3x512xf32>
    %176 = arith.mulf %160, %175 : vector<3x512xf32>
    %177 = arith.addf %160, %176 : vector<3x512xf32>
    %cst_72 = arith.constant 5.000000e-01 : f32
    %178 = vector.broadcast %cst_72 : f32 to vector<3x512xf32>
    %179 = arith.mulf %178, %151 : vector<3x512xf32>
    %180 = math.floor %179 : vector<3x512xf32>
    %cst_73 = arith.constant 2.000000e+00 : f32
    %181 = vector.broadcast %cst_73 : f32 to vector<3x512xf32>
    %182 = arith.mulf %181, %180 : vector<3x512xf32>
    %183 = arith.subf %151, %182 : vector<3x512xf32>
    %cst_74 = arith.constant 5.000000e-01 : f32
    %184 = vector.broadcast %cst_74 : f32 to vector<3x512xf32>
    %185 = arith.cmpf ogt, %183, %184 : vector<3x512xf32>
    %cst_75 = arith.constant 0.000000e+00 : f32
    %186 = vector.broadcast %cst_75 : f32 to vector<3x512xf32>
    %187 = arith.subf %186, %177 : vector<3x512xf32>
    %188 = arith.select %185, %187, %177 : vector<3x512xi1>, vector<3x512xf32>
    %c0_76 = arith.constant 0 : index
    %c0_77 = arith.constant 0 : index
    %189 = vector.load %arg10[%c0_76, %c0_77] : memref<3x1536xf32, #tpu.memory_space<vmem>>, vector<3x512xf32>
    tpu.vector_store %arg10[%c0_76, %c0_77], %188 {strides = array<i32>} : memref<3x1536xf32, #tpu.memory_space<vmem>>, vector<3x512xf32>,
    %c0_78 = arith.constant 0 : index
    %c512 = arith.constant 512 : index
    %190 = vector.load %arg1[%c0_78, %c512] : memref<2x1536xf32, #tpu.memory_space<vmem>>, vector<2x512xf32>
    %cst_79 = arith.constant dense<0.000000e+00> : vector<32x512xf32>
    %191 = tpu.matmul %0, %190, %cst_79 {dimension_numbers = #tpu.dot_dimension_numbers<[1], [0], [0], [1], [0, 0, 1, 1], [], []>} : vector<32x2xf32>, vector<2x512xf32>, vector<32x512xf32> -> vector<32x512xf32>
    %192 = vector.broadcast %1 : vector<32x1xf32> to vector<32x512xf32>
    %193 = arith.addf %191, %192 : vector<32x512xf32>
    %cst_80 = arith.constant 0.318309873 : f32
    %194 = vector.broadcast %cst_80 : f32 to vector<32x512xf32>
    %195 = arith.mulf %193, %194 : vector<32x512xf32>
    %cst_81 = arith.constant 5.000000e-01 : f32
    %196 = vector.broadcast %cst_81 : f32 to vector<32x512xf32>
    %197 = arith.addf %195, %196 : vector<32x512xf32>
    %198 = math.floor %197 : vector<32x512xf32>
    %cst_82 = arith.constant 3.140625 : f32
    %199 = vector.broadcast %cst_82 : f32 to vector<32x512xf32>
    %200 = arith.mulf %198, %199 : vector<32x512xf32>
    %201 = arith.subf %193, %200 : vector<32x512xf32>
    %cst_83 = arith.constant 9.67025756E-4 : f32
    %202 = vector.broadcast %cst_83 : f32 to vector<32x512xf32>
    %203 = arith.mulf %198, %202 : vector<32x512xf32>
    %204 = arith.subf %201, %203 : vector<32x512xf32>
    %cst_84 = arith.constant 6.27711415E-7 : f32
    %205 = vector.broadcast %cst_84 : f32 to vector<32x512xf32>
    %206 = arith.mulf %198, %205 : vector<32x512xf32>
    %207 = arith.subf %204, %206 : vector<32x512xf32>
    %208 = arith.mulf %207, %207 : vector<32x512xf32>
    %cst_85 = arith.constant -2.50521079E-8 : f32
    %209 = vector.broadcast %cst_85 : f32 to vector<32x512xf32>
    %210 = arith.mulf %209, %208 : vector<32x512xf32>
    %cst_86 = arith.constant 2.75573188E-6 : f32
    %211 = vector.broadcast %cst_86 : f32 to vector<32x512xf32>
    %212 = arith.addf %210, %211 : vector<32x512xf32>
    %213 = arith.mulf %212, %208 : vector<32x512xf32>
    %cst_87 = arith.constant -1.98412701E-4 : f32
    %214 = vector.broadcast %cst_87 : f32 to vector<32x512xf32>
    %215 = arith.addf %213, %214 : vector<32x512xf32>
    %216 = arith.mulf %215, %208 : vector<32x512xf32>
    %cst_88 = arith.constant 0.00833333377 : f32
    %217 = vector.broadcast %cst_88 : f32 to vector<32x512xf32>
    %218 = arith.addf %216, %217 : vector<32x512xf32>
    %219 = arith.mulf %218, %208 : vector<32x512xf32>
    %cst_89 = arith.constant -0.166666672 : f32
    %220 = vector.broadcast %cst_89 : f32 to vector<32x512xf32>
    %221 = arith.addf %219, %220 : vector<32x512xf32>
    %222 = arith.mulf %208, %221 : vector<32x512xf32>
    %223 = arith.mulf %207, %222 : vector<32x512xf32>
    %224 = arith.addf %207, %223 : vector<32x512xf32>
    %cst_90 = arith.constant 5.000000e-01 : f32
    %225 = vector.broadcast %cst_90 : f32 to vector<32x512xf32>
    %226 = arith.mulf %225, %198 : vector<32x512xf32>
    %227 = math.floor %226 : vector<32x512xf32>
    %cst_91 = arith.constant 2.000000e+00 : f32
    %228 = vector.broadcast %cst_91 : f32 to vector<32x512xf32>
    %229 = arith.mulf %228, %227 : vector<32x512xf32>
    %230 = arith.subf %198, %229 : vector<32x512xf32>
    %cst_92 = arith.constant 5.000000e-01 : f32
    %231 = vector.broadcast %cst_92 : f32 to vector<32x512xf32>
    %232 = arith.cmpf ogt, %230, %231 : vector<32x512xf32>
    %cst_93 = arith.constant 0.000000e+00 : f32
    %233 = vector.broadcast %cst_93 : f32 to vector<32x512xf32>
    %234 = arith.subf %233, %224 : vector<32x512xf32>
    %235 = arith.select %232, %234, %224 : vector<32x512xi1>, vector<32x512xf32>
    %cst_94 = arith.constant dense<0.000000e+00> : vector<32x512xf32>
    %236 = tpu.matmul %2, %235, %cst_94 {dimension_numbers = #tpu.dot_dimension_numbers<[1], [0], [0], [1], [0, 0, 1, 1], [], []>} : vector<32x32xf32>, vector<32x512xf32>, vector<32x512xf32> -> vector<32x512xf32>
    %237 = vector.broadcast %3 : vector<32x1xf32> to vector<32x512xf32>
    %238 = arith.addf %236, %237 : vector<32x512xf32>
    %cst_95 = arith.constant 0.318309873 : f32
    %239 = vector.broadcast %cst_95 : f32 to vector<32x512xf32>
    %240 = arith.mulf %238, %239 : vector<32x512xf32>
    %cst_96 = arith.constant 5.000000e-01 : f32
    %241 = vector.broadcast %cst_96 : f32 to vector<32x512xf32>
    %242 = arith.addf %240, %241 : vector<32x512xf32>
    %243 = math.floor %242 : vector<32x512xf32>
    %cst_97 = arith.constant 3.140625 : f32
    %244 = vector.broadcast %cst_97 : f32 to vector<32x512xf32>
    %245 = arith.mulf %243, %244 : vector<32x512xf32>
    %246 = arith.subf %238, %245 : vector<32x512xf32>
    %cst_98 = arith.constant 9.67025756E-4 : f32
    %247 = vector.broadcast %cst_98 : f32 to vector<32x512xf32>
    %248 = arith.mulf %243, %247 : vector<32x512xf32>
    %249 = arith.subf %246, %248 : vector<32x512xf32>
    %cst_99 = arith.constant 6.27711415E-7 : f32
    %250 = vector.broadcast %cst_99 : f32 to vector<32x512xf32>
    %251 = arith.mulf %243, %250 : vector<32x512xf32>
    %252 = arith.subf %249, %251 : vector<32x512xf32>
    %253 = arith.mulf %252, %252 : vector<32x512xf32>
    %cst_100 = arith.constant -2.50521079E-8 : f32
    %254 = vector.broadcast %cst_100 : f32 to vector<32x512xf32>
    %255 = arith.mulf %254, %253 : vector<32x512xf32>
    %cst_101 = arith.constant 2.75573188E-6 : f32
    %256 = vector.broadcast %cst_101 : f32 to vector<32x512xf32>
    %257 = arith.addf %255, %256 : vector<32x512xf32>
    %258 = arith.mulf %257, %253 : vector<32x512xf32>
    %cst_102 = arith.constant -1.98412701E-4 : f32
    %259 = vector.broadcast %cst_102 : f32 to vector<32x512xf32>
    %260 = arith.addf %258, %259 : vector<32x512xf32>
    %261 = arith.mulf %260, %253 : vector<32x512xf32>
    %cst_103 = arith.constant 0.00833333377 : f32
    %262 = vector.broadcast %cst_103 : f32 to vector<32x512xf32>
    %263 = arith.addf %261, %262 : vector<32x512xf32>
    %264 = arith.mulf %263, %253 : vector<32x512xf32>
    %cst_104 = arith.constant -0.166666672 : f32
    %265 = vector.broadcast %cst_104 : f32 to vector<32x512xf32>
    %266 = arith.addf %264, %265 : vector<32x512xf32>
    %267 = arith.mulf %253, %266 : vector<32x512xf32>
    %268 = arith.mulf %252, %267 : vector<32x512xf32>
    %269 = arith.addf %252, %268 : vector<32x512xf32>
    %cst_105 = arith.constant 5.000000e-01 : f32
    %270 = vector.broadcast %cst_105 : f32 to vector<32x512xf32>
    %271 = arith.mulf %270, %243 : vector<32x512xf32>
    %272 = math.floor %271 : vector<32x512xf32>
    %cst_106 = arith.constant 2.000000e+00 : f32
    %273 = vector.broadcast %cst_106 : f32 to vector<32x512xf32>
    %274 = arith.mulf %273, %272 : vector<32x512xf32>
    %275 = arith.subf %243, %274 : vector<32x512xf32>
    %cst_107 = arith.constant 5.000000e-01 : f32
    %276 = vector.broadcast %cst_107 : f32 to vector<32x512xf32>
    %277 = arith.cmpf ogt, %275, %276 : vector<32x512xf32>
    %cst_108 = arith.constant 0.000000e+00 : f32
    %278 = vector.broadcast %cst_108 : f32 to vector<32x512xf32>
    %279 = arith.subf %278, %269 : vector<32x512xf32>
    %280 = arith.select %277, %279, %269 : vector<32x512xi1>, vector<32x512xf32>
    %cst_109 = arith.constant dense<0.000000e+00> : vector<32x512xf32>
    %281 = tpu.matmul %4, %280, %cst_109 {dimension_numbers = #tpu.dot_dimension_numbers<[1], [0], [0], [1], [0, 0, 1, 1], [], []>} : vector<32x32xf32>, vector<32x512xf32>, vector<32x512xf32> -> vector<32x512xf32>
    %282 = vector.broadcast %5 : vector<32x1xf32> to vector<32x512xf32>
    %283 = arith.addf %281, %282 : vector<32x512xf32>
    %cst_110 = arith.constant 0.318309873 : f32
    %284 = vector.broadcast %cst_110 : f32 to vector<32x512xf32>
    %285 = arith.mulf %283, %284 : vector<32x512xf32>
    %cst_111 = arith.constant 5.000000e-01 : f32
    %286 = vector.broadcast %cst_111 : f32 to vector<32x512xf32>
    %287 = arith.addf %285, %286 : vector<32x512xf32>
    %288 = math.floor %287 : vector<32x512xf32>
    %cst_112 = arith.constant 3.140625 : f32
    %289 = vector.broadcast %cst_112 : f32 to vector<32x512xf32>
    %290 = arith.mulf %288, %289 : vector<32x512xf32>
    %291 = arith.subf %283, %290 : vector<32x512xf32>
    %cst_113 = arith.constant 9.67025756E-4 : f32
    %292 = vector.broadcast %cst_113 : f32 to vector<32x512xf32>
    %293 = arith.mulf %288, %292 : vector<32x512xf32>
    %294 = arith.subf %291, %293 : vector<32x512xf32>
    %cst_114 = arith.constant 6.27711415E-7 : f32
    %295 = vector.broadcast %cst_114 : f32 to vector<32x512xf32>
    %296 = arith.mulf %288, %295 : vector<32x512xf32>
    %297 = arith.subf %294, %296 : vector<32x512xf32>
    %298 = arith.mulf %297, %297 : vector<32x512xf32>
    %cst_115 = arith.constant -2.50521079E-8 : f32
    %299 = vector.broadcast %cst_115 : f32 to vector<32x512xf32>
    %300 = arith.mulf %299, %298 : vector<32x512xf32>
    %cst_116 = arith.constant 2.75573188E-6 : f32
    %301 = vector.broadcast %cst_116 : f32 to vector<32x512xf32>
    %302 = arith.addf %300, %301 : vector<32x512xf32>
    %303 = arith.mulf %302, %298 : vector<32x512xf32>
    %cst_117 = arith.constant -1.98412701E-4 : f32
    %304 = vector.broadcast %cst_117 : f32 to vector<32x512xf32>
    %305 = arith.addf %303, %304 : vector<32x512xf32>
    %306 = arith.mulf %305, %298 : vector<32x512xf32>
    %cst_118 = arith.constant 0.00833333377 : f32
    %307 = vector.broadcast %cst_118 : f32 to vector<32x512xf32>
    %308 = arith.addf %306, %307 : vector<32x512xf32>
    %309 = arith.mulf %308, %298 : vector<32x512xf32>
    %cst_119 = arith.constant -0.166666672 : f32
    %310 = vector.broadcast %cst_119 : f32 to vector<32x512xf32>
    %311 = arith.addf %309, %310 : vector<32x512xf32>
    %312 = arith.mulf %298, %311 : vector<32x512xf32>
    %313 = arith.mulf %297, %312 : vector<32x512xf32>
    %314 = arith.addf %297, %313 : vector<32x512xf32>
    %cst_120 = arith.constant 5.000000e-01 : f32
    %315 = vector.broadcast %cst_120 : f32 to vector<32x512xf32>
    %316 = arith.mulf %315, %288 : vector<32x512xf32>
    %317 = math.floor %316 : vector<32x512xf32>
    %cst_121 = arith.constant 2.000000e+00 : f32
    %318 = vector.broadcast %cst_121 : f32 to vector<32x512xf32>
    %319 = arith.mulf %318, %317 : vector<32x512xf32>
    %320 = arith.subf %288, %319 : vector<32x512xf32>
    %cst_122 = arith.constant 5.000000e-01 : f32
    %321 = vector.broadcast %cst_122 : f32 to vector<32x512xf32>
    %322 = arith.cmpf ogt, %320, %321 : vector<32x512xf32>
    %cst_123 = arith.constant 0.000000e+00 : f32
    %323 = vector.broadcast %cst_123 : f32 to vector<32x512xf32>
    %324 = arith.subf %323, %314 : vector<32x512xf32>
    %325 = arith.select %322, %324, %314 : vector<32x512xi1>, vector<32x512xf32>
    %cst_124 = arith.constant dense<0.000000e+00> : vector<3x512xf32>
    %326 = tpu.matmul %6, %325, %cst_124 {dimension_numbers = #tpu.dot_dimension_numbers<[1], [0], [0], [1], [0, 0, 1, 1], [], []>} : vector<3x32xf32>, vector<32x512xf32>, vector<3x512xf32> -> vector<3x512xf32>
    %327 = vector.broadcast %7 : vector<3x1xf32> to vector<3x512xf32>
    %328 = arith.addf %326, %327 : vector<3x512xf32>
    %cst_125 = arith.constant 0.318309873 : f32
    %329 = vector.broadcast %cst_125 : f32 to vector<3x512xf32>
    %330 = arith.mulf %328, %329 : vector<3x512xf32>
    %cst_126 = arith.constant 5.000000e-01 : f32
    %331 = vector.broadcast %cst_126 : f32 to vector<3x512xf32>
    %332 = arith.addf %330, %331 : vector<3x512xf32>
    %333 = math.floor %332 : vector<3x512xf32>
    %cst_127 = arith.constant 3.140625 : f32
    %334 = vector.broadcast %cst_127 : f32 to vector<3x512xf32>
    %335 = arith.mulf %333, %334 : vector<3x512xf32>
    %336 = arith.subf %328, %335 : vector<3x512xf32>
    %cst_128 = arith.constant 9.67025756E-4 : f32
    %337 = vector.broadcast %cst_128 : f32 to vector<3x512xf32>
    %338 = arith.mulf %333, %337 : vector<3x512xf32>
    %339 = arith.subf %336, %338 : vector<3x512xf32>
    %cst_129 = arith.constant 6.27711415E-7 : f32
    %340 = vector.broadcast %cst_129 : f32 to vector<3x512xf32>
    %341 = arith.mulf %333, %340 : vector<3x512xf32>
    %342 = arith.subf %339, %341 : vector<3x512xf32>
    %343 = arith.mulf %342, %342 : vector<3x512xf32>
    %cst_130 = arith.constant -2.50521079E-8 : f32
    %344 = vector.broadcast %cst_130 : f32 to vector<3x512xf32>
    %345 = arith.mulf %344, %343 : vector<3x512xf32>
    %cst_131 = arith.constant 2.75573188E-6 : f32
    %346 = vector.broadcast %cst_131 : f32 to vector<3x512xf32>
    %347 = arith.addf %345, %346 : vector<3x512xf32>
    %348 = arith.mulf %347, %343 : vector<3x512xf32>
    %cst_132 = arith.constant -1.98412701E-4 : f32
    %349 = vector.broadcast %cst_132 : f32 to vector<3x512xf32>
    %350 = arith.addf %348, %349 : vector<3x512xf32>
    %351 = arith.mulf %350, %343 : vector<3x512xf32>
    %cst_133 = arith.constant 0.00833333377 : f32
    %352 = vector.broadcast %cst_133 : f32 to vector<3x512xf32>
    %353 = arith.addf %351, %352 : vector<3x512xf32>
    %354 = arith.mulf %353, %343 : vector<3x512xf32>
    %cst_134 = arith.constant -0.166666672 : f32
    %355 = vector.broadcast %cst_134 : f32 to vector<3x512xf32>
    %356 = arith.addf %354, %355 : vector<3x512xf32>
    %357 = arith.mulf %343, %356 : vector<3x512xf32>
    %358 = arith.mulf %342, %357 : vector<3x512xf32>
    %359 = arith.addf %342, %358 : vector<3x512xf32>
    %cst_135 = arith.constant 5.000000e-01 : f32
    %360 = vector.broadcast %cst_135 : f32 to vector<3x512xf32>
    %361 = arith.mulf %360, %333 : vector<3x512xf32>
    %362 = math.floor %361 : vector<3x512xf32>
    %cst_136 = arith.constant 2.000000e+00 : f32
    %363 = vector.broadcast %cst_136 : f32 to vector<3x512xf32>
    %364 = arith.mulf %363, %362 : vector<3x512xf32>
    %365 = arith.subf %333, %364 : vector<3x512xf32>
    %cst_137 = arith.constant 5.000000e-01 : f32
    %366 = vector.broadcast %cst_137 : f32 to vector<3x512xf32>
    %367 = arith.cmpf ogt, %365, %366 : vector<3x512xf32>
    %cst_138 = arith.constant 0.000000e+00 : f32
    %368 = vector.broadcast %cst_138 : f32 to vector<3x512xf32>
    %369 = arith.subf %368, %359 : vector<3x512xf32>
    %370 = arith.select %367, %369, %359 : vector<3x512xi1>, vector<3x512xf32>
    %c0_139 = arith.constant 0 : index
    %c512_140 = arith.constant 512 : index
    %371 = vector.load %arg10[%c0_139, %c512_140] : memref<3x1536xf32, #tpu.memory_space<vmem>>, vector<3x512xf32>
    tpu.vector_store %arg10[%c0_139, %c512_140], %370 {strides = array<i32>} : memref<3x1536xf32, #tpu.memory_space<vmem>>, vector<3x512xf32>,
    %c0_141 = arith.constant 0 : index
    %c1024 = arith.constant 1024 : index
    %372 = vector.load %arg1[%c0_141, %c1024] : memref<2x1536xf32, #tpu.memory_space<vmem>>, vector<2x512xf32>
    %cst_142 = arith.constant dense<0.000000e+00> : vector<32x512xf32>
    %373 = tpu.matmul %0, %372, %cst_142 {dimension_numbers = #tpu.dot_dimension_numbers<[1], [0], [0], [1], [0, 0, 1, 1], [], []>} : vector<32x2xf32>, vector<2x512xf32>, vector<32x512xf32> -> vector<32x512xf32>
    %374 = vector.broadcast %1 : vector<32x1xf32> to vector<32x512xf32>
    %375 = arith.addf %373, %374 : vector<32x512xf32>
    %cst_143 = arith.constant 0.318309873 : f32
    %376 = vector.broadcast %cst_143 : f32 to vector<32x512xf32>
    %377 = arith.mulf %375, %376 : vector<32x512xf32>
    %cst_144 = arith.constant 5.000000e-01 : f32
    %378 = vector.broadcast %cst_144 : f32 to vector<32x512xf32>
    %379 = arith.addf %377, %378 : vector<32x512xf32>
    %380 = math.floor %379 : vector<32x512xf32>
    %cst_145 = arith.constant 3.140625 : f32
    %381 = vector.broadcast %cst_145 : f32 to vector<32x512xf32>
    %382 = arith.mulf %380, %381 : vector<32x512xf32>
    %383 = arith.subf %375, %382 : vector<32x512xf32>
    %cst_146 = arith.constant 9.67025756E-4 : f32
    %384 = vector.broadcast %cst_146 : f32 to vector<32x512xf32>
    %385 = arith.mulf %380, %384 : vector<32x512xf32>
    %386 = arith.subf %383, %385 : vector<32x512xf32>
    %cst_147 = arith.constant 6.27711415E-7 : f32
    %387 = vector.broadcast %cst_147 : f32 to vector<32x512xf32>
    %388 = arith.mulf %380, %387 : vector<32x512xf32>
    %389 = arith.subf %386, %388 : vector<32x512xf32>
    %390 = arith.mulf %389, %389 : vector<32x512xf32>
    %cst_148 = arith.constant -2.50521079E-8 : f32
    %391 = vector.broadcast %cst_148 : f32 to vector<32x512xf32>
    %392 = arith.mulf %391, %390 : vector<32x512xf32>
    %cst_149 = arith.constant 2.75573188E-6 : f32
    %393 = vector.broadcast %cst_149 : f32 to vector<32x512xf32>
    %394 = arith.addf %392, %393 : vector<32x512xf32>
    %395 = arith.mulf %394, %390 : vector<32x512xf32>
    %cst_150 = arith.constant -1.98412701E-4 : f32
    %396 = vector.broadcast %cst_150 : f32 to vector<32x512xf32>
    %397 = arith.addf %395, %396 : vector<32x512xf32>
    %398 = arith.mulf %397, %390 : vector<32x512xf32>
    %cst_151 = arith.constant 0.00833333377 : f32
    %399 = vector.broadcast %cst_151 : f32 to vector<32x512xf32>
    %400 = arith.addf %398, %399 : vector<32x512xf32>
    %401 = arith.mulf %400, %390 : vector<32x512xf32>
    %cst_152 = arith.constant -0.166666672 : f32
    %402 = vector.broadcast %cst_152 : f32 to vector<32x512xf32>
    %403 = arith.addf %401, %402 : vector<32x512xf32>
    %404 = arith.mulf %390, %403 : vector<32x512xf32>
    %405 = arith.mulf %389, %404 : vector<32x512xf32>
    %406 = arith.addf %389, %405 : vector<32x512xf32>
    %cst_153 = arith.constant 5.000000e-01 : f32
    %407 = vector.broadcast %cst_153 : f32 to vector<32x512xf32>
    %408 = arith.mulf %407, %380 : vector<32x512xf32>
    %409 = math.floor %408 : vector<32x512xf32>
    %cst_154 = arith.constant 2.000000e+00 : f32
    %410 = vector.broadcast %cst_154 : f32 to vector<32x512xf32>
    %411 = arith.mulf %410, %409 : vector<32x512xf32>
    %412 = arith.subf %380, %411 : vector<32x512xf32>
    %cst_155 = arith.constant 5.000000e-01 : f32
    %413 = vector.broadcast %cst_155 : f32 to vector<32x512xf32>
    %414 = arith.cmpf ogt, %412, %413 : vector<32x512xf32>
    %cst_156 = arith.constant 0.000000e+00 : f32
    %415 = vector.broadcast %cst_156 : f32 to vector<32x512xf32>
    %416 = arith.subf %415, %406 : vector<32x512xf32>
    %417 = arith.select %414, %416, %406 : vector<32x512xi1>, vector<32x512xf32>
    %cst_157 = arith.constant dense<0.000000e+00> : vector<32x512xf32>
    %418 = tpu.matmul %2, %417, %cst_157 {dimension_numbers = #tpu.dot_dimension_numbers<[1], [0], [0], [1], [0, 0, 1, 1], [], []>} : vector<32x32xf32>, vector<32x512xf32>, vector<32x512xf32> -> vector<32x512xf32>
    %419 = vector.broadcast %3 : vector<32x1xf32> to vector<32x512xf32>
    %420 = arith.addf %418, %419 : vector<32x512xf32>
    %cst_158 = arith.constant 0.318309873 : f32
    %421 = vector.broadcast %cst_158 : f32 to vector<32x512xf32>
    %422 = arith.mulf %420, %421 : vector<32x512xf32>
    %cst_159 = arith.constant 5.000000e-01 : f32
    %423 = vector.broadcast %cst_159 : f32 to vector<32x512xf32>
    %424 = arith.addf %422, %423 : vector<32x512xf32>
    %425 = math.floor %424 : vector<32x512xf32>
    %cst_160 = arith.constant 3.140625 : f32
    %426 = vector.broadcast %cst_160 : f32 to vector<32x512xf32>
    %427 = arith.mulf %425, %426 : vector<32x512xf32>
    %428 = arith.subf %420, %427 : vector<32x512xf32>
    %cst_161 = arith.constant 9.67025756E-4 : f32
    %429 = vector.broadcast %cst_161 : f32 to vector<32x512xf32>
    %430 = arith.mulf %425, %429 : vector<32x512xf32>
    %431 = arith.subf %428, %430 : vector<32x512xf32>
    %cst_162 = arith.constant 6.27711415E-7 : f32
    %432 = vector.broadcast %cst_162 : f32 to vector<32x512xf32>
    %433 = arith.mulf %425, %432 : vector<32x512xf32>
    %434 = arith.subf %431, %433 : vector<32x512xf32>
    %435 = arith.mulf %434, %434 : vector<32x512xf32>
    %cst_163 = arith.constant -2.50521079E-8 : f32
    %436 = vector.broadcast %cst_163 : f32 to vector<32x512xf32>
    %437 = arith.mulf %436, %435 : vector<32x512xf32>
    %cst_164 = arith.constant 2.75573188E-6 : f32
    %438 = vector.broadcast %cst_164 : f32 to vector<32x512xf32>
    %439 = arith.addf %437, %438 : vector<32x512xf32>
    %440 = arith.mulf %439, %435 : vector<32x512xf32>
    %cst_165 = arith.constant -1.98412701E-4 : f32
    %441 = vector.broadcast %cst_165 : f32 to vector<32x512xf32>
    %442 = arith.addf %440, %441 : vector<32x512xf32>
    %443 = arith.mulf %442, %435 : vector<32x512xf32>
    %cst_166 = arith.constant 0.00833333377 : f32
    %444 = vector.broadcast %cst_166 : f32 to vector<32x512xf32>
    %445 = arith.addf %443, %444 : vector<32x512xf32>
    %446 = arith.mulf %445, %435 : vector<32x512xf32>
    %cst_167 = arith.constant -0.166666672 : f32
    %447 = vector.broadcast %cst_167 : f32 to vector<32x512xf32>
    %448 = arith.addf %446, %447 : vector<32x512xf32>
    %449 = arith.mulf %435, %448 : vector<32x512xf32>
    %450 = arith.mulf %434, %449 : vector<32x512xf32>
    %451 = arith.addf %434, %450 : vector<32x512xf32>
    %cst_168 = arith.constant 5.000000e-01 : f32
    %452 = vector.broadcast %cst_168 : f32 to vector<32x512xf32>
    %453 = arith.mulf %452, %425 : vector<32x512xf32>
    %454 = math.floor %453 : vector<32x512xf32>
    %cst_169 = arith.constant 2.000000e+00 : f32
    %455 = vector.broadcast %cst_169 : f32 to vector<32x512xf32>
    %456 = arith.mulf %455, %454 : vector<32x512xf32>
    %457 = arith.subf %425, %456 : vector<32x512xf32>
    %cst_170 = arith.constant 5.000000e-01 : f32
    %458 = vector.broadcast %cst_170 : f32 to vector<32x512xf32>
    %459 = arith.cmpf ogt, %457, %458 : vector<32x512xf32>
    %cst_171 = arith.constant 0.000000e+00 : f32
    %460 = vector.broadcast %cst_171 : f32 to vector<32x512xf32>
    %461 = arith.subf %460, %451 : vector<32x512xf32>
    %462 = arith.select %459, %461, %451 : vector<32x512xi1>, vector<32x512xf32>
    %cst_172 = arith.constant dense<0.000000e+00> : vector<32x512xf32>
    %463 = tpu.matmul %4, %462, %cst_172 {dimension_numbers = #tpu.dot_dimension_numbers<[1], [0], [0], [1], [0, 0, 1, 1], [], []>} : vector<32x32xf32>, vector<32x512xf32>, vector<32x512xf32> -> vector<32x512xf32>
    %464 = vector.broadcast %5 : vector<32x1xf32> to vector<32x512xf32>
    %465 = arith.addf %463, %464 : vector<32x512xf32>
    %cst_173 = arith.constant 0.318309873 : f32
    %466 = vector.broadcast %cst_173 : f32 to vector<32x512xf32>
    %467 = arith.mulf %465, %466 : vector<32x512xf32>
    %cst_174 = arith.constant 5.000000e-01 : f32
    %468 = vector.broadcast %cst_174 : f32 to vector<32x512xf32>
    %469 = arith.addf %467, %468 : vector<32x512xf32>
    %470 = math.floor %469 : vector<32x512xf32>
    %cst_175 = arith.constant 3.140625 : f32
    %471 = vector.broadcast %cst_175 : f32 to vector<32x512xf32>
    %472 = arith.mulf %470, %471 : vector<32x512xf32>
    %473 = arith.subf %465, %472 : vector<32x512xf32>
    %cst_176 = arith.constant 9.67025756E-4 : f32
    %474 = vector.broadcast %cst_176 : f32 to vector<32x512xf32>
    %475 = arith.mulf %470, %474 : vector<32x512xf32>
    %476 = arith.subf %473, %475 : vector<32x512xf32>
    %cst_177 = arith.constant 6.27711415E-7 : f32
    %477 = vector.broadcast %cst_177 : f32 to vector<32x512xf32>
    %478 = arith.mulf %470, %477 : vector<32x512xf32>
    %479 = arith.subf %476, %478 : vector<32x512xf32>
    %480 = arith.mulf %479, %479 : vector<32x512xf32>
    %cst_178 = arith.constant -2.50521079E-8 : f32
    %481 = vector.broadcast %cst_178 : f32 to vector<32x512xf32>
    %482 = arith.mulf %481, %480 : vector<32x512xf32>
    %cst_179 = arith.constant 2.75573188E-6 : f32
    %483 = vector.broadcast %cst_179 : f32 to vector<32x512xf32>
    %484 = arith.addf %482, %483 : vector<32x512xf32>
    %485 = arith.mulf %484, %480 : vector<32x512xf32>
    %cst_180 = arith.constant -1.98412701E-4 : f32
    %486 = vector.broadcast %cst_180 : f32 to vector<32x512xf32>
    %487 = arith.addf %485, %486 : vector<32x512xf32>
    %488 = arith.mulf %487, %480 : vector<32x512xf32>
    %cst_181 = arith.constant 0.00833333377 : f32
    %489 = vector.broadcast %cst_181 : f32 to vector<32x512xf32>
    %490 = arith.addf %488, %489 : vector<32x512xf32>
    %491 = arith.mulf %490, %480 : vector<32x512xf32>
    %cst_182 = arith.constant -0.166666672 : f32
    %492 = vector.broadcast %cst_182 : f32 to vector<32x512xf32>
    %493 = arith.addf %491, %492 : vector<32x512xf32>
    %494 = arith.mulf %480, %493 : vector<32x512xf32>
    %495 = arith.mulf %479, %494 : vector<32x512xf32>
    %496 = arith.addf %479, %495 : vector<32x512xf32>
    %cst_183 = arith.constant 5.000000e-01 : f32
    %497 = vector.broadcast %cst_183 : f32 to vector<32x512xf32>
    %498 = arith.mulf %497, %470 : vector<32x512xf32>
    %499 = math.floor %498 : vector<32x512xf32>
    %cst_184 = arith.constant 2.000000e+00 : f32
    %500 = vector.broadcast %cst_184 : f32 to vector<32x512xf32>
    %501 = arith.mulf %500, %499 : vector<32x512xf32>
    %502 = arith.subf %470, %501 : vector<32x512xf32>
    %cst_185 = arith.constant 5.000000e-01 : f32
    %503 = vector.broadcast %cst_185 : f32 to vector<32x512xf32>
    %504 = arith.cmpf ogt, %502, %503 : vector<32x512xf32>
    %cst_186 = arith.constant 0.000000e+00 : f32
    %505 = vector.broadcast %cst_186 : f32 to vector<32x512xf32>
    %506 = arith.subf %505, %496 : vector<32x512xf32>
    %507 = arith.select %504, %506, %496 : vector<32x512xi1>, vector<32x512xf32>
    %cst_187 = arith.constant dense<0.000000e+00> : vector<3x512xf32>
    %508 = tpu.matmul %6, %507, %cst_187 {dimension_numbers = #tpu.dot_dimension_numbers<[1], [0], [0], [1], [0, 0, 1, 1], [], []>} : vector<3x32xf32>, vector<32x512xf32>, vector<3x512xf32> -> vector<3x512xf32>
    %509 = vector.broadcast %7 : vector<3x1xf32> to vector<3x512xf32>
    %510 = arith.addf %508, %509 : vector<3x512xf32>
    %cst_188 = arith.constant 0.318309873 : f32
    %511 = vector.broadcast %cst_188 : f32 to vector<3x512xf32>
    %512 = arith.mulf %510, %511 : vector<3x512xf32>
    %cst_189 = arith.constant 5.000000e-01 : f32
    %513 = vector.broadcast %cst_189 : f32 to vector<3x512xf32>
    %514 = arith.addf %512, %513 : vector<3x512xf32>
    %515 = math.floor %514 : vector<3x512xf32>
    %cst_190 = arith.constant 3.140625 : f32
    %516 = vector.broadcast %cst_190 : f32 to vector<3x512xf32>
    %517 = arith.mulf %515, %516 : vector<3x512xf32>
    %518 = arith.subf %510, %517 : vector<3x512xf32>
    %cst_191 = arith.constant 9.67025756E-4 : f32
    %519 = vector.broadcast %cst_191 : f32 to vector<3x512xf32>
    %520 = arith.mulf %515, %519 : vector<3x512xf32>
    %521 = arith.subf %518, %520 : vector<3x512xf32>
    %cst_192 = arith.constant 6.27711415E-7 : f32
    %522 = vector.broadcast %cst_192 : f32 to vector<3x512xf32>
    %523 = arith.mulf %515, %522 : vector<3x512xf32>
    %524 = arith.subf %521, %523 : vector<3x512xf32>
    %525 = arith.mulf %524, %524 : vector<3x512xf32>
    %cst_193 = arith.constant -2.50521079E-8 : f32
    %526 = vector.broadcast %cst_193 : f32 to vector<3x512xf32>
    %527 = arith.mulf %526, %525 : vector<3x512xf32>
    %cst_194 = arith.constant 2.75573188E-6 : f32
    %528 = vector.broadcast %cst_194 : f32 to vector<3x512xf32>
    %529 = arith.addf %527, %528 : vector<3x512xf32>
    %530 = arith.mulf %529, %525 : vector<3x512xf32>
    %cst_195 = arith.constant -1.98412701E-4 : f32
    %531 = vector.broadcast %cst_195 : f32 to vector<3x512xf32>
    %532 = arith.addf %530, %531 : vector<3x512xf32>
    %533 = arith.mulf %532, %525 : vector<3x512xf32>
    %cst_196 = arith.constant 0.00833333377 : f32
    %534 = vector.broadcast %cst_196 : f32 to vector<3x512xf32>
    %535 = arith.addf %533, %534 : vector<3x512xf32>
    %536 = arith.mulf %535, %525 : vector<3x512xf32>
    %cst_197 = arith.constant -0.166666672 : f32
    %537 = vector.broadcast %cst_197 : f32 to vector<3x512xf32>
    %538 = arith.addf %536, %537 : vector<3x512xf32>
    %539 = arith.mulf %525, %538 : vector<3x512xf32>
    %540 = arith.mulf %524, %539 : vector<3x512xf32>
    %541 = arith.addf %524, %540 : vector<3x512xf32>
    %cst_198 = arith.constant 5.000000e-01 : f32
    %542 = vector.broadcast %cst_198 : f32 to vector<3x512xf32>
    %543 = arith.mulf %542, %515 : vector<3x512xf32>
    %544 = math.floor %543 : vector<3x512xf32>
    %cst_199 = arith.constant 2.000000e+00 : f32
    %545 = vector.broadcast %cst_199 : f32 to vector<3x512xf32>
    %546 = arith.mulf %545, %544 : vector<3x512xf32>
    %547 = arith.subf %515, %546 : vector<3x512xf32>
    %cst_200 = arith.constant 5.000000e-01 : f32
    %548 = vector.broadcast %cst_200 : f32 to vector<3x512xf32>
    %549 = arith.cmpf ogt, %547, %548 : vector<3x512xf32>
    %cst_201 = arith.constant 0.000000e+00 : f32
    %550 = vector.broadcast %cst_201 : f32 to vector<3x512xf32>
    %551 = arith.subf %550, %541 : vector<3x512xf32>
    %552 = arith.select %549, %551, %541 : vector<3x512xi1>, vector<3x512xf32>
    %c0_202 = arith.constant 0 : index
    %c1024_203 = arith.constant 1024 : index
    %553 = vector.load %arg10[%c0_202, %c1024_203] : memref<3x1536xf32, #tpu.memory_space<vmem>>, vector<3x512xf32>
    tpu.vector_store %arg10[%c0_202, %c1024_203], %552 {strides = array<i32>} : memref<3x1536xf32, #tpu.memory_space<vmem>>, vector<3x512xf32>,
    return
  }
  func.func @transform_0(%arg0: i32) -> (i32, i32) {
    %c0_i32 = arith.constant 0 : i32
    %c0_i32_0 = arith.constant 0 : i32
    return %c0_i32, %arg0 : i32, i32
  }
  func.func @transform_1(%arg0: i32) -> (i32, i32) {
    %c0_i32 = arith.constant 0 : i32
    %c0_i32_0 = arith.constant 0 : i32
    %c0_i32_1 = arith.constant 0 : i32
    return %c0_i32, %c0_i32_0 : i32, i32
  }
  func.func @transform_2(%arg0: i32) -> (i32, i32) {
    %c0_i32 = arith.constant 0 : i32
    %c0_i32_0 = arith.constant 0 : i32
    %c0_i32_1 = arith.constant 0 : i32
    return %c0_i32, %c0_i32_0 : i32, i32
  }
  func.func @transform_3(%arg0: i32) -> (i32, i32) {
    %c0_i32 = arith.constant 0 : i32
    %c0_i32_0 = arith.constant 0 : i32
    %c0_i32_1 = arith.constant 0 : i32
    return %c0_i32, %c0_i32_0 : i32, i32
  }
  func.func @transform_4(%arg0: i32) -> (i32, i32) {
    %c0_i32 = arith.constant 0 : i32
    %c0_i32_0 = arith.constant 0 : i32
    %c0_i32_1 = arith.constant 0 : i32
    return %c0_i32, %c0_i32_0 : i32, i32
  }
  func.func @transform_5(%arg0: i32) -> (i32, i32) {
    %c0_i32 = arith.constant 0 : i32
    %c0_i32_0 = arith.constant 0 : i32
    %c0_i32_1 = arith.constant 0 : i32
    return %c0_i32, %c0_i32_0 : i32, i32
  }
  func.func @transform_6(%arg0: i32) -> (i32, i32) {
    %c0_i32 = arith.constant 0 : i32
    %c0_i32_0 = arith.constant 0 : i32
    %c0_i32_1 = arith.constant 0 : i32
    return %c0_i32, %c0_i32_0 : i32, i32
  }
  func.func @transform_7(%arg0: i32) -> (i32, i32) {
    %c0_i32 = arith.constant 0 : i32
    %c0_i32_0 = arith.constant 0 : i32
    %c0_i32_1 = arith.constant 0 : i32
    return %c0_i32, %c0_i32_0 : i32, i32
  }
  func.func @transform_8(%arg0: i32) -> (i32, i32) {
    %c0_i32 = arith.constant 0 : i32
    %c0_i32_0 = arith.constant 0 : i32
    %c0_i32_1 = arith.constant 0 : i32
    return %c0_i32, %c0_i32_0 : i32, i32
  }
  func.func @transform_9(%arg0: i32) -> (i32, i32) {
    %c0_i32 = arith.constant 0 : i32
    %c0_i32_0 = arith.constant 0 : i32
    return %c0_i32, %arg0 : i32, i32
  }
}

</mosaic_0001>

<bundles_post_ra>
// kernel: tpu_custom_call.1
= control target key start
LH: loop header
LB: loop body
LE: loop exit
PB: predicated region body
PF: predicated region fallthrough
CT: control target
= control target key end

     0   :  { %14 = vsyncpa [#allocation3], 0  ;;  %s11902_s0 = inlined_call_operand.vmem [shape: f32[2,3072], index: 0, kind: input, shape index: {}]   ;;  %s11903_s1 = inlined_call_operand.vmem [shape: f32[32,2], index: 1, kind: input, shape index: {}]   ;;  %s11904_s2 = inlined_call_operand.vmem [shape: f32[32,1], index: 2, kind: input, shape index: {}]   ;;  %s11905_s3 = inlined_call_operand.vmem [shape: f32[32,32], index: 3, kind: input, shape index: {}]   ;;  %s11906_s4 = inlined_call_operand.vmem [shape: f32[32,1], index: 4, kind: input, shape index: {}]   ;;  %s11907_s5 = inlined_call_operand.vmem [shape: f32[32,32], index: 5, kind: input, shape index: {}]   ;;  %s11908_s6 = inlined_call_operand.vmem [shape: f32[32,1], index: 6, kind: input, shape index: {}]   ;;  %s11909_s7 = inlined_call_operand.vmem [shape: f32[3,32], index: 7, kind: input, shape index: {}]   ;;  %s11910_s8 = inlined_call_operand.vmem [shape: f32[3,1], index: 8, kind: input, shape index: {}]   ;;  %s11911_s9 = inlined_call_operand.hbm [shape: f32[3,3072], index: 9, kind: output, shape index: {}]  }
   0x1   :  { %16 = vsyncpa [#allocation3 + $0x1], 0  ;;  %s7337_s30 = smov 0   ;;  %s7339_s10 = smov 0  }
   0x2   :  { %s7341_s11 = smov 0   ;;  %s7343_s12 = smov 0  }
   0x3 LB: > { %s7358_s13 = sadd.s32 4294967295, %s7281_s12   ;;  %s7048_s14 = sadd.s32 4294967294, %s7281_s12   ;;  %s7281_s12 = sphi %s7343_s12, %s12387_s12   ;;  %s7277_s11 = sphi %s7341_s11, %s12386_s11   ;;  %s7273_s10 = sphi %s7339_s10, %s12385_s10   ;;  %s7269_s30 = sphi %s7337_s30, %s12384_s30  }
   0x4   : > { %s7362_s15 = sadd.s32 1, %s7281_s12   ;;  %s223_s16 = sadd.s32 1, %s7277_s11 }
   0x5   : > { %s220_s17 = ssub.s32 %s7281_s12, %s7362_s15  ;;  %p233_p0 = scmp.ne.s32.totalorder %s7277_s11, %s7273_s10 }
   0x6   : > { %p221_p1 = scmp.eq.s32.totalorder %s220_s17, 0  ;;  %p234_p2 = scmp.eq.s32.totalorder %s7358_s13, 1 }
   0x7   : > { %p239_p3 = scmp.ne.s32.totalorder %s7273_s10, %s7269_s30  ;;  %p240_p4 = scmp.eq.s32.totalorder %s7048_s14, 1 }
   0x8   : > { %s7373_s18 = scalar_select %p221_p1, %s7277_s11, %s223_s16  }
   0x9   : > { %p7375_p5 = por %p234_p2, %p233_p0  ;;  %p7379_p6 = por %p240_p4, %p239_p3 }
   0xa   : > { %p7051_p7 = scmp.ge.s32.totalorder %s7281_s12, 1  ;;  %p291_p8 = scmp.lt.s32.totalorder %s7281_s12, 3 }
   0xc   : > { %p292_p9 = pnand %p7051_p7, %p291_p8 }
   0xe   : > { %295 = sbr.rel (%p292_p9) target bundleno = 3162 (0xc5a), region = 56 }
  0x13   : > { %s327_s21 = smul.u32 12, %s7358_s13  ;;  %v386_v0 = vlaneseq  ;;  %v7283_v1 = vmov 1983009808   ;;  %v11912_v3 = vmov 0.0   ;;  %v7285_v5 = vmov 0   ;;  %v341_v6 = vld [vmem:[%s11904_s2 + $0x18] sm:$0xff] }
  0x14   : > { %v384_v2 = vunpack.c.l.s4 %v7283_v1  ;;  %485 = vmatprep.mubr.f32.mxu0 %v11912_v3  ;;  %574 = vmatprep.mubr.f32.mxu1 %v11912_v3  ;;  %v339_v7 = vld [vmem:[%s11904_s2 + $0x8] sm:$0xff]  ;;  %v340_v9 = vld [vmem:[%s11904_s2 + $0x10] sm:$0xff]  ;;  %v338_v10 = vld [vmem:[%s11904_s2] sm:$0xff]  ;;  %vm412_vm0 = vcmask 1041408   ;;  %vm399_vm1 = vcmask 15360   ;;  %vm1067_vm15 = vcmask 261120  }
  0x15   : > { %p328_p10 = scmp.lt.s32.totalorder %s327_s21, 23  ;;  %v387_v4 = vshrl.u32 %v386_v0, 7  ;;  %7190 = vset.pattern.permute.xlu0 %v7285_v5  ;;  %7191 = vset.pattern.permute.xlu1 %v7285_v5  ;;  %v349_v13 = vld [vmem:[%s11906_s4 + $0x18] sm:$0xff]  ;;  %v348_v14 = vld [vmem:[%s11906_s4 + $0x10] sm:$0xff]  ;;  %v334_v19 = vld [vmem:[%s11903_s1] sm:$0xff]  ;;  %s7146_s27 = smul.u32 768, %s7358_s13 }
  0x16   : > { %v385_v8 = vunpack.c.0.s8 %v384_v2  ;;  %378 = vperm.xlu0 %7190, %v341_v6   ;;  %368 = vperm.xlu1 %7191, %v339_v7   ;;  %v347_v21 = vld [vmem:[%s11906_s4 + $0x8] sm:$0xff]  ;;  %v346_v22 = vld [vmem:[%s11906_s4] sm:$0xff]  ;;  %v357_v24 = vld [vmem:[%s11908_s6 + $0x18] sm:$0xff]  ;;  %s7286_s13 = smov [#allocation2]  }
  0x17   : > { %s12389_s21 = smov (!%p328_p10, %s327_s21), 23  ;;  %v335_v23 = vld [vmem:[%s11903_s1 + $0x8] sm:$0xff]  ;;  %v356_v25 = vld [vmem:[%s11908_s6 + $0x10] sm:$0xff]  ;;  %v354_v28 = vld [vmem:[%s11908_s6] sm:$0xff]  ;;  %s7225_s25 = sshll.u32 %s7286_s13, 4  ;;  %s7226_s25 = int_to_ptr.vmem [resolvable:$false] %s7225_s25 }
  0x18   : > { %v7400_v11 = vsub.s32 %v385_v8, %v387_v4  ;;  %s7052_s14 = sshll.u32 %s12389_s21, 1  ;;  %v336_v26 = vld [vmem:[%s11903_s1 + $0x10] sm:$0xff]  ;;  %v355_v27 = vld [vmem:[%s11908_s6 + $0x8] sm:$0xff]  ;;  %v337_v29 = vld [vmem:[%s11903_s1 + $0x18] sm:$0xff]  ;;  %s7227_s26 = scalar_lea.vmem %s7226_s25, 1536 }
  0x19   : > { %s7405_s22 = scalar_lea.vmem %s11902_s0, %s7052_s14  ;;  %v359_v30 = vld [vmem:[%s11910_s8] sm:$0x7]  ;;  %s324_s14 = sand.u32 1, %s7273_s10  }
  0x1a   : > { %12070 = vst [vmem:[#allocation5_spill] sm:$0xff] %v7400_v11  ;;  %373 = vperm.xlu0 %7190, %v340_v9   ;;  %363 = vperm.xlu1 %7191, %v338_v10   ;;  %v360_v12 = vld [vmem:[%s7405_s22] sm:$0xff]  ;;  %s9010_s16 = smul.u32 48, %s324_s14  ;;  %s6975_s23 = scalar_lea.sflag [#allocation3], %s324_s14 }
  0x1b   : > { %v389_v15 = vrot.slane %v360_v12, %v7400_v11  ;;  %v382_v16 = vcombine.high %v360_v12, %v360_v12 }
  0x1c   : > { %s9038_s17 = scalar_lea.vmem [#allocation2], %s9010_s16  ;;  %s6987_s16 = scalar_lea.hbm %s11911_s9, %s7146_s27 }
  0x1d   : > { %v397_v17 = vcombine.high %v389_v15, %v389_v15  ;;  %v396_v18 = vrot.slane %v382_v16, %v7400_v11  ;;  %s6989_s28 = sshll.u32 %s9038_s17, 4  ;;  %s6990_s28 = int_to_ptr.vmem [resolvable:$true] %s6989_s28 }
  0x1e   : > { %1064 = vperm.xlu0 %7190, %v349_v13   ;;  %1059 = vperm.xlu1 %7191, %v348_v14   ;;  %s7221_s24 = scalar_lea.vmem %s6990_s28, 768  ;;  %p7228_p0 = scmp.lt.s32.totalorder %s6990_s28, %s7226_s25 }
  0x1f   : > { %7053 = vmatprep.subr.msk.mxu0 %vm412_vm0, %v397_v17  ;;  %v398_v20 = vcombine.high %v396_v18, %v396_v18  ;;  %p7222_p11 = scmp.ne.s32.totalorder %s6990_s28, %s7221_s24  ;;  %p7229_p1 = scmp.lt.s32.totalorder %s7227_s26, %s7221_s24 }
  0x20   : > { %7054 = vmatpush1.msk.msra.mxu0 %vm412_vm0, %v389_v15 }
  0x21   : > { %7055 = vmatmul.mubr.msk.f32.vlgmr.msra.gmra.mxu0 %vm399_vm1, %v334_v19  ;;  %7059 = vmatprep.subr.msk.mxu1 %vm412_vm0, %v398_v20  ;;  %p7223_p12 = pnand %p7222_p11, %p7375_p5  ;;  %p7230_p2 = por %p7229_p1, %p7228_p0 }
  0x22   : > { %7060 = vmatpush1.msk.msra.mxu1 %vm412_vm0, %v396_v18  ;;  %491 = vmatprep.mubr.f32.mxu0 %v11912_v3 }
  0x23   : > { %7061 = vmatmul.mubr.msk.f32.vlgmr.msra.gmra.mxu1 %vm399_vm1, %v334_v19  ;;  %1054 = vperm.xlu0 %7190, %v347_v21   ;;  %p7224_p13 = pneg %p7223_p12 }
  0x24   : > { %580 = vmatprep.mubr.f32.mxu1 %v11912_v3  ;;  %1049 = vperm.xlu1 %7191, %v346_v22  }
  0x25   : > { %7056 = vmatmul.mubr.msk.f32.gmra.mxu0 %vm399_vm1, %v335_v23  ;;  %p7231_p3 = pnand %p7230_p2, %p7224_p13 }
  0x26   : > { %497 = vmatprep.mubr.f32.mxu0 %v11912_v3 }
  0x27   : > { %7062 = vmatmul.mubr.msk.f32.gmra.mxu1 %vm399_vm1, %v335_v23  ;;  %1723 = vperm.xlu0 %7190, %v357_v24  }
  0x28   : > { %586 = vmatprep.mubr.f32.mxu1 %v11912_v3  ;;  %1718 = vperm.xlu1 %7191, %v356_v25  }
  0x29   : > { %7057 = vmatmul.mubr.msk.f32.gmra.mxu0 %vm399_vm1, %v336_v26 }
  0x2a   : > { %503 = vmatprep.mubr.f32.mxu0 %v11912_v3 }
  0x2b   : > { %7063 = vmatmul.mubr.msk.f32.gmra.mxu1 %vm399_vm1, %v336_v26  ;;  %1713 = vperm.xlu0 %7190, %v355_v27  }
  0x2c   : > { %592 = vmatprep.mubr.f32.mxu1 %v11912_v3  ;;  %1708 = vperm.xlu1 %7191, %v354_v28  }
  0x2d   : > { %7058 = vmatmul.mubr.msk.f32.gmra.mxu0 %vm399_vm1, %v337_v29 }
  0x2e   : > { %1144 = vmatprep.mubr.f32.mxu0 %v11912_v3 }
  0x2f   : > { %7064 = vmatmul.mubr.msk.f32.gmra.mxu1 %vm399_vm1, %v337_v29  ;;  %2366 = vperm.xlu0 %7190, %v359_v30  }
  0x30   : > { %1233 = vmatprep.mubr.f32.mxu1 %v11912_v3 }
  0x91   : > { %v7469_v31 = vpop.permute.xlu1 %368  ;;  %v7500_v2 = vpop.permute.xlu0 %378 }
  0x92   : > { %12071 = vst [vmem:[#allocation6_spill] sm:$0xff] %v7469_v31  ;;  %12074 = vst [vmem:[#allocation9_spill] sm:$0xff] %v7500_v2 }
  0x95   : > { %v7471_v32 = vpop.permute.xlu1 %363  ;;  %v7520_v27 = vpop.permute.xlu0 %373 }
  0x96   : > { %12072 = vst [vmem:[#allocation7_spill] sm:$0xff] %v7471_v32  ;;  %12077 = vst [vmem:[#allocation12_spill] sm:$0xff] %v7520_v27 }
  0xe1   : > { %v487_v33 = vpop.f32.mrf.mxu0 }
  0xe2   : > { %v488_v34 = vadd.f32 %v487_v33, %v7471_v32 }
  0xe3   : > { %v489_v35 = vpop.f32.mrf.mxu0  ;;  %v576_v36 = vpop.f32.mrf.mxu1 }
  0xe4   : > { %v599_v37 = vmul.f32 0.31830987, %v488_v34  ;;  %v490_v38 = vadd.f32 %v489_v35, %v7471_v32  ;;  %v577_v39 = vadd.f32 %v576_v36, %v7471_v32 }
  0xe5   : > { %v493_v40 = vpop.f32.mrf.mxu0  ;;  %v578_v41 = vpop.f32.mrf.mxu1 }
  0xe6   : > { %v615_v42 = vadd.f32 0.5, %v599_v37  ;;  %v600_v43 = vmul.f32 0.31830987, %v490_v38  ;;  %v601_v44 = vmul.f32 0.31830987, %v577_v39  ;;  %v7477_v45 = vadd.f32 %v493_v40, %v7469_v31 }
  0xe7   : > { %v7480_v46 = vadd.f32 %v578_v41, %v7471_v32  ;;  %v495_v47 = vpop.f32.mrf.mxu0  ;;  %v582_v61 = vpop.f32.mrf.mxu1 }
  0xe8   : > { %v7482_v48 = vfloor.f32 %v615_v42  ;;  %v616_v49 = vadd.f32 0.5, %v600_v43  ;;  %v617_v50 = vadd.f32 0.5, %v601_v44  ;;  %v603_v51 = vmul.f32 0.31830987, %v7477_v45 }
  0xe9   : > { %v602_v52 = vmul.f32 0.31830987, %v7480_v46  ;;  %v7487_v53 = vadd.f32 %v495_v47, %v7469_v31  ;;  %v7505_v7 = vadd.f32 %v582_v61, %v7469_v31  ;;  %v499_v9 = vpop.f32.mrf.mxu0  ;;  %v584_v10 = vpop.f32.mrf.mxu1 }
  0xea   : > { %v647_v54 = vmul.f32 3.140625, %v7482_v48  ;;  %v679_v55 = vmul.f32 0.00096702576, %v7482_v48  ;;  %v7491_v56 = vfloor.f32 %v616_v49  ;;  %v7493_v57 = vfloor.f32 %v617_v50 }
  0xeb   : > { %v619_v58 = vadd.f32 0.5, %v603_v51  ;;  %v618_v59 = vadd.f32 0.5, %v602_v52  ;;  %v604_v60 = vmul.f32 0.31830987, %v7487_v53  ;;  %v711_v16 = vmul.f32 6.277114e-07, %v7482_v48  ;;  %v501_v25 = vpop.f32.mrf.mxu0  ;;  %v588_v26 = vpop.f32.mrf.mxu1 }
  0xec   : > { %12073 = vst [vmem:[#allocation8_spill] sm:$0xff] %v7493_v57  ;;  %v663_v62 = vsub.f32 %v488_v34, %v647_v54  ;;  %v648_v63 = vmul.f32 3.140625, %v7491_v56  ;;  %v649_v0 = vmul.f32 3.140625, %v7493_v57  ;;  %v680_v12 = vmul.f32 0.00096702576, %v7491_v56 }
  0xed   : > { %v7498_v1 = vfloor.f32 %v619_v58  ;;  %v7502_v5 = vfloor.f32 %v618_v59  ;;  %v620_v6 = vadd.f32 0.5, %v604_v60  ;;  %v681_v19 = vmul.f32 0.00096702576, %v7493_v57  ;;  %v590_v47 = vpop.f32.mrf.mxu1 }
  0xee   : > { %v664_v4 = vsub.f32 %v490_v38, %v648_v63  ;;  %v695_v8 = vsub.f32 %v663_v62, %v679_v55  ;;  %v665_v13 = vsub.f32 %v577_v39, %v649_v0  ;;  %v605_v20 = vmul.f32 0.31830987, %v7505_v7 }
  0xef   : > { %12075 = vst [vmem:[#allocation10_spill] sm:$0xff] %v7502_v5  ;;  %v651_v14 = vmul.f32 3.140625, %v7498_v1  ;;  %v650_v15 = vmul.f32 3.140625, %v7502_v5  ;;  %v7511_v17 = vfloor.f32 %v620_v6  ;;  %v712_v22 = vmul.f32 6.277114e-07, %v7491_v56 }
  0xf0   : > { %v696_v18 = vsub.f32 %v664_v4, %v680_v12  ;;  %v7515_v21 = vsub.f32 %v695_v8, %v711_v16  ;;  %v713_v23 = vmul.f32 6.277114e-07, %v7493_v57  ;;  %v697_v28 = vsub.f32 %v665_v13, %v681_v19 }
  0xf1   : > { %v652_v24 = vmul.f32 3.140625, %v7511_v17  ;;  %v667_v29 = vsub.f32 %v7477_v45, %v651_v14  ;;  %v683_v30 = vmul.f32 0.00096702576, %v7498_v1  ;;  %v666_v33 = vsub.f32 %v7480_v46, %v650_v15  ;;  %v505_v46 = vpop.f32.mrf.mxu0 }
  0xf2   : > { %12076 = vst [vmem:[#allocation11_spill] sm:$0xff] %v7515_v21  ;;  %v715_v34 = vmul.f32 6.277114e-07, %v7498_v1  ;;  %v682_v35 = vmul.f32 0.00096702576, %v7502_v5  ;;  %v621_v36 = vadd.f32 0.5, %v605_v20  ;;  %v500_v37 = vadd.f32 %v499_v9, %v7520_v27 }
  0xf3   : > { %v7528_v38 = vsub.f32 %v696_v18, %v712_v22  ;;  %v714_v39 = vmul.f32 6.277114e-07, %v7502_v5  ;;  %v7532_v40 = vadd.f32 %v584_v10, %v7469_v31  ;;  %v502_v41 = vadd.f32 %v501_v25, %v7520_v27 }
  0xf4   : > { %v7537_v42 = vmul.f32 %v7515_v21, %v7515_v21  ;;  %v668_v43 = vsub.f32 %v7487_v53, %v652_v24  ;;  %v607_v44 = vmul.f32 0.31830987, %v500_v37  ;;  %v7541_v45 = vadd.f32 %v588_v26, %v7520_v27 }
  0xf5   : > { %v7543_v49 = vsub.f32 %v697_v28, %v713_v23  ;;  %v699_v50 = vsub.f32 %v667_v29, %v683_v30  ;;  %v698_v51 = vsub.f32 %v666_v33, %v682_v35  ;;  %v684_v52 = vmul.f32 0.00096702576, %v7511_v17 }
  0xf6   : > { %v7546_v54 = vfloor.f32 %v621_v36  ;;  %v623_v55 = vadd.f32 0.5, %v607_v44  ;;  %v606_v58 = vmul.f32 0.31830987, %v7532_v40  ;;  %v608_v59 = vmul.f32 0.31830987, %v502_v41 }
  0xf7   : > { %12078 = vst [vmem:[#allocation13_spill] sm:$0xff] %v7543_v49  ;;  %v7551_v53 = vmul.f32 %v7528_v38, %v7528_v38  ;;  %v609_v60 = vmul.f32 0.31830987, %v7541_v45  ;;  %v506_v61 = vadd.f32 %v505_v46, %v7500_v2  ;;  %v7556_v62 = vadd.f32 %v590_v47, %v7520_v27 }
  0xf8   : > { %v700_v63 = vsub.f32 %v668_v43, %v684_v52  ;;  %v7558_v0 = vfloor.f32 %v623_v55  ;;  %v622_v4 = vadd.f32 0.5, %v606_v58  ;;  %v624_v6 = vadd.f32 0.5, %v608_v59 }
  0xf9   : > { %v7560_v8 = vsub.f32 %v699_v50, %v715_v34  ;;  %v7562_v9 = vsub.f32 %v698_v51, %v714_v39  ;;  %v625_v10 = vadd.f32 0.5, %v609_v60  ;;  %v611_v12 = vmul.f32 0.31830987, %v506_v61  ;;  %v507_v34 = vpop.f32.mrf.mxu0  ;;  %v594_v50 = vpop.f32.mrf.mxu1 }
  0xfa   : > { %v716_v13 = vmul.f32 6.277114e-07, %v7511_v17  ;;  %v653_v14 = vmul.f32 3.140625, %v7546_v54  ;;  %v655_v15 = vmul.f32 3.140625, %v7558_v0  ;;  %v7567_v16 = vfloor.f32 %v622_v4 }
  0xfb   : > { %12079 = vst [vmem:[#allocation14_spill] sm:$0xff] %v7562_v9  ;;  %v7569_v18 = vfloor.f32 %v624_v6  ;;  %v7571_v19 = vfloor.f32 %v625_v10  ;;  %v627_v20 = vadd.f32 0.5, %v611_v12  ;;  %v610_v22 = vmul.f32 0.31830987, %v7556_v62 }
  0xfc   : > { %v7574_v23 = vsub.f32 %v700_v63, %v716_v13  ;;  %v671_v24 = vsub.f32 %v500_v37, %v655_v15  ;;  %v687_v25 = vmul.f32 0.00096702576, %v7558_v0  ;;  %v654_v26 = vmul.f32 3.140625, %v7567_v16  ;;  %v596_v15 = vpop.f32.mrf.mxu1 }
  0xfd   : > { %v7580_v28 = vmul.f32 %v7543_v49, %v7543_v49  ;;  %v7584_v29 = vmul.f32 %v7560_v8, %v7560_v8  ;;  %v7588_v30 = vmul.f32 %v7562_v9, %v7562_v9  ;;  %v656_v33 = vmul.f32 3.140625, %v7569_v18 }
  0xfe   : > { %v669_v35 = vsub.f32 %v7505_v7, %v653_v14  ;;  %v685_v36 = vmul.f32 0.00096702576, %v7546_v54  ;;  %v717_v37 = vmul.f32 6.277114e-07, %v7546_v54  ;;  %v657_v39 = vmul.f32 3.140625, %v7571_v19 }
  0xff   : > { %12080 = vst [vmem:[#allocation15_spill] sm:$0xff] %v7580_v28  ;;  %12081 = vst [vmem:[#allocation16_spill] sm:$0xff] %v7588_v30  ;;  %v672_v43 = vsub.f32 %v502_v41, %v656_v33  ;;  %v688_v44 = vmul.f32 0.00096702576, %v7569_v18  ;;  %v7596_v46 = vfloor.f32 %v627_v20  ;;  %v626_v47 = vadd.f32 0.5, %v610_v22 }
 0x100   : > { %v7600_v51 = vmul.f32 %v7574_v23, %v7574_v23  ;;  %v703_v52 = vsub.f32 %v671_v24, %v687_v25  ;;  %v670_v7 = vsub.f32 %v7532_v40, %v654_v26  ;;  %v508_v55 = vadd.f32 %v507_v34, %v7500_v2 }
 0x101   : > { %v704_v58 = vsub.f32 %v672_v43, %v688_v44  ;;  %v720_v59 = vmul.f32 6.277114e-07, %v7569_v18  ;;  %v659_v41 = vmul.f32 3.140625, %v7596_v46  ;;  %v691_v60 = vmul.f32 0.00096702576, %v7596_v46 }
 0x102   : > { %v719_v63 = vmul.f32 6.277114e-07, %v7558_v0  ;;  %v686_v4 = vmul.f32 0.00096702576, %v7567_v16  ;;  %v673_v6 = vsub.f32 %v7541_v45, %v657_v39  ;;  %v7610_v10 = vfloor.f32 %v626_v47 }
 0x103   : > { %v7612_v12 = vsub.f32 %v704_v58, %v720_v59  ;;  %v675_v40 = vsub.f32 %v506_v61, %v659_v41  ;;  %v612_v13 = vmul.f32 0.31830987, %v508_v55  ;;  %v595_v14 = vadd.f32 %v594_v50, %v7500_v2 }
 0x104   : > { %v701_v20 = vsub.f32 %v669_v35, %v685_v36  ;;  %v7615_v22 = vsub.f32 %v703_v52, %v719_v63  ;;  %v702_v24 = vsub.f32 %v670_v7, %v686_v4  ;;  %v689_v25 = vmul.f32 0.00096702576, %v7571_v19 }
 0x105   : > { %v7620_v26 = vmul.f32 %v7612_v12, %v7612_v12  ;;  %v707_v45 = vsub.f32 %v675_v40, %v691_v60  ;;  %v723_v33 = vmul.f32 6.277114e-07, %v7596_v46  ;;  %v628_v34 = vadd.f32 0.5, %v612_v13 }
 0x106   : > { %v705_v39 = vsub.f32 %v673_v6, %v689_v25  ;;  %v658_v61 = vmul.f32 3.140625, %v7610_v10  ;;  %v613_v43 = vmul.f32 0.31830987, %v595_v14  ;;  %v597_v44 = vadd.f32 %v596_v15, %v7500_v2 }
 0x107   : > { %v718_v35 = vmul.f32 6.277114e-07, %v7567_v16  ;;  %v7626_v36 = vsub.f32 %v707_v45, %v723_v33  ;;  %v7628_v47 = vfloor.f32 %v628_v34  ;;  %v768_v50 = vmul.f32 -2.5052108e-08, %v7620_v26 }
 0x108   : > { %v7631_v52 = vsub.f32 %v701_v20, %v717_v37  ;;  %v721_v7 = vmul.f32 6.277114e-07, %v7571_v19  ;;  %v629_v58 = vadd.f32 0.5, %v613_v43  ;;  %v614_v59 = vmul.f32 0.31830987, %v597_v44 }
 0x109   : > { %v7636_v41 = vmul.f32 %v7615_v22, %v7615_v22  ;;  %v7638_v60 = vsub.f32 %v702_v24, %v718_v35  ;;  %v7642_v63 = vmul.f32 %v7626_v36, %v7626_v36  ;;  %v660_v4 = vmul.f32 3.140625, %v7628_v47 }
 0x10a   : > { %v7645_v6 = vsub.f32 %v705_v39, %v721_v7  ;;  %v674_v37 = vsub.f32 %v7556_v62, %v658_v61  ;;  %v7648_v40 = vfloor.f32 %v629_v58  ;;  %v630_v13 = vadd.f32 0.5, %v614_v59 }
 0x10b   : > { %v676_v15 = vsub.f32 %v508_v55, %v660_v4  ;;  %v692_v20 = vmul.f32 0.00096702576, %v7628_v47  ;;  %v771_v25 = vmul.f32 -2.5052108e-08, %v7642_v63  ;;  %v784_v24 = vadd.f32 2.7557319e-06, %v768_v50 }
 0x10c   : > { %v690_v45 = vmul.f32 0.00096702576, %v7610_v10  ;;  %v722_v33 = vmul.f32 6.277114e-07, %v7610_v10  ;;  %v661_v34 = vmul.f32 3.140625, %v7648_v40  ;;  %v947_v39 = vmul.f32 0.5, %v7596_v46 }
 0x10d   : > { %v708_v43 = vsub.f32 %v676_v15, %v692_v20  ;;  %v724_v62 = vmul.f32 6.277114e-07, %v7628_v47  ;;  %v7657_v61 = vfloor.f32 %v630_v13  ;;  %v787_v35 = vadd.f32 2.7557319e-06, %v771_v25 }
 0x10e   : > { %v706_v55 = vsub.f32 %v674_v37, %v690_v45  ;;  %v677_v7 = vsub.f32 %v595_v14, %v661_v34  ;;  %v693_v58 = vmul.f32 0.00096702576, %v7648_v40  ;;  %v800_v50 = vmul.f32 %v784_v24, %v7620_v26 }
 0x10f   : > { %v7661_v59 = vsub.f32 %v708_v43, %v724_v62  ;;  %v662_v4 = vmul.f32 3.140625, %v7657_v61  ;;  %v948_v3 = vmul.f32 0.5, %v7628_v47  ;;  %v944_v2 = vmul.f32 0.5, %v7569_v18 }
 0x110   : > { %v709_v15 = vsub.f32 %v677_v7, %v693_v58  ;;  %v725_v20 = vmul.f32 6.277114e-07, %v7648_v40  ;;  %v803_v13 = vmul.f32 %v787_v35, %v7642_v63  ;;  %v963_v25 = vfloor.f32 %v947_v39 }
 0x111   : > { %v7670_v14 = vmul.f32 %v7661_v59, %v7661_v59  ;;  %v678_v37 = vsub.f32 %v597_v44, %v662_v4  ;;  %v694_v24 = vmul.f32 0.00096702576, %v7657_v61  ;;  %v816_v45 = vadd.f32 -0.0001984127, %v800_v50 }
 0x112   : > { %v7675_v34 = vmul.f32 %v7645_v6, %v7645_v6  ;;  %v7677_v43 = vsub.f32 %v706_v55, %v722_v33  ;;  %v7679_v62 = vsub.f32 %v709_v15, %v725_v20  ;;  %v819_v7 = vadd.f32 -0.0001984127, %v803_v13 }
 0x113   : > { %v710_v58 = vsub.f32 %v678_v37, %v694_v24  ;;  %v726_v39 = vmul.f32 6.277114e-07, %v7657_v61  ;;  %v772_v35 = vmul.f32 -2.5052108e-08, %v7670_v14  ;;  %v832_v27 = vmul.f32 %v816_v45, %v7620_v26 }
 0x114   : > { %v7686_v44 = vmul.f32 %v7679_v62, %v7679_v62  ;;  %v964_v50 = vfloor.f32 %v948_v3  ;;  %v835_v4 = vmul.f32 %v819_v7, %v7642_v63  ;;  %v979_v31 = vmul.f32 2.0, %v963_v25 }
 0x115   : > { %v7689_v33 = vsub.f32 %v710_v58, %v726_v39  ;;  %v788_v55 = vadd.f32 2.7557319e-06, %v772_v35  ;;  %v848_v15 = vadd.f32 0.008333334, %v832_v27  ;;  %v960_v20 = vfloor.f32 %v944_v2 }
 0x116   : > { %v851_v13 = vadd.f32 0.008333334, %v835_v4  ;;  %v950_v37 = vmul.f32 0.5, %v7657_v61  ;;  %v767_v24 = vmul.f32 -2.5052108e-08, %v7636_v41  ;;  %v943_v45 = vmul.f32 0.5, %v7558_v0 }
 0x117   : > { %v7696_v32 = vmul.f32 %v7689_v33, %v7689_v33  ;;  %v804_v3 = vmul.f32 %v788_v55, %v7670_v14  ;;  %v864_v25 = vmul.f32 %v848_v15, %v7620_v26  ;;  %v773_v7 = vmul.f32 -2.5052108e-08, %v7686_v44 }
 0x118   : > { %v980_v58 = vmul.f32 2.0, %v964_v50  ;;  %v867_v2 = vmul.f32 %v851_v13, %v7642_v63  ;;  %v783_v27 = vadd.f32 2.7557319e-06, %v767_v24  ;;  %v959_v39 = vfloor.f32 %v943_v45 }
 0x119   : > { %v7704_v35 = vmul.f32 %v7677_v43, %v7677_v43  ;;  %v820_v4 = vadd.f32 -0.0001984127, %v804_v3  ;;  %v880_v11 = vadd.f32 -0.16666667, %v864_v25  ;;  %v774_v49 = vmul.f32 -2.5052108e-08, %v7696_v32 }
 0x11a   : > { %v883_v9 = vadd.f32 -0.16666667, %v867_v2  ;;  %v976_v57 = vmul.f32 2.0, %v960_v20  ;;  %v966_v55 = vfloor.f32 %v950_v37  ;;  %v799_v15 = vmul.f32 %v783_v27, %v7636_v41 }
 0x11b   : > { %v836_v5 = vmul.f32 %v820_v4, %v7670_v14  ;;  %v896_v50 = vmul.f32 %v880_v11, %v7620_v26  ;;  %v790_v13 = vadd.f32 2.7557319e-06, %v774_v49  ;;  %v789_v24 = vadd.f32 2.7557319e-06, %v773_v7 }
 0x11c   : > { %v899_v45 = vmul.f32 %v883_v9, %v7642_v63  ;;  %v995_v21 = vsub.f32 %v7596_v46, %v979_v31  ;;  %v815_v28 = vadd.f32 -0.0001984127, %v799_v15  ;;  %v975_v3 = vmul.f32 2.0, %v959_v39 }
 0x11d   : > { %v852_v25 = vadd.f32 0.008333334, %v836_v5  ;;  %v912_v30 = vmul.f32 %v896_v50, %v7612_v12  ;;  %v806_v20 = vmul.f32 %v790_v13, %v7696_v32  ;;  %v805_v37 = vmul.f32 %v789_v24, %v7686_v44 }
 0x11e   : > { %v996_v2 = vsub.f32 %v7628_v47, %v980_v58  ;;  %v992_v27 = vsub.f32 %v7569_v18, %v976_v57  ;;  %v982_v11 = vmul.f32 2.0, %v966_v55  ;;  %v831_v49 = vmul.f32 %v815_v28, %v7636_v41 }
 0x11f   : > { %v868_v9 = vmul.f32 %v852_v25, %v7670_v14  ;;  %v915_v31 = vmul.f32 %v899_v45, %v7626_v36  ;;  %v822_v46 = vadd.f32 -0.0001984127, %v806_v20  ;;  %v821_v26 = vadd.f32 -0.0001984127, %v805_v37 }
 0x120   : > { %v847_v5 = vadd.f32 0.008333334, %v831_v49  ;;  %v991_v63 = vsub.f32 %v7558_v0, %v975_v3  ;;  %v949_v7 = vmul.f32 0.5, %v7648_v40  ;;  %v764_v39 = vmul.f32 -2.5052108e-08, %v7600_v51 }
 0x121   : > { %v884_v4 = vadd.f32 -0.16666667, %v868_v9  ;;  %v928_v47 = vadd.f32 %v912_v30, %v7612_v12  ;;  %v838_v57 = vmul.f32 %v822_v46, %v7696_v32  ;;  %v837_v18 = vmul.f32 %v821_v26, %v7686_v44 }
 0x122   : > { %vm7726_vm2 = vcmp.gt.f32.partialorder %v996_v2, 0.5  ;;  %vm7730_vm3 = vcmp.gt.f32.partialorder %v995_v21, 0.5  ;;  %vm7734_vm4 = vcmp.gt.f32.partialorder %v992_v27, 0.5  ;;  %v863_v55 = vmul.f32 %v847_v5, %v7636_v41 }
 0x123   : > { %v780_v15 = vadd.f32 2.7557319e-06, %v764_v39  ;;  %v900_v30 = vmul.f32 %v884_v4, %v7670_v14  ;;  %v931_v12 = vadd.f32 %v915_v31, %v7626_v36  ;;  %v854_v50 = vadd.f32 0.008333334, %v838_v57 }
 0x124   : > { %v853_v13 = vadd.f32 0.008333334, %v837_v18  ;;  %v998_v24 = vsub.f32 %v7657_v61, %v982_v11  ;;  %v879_v45 = vadd.f32 -0.16666667, %v863_v55  ;;  %v965_v21 = vfloor.f32 %v949_v7 }
 0x125   : > { %v796_v3 = vmul.f32 %v780_v15, %v7600_v51  ;;  %v916_v25 = vmul.f32 %v900_v30, %v7661_v59  ;;  %v1024_v20 = vsub.f32 0.0, %v928_v47  ;;  %v870_v37 = vmul.f32 %v854_v50, %v7696_v32 }
 0x126   : > { %vm7745_vm5 = vcmp.gt.f32.partialorder %v991_v63, 0.5  ;;  %v869_v14 = vmul.f32 %v853_v13, %v7686_v44  ;;  %v895_v36 = vmul.f32 %v879_v45, %v7636_v41  ;;  %v940_v61 = vmul.f32 0.5, %v7511_v17 }
 0x127   : > { %v812_v27 = vadd.f32 -0.0001984127, %v796_v3  ;;  %v770_v11 = vmul.f32 -2.5052108e-08, %v7704_v35  ;;  %v932_v49 = vadd.f32 %v916_v25, %v7661_v59  ;;  %v1027_v9 = vsub.f32 0.0, %v931_v12 }
 0x128   : > { %v886_v31 = vadd.f32 -0.16666667, %v870_v37  ;;  %v885_v46 = vadd.f32 -0.16666667, %v869_v14  ;;  %vm7754_vm6 = vcmp.gt.f32.partialorder %v998_v24, 0.5  ;;  %v911_v5 = vmul.f32 %v895_v36, %v7615_v22 }
 0x129   : > { %v981_v63 = vmul.f32 2.0, %v965_v21  ;;  %v828_v7 = vmul.f32 %v812_v27, %v7600_v51  ;;  %v786_v41 = vadd.f32 2.7557319e-06, %v770_v11  ;;  %v1028_v39 = vsub.f32 0.0, %v932_v49 }
 0x12a   : > { %v1040_v4 = vsel %vm7734_vm4, %v1024_v20, %v928_v47  ;;  %v902_v57 = vmul.f32 %v886_v31, %v7696_v32  ;;  %v901_v59 = vmul.f32 %v885_v46, %v7686_v44  ;;  %v927_v18 = vadd.f32 %v911_v5, %v7615_v22 }
 0x12b   : > { %v844_v55 = vadd.f32 0.008333334, %v828_v7  ;;  %v956_v15 = vfloor.f32 %v940_v61  ;;  %v802_v30 = vmul.f32 %v786_v41, %v7704_v35  ;;  %v1044_v50 = vsel %vm7726_vm2, %v1028_v39, %v932_v49 }
 0x12c   : > { %v1043_v13 = vsel %vm7730_vm3, %v1027_v9, %v931_v12  ;;  %v918_v24 = vmul.f32 %v902_v57, %v7689_v33  ;;  %v917_v47 = vmul.f32 %v901_v59, %v7679_v62  ;;  %1104 = vmatprep.subr.mxu0 %v1044_v50  ;;  %v1023_v32 = vsub.f32 0.0, %v927_v18 }
 0x12d   : > { %v860_v44 = vmul.f32 %v844_v55, %v7600_v51  ;;  %v818_v0 = vadd.f32 -0.0001984127, %v802_v30  ;;  %v946_v22 = vmul.f32 0.5, %v7610_v10  ;;  %1105 = vmatpush1.msra.mxu0 %v1043_v13  ;;  %v997_v21 = vsub.f32 %v7648_v40, %v981_v63 }
 0x12e   : > { %v934_v45 = vadd.f32 %v918_v24, %v7689_v33  ;;  %v933_v28 = vadd.f32 %v917_v47, %v7679_v62  ;;  %v763_v58 = vmul.f32 -2.5052108e-08, %v7584_v29  ;;  %1106 = vmatprep.subr.mxu0 %v1040_v4  ;;  %v1039_v12 = vsel %vm7745_vm5, %v1023_v32, %v927_v18 }
 0x12f   : > { %v876_v3 = vadd.f32 -0.16666667, %v860_v44  ;;  %v972_v25 = vmul.f32 2.0, %v956_v15  ;;  %v834_v20 = vmul.f32 %v818_v0, %v7704_v35  ;;  %1107 = vmatpush1.msra.mxu0 %v1039_v12  ;;  %v939_v33 = vmul.f32 0.5, %v7498_v1 }
 0x130   : > { %v1030_v37 = vsub.f32 0.0, %v934_v45  ;;  %v1029_v14 = vsub.f32 0.0, %v933_v28  ;;  %v779_v36 = vadd.f32 2.7557319e-06, %v763_v58  ;;  %v962_v40 = vfloor.f32 %v946_v22 }
 0x131   : > { %v892_v62 = vmul.f32 %v876_v3, %v7600_v51  ;;  %v850_v27 = vadd.f32 0.008333334, %v834_v20  ;;  %v769_v61 = vmul.f32 -2.5052108e-08, %v7675_v34  ;;  %vm1013_vm7 = vcmp.gt.f32.partialorder %v997_v21, 0.5 }
 0x132   : > { %v1046_v2 = vsel %vm7754_vm6, %v1030_v37, %v934_v45  ;;  %v795_v11 = vmul.f32 %v779_v36, %v7584_v29  ;;  %v955_v49 = vfloor.f32 %v939_v33  ;;  %v1045_v9 = vsel %vm1013_vm7, %v1029_v14, %v933_v28 }
 0x133   : > { %1193 = vmatprep.subr.mxu1 %v1046_v2  ;;  %v908_v31 = vmul.f32 %v892_v62, %v7574_v23  ;;  %v866_v46 = vmul.f32 %v850_v27, %v7704_v35  ;;  %v785_v5 = vadd.f32 2.7557319e-06, %v769_v61  ;;  %v988_v51 = vsub.f32 %v7511_v17, %v972_v25 }
 0x134   : > { %1194 = vmatpush1.msra.mxu1 %v1045_v9  ;;  %v811_v63 = vadd.f32 -0.0001984127, %v795_v11  ;;  %v945_v7 = vmul.f32 0.5, %v7571_v19  ;;  %v760_v26 = vmul.f32 -2.5052108e-08, %v7551_v53  ;;  %v978_v4 = vmul.f32 2.0, %v962_v40 }
 0x135   : > { %v924_v41 = vadd.f32 %v908_v31, %v7574_v23  ;;  %v882_v39 = vadd.f32 -0.16666667, %v866_v46  ;;  %v801_v57 = vmul.f32 %v785_v5, %v7675_v34  ;;  %v7796_v59 = vmul.f32 %v7638_v60, %v7638_v60 }
 0x136   : > { %v827_v18 = vmul.f32 %v811_v63, %v7584_v29  ;;  %v971_v55 = vmul.f32 2.0, %v955_v49  ;;  %v776_v15 = vadd.f32 2.7557319e-06, %v760_v26  ;;  %v936_v13 = vmul.f32 0.5, %v7491_v56 }
 0x137   : > { %v1020_v17 = vsub.f32 0.0, %v924_v41  ;;  %v898_v30 = vmul.f32 %v882_v39, %v7704_v35  ;;  %v817_v50 = vadd.f32 -0.0001984127, %v801_v57  ;;  %vm1004_vm8 = vcmp.gt.f32.partialorder %v988_v51, 0.5 }
 0x138   : > { %v843_v23 = vadd.f32 0.008333334, %v827_v18  ;;  %v961_v24 = vfloor.f32 %v945_v7  ;;  %v792_v47 = vmul.f32 %v776_v15, %v7551_v53  ;;  %v994_v0 = vsub.f32 %v7610_v10, %v978_v4 }
 0x139   : > { %v1036_v32 = vsel %vm1004_vm8, %v1020_v17, %v924_v41  ;;  %v914_v44 = vmul.f32 %v898_v30, %v7677_v43  ;;  %v833_v22 = vmul.f32 %v817_v50, %v7675_v34  ;;  %v987_v35 = vsub.f32 %v7498_v1, %v971_v55 }
 0x13a   : > { %1108 = vmatprep.subr.mxu0 %v1036_v32  ;;  %v859_v45 = vmul.f32 %v843_v23, %v7584_v29  ;;  %v808_v28 = vadd.f32 -0.0001984127, %v792_v47  ;;  %v766_v21 = vmul.f32 -2.5052108e-08, %v7796_v59  ;;  %v7810_v58 = vmul.f32 %v7631_v52, %v7631_v52 }
 0x13b   : > { %v930_v12 = vadd.f32 %v914_v44, %v7677_v43  ;;  %v849_v3 = vadd.f32 0.008333334, %v833_v22  ;;  %v952_v25 = vfloor.f32 %v936_v13  ;;  %v977_v10 = vmul.f32 2.0, %v961_v24 }
 0x13c   : > { %v875_v20 = vadd.f32 -0.16666667, %v859_v45  ;;  %v824_v37 = vmul.f32 %v808_v28, %v7551_v53  ;;  %v782_v14 = vadd.f32 2.7557319e-06, %v766_v21  ;;  %vm1010_vm9 = vcmp.gt.f32.partialorder %v994_v0, 0.5  ;;  %v12098_v28 = vld [vmem:[#allocation16_spill] sm:$0xff] }
 0x13d   : > { %v1026_v36 = vsub.f32 0.0, %v930_v12  ;;  %v865_v1 = vmul.f32 %v849_v3, %v7675_v34  ;;  %v759_v33 = vmul.f32 -2.5052108e-08, %v7537_v42  ;;  %vm7817_vm10 = vcmp.gt.f32.partialorder %v987_v35, 0.5 }
 0x13e   : > { %v891_v62 = vmul.f32 %v875_v20, %v7584_v29  ;;  %v840_v43 = vadd.f32 0.008333334, %v824_v37  ;;  %v798_v40 = vmul.f32 %v782_v14, %v7796_v59  ;;  %v968_v11 = vmul.f32 2.0, %v952_v25 }
 0x13f   : > { %v1042_v61 = vsel %vm1010_vm9, %v1026_v36, %v930_v12  ;;  %v881_v2 = vadd.f32 -0.16666667, %v865_v1  ;;  %v775_v49 = vadd.f32 2.7557319e-06, %v759_v33  ;;  %v993_v31 = vsub.f32 %v7571_v19, %v977_v10  ;;  %v12099_v33 = vld [vmem:[#allocation15_spill] sm:$0xff] }
 0x140   : > { %1195 = vmatprep.subr.mxu1 %v1042_v61  ;;  %v907_v9 = vmul.f32 %v891_v62, %v7560_v8  ;;  %v856_v46 = vmul.f32 %v840_v43, %v7551_v53  ;;  %v814_v5 = vadd.f32 -0.0001984127, %v798_v40  ;;  %v942_v51 = vmul.f32 0.5, %v7567_v16 }
 0x141   : > { %v897_v29 = vmul.f32 %v881_v2, %v7675_v34  ;;  %v791_v63 = vmul.f32 %v775_v49, %v7537_v42  ;;  %v765_v7 = vmul.f32 -2.5052108e-08, %v7810_v58  ;;  %v935_v4 = vmul.f32 0.5, %v7482_v48 }
 0x142   : > { %v923_v26 = vadd.f32 %v907_v9, %v7560_v8  ;;  %v872_v41 = vadd.f32 -0.16666667, %v856_v46  ;;  %v830_v39 = vmul.f32 %v814_v5, %v7796_v59  ;;  %v984_v57 = vsub.f32 %v7491_v56, %v968_v11  ;;  %v12100_v46 = vld [vmem:[#allocation11_spill] sm:$0xff] }
 0x143   : > { %v913_v19 = vmul.f32 %v897_v29, %v7645_v6  ;;  %v807_v18 = vadd.f32 -0.0001984127, %v791_v63  ;;  %v781_v55 = vadd.f32 2.7557319e-06, %v765_v7  ;;  %vm7834_vm11 = vcmp.gt.f32.partialorder %v993_v31, 0.5 }
 0x144   : > { %v1019_v34 = vsub.f32 0.0, %v923_v26  ;;  %v888_v17 = vmul.f32 %v872_v41, %v7551_v53  ;;  %v846_v30 = vadd.f32 0.008333334, %v830_v39  ;;  %v958_v50 = vfloor.f32 %v942_v51  ;;  %v12101_v51 = vld [vmem:[#allocation10_spill] sm:$0xff] }
 0x145   : > { %v929_v8 = vadd.f32 %v913_v19, %v7645_v6  ;;  %v823_v13 = vmul.f32 %v807_v18, %v7537_v42  ;;  %v797_v23 = vmul.f32 %v781_v55, %v7810_v58  ;;  %v951_v32 = vfloor.f32 %v935_v4  ;;  %v12102_v18 = vld [vmem:[#allocation8_spill] sm:$0xff] }
 0x146   : > { %v1035_v56 = vsel %vm7817_vm10, %v1019_v34, %v923_v26  ;;  %v904_v24 = vmul.f32 %v888_v17, %v7528_v38  ;;  %v862_v47 = vmul.f32 %v846_v30, %v7796_v59  ;;  %vm7846_vm12 = vcmp.gt.f32.partialorder %v984_v57, 0.5 }
 0x147   : > { %1109 = vmatpush1.msra.mxu0 %v1035_v56  ;;  %v1025_v44 = vsub.f32 0.0, %v929_v8  ;;  %v839_v6 = vadd.f32 0.008333334, %v823_v13  ;;  %v813_v0 = vadd.f32 -0.0001984127, %v797_v23  ;;  %v941_v35 = vmul.f32 0.5, %v7546_v54 }
 0x148   : > { %v920_v22 = vadd.f32 %v904_v24, %v7528_v38  ;;  %v878_v45 = vadd.f32 -0.16666667, %v862_v47  ;;  %v762_v21 = vmul.f32 -2.5052108e-08, %v12098_v28  ;;  %v974_v3 = vmul.f32 2.0, %v958_v50 }
 0x149   : > { %v1041_v12 = vsel %vm7834_vm11, %v1025_v44, %v929_v8  ;;  %v855_v25 = vmul.f32 %v839_v6, %v7537_v42  ;;  %v829_v20 = vmul.f32 %v813_v0, %v7810_v58  ;;  %v967_v14 = vmul.f32 2.0, %v951_v32  ;;  %v342_v8 = vld [vmem:[%s11905_s3] sm:$0xff]  ;;  %v343_v6 = vld [vmem:[%s11905_s3 + $0x8] sm:$0xff] }
 0x14a   : > { %1196 = vmatpush1.msra.mxu1 %v1041_v12  ;;  %v1016_v10 = vsub.f32 0.0, %v920_v22  ;;  %v894_v37 = vmul.f32 %v878_v45, %v7796_v59  ;;  %v778_v36 = vadd.f32 2.7557319e-06, %v762_v21  ;;  %v761_v62 = vmul.f32 -2.5052108e-08, %v12099_v33 }
 0x14b   : > { %v871_v38 = vadd.f32 -0.16666667, %v855_v25  ;;  %v845_v1 = vadd.f32 0.008333334, %v829_v20  ;;  %v957_v40 = vfloor.f32 %v941_v35  ;;  %v990_v2 = vsub.f32 %v7567_v16, %v974_v3  ;;  %v344_v3 = vld [vmem:[%s11905_s3 + $0x10] sm:$0xff]  ;;  %v12105_v25 = vld [vmem:[#allocation13_spill] sm:$0xff] }
 0x14c   : > { %v1032_v27 = vsel %vm7846_vm12, %v1016_v10, %v920_v22  ;;  %v910_v43 = vmul.f32 %v894_v37, %v7638_v60  ;;  %v794_v61 = vmul.f32 %v778_v36, %v12098_v28  ;;  %v777_v49 = vadd.f32 2.7557319e-06, %v761_v62  ;;  %v12104_v22 = vld [vmem:[#allocation14_spill] sm:$0xff]  ;;  %v7917_v62 = vpop.permute.xlu1 %1059 }
 0x14d   : > { %1110 = vmatprep.subr.mxu0 %v1032_v27  ;;  %v887_v11 = vmul.f32 %v871_v38, %v7537_v42  ;;  %v861_v59 = vmul.f32 %v845_v1, %v7810_v58  ;;  %v938_v63 = vmul.f32 0.5, %v12101_v51  ;;  %v983_v41 = vsub.f32 %v7482_v48, %v967_v14  ;;  %v345_v38 = vld [vmem:[%s11905_s3 + $0x18] sm:$0xff]  ;;  %12106 = vst [vmem:[#allocation16_spill] sm:$0xff] %v7917_v62  ;;  %v7919_v27 = vpop.permute.xlu0 %1064 }
 0x14e   : > { %v926_v9 = vadd.f32 %v910_v43, %v7638_v60  ;;  %v810_v31 = vadd.f32 -0.0001984127, %v794_v61  ;;  %v793_v7 = vmul.f32 %v777_v49, %v12099_v33  ;;  %v973_v39 = vmul.f32 2.0, %v957_v40  ;;  %12107 = vst [vmem:[#allocation15_spill] sm:$0xff] %v7919_v27 }
 0x14f   : > { %v903_v5 = vmul.f32 %v887_v11, %v12100_v46  ;;  %v877_v29 = vadd.f32 -0.16666667, %v861_v59  ;;  %vm1006_vm13 = vcmp.gt.f32.partialorder %v990_v2, 0.5  ;;  %v937_v55 = vmul.f32 0.5, %v12102_v18 }
 0x150   : > { %v1022_v26 = vsub.f32 0.0, %v926_v9  ;;  %v826_v16 = vmul.f32 %v810_v31, %v12098_v28  ;;  %v809_v60 = vadd.f32 -0.0001984127, %v793_v7  ;;  %v954_v17 = vfloor.f32 %v938_v63  ;;  %v7921_v43 = vpop.permute.xlu1 %1049 }
 0x151   : > { %v919_v42 = vadd.f32 %v903_v5, %v12100_v46  ;;  %v893_v4 = vmul.f32 %v877_v29, %v7810_v58  ;;  %vm999_vm14 = vcmp.gt.f32.partialorder %v983_v41, 0.5  ;;  %v989_v30 = vsub.f32 %v7546_v54, %v973_v39  ;;  %12108 = vst [vmem:[#allocation11_spill] sm:$0xff] %v7921_v43  ;;  %v7925_v49 = vpop.permute.xlu0 %1054 }
 0x152   : > { %v1038_v19 = vsel %vm1006_vm13, %v1022_v26, %v926_v9  ;;  %v842_v57 = vadd.f32 0.008333334, %v826_v16  ;;  %v825_v48 = vmul.f32 %v809_v60, %v12099_v33  ;;  %v953_v24 = vfloor.f32 %v937_v55  ;;  %12109 = vst [vmem:[#allocation10_spill] sm:$0xff] %v7925_v49 }
 0x153   : > { %1197 = vmatprep.subr.mxu1 %v1038_v19  ;;  %v1015_v34 = vsub.f32 0.0, %v919_v42  ;;  %v909_v15 = vmul.f32 %v893_v4, %v7631_v52  ;;  %v970_v32 = vmul.f32 2.0, %v954_v17  ;;  %vm1005_vm2 = vcmp.gt.f32.partialorder %v989_v30, 0.5 }
 0x154   : > { %v858_v58 = vmul.f32 %v842_v57, %v12098_v28  ;;  %v841_v23 = vadd.f32 0.008333334, %v825_v48  ;;  %v12103_v53 = vmov 0.0   ;;  %v969_v35 = vmul.f32 2.0, %v953_v24 }
 0x155   : > { %v1031_v50 = vsel %vm999_vm14, %v1015_v34, %v919_v42  ;;  %v925_v13 = vadd.f32 %v909_v15, %v7631_v52  ;;  %v986_v21 = vsub.f32 %v12101_v51, %v970_v32 }
 0x156   : > { %1111 = vmatpush1.msra.mxu0 %v1031_v50  ;;  %v874_v56 = vadd.f32 -0.16666667, %v858_v58  ;;  %v857_v54 = vmul.f32 %v841_v23, %v12099_v33  ;;  %v985_v37 = vsub.f32 %v12102_v18, %v969_v35 }
 0x157   : > { %v1021_v47 = vsub.f32 0.0, %v925_v13  ;;  %7065 = vmatmul.mubr.msk.f32.vlgmr.msra.gmra.mxu0 %vm1067_vm15, %v342_v8  ;;  %vm1002_vm3 = vcmp.gt.f32.partialorder %v986_v21, 0.5 }
 0x158   : > { %v890_v44 = vmul.f32 %v874_v56, %v12098_v28  ;;  %1150 = vmatprep.mubr.f32.mxu0 %v12103_v53  ;;  %v873_v0 = vadd.f32 -0.16666667, %v857_v54  ;;  %vm1001_vm4 = vcmp.gt.f32.partialorder %v985_v37, 0.5 }
 0x159   : > { %v1037_v52 = vsel %vm1005_vm2, %v1021_v47, %v925_v13 }
 0x15a   : > { %1198 = vmatpush1.msra.mxu1 %v1037_v52  ;;  %v906_v45 = vmul.f32 %v890_v44, %v12104_v22  ;;  %v889_v12 = vmul.f32 %v873_v0, %v12099_v33 }
 0x15b   : > { %7066 = vmatmul.mubr.msk.f32.gmra.mxu0 %vm1067_vm15, %v343_v6 }
 0x15c   : > { %v922_v28 = vadd.f32 %v906_v45, %v12104_v22  ;;  %1156 = vmatprep.mubr.f32.mxu0 %v12103_v53  ;;  %v905_v20 = vmul.f32 %v889_v12, %v12105_v25 }
 0x15e   : > { %v1018_v10 = vsub.f32 0.0, %v922_v28  ;;  %v921_v14 = vadd.f32 %v905_v20, %v12105_v25 }
 0x15f   : > { %7067 = vmatmul.mubr.msk.f32.gmra.mxu0 %vm1067_vm15, %v344_v3 }
 0x160   : > { %v1034_v36 = vsel %vm1002_vm3, %v1018_v10, %v922_v28  ;;  %1162 = vmatprep.mubr.f32.mxu0 %v12103_v53  ;;  %v1017_v1 = vsub.f32 0.0, %v921_v14 }
 0x161   : > { %1199 = vmatprep.subr.mxu1 %v1034_v36 }
 0x162   : > { %v1033_v33 = vsel %vm1001_vm4, %v1017_v1, %v921_v14 }
 0x163   : > { %7068 = vmatmul.mubr.msk.f32.gmra.mxu0 %vm1067_vm15, %v345_v38  ;;  %1200 = vmatpush1.msra.mxu1 %v1033_v33 }
 0x164   : > { %1802 = vmatprep.mubr.f32.mxu0 %v12103_v53  ;;  %7069 = vmatmul.mubr.msk.f32.vlgmr.msra.gmra.mxu1 %vm1067_vm15, %v342_v8 }
 0x165   : > { %1239 = vmatprep.mubr.f32.mxu1 %v12103_v53 }
 0x168   : > { %7070 = vmatmul.mubr.msk.f32.gmra.mxu1 %vm1067_vm15, %v343_v6 }
 0x169   : > { %1245 = vmatprep.mubr.f32.mxu1 %v12103_v53 }
 0x16c   : > { %7071 = vmatmul.mubr.msk.f32.gmra.mxu1 %vm1067_vm15, %v344_v3 }
 0x16d   : > { %1251 = vmatprep.mubr.f32.mxu1 %v12103_v53 }
 0x170   : > { %7072 = vmatmul.mubr.msk.f32.gmra.mxu1 %vm1067_vm15, %v345_v38 }
 0x171   : > { %1891 = vmatprep.mubr.f32.mxu1 %v12103_v53 }
 0x217   : > { %v1146_v40 = vpop.f32.mrf.mxu0 }
 0x218   : > { %v1147_v61 = vadd.f32 %v1146_v40, %v7921_v43 }
 0x219   : > { %v1148_v2 = vpop.f32.mrf.mxu0 }
 0x21a   : > { %v1258_v11 = vmul.f32 0.31830987, %v1147_v61  ;;  %v1149_v59 = vadd.f32 %v1148_v2, %v7921_v43 }
 0x21b   : > { %v1152_v9 = vpop.f32.mrf.mxu0 }
 0x21c   : > { %v1274_v31 = vadd.f32 0.5, %v1258_v11  ;;  %v1259_v46 = vmul.f32 0.31830987, %v1149_v59  ;;  %v1153_v5 = vadd.f32 %v1152_v9, %v7925_v49 }
 0x21d   : > { %v1154_v29 = vpop.f32.mrf.mxu0 }
 0x21e   : > { %v7928_v51 = vfloor.f32 %v1274_v31  ;;  %v1275_v63 = vadd.f32 0.5, %v1259_v46  ;;  %v1262_v7 = vmul.f32 0.31830987, %v1153_v5  ;;  %v1155_v26 = vadd.f32 %v1154_v29, %v7925_v49 }
 0x21f   : > { %v1158_v41 = vpop.f32.mrf.mxu0 }
 0x220   : > { %12110 = vst [vmem:[#allocation8_spill] sm:$0xff] %v7928_v51  ;;  %v7931_v39 = vfloor.f32 %v1275_v63  ;;  %v1306_v16 = vmul.f32 3.140625, %v7928_v51  ;;  %v1278_v42 = vadd.f32 0.5, %v1262_v7  ;;  %v1263_v4 = vmul.f32 0.31830987, %v1155_v26 }
 0x221   : > { %v7935_v60 = vadd.f32 %v1158_v41, %v7917_v62  ;;  %v1160_v8 = vpop.f32.mrf.mxu0  ;;  %v1338_v13 = vmul.f32 0.00096702576, %v7928_v51  ;;  %v1370_v3 = vmul.f32 6.277114e-07, %v7928_v51 }
 0x222   : > { %v1307_v19 = vmul.f32 3.140625, %v7931_v39  ;;  %v7938_v57 = vfloor.f32 %v1278_v42  ;;  %v1279_v18 = vadd.f32 0.5, %v1263_v4  ;;  %v1322_v34 = vsub.f32 %v1147_v61, %v1306_v16 }
 0x223   : > { %v1266_v55 = vmul.f32 0.31830987, %v7935_v60  ;;  %v1339_v23 = vmul.f32 0.00096702576, %v7931_v39  ;;  %v7955_v44 = vadd.f32 %v1160_v8, %v7917_v62  ;;  %v1371_v25 = vmul.f32 6.277114e-07, %v7931_v39  ;;  %v1164_v14 = vpop.f32.mrf.mxu0 }
 0x224   : > { %v1323_v15 = vsub.f32 %v1149_v59, %v1307_v19  ;;  %v1235_v17 = vpop.f32.mrf.mxu1  ;;  %v1310_v48 = vmul.f32 3.140625, %v7938_v57  ;;  %v7942_v30 = vfloor.f32 %v1279_v18  ;;  %v1354_v6 = vsub.f32 %v1322_v34, %v1338_v13 }
 0x225   : > { %v7945_v58 = vadd.f32 %v1235_v17, %v7921_v43  ;;  %v1282_v50 = vadd.f32 0.5, %v1266_v55  ;;  %v1342_v0 = vmul.f32 0.00096702576, %v7938_v57  ;;  %v1267_v11 = vmul.f32 0.31830987, %v7955_v44 }
 0x226   : > { %v1237_v56 = vpop.f32.mrf.mxu1  ;;  %v1311_v24 = vmul.f32 3.140625, %v7942_v30  ;;  %v1326_v32 = vsub.f32 %v1153_v5, %v1310_v48  ;;  %v1355_v52 = vsub.f32 %v1323_v15, %v1339_v23  ;;  %v1343_v20 = vmul.f32 0.00096702576, %v7942_v30 }
 0x227   : > { %v1260_v47 = vmul.f32 0.31830987, %v7945_v58  ;;  %v7952_v54 = vadd.f32 %v1237_v56, %v7921_v43  ;;  %v7958_v45 = vfloor.f32 %v1282_v50  ;;  %v7971_v40 = vsub.f32 %v1354_v6, %v1370_v3 }
 0x228   : > { %v1241_v22 = vpop.f32.mrf.mxu1  ;;  %v1327_v12 = vsub.f32 %v1155_v26, %v1311_v24  ;;  %v1358_v38 = vsub.f32 %v1326_v32, %v1342_v0  ;;  %v7973_v61 = vsub.f32 %v1355_v52, %v1371_v25  ;;  %v1374_v59 = vmul.f32 6.277114e-07, %v7938_v57 }
 0x229   : > { %v1276_v35 = vadd.f32 0.5, %v1260_v47  ;;  %v1261_v21 = vmul.f32 0.31830987, %v7952_v54  ;;  %v7962_v28 = vadd.f32 %v1241_v22, %v7925_v49  ;;  %v1314_v10 = vmul.f32 3.140625, %v7958_v45  ;;  %12112 = vst [vmem:[#allocation13_spill] sm:$0xff] %v7971_v40 }
 0x22a   : > { %v1243_v37 = vpop.f32.mrf.mxu1  ;;  %12113 = vst [vmem:[#allocation17_spill] sm:$0xff] %v7973_v61  ;;  %v1359_v9 = vsub.f32 %v1327_v12, %v1343_v20  ;;  %v7982_v5 = vadd.f32 %v1164_v14, %v7919_v27  ;;  %v7988_v26 = vmul.f32 0.5, %v7928_v51  ;;  %v7990_v41 = vsub.f32 %v1358_v38, %v1374_v59  ;;  %v1166_v14 = vpop.f32.mrf.mxu0 }
 0x22b   : > { %v7968_v36 = vfloor.f32 %v1276_v35  ;;  %v1277_v1 = vadd.f32 0.5, %v1261_v21  ;;  %v1264_v33 = vmul.f32 0.31830987, %v7962_v28  ;;  %v7976_v2 = vadd.f32 %v1243_v37, %v7925_v49 }
 0x22c   : > { %v1330_v31 = vsub.f32 %v7935_v60, %v1314_v10  ;;  %v1247_v46 = vpop.f32.mrf.mxu1  ;;  %v1375_v16 = vmul.f32 6.277114e-07, %v7942_v30  ;;  %v1346_v42 = vmul.f32 0.00096702576, %v7958_v45  ;;  %v7997_v60 = vmul.f32 %v7971_v40, %v7971_v40 }
 0x22d   : > { %12111 = vst [vmem:[#allocation14_spill] sm:$0xff] %v7968_v36  ;;  %v1308_v29 = vmul.f32 3.140625, %v7968_v36  ;;  %v7985_v63 = vfloor.f32 %v1277_v1  ;;  %v1280_v7 = vadd.f32 0.5, %v1264_v33  ;;  %v1265_v4 = vmul.f32 0.31830987, %v7976_v2 }
 0x22e   : > { %v8001_v19 = vmul.f32 %v7973_v61, %v7973_v61  ;;  %v1283_v18 = vadd.f32 0.5, %v1267_v11  ;;  %v8004_v55 = vmul.f32 0.5, %v7931_v39  ;;  %v8006_v34 = vsub.f32 %v1359_v9, %v1375_v16  ;;  %v1249_v8 = vpop.f32.mrf.mxu1 }
 0x22f   : > { %12114 = vst [vmem:[#allocation18_spill] sm:$0xff] %v7985_v63  ;;  %v1362_v15 = vsub.f32 %v1330_v31, %v1346_v42  ;;  %v8009_v17 = vadd.f32 %v1247_v46, %v7917_v62  ;;  %v1270_v48 = vmul.f32 0.31830987, %v7982_v5  ;;  %v1324_v50 = vsub.f32 %v7945_v58, %v1308_v29 }
 0x230   : > { %v1309_v13 = vmul.f32 3.140625, %v7985_v63  ;;  %v8014_v23 = vfloor.f32 %v1280_v7  ;;  %v1378_v56 = vmul.f32 6.277114e-07, %v7958_v45  ;;  %v1340_v24 = vmul.f32 0.00096702576, %v7968_v36  ;;  %v1253_v38 = vpop.f32.mrf.mxu1 }
 0x231   : > { %v8020_v47 = vmul.f32 %v7990_v41, %v7990_v41  ;;  %v1281_v32 = vadd.f32 0.5, %v1265_v4  ;;  %v8022_v6 = vfloor.f32 %v1283_v18  ;;  %v1372_v52 = vmul.f32 6.277114e-07, %v7968_v36 }
 0x232   : > { %12115 = vst [vmem:[#allocation19_spill] sm:$0xff] %v8014_v23  ;;  %v1268_v0 = vmul.f32 0.31830987, %v8009_v17  ;;  %v1286_v58 = vadd.f32 0.5, %v1270_v48  ;;  %v8027_v22 = vadd.f32 %v1249_v8, %v7917_v62  ;;  %v1341_v35 = vmul.f32 0.00096702576, %v7985_v63 }
 0x233   : > { %v1373_v21 = vmul.f32 6.277114e-07, %v7985_v63  ;;  %v8033_v12 = vmul.f32 %v8006_v34, %v8006_v34  ;;  %v8035_v3 = vsub.f32 %v1362_v15, %v1378_v56  ;;  %v1356_v25 = vsub.f32 %v1324_v50, %v1340_v24  ;;  %v1255_v56 = vpop.f32.mrf.mxu1 }
 0x234   : > { %v1325_v20 = vsub.f32 %v7952_v54, %v1309_v13  ;;  %v1312_v10 = vmul.f32 3.140625, %v8014_v23  ;;  %v1315_v37 = vmul.f32 3.140625, %v8022_v6  ;;  %v1344_v1 = vmul.f32 0.00096702576, %v8014_v23 }
 0x235   : > { %v8042_v33 = vmul.f32 6.277114e-07, %v8014_v23  ;;  %v8044_v11 = vfloor.f32 %v1281_v32  ;;  %v1284_v59 = vadd.f32 0.5, %v1268_v0  ;;  %v1347_v31 = vmul.f32 0.00096702576, %v8022_v6 }
 0x236   : > { %v1331_v9 = vsub.f32 %v7955_v44, %v1315_v37  ;;  %v8048_v46 = vfloor.f32 %v1286_v58  ;;  %v1269_v54 = vmul.f32 0.31830987, %v8027_v22  ;;  %v8053_v29 = vmul.f32 %v8035_v3, %v8035_v3 }
 0x237   : > { %v8055_v7 = vfloor.f32 %v1284_v59  ;;  %v1167_v16 = vadd.f32 %v1166_v14, %v7919_v27  ;;  %v8059_v42 = vadd.f32 %v1253_v38, %v7919_v27  ;;  %v8061_v4 = vsub.f32 %v1356_v25, %v1372_v52 }
 0x238   : > { %v1363_v44 = vsub.f32 %v1331_v9, %v1347_v31  ;;  %v1379_v18 = vmul.f32 6.277114e-07, %v8022_v6  ;;  %v1318_v15 = vmul.f32 3.140625, %v8048_v46  ;;  %v1357_v48 = vsub.f32 %v1325_v20, %v1341_v35 }
 0x239   : > { %12116 = vst [vmem:[#allocation20_spill] sm:$0xff] %v8061_v4  ;;  %v1328_v8 = vsub.f32 %v7962_v28, %v1312_v10  ;;  %v1313_v50 = vmul.f32 3.140625, %v8044_v11  ;;  %v1316_v13 = vmul.f32 3.140625, %v8055_v7  ;;  %v1350_v52 = vmul.f32 0.00096702576, %v8048_v46 }
 0x23a   : > { %v8068_v24 = vsub.f32 %v1363_v44, %v1379_v18  ;;  %v1334_v32 = vsub.f32 %v7982_v5, %v1318_v15  ;;  %v1285_v0 = vadd.f32 0.5, %v1269_v54  ;;  %v1382_v25 = vmul.f32 6.277114e-07, %v8048_v46 }
 0x23b   : > { %v1332_v58 = vsub.f32 %v8009_v17, %v1316_v13  ;;  %v1271_v37 = vmul.f32 0.31830987, %v1167_v16  ;;  %v1272_v35 = vmul.f32 0.31830987, %v8059_v42  ;;  %v1256_v14 = vadd.f32 %v1255_v56, %v7919_v27 }
 0x23c   : > { %v8077_v28 = vmul.f32 %v8068_v24, %v8068_v24  ;;  %v1366_v20 = vsub.f32 %v1334_v32, %v1350_v52  ;;  %v8079_v10 = vfloor.f32 %v1285_v0  ;;  %v8084_v5 = vmul.f32 %v8061_v4, %v8061_v4 }
 0x23d   : > { %v1329_v17 = vsub.f32 %v7976_v2, %v1313_v50  ;;  %v1287_v38 = vadd.f32 0.5, %v1271_v37  ;;  %v1288_v59 = vadd.f32 0.5, %v1272_v35  ;;  %v8087_v9 = vsub.f32 %v1357_v48, %v1373_v21 }
 0x23e   : > { %12117 = vst [vmem:[#allocation21_spill] sm:$0xff] %v8084_v5  ;;  %v1348_v31 = vmul.f32 0.00096702576, %v8055_v7  ;;  %v8090_v54 = vsub.f32 %v1366_v20, %v1382_v25  ;;  %v1317_v44 = vmul.f32 3.140625, %v8079_v10  ;;  %v1345_v18 = vmul.f32 0.00096702576, %v8044_v11 }
 0x23f   : > { %v8094_v15 = vfloor.f32 %v1287_v38  ;;  %v8096_v13 = vfloor.f32 %v1288_v59  ;;  %v1273_v56 = vmul.f32 0.31830987, %v1256_v14  ;;  %v8098_v32 = vsub.f32 %v1328_v8, %v1344_v1 }
 0x240   : > { %v1364_v2 = vsub.f32 %v1332_v58, %v1348_v31  ;;  %v8102_v21 = vmul.f32 %v8090_v54, %v8090_v54  ;;  %v1427_v48 = vmul.f32 -2.5052108e-08, %v8077_v28  ;;  %v1361_v50 = vsub.f32 %v1329_v17, %v1345_v18 }
 0x241   : > { %v1377_v52 = vmul.f32 6.277114e-07, %v8044_v11  ;;  %v1380_v0 = vmul.f32 6.277114e-07, %v8055_v7  ;;  %v1319_v25 = vmul.f32 3.140625, %v8094_v15  ;;  %v1333_v37 = vsub.f32 %v8027_v22, %v1317_v44 }
 0x242   : > { %v1349_v35 = vmul.f32 0.00096702576, %v8079_v10  ;;  %v1320_v1 = vmul.f32 3.140625, %v8096_v13  ;;  %v1606_v8 = vmul.f32 0.5, %v8048_v46  ;;  %v1351_v20 = vmul.f32 0.00096702576, %v8094_v15 }
 0x243   : > { %v1335_v58 = vsub.f32 %v1167_v16, %v1319_v25  ;;  %v1289_v38 = vadd.f32 0.5, %v1273_v56  ;;  %v1430_v17 = vmul.f32 -2.5052108e-08, %v8102_v21  ;;  %v8114_v59 = vsub.f32 %v1364_v2, %v1380_v0 }
 0x244   : > { %v1383_v31 = vmul.f32 6.277114e-07, %v8094_v15  ;;  %v1336_v18 = vsub.f32 %v8059_v42, %v1320_v1  ;;  %v1443_v27 = vadd.f32 2.7557319e-06, %v1427_v48  ;;  %v1352_v44 = vmul.f32 0.00096702576, %v8096_v13 }
 0x245   : > { %v1367_v22 = vsub.f32 %v1335_v58, %v1351_v20  ;;  %v8119_v62 = vfloor.f32 %v1289_v38  ;;  %v1446_v49 = vadd.f32 2.7557319e-06, %v1430_v17  ;;  %v8121_v43 = vsub.f32 %v1361_v50, %v1377_v52 }
 0x246   : > { %v1365_v16 = vsub.f32 %v1333_v37, %v1349_v35  ;;  %v1381_v56 = vmul.f32 6.277114e-07, %v8079_v10  ;;  %v1459_v25 = vmul.f32 %v1443_v27, %v8077_v28  ;;  %v1368_v0 = vsub.f32 %v1336_v18, %v1352_v44 }
 0x247   : > { %v8125_v2 = vsub.f32 %v1367_v22, %v1383_v31  ;;  %v1321_v4 = vmul.f32 3.140625, %v8119_v62  ;;  %v1622_v42 = vfloor.f32 %v1606_v8  ;;  %v8130_v48 = vmul.f32 %v8114_v59, %v8114_v59 }
 0x248   : > { %v1384_v1 = vmul.f32 6.277114e-07, %v8096_v13  ;;  %v1607_v50 = vmul.f32 0.5, %v8094_v15  ;;  %v1462_v52 = vmul.f32 %v1446_v49, %v8102_v21  ;;  %v1353_v35 = vmul.f32 0.00096702576, %v8119_v62 }
 0x249   : > { %v8137_v37 = vmul.f32 %v8125_v2, %v8125_v2  ;;  %v1337_v27 = vsub.f32 %v1256_v14, %v1321_v4  ;;  %v1475_v58 = vadd.f32 -0.0001984127, %v1459_v25  ;;  %v8140_v20 = vsub.f32 %v1365_v16, %v1381_v56 }
 0x24a   : > { %v1385_v8 = vmul.f32 6.277114e-07, %v8119_v62  ;;  %v1478_v38 = vadd.f32 -0.0001984127, %v1462_v52  ;;  %v1603_v17 = vmul.f32 0.5, %v8022_v6  ;;  %v8144_v31 = vsub.f32 %v1368_v0, %v1384_v1 }
 0x24b   : > { %v1369_v18 = vsub.f32 %v1337_v27, %v1353_v35  ;;  %v1431_v49 = vmul.f32 -2.5052108e-08, %v8137_v37  ;;  %v1491_v22 = vmul.f32 %v1475_v58, %v8077_v28  ;;  %v1638_v4 = vmul.f32 2.0, %v1622_v42 }
 0x24c   : > { %v1494_v44 = vmul.f32 %v1478_v38, %v8102_v21  ;;  %v1609_v14 = vmul.f32 0.5, %v8119_v62  ;;  %v1426_v16 = vmul.f32 -2.5052108e-08, %v8053_v29  ;;  %v1623_v52 = vfloor.f32 %v1607_v50 }
 0x24d   : > { %v8151_v56 = vsub.f32 %v1369_v18, %v1385_v8  ;;  %v1447_v25 = vadd.f32 2.7557319e-06, %v1431_v49  ;;  %v1507_v53 = vadd.f32 0.008333334, %v1491_v22  ;;  %v1619_v0 = vfloor.f32 %v1603_v17 }
 0x24e   : > { %v1510_v36 = vadd.f32 0.008333334, %v1494_v44  ;;  %v1442_v1 = vadd.f32 2.7557319e-06, %v1426_v16  ;;  %v1602_v27 = vmul.f32 0.5, %v7958_v45  ;;  %v8156_v35 = vmul.f32 %v8144_v31, %v8144_v31 }
 0x24f   : > { %v8160_v42 = vmul.f32 %v8151_v56, %v8151_v56  ;;  %v1463_v58 = vmul.f32 %v1447_v25, %v8137_v37  ;;  %v1523_v8 = vmul.f32 %v1507_v53, %v8077_v28  ;;  %v8166_v50 = vmul.f32 %v8140_v20, %v8140_v20 }
 0x250   : > { %v1526_v38 = vmul.f32 %v1510_v36, %v8102_v21  ;;  %v1625_v17 = vfloor.f32 %v1609_v14  ;;  %v1458_v18 = vmul.f32 %v1442_v1, %v8053_v29  ;;  %v1639_v22 = vmul.f32 2.0, %v1623_v52 }
 0x251   : > { %v1479_v49 = vadd.f32 -0.0001984127, %v1463_v58  ;;  %v1539_v44 = vadd.f32 -0.16666667, %v1523_v8  ;;  %v1618_v16 = vfloor.f32 %v1602_v27  ;;  %v1635_v51 = vmul.f32 2.0, %v1619_v0 }
 0x252   : > { %v1542_v40 = vadd.f32 -0.16666667, %v1526_v38  ;;  %v1433_v63 = vmul.f32 -2.5052108e-08, %v8160_v42  ;;  %v1608_v25 = vmul.f32 0.5, %v8096_v13  ;;  %v1654_v1 = vsub.f32 %v8048_v46, %v1638_v4 }
 0x253   : > { %v1495_v53 = vmul.f32 %v1479_v49, %v8137_v37  ;;  %v1555_v5 = vmul.f32 %v1539_v44, %v8077_v28  ;;  %v1474_v23 = vadd.f32 -0.0001984127, %v1458_v18  ;;  %v1432_v36 = vmul.f32 -2.5052108e-08, %v8156_v35 }
 0x254   : > { %v1558_v14 = vmul.f32 %v1542_v40, %v8102_v21  ;;  %v1449_v52 = vadd.f32 2.7557319e-06, %v1433_v63  ;;  %v1641_v58 = vmul.f32 2.0, %v1625_v17  ;;  %v1634_v8 = vmul.f32 2.0, %v1618_v16 }
 0x255   : > { %v1511_v27 = vadd.f32 0.008333334, %v1495_v53  ;;  %v1490_v0 = vmul.f32 %v1474_v23, %v8053_v29  ;;  %v1448_v38 = vadd.f32 2.7557319e-06, %v1432_v36  ;;  %v1655_v61 = vsub.f32 %v8094_v15, %v1639_v22 }
 0x256   : > { %v1571_v49 = vmul.f32 %v1555_v5, %v8068_v24  ;;  %v1465_v28 = vmul.f32 %v1449_v52, %v8160_v42  ;;  %v1624_v18 = vfloor.f32 %v1608_v25  ;;  %v1651_v40 = vsub.f32 %v8022_v6, %v1635_v51 }
 0x257   : > { %v1527_v44 = vmul.f32 %v1511_v27, %v8137_v37  ;;  %v1506_v21 = vadd.f32 0.008333334, %v1490_v0  ;;  %v1464_v63 = vmul.f32 %v1448_v38, %v8156_v35  ;;  %v1574_v46 = vmul.f32 %v1558_v14, %v8090_v54 }
 0x258   : > { %v1481_v4 = vadd.f32 -0.0001984127, %v1465_v28  ;;  %v1657_v23 = vsub.f32 %v8119_v62, %v1641_v58  ;;  %v1423_v17 = vmul.f32 -2.5052108e-08, %v8033_v12  ;;  %v1650_v22 = vsub.f32 %v7958_v45, %v1634_v8 }
 0x259   : > { %v1543_v15 = vadd.f32 -0.16666667, %v1527_v44  ;;  %v1522_v5 = vmul.f32 %v1506_v21, %v8053_v29  ;;  %v1480_v16 = vadd.f32 -0.0001984127, %v1464_v63  ;;  %vm8189_vm5 = vcmp.gt.f32.partialorder %v1655_v61, 0.5 }
 0x25a   : > { %v1587_v51 = vadd.f32 %v1571_v49, %v8068_v24  ;;  %v1497_v6 = vmul.f32 %v1481_v4, %v8160_v42  ;;  %v1640_v53 = vmul.f32 2.0, %v1624_v18  ;;  %v1439_v36 = vadd.f32 2.7557319e-06, %v1423_v17 }
 0x25b   : > { %v1559_v62 = vmul.f32 %v1543_v15, %v8137_v37  ;;  %vm8196_vm6 = vcmp.gt.f32.partialorder %v1654_v1, 0.5  ;;  %vm8200_vm7 = vcmp.gt.f32.partialorder %v1651_v40, 0.5  ;;  %v1538_v45 = vadd.f32 -0.16666667, %v1522_v5 }
 0x25c   : > { %v1496_v61 = vmul.f32 %v1480_v16, %v8156_v35  ;;  %v1590_v58 = vadd.f32 %v1574_v46, %v8090_v54  ;;  %v1513_v24 = vadd.f32 0.008333334, %v1497_v6  ;;  %v1455_v27 = vmul.f32 %v1439_v36, %v8033_v12 }
 0x25d   : > { %v1599_v0 = vmul.f32 0.5, %v7942_v30  ;;  %v1575_v37 = vmul.f32 %v1559_v62, %v8125_v2  ;;  %v1554_v1 = vmul.f32 %v1538_v45, %v8053_v29  ;;  %vm8210_vm8 = vcmp.gt.f32.partialorder %v1650_v22, 0.5 }
 0x25e   : > { %v1512_v38 = vadd.f32 0.008333334, %v1496_v61  ;;  %v1429_v49 = vmul.f32 -2.5052108e-08, %v8166_v50  ;;  %v1683_v28 = vsub.f32 0.0, %v1587_v51  ;;  %v1529_v18 = vmul.f32 %v1513_v24, %v8160_v42 }
 0x25f   : > { %v1656_v54 = vsub.f32 %v8096_v13, %v1640_v53  ;;  %v1471_v44 = vadd.f32 -0.0001984127, %v1455_v27  ;;  %v1591_v40 = vadd.f32 %v1575_v37, %v8125_v2  ;;  %v1570_v21 = vmul.f32 %v1554_v1, %v8035_v3 }
 0x260   : > { %v1528_v63 = vmul.f32 %v1512_v38, %v8156_v35  ;;  %v1445_v29 = vadd.f32 2.7557319e-06, %v1429_v49  ;;  %v1686_v46 = vsub.f32 0.0, %v1590_v58  ;;  %v1545_v4 = vadd.f32 -0.16666667, %v1529_v18 }
 0x261   : > { %v1487_v17 = vmul.f32 %v1471_v44, %v8033_v12  ;;  %v1615_v15 = vfloor.f32 %v1599_v0  ;;  %v1687_v5 = vsub.f32 0.0, %v1591_v40  ;;  %vm8221_vm9 = vcmp.gt.f32.partialorder %v1657_v23, 0.5 }
 0x262   : > { %v1586_v13 = vadd.f32 %v1570_v21, %v8035_v3  ;;  %v1544_v16 = vadd.f32 -0.16666667, %v1528_v63  ;;  %v1461_v2 = vmul.f32 %v1445_v29, %v8166_v50  ;;  %v1561_v6 = vmul.f32 %v1545_v4, %v8160_v42 }
 0x263   : > { %vm8228_vm10 = vcmp.gt.f32.partialorder %v1656_v54, 0.5  ;;  %v1503_v36 = vadd.f32 0.008333334, %v1487_v17  ;;  %v1605_v62 = vmul.f32 0.5, %v8079_v10  ;;  %v1703_v23 = vsel %vm8189_vm5, %v1687_v5, %v1591_v40 }
 0x264   : > { %v1682_v45 = vsub.f32 0.0, %v1586_v13  ;;  %v1560_v61 = vmul.f32 %v1544_v16, %v8156_v35  ;;  %v1477_v24 = vadd.f32 -0.0001984127, %v1461_v2  ;;  %1762 = vmatprep.subr.mxu0 %v1703_v23  ;;  %v1702_v3 = vsel %vm8196_vm6, %v1686_v46, %v1590_v58 }
 0x265   : > { %v1699_v42 = vsel %vm8200_vm7, %v1683_v28, %v1587_v51  ;;  %v1577_v27 = vmul.f32 %v1561_v6, %v8151_v56  ;;  %v1519_v0 = vmul.f32 %v1503_v36, %v8033_v12  ;;  %1763 = vmatpush1.msra.mxu0 %v1702_v3  ;;  %v1631_v25 = vmul.f32 2.0, %v1615_v15 }
 0x266   : > { %v1576_v37 = vmul.f32 %v1560_v61, %v8144_v31  ;;  %v1493_v1 = vmul.f32 %v1477_v24, %v8166_v50  ;;  %v1422_v35 = vmul.f32 -2.5052108e-08, %v8020_v47  ;;  %1764 = vmatprep.subr.mxu0 %v1699_v42  ;;  %v1698_v14 = vsel %vm8210_vm8, %v1682_v45, %v1586_v13 }
 0x267   : > { %v1593_v38 = vadd.f32 %v1577_v27, %v8151_v56  ;;  %v1535_v52 = vadd.f32 -0.16666667, %v1519_v0  ;;  %v1621_v51 = vfloor.f32 %v1605_v62  ;;  %1765 = vmatpush1.msra.mxu0 %v1698_v14  ;;  %v1428_v18 = vmul.f32 -2.5052108e-08, %v8130_v48 }
 0x268   : > { %v1592_v58 = vadd.f32 %v1576_v37, %v8144_v31  ;;  %v1509_v49 = vadd.f32 0.008333334, %v1493_v1  ;;  %v1438_v28 = vadd.f32 2.7557319e-06, %v1422_v35  ;;  %v1598_v40 = vmul.f32 0.5, %v7938_v57 }
 0x269   : > { %v1689_v54 = vsub.f32 0.0, %v1593_v38  ;;  %v1551_v44 = vmul.f32 %v1535_v52, %v8033_v12  ;;  %v1604_v21 = vmul.f32 0.5, %v8055_v7  ;;  %v1444_v29 = vadd.f32 2.7557319e-06, %v1428_v18 }
 0x26a   : > { %v1688_v56 = vsub.f32 0.0, %v1592_v58  ;;  %v1525_v8 = vmul.f32 %v1509_v49, %v8166_v50  ;;  %v1454_v63 = vmul.f32 %v1438_v28, %v8020_v47  ;;  %v1647_v4 = vsub.f32 %v7942_v30, %v1631_v25 }
 0x26b   : > { %v1705_v31 = vsel %vm8221_vm9, %v1689_v54, %v1593_v38  ;;  %v1567_v46 = vmul.f32 %v1551_v44, %v8006_v34  ;;  %v1637_v17 = vmul.f32 2.0, %v1621_v51  ;;  %v1460_v13 = vmul.f32 %v1444_v29, %v8130_v48 }
 0x26c   : > { %1851 = vmatprep.subr.mxu1 %v1705_v31  ;;  %v1704_v12 = vsel %vm8228_vm10, %v1688_v56, %v1592_v58  ;;  %v1541_v15 = vadd.f32 -0.16666667, %v1525_v8  ;;  %v1470_v5 = vadd.f32 -0.0001984127, %v1454_v63  ;;  %v8264_v16 = vmul.f32 %v8121_v43, %v8121_v43 }
 0x26d   : > { %1852 = vmatpush1.msra.mxu1 %v1704_v12  ;;  %v1583_v22 = vadd.f32 %v1567_v46, %v8006_v34  ;;  %v1614_v2 = vfloor.f32 %v1598_v40  ;;  %v1419_v6 = vmul.f32 -2.5052108e-08, %v8001_v19  ;;  %v1476_v53 = vadd.f32 -0.0001984127, %v1460_v13 }
 0x26e   : > { %v1557_v30 = vmul.f32 %v1541_v15, %v8166_v50  ;;  %v1486_v36 = vmul.f32 %v1470_v5, %v8020_v47  ;;  %v1620_v62 = vfloor.f32 %v1604_v21  ;;  %v8272_v23 = vsub.f32 %v8098_v32, %v8042_v33 }
 0x26f   : > { %vm1663_vm11 = vcmp.gt.f32.partialorder %v1647_v4, 0.5  ;;  %v1679_v45 = vsub.f32 0.0, %v1583_v22  ;;  %v1435_v61 = vadd.f32 2.7557319e-06, %v1419_v6  ;;  %v1653_v34 = vsub.f32 %v8079_v10, %v1637_v17 }
 0x270   : > { %v1573_v24 = vmul.f32 %v1557_v30, %v8140_v20  ;;  %v1502_v3 = vadd.f32 0.008333334, %v1486_v36  ;;  %v1492_v42 = vmul.f32 %v1476_v53, %v8130_v48  ;;  %v1630_v50 = vmul.f32 2.0, %v1614_v2 }
 0x271   : > { %v1695_v27 = vsel %vm1663_vm11, %v1679_v45, %v1583_v22  ;;  %v1451_v0 = vmul.f32 %v1435_v61, %v8001_v19  ;;  %v1425_v37 = vmul.f32 -2.5052108e-08, %v8264_v16  ;;  %v1636_v1 = vmul.f32 2.0, %v1620_v62 }
 0x272   : > { %1766 = vmatprep.subr.mxu0 %v1695_v27  ;;  %v1589_v33 = vadd.f32 %v1573_v24, %v8140_v20  ;;  %v1518_v32 = vmul.f32 %v1502_v3, %v8020_v47  ;;  %v1508_v25 = vadd.f32 0.008333334, %v1492_v42  ;;  %v8283_v35 = vmul.f32 %v8272_v23, %v8272_v23 }
 0x273   : > { %v1467_v10 = vadd.f32 -0.0001984127, %v1451_v0  ;;  %v1611_v38 = vfloor.f32 %v8004_v55  ;;  %v1441_v14 = vadd.f32 2.7557319e-06, %v1425_v37  ;;  %vm1669_vm12 = vcmp.gt.f32.partialorder %v1653_v34, 0.5 }
 0x274   : > { %v1685_v52 = vsub.f32 0.0, %v1589_v33  ;;  %v1534_v51 = vadd.f32 -0.16666667, %v1518_v32  ;;  %v1524_v58 = vmul.f32 %v1508_v25, %v8130_v48  ;;  %v1646_v49 = vsub.f32 %v7938_v57, %v1630_v50  ;;  %v12135_v32 = vld [vmem:[#allocation19_spill] sm:$0xff] }
 0x275   : > { %v1483_v20 = vmul.f32 %v1467_v10, %v8001_v19  ;;  %v1457_v28 = vmul.f32 %v1441_v14, %v8264_v16  ;;  %v1418_v18 = vmul.f32 -2.5052108e-08, %v7997_v60  ;;  %v1652_v55 = vsub.f32 %v8055_v7, %v1636_v1 }
 0x276   : > { %v1701_v54 = vsel %vm1669_vm12, %v1685_v52, %v1589_v33  ;;  %v1550_v44 = vmul.f32 %v1534_v51, %v8020_v47  ;;  %v1540_v40 = vadd.f32 -0.16666667, %v1524_v58  ;;  %v1627_v56 = vmul.f32 2.0, %v1611_v38  ;;  %v12136_v58 = vld [vmem:[#allocation21_spill] sm:$0xff] }
 0x277   : > { %1853 = vmatprep.subr.mxu1 %v1701_v54  ;;  %v1499_v21 = vadd.f32 0.008333334, %v1483_v20  ;;  %v1473_v8 = vadd.f32 -0.0001984127, %v1457_v28  ;;  %v1601_v63 = vmul.f32 0.5, %v8044_v11  ;;  %v8296_v57 = vmul.f32 %v8087_v9, %v8087_v9 }
 0x278   : > { %v1566_v29 = vmul.f32 %v1550_v44, %v7990_v41  ;;  %v1556_v31 = vmul.f32 %v1540_v40, %v8130_v48  ;;  %v1434_v46 = vadd.f32 2.7557319e-06, %v1418_v18  ;;  %vm8300_vm13 = vcmp.gt.f32.partialorder %v1646_v49, 0.5 }
 0x279   : > { %v1515_v7 = vmul.f32 %v1499_v21, %v8001_v19  ;;  %v1489_v4 = vmul.f32 %v1473_v8, %v8264_v16  ;;  %v1424_v17 = vmul.f32 -2.5052108e-08, %v8283_v35  ;;  %vm8309_vm14 = vcmp.gt.f32.partialorder %v1652_v55, 0.5  ;;  %v12137_v21 = vld [vmem:[#allocation18_spill] sm:$0xff] }
 0x27a   : > { %v1582_v12 = vadd.f32 %v1566_v29, %v7990_v41  ;;  %v1572_v15 = vmul.f32 %v1556_v31, %v8114_v59  ;;  %v1450_v48 = vmul.f32 %v1434_v46, %v7997_v60  ;;  %v1643_v22 = vsub.f32 %v7931_v39, %v1627_v56 }
 0x27b   : > { %v1531_v13 = vadd.f32 -0.16666667, %v1515_v7  ;;  %v1505_v2 = vadd.f32 0.008333334, %v1489_v4  ;;  %v1617_v6 = vfloor.f32 %v1601_v63  ;;  %v1440_v62 = vadd.f32 2.7557319e-06, %v1424_v17 }
 0x27c   : > { %v1678_v30 = vsub.f32 0.0, %v1582_v12  ;;  %v1588_v36 = vadd.f32 %v1572_v15, %v8114_v59  ;;  %v1466_v53 = vadd.f32 -0.0001984127, %v1450_v48  ;;  %v1610_v61 = vfloor.f32 %v7988_v26  ;;  %v12134_v59 = vld [vmem:[#allocation17_spill] sm:$0xff]  ;;  %v12138_v7 = vld [vmem:[#allocation8_spill] sm:$0xff] }
 0x27d   : > { %v1547_v41 = vmul.f32 %v1531_v13, %v8001_v19  ;;  %v1521_v45 = vmul.f32 %v1505_v2, %v8264_v16  ;;  %v1421_v24 = vmul.f32 -2.5052108e-08, %v8296_v57  ;;  %v1456_v42 = vmul.f32 %v1440_v62, %v8283_v35 }
 0x27e   : > { %v1694_v34 = vsel %vm8300_vm13, %v1678_v30, %v1582_v12  ;;  %v1684_v3 = vsub.f32 0.0, %v1588_v36  ;;  %v1482_v39 = vmul.f32 %v1466_v53, %v7997_v60  ;;  %v1633_v0 = vmul.f32 2.0, %v1617_v6  ;;  %v12139_v12 = vld [vmem:[#allocation13_spill] sm:$0xff]  ;;  %v12140_v30 = vld [vmem:[#allocation14_spill] sm:$0xff] }
 0x27f   : > { %1767 = vmatpush1.msra.mxu0 %v1694_v34  ;;  %v1563_v27 = vmul.f32 %v1547_v41, %v12134_v59  ;;  %v1537_v50 = vadd.f32 -0.16666667, %v1521_v45  ;;  %v1437_v19 = vadd.f32 2.7557319e-06, %v1421_v24  ;;  %v1472_v33 = vadd.f32 -0.0001984127, %v1456_v42 }
 0x280   : > { %v1700_v37 = vsel %vm8309_vm14, %v1684_v3, %v1588_v36  ;;  %v1498_v26 = vadd.f32 0.008333334, %v1482_v39  ;;  %v1600_v25 = vmul.f32 0.5, %v12135_v32  ;;  %vm1659_vm2 = vcmp.gt.f32.partialorder %v1643_v22, 0.5  ;;  %v350_v34 = vld [vmem:[%s11907_s5] sm:$0xff] }
 0x281   : > { %1854 = vmatpush1.msra.mxu1 %v1700_v37  ;;  %v1579_v1 = vadd.f32 %v1563_v27, %v12134_v59  ;;  %v1553_v10 = vmul.f32 %v1537_v50, %v8264_v16  ;;  %v1453_v38 = vmul.f32 %v1437_v19, %v8296_v57  ;;  %v1626_v52 = vmul.f32 2.0, %v1610_v61 }
 0x282   : > { %v1514_v14 = vmul.f32 %v1498_v26, %v7997_v60  ;;  %v1488_v51 = vmul.f32 %v1472_v33, %v8283_v35  ;;  %v1420_v49 = vmul.f32 -2.5052108e-08, %v12136_v58  ;;  %v1649_v18 = vsub.f32 %v8044_v11, %v1633_v0 }
 0x283   : > { %v1675_v20 = vsub.f32 0.0, %v1579_v1  ;;  %v1569_v28 = vmul.f32 %v1553_v10, %v8121_v43  ;;  %v1469_v54 = vadd.f32 -0.0001984127, %v1453_v38  ;;  %v1616_v55 = vfloor.f32 %v1600_v25  ;;  %v12142_v38 = vld [vmem:[#allocation20_spill] sm:$0xff] }
 0x284   : > { %v1530_v44 = vadd.f32 -0.16666667, %v1514_v14  ;;  %v1504_v40 = vadd.f32 0.008333334, %v1488_v51  ;;  %v1597_v16 = vmul.f32 0.5, %v12137_v21  ;;  %v1642_v11 = vsub.f32 %v12138_v7, %v1626_v52 }
 0x285   : > { %v1691_v56 = vsel %vm1659_vm2, %v1675_v20, %v1579_v1  ;;  %v1585_v8 = vadd.f32 %v1569_v28, %v8121_v43  ;;  %v1485_v63 = vmul.f32 %v1469_v54, %v8296_v57  ;;  %v1436_v29 = vadd.f32 2.7557319e-06, %v1420_v49  ;;  %v353_v49 = vld [vmem:[%s11907_s5 + $0x18] sm:$0xff]  ;;  %v8389_v28 = vpop.permute.xlu1 %1718 }
 0x286   : > { %1768 = vmatprep.subr.mxu0 %v1691_v56  ;;  %v1546_v31 = vmul.f32 %v1530_v44, %v7997_v60  ;;  %v1520_v46 = vmul.f32 %v1504_v40, %v8283_v35  ;;  %vm1665_vm3 = vcmp.gt.f32.partialorder %v1649_v18, 0.5  ;;  %v1613_v48 = vfloor.f32 %v1597_v16  ;;  %12143 = vst [vmem:[#allocation17_spill] sm:$0xff] %v8389_v28  ;;  %v8391_v18 = vpop.permute.xlu0 %1723 }
 0x287   : > { %v1681_v47 = vsub.f32 0.0, %v1585_v8  ;;  %v1501_v4 = vadd.f32 0.008333334, %v1485_v63  ;;  %v1452_v17 = vmul.f32 %v1436_v29, %v12136_v58  ;;  %v1632_v13 = vmul.f32 2.0, %v1616_v55  ;;  %12144 = vst [vmem:[#allocation19_spill] sm:$0xff] %v8391_v18 }
 0x288   : > { %v1562_v15 = vmul.f32 %v1546_v31, %v12139_v12  ;;  %v1536_v5 = vadd.f32 -0.16666667, %v1520_v46  ;;  %v1596_v36 = vmul.f32 0.5, %v12140_v30  ;;  %v1629_v61 = vmul.f32 2.0, %v1613_v48 }
 0x289   : > { %v1697_v43 = vsel %vm1665_vm3, %v1681_v47, %v1585_v8  ;;  %v1517_v22 = vmul.f32 %v1501_v4, %v8296_v57  ;;  %v1468_v2 = vadd.f32 -0.0001984127, %v1452_v17  ;;  %vm1658_vm4 = vcmp.gt.f32.partialorder %v1642_v11, 0.5  ;;  %v8393_v54 = vpop.permute.xlu1 %1708 }
 0x28a   : > { %1855 = vmatprep.subr.mxu1 %v1697_v43  ;;  %v1578_v60 = vadd.f32 %v1562_v15, %v12139_v12  ;;  %v1552_v6 = vmul.f32 %v1536_v5, %v8283_v35  ;;  %v1648_v24 = vsub.f32 %v12135_v32, %v1632_v13  ;;  %v1612_v59 = vfloor.f32 %v1596_v36  ;;  %12145 = vst [vmem:[#allocation21_spill] sm:$0xff] %v8393_v54  ;;  %v8397_v56 = vpop.permute.xlu0 %1713 }
 0x28b   : > { %v1533_v53 = vadd.f32 -0.16666667, %v1517_v22  ;;  %v1484_v62 = vmul.f32 %v1468_v2, %v12136_v58  ;;  %v1645_v19 = vsub.f32 %v12137_v21, %v1629_v61  ;;  %12146 = vst [vmem:[#allocation18_spill] sm:$0xff] %v8397_v56 }
 0x28c   : > { %v1674_v41 = vsub.f32 0.0, %v1578_v60  ;;  %v1568_v45 = vmul.f32 %v1552_v6, %v8272_v23  ;;  %vm1664_vm5 = vcmp.gt.f32.partialorder %v1648_v24, 0.5  ;;  %v1628_v32 = vmul.f32 2.0, %v1612_v59 }
 0x28d   : > { %v1549_v3 = vmul.f32 %v1533_v53, %v8296_v57  ;;  %v1500_v39 = vadd.f32 0.008333334, %v1484_v62  ;;  %v12141_v57 = vmov 0.0   ;;  %vm1661_vm6 = vcmp.gt.f32.partialorder %v1645_v19, 0.5 }
 0x28e   : > { %v1690_v35 = vsel %vm1658_vm4, %v1674_v41, %v1578_v60  ;;  %v1584_v42 = vadd.f32 %v1568_v45, %v8272_v23  ;;  %v351_v23 = vld [vmem:[%s11907_s5 + $0x8] sm:$0xff]  ;;  %v1644_v52 = vsub.f32 %v12140_v30, %v1628_v32 }
 0x28f   : > { %1769 = vmatpush1.msra.mxu0 %v1690_v35  ;;  %v1565_v27 = vmul.f32 %v1549_v3, %v8087_v9  ;;  %v1516_v50 = vmul.f32 %v1500_v39, %v12136_v58 }
 0x290   : > { %v1680_v0 = vsub.f32 0.0, %v1584_v42  ;;  %7073 = vmatmul.mubr.msk.f32.vlgmr.msra.gmra.mxu0 %vm1067_vm15, %v350_v34  ;;  %vm1660_vm7 = vcmp.gt.f32.partialorder %v1644_v52, 0.5 }
 0x291   : > { %v1581_v37 = vadd.f32 %v1565_v27, %v8087_v9  ;;  %v1532_v26 = vadd.f32 -0.16666667, %v1516_v50  ;;  %1808 = vmatprep.mubr.f32.mxu0 %v12141_v57  ;;  %v352_v9 = vld [vmem:[%s11907_s5 + $0x10] sm:$0xff] }
 0x292   : > { %v1696_v33 = vsel %vm1664_vm5, %v1680_v0, %v1584_v42 }
 0x293   : > { %1856 = vmatpush1.msra.mxu1 %v1696_v33  ;;  %v1677_v25 = vsub.f32 0.0, %v1581_v37  ;;  %v1548_v1 = vmul.f32 %v1532_v26, %v12136_v58 }
 0x294   : > { %7074 = vmatmul.mubr.msk.f32.gmra.mxu0 %vm1067_vm15, %v351_v23 }
 0x295   : > { %v1693_v10 = vsel %vm1661_vm6, %v1677_v25, %v1581_v37  ;;  %v1564_v14 = vmul.f32 %v1548_v1, %v12142_v38  ;;  %1814 = vmatprep.mubr.f32.mxu0 %v12141_v57 }
 0x296   : > { %1857 = vmatprep.subr.mxu1 %v1693_v10 }
 0x297   : > { %v1580_v51 = vadd.f32 %v1564_v14, %v12142_v38 }
 0x298   : > { %7075 = vmatmul.mubr.msk.f32.gmra.mxu0 %vm1067_vm15, %v352_v9 }
 0x299   : > { %v1676_v58 = vsub.f32 0.0, %v1580_v51  ;;  %1820 = vmatprep.mubr.f32.mxu0 %v12141_v57 }
 0x29b   : > { %v1692_v20 = vsel %vm1660_vm7, %v1676_v58, %v1580_v51 }
 0x29c   : > { %1858 = vmatpush1.msra.mxu1 %v1692_v20  ;;  %7076 = vmatmul.mubr.msk.f32.gmra.mxu0 %vm1067_vm15, %v353_v49 }
 0x29d   : > { %7077 = vmatmul.mubr.msk.f32.vlgmr.msra.gmra.mxu1 %vm1067_vm15, %v350_v34  ;;  %2436 = vmatprep.mubr.f32.mxu0 %v12141_v57 }
 0x29e   : > { %1897 = vmatprep.mubr.f32.mxu1 %v12141_v57 }
 0x2a1   : > { %7078 = vmatmul.mubr.msk.f32.gmra.mxu1 %vm1067_vm15, %v351_v23 }
 0x2a2   : > { %1903 = vmatprep.mubr.f32.mxu1 %v12141_v57 }
 0x2a5   : > { %7079 = vmatmul.mubr.msk.f32.gmra.mxu1 %vm1067_vm15, %v352_v9 }
 0x2a6   : > { %1909 = vmatprep.mubr.f32.mxu1 %v12141_v57 }
 0x2a9   : > { %7080 = vmatmul.mubr.msk.f32.gmra.mxu1 %vm1067_vm15, %v353_v49 }
 0x2aa   : > { %2507 = vmatprep.mubr.f32.mxu1 %v12141_v57 }
 0x350   : > { %v1804_v44 = vpop.f32.mrf.mxu0 }
 0x351   : > { %v1805_v40 = vadd.f32 %v1804_v44, %v8393_v54 }
 0x352   : > { %v1806_v55 = vpop.f32.mrf.mxu0 }
 0x353   : > { %v1916_v21 = vmul.f32 0.31830987, %v1805_v40  ;;  %v1807_v16 = vadd.f32 %v1806_v55, %v8393_v54 }
 0x354   : > { %v1810_v8 = vpop.f32.mrf.mxu0 }
 0x355   : > { %v1932_v63 = vadd.f32 0.5, %v1916_v21  ;;  %v1917_v29 = vmul.f32 0.31830987, %v1807_v16  ;;  %v1811_v31 = vadd.f32 %v1810_v8, %v8397_v56 }
 0x356   : > { %v1812_v46 = vpop.f32.mrf.mxu0 }
 0x357   : > { %v8400_v47 = vfloor.f32 %v1932_v63  ;;  %v1933_v7 = vadd.f32 0.5, %v1917_v29  ;;  %v1920_v11 = vmul.f32 0.31830987, %v1811_v31  ;;  %v1813_v4 = vadd.f32 %v1812_v46, %v8397_v56 }
 0x358   : > { %v1816_v17 = vpop.f32.mrf.mxu0 }
 0x359   : > { %12147 = vst [vmem:[#allocation8_spill] sm:$0xff] %v8400_v47  ;;  %v1964_v12 = vmul.f32 3.140625, %v8400_v47  ;;  %v8404_v15 = vfloor.f32 %v1933_v7  ;;  %v1936_v5 = vadd.f32 0.5, %v1920_v11  ;;  %v1921_v48 = vmul.f32 0.31830987, %v1813_v4 }
 0x35a   : > { %v8407_v43 = vadd.f32 %v1816_v17, %v8389_v28  ;;  %v1818_v22 = vpop.f32.mrf.mxu0  ;;  %v1996_v61 = vmul.f32 0.00096702576, %v8400_v47  ;;  %v2028_v24 = vmul.f32 6.277114e-07, %v8400_v47 }
 0x35b   : > { %v1965_v13 = vmul.f32 3.140625, %v8404_v15  ;;  %v8410_v2 = vfloor.f32 %v1936_v5  ;;  %v1937_v60 = vadd.f32 0.5, %v1921_v48  ;;  %v1980_v30 = vsub.f32 %v1805_v40, %v1964_v12 }
 0x35c   : > { %v1924_v6 = vmul.f32 0.31830987, %v8407_v43  ;;  %v8416_v45 = vadd.f32 %v1818_v22, %v8389_v28  ;;  %v1997_v35 = vmul.f32 0.00096702576, %v8404_v15  ;;  %v2029_v0 = vmul.f32 6.277114e-07, %v8404_v15  ;;  %v1822_v63 = vpop.f32.mrf.mxu0 }
 0x35d   : > { %v1893_v36 = vpop.f32.mrf.mxu1  ;;  %v1981_v53 = vsub.f32 %v1807_v16, %v1965_v13  ;;  %v1968_v41 = vmul.f32 3.140625, %v8410_v2  ;;  %v8420_v3 = vfloor.f32 %v1937_v60  ;;  %v2012_v50 = vsub.f32 %v1980_v30, %v1996_v61 }
 0x35e   : > { %v1894_v62 = vadd.f32 %v1893_v36, %v8393_v54  ;;  %v1940_v39 = vadd.f32 0.5, %v1924_v6  ;;  %v2000_v19 = vmul.f32 0.00096702576, %v8410_v2  ;;  %v1925_v25 = vmul.f32 0.31830987, %v8416_v45 }
 0x35f   : > { %v1895_v34 = vpop.f32.mrf.mxu1  ;;  %v1984_v59 = vsub.f32 %v1811_v31, %v1968_v41  ;;  %v1969_v37 = vmul.f32 3.140625, %v8420_v3  ;;  %v2013_v23 = vsub.f32 %v1981_v53, %v1997_v35  ;;  %v2001_v10 = vmul.f32 0.00096702576, %v8420_v3 }
 0x360   : > { %v1918_v42 = vmul.f32 0.31830987, %v1894_v62  ;;  %v8424_v27 = vadd.f32 %v1895_v34, %v8393_v54  ;;  %v8435_v14 = vfloor.f32 %v1940_v39  ;;  %v8442_v20 = vsub.f32 %v2012_v50, %v2028_v24 }
 0x361   : > { %v1899_v26 = vpop.f32.mrf.mxu1  ;;  %v1985_v1 = vsub.f32 %v1813_v4, %v1969_v37  ;;  %v2016_v51 = vsub.f32 %v1984_v59, %v2000_v19  ;;  %v8446_v40 = vmul.f32 0.5, %v8400_v47  ;;  %v8448_v55 = vsub.f32 %v2013_v23, %v2029_v0 }
 0x362   : > { %v1934_v33 = vadd.f32 0.5, %v1918_v42  ;;  %v1919_v32 = vmul.f32 0.31830987, %v8424_v27  ;;  %v8433_v38 = vadd.f32 %v1899_v26, %v8397_v56  ;;  %12149 = vst [vmem:[#allocation14_spill] sm:$0xff] %v8442_v20  ;;  %v2032_v16 = vmul.f32 6.277114e-07, %v8410_v2 }
 0x363   : > { %v1901_v9 = vpop.f32.mrf.mxu1  ;;  %v2017_v8 = vsub.f32 %v1985_v1, %v2001_v10  ;;  %v2033_v31 = vmul.f32 6.277114e-07, %v8420_v3  ;;  %v1972_v7 = vmul.f32 3.140625, %v8435_v14  ;;  %v1941_v12 = vadd.f32 0.5, %v1925_v25 }
 0x364   : > { %v8437_v52 = vfloor.f32 %v1934_v33  ;;  %v1935_v58 = vadd.f32 0.5, %v1919_v32  ;;  %v8440_v49 = vadd.f32 %v1901_v9, %v8397_v56  ;;  %v1922_v44 = vmul.f32 0.31830987, %v8433_v38  ;;  %v1824_v9 = vpop.f32.mrf.mxu0 }
 0x365   : > { %v8456_v4 = vsub.f32 %v2016_v51, %v2032_v16  ;;  %v8461_v5 = vmul.f32 %v8442_v20, %v8442_v20  ;;  %v1905_v13 = vpop.f32.mrf.mxu1  ;;  %v8465_v22 = vadd.f32 %v1822_v63, %v8391_v18  ;;  %v8468_v60 = vmul.f32 0.5, %v8404_v15 }
 0x366   : > { %12148 = vst [vmem:[#allocation13_spill] sm:$0xff] %v8437_v52  ;;  %v1966_v21 = vmul.f32 3.140625, %v8437_v52  ;;  %v8452_v29 = vfloor.f32 %v1935_v58  ;;  %v1938_v46 = vadd.f32 0.5, %v1922_v44  ;;  %v1923_v17 = vmul.f32 0.31830987, %v8440_v49 }
 0x367   : > { %v1998_v48 = vmul.f32 0.00096702576, %v8437_v52  ;;  %v8472_v6 = vmul.f32 %v8448_v55, %v8448_v55  ;;  %v8474_v30 = vsub.f32 %v2017_v8, %v2033_v31  ;;  %v1988_v61 = vsub.f32 %v8407_v43, %v1972_v7  ;;  %v1907_v19 = vpop.f32.mrf.mxu1 }
 0x368   : > { %12150 = vst [vmem:[#allocation20_spill] sm:$0xff] %v8452_v29  ;;  %v1982_v11 = vsub.f32 %v1894_v62, %v1966_v21  ;;  %v8476_v36 = vfloor.f32 %v1938_v46  ;;  %v1939_v53 = vadd.f32 0.5, %v1923_v17  ;;  %v1967_v41 = vmul.f32 3.140625, %v8452_v29 }
 0x369   : > { %v8480_v24 = vfloor.f32 %v1941_v12  ;;  %v2030_v34 = vmul.f32 6.277114e-07, %v8437_v52  ;;  %v8485_v39 = vmul.f32 %v8456_v4, %v8456_v4  ;;  %v2004_v35 = vmul.f32 0.00096702576, %v8435_v14 }
 0x36a   : > { %12151 = vst [vmem:[#allocation22_spill] sm:$0xff] %v8476_v36  ;;  %v2014_v62 = vsub.f32 %v1982_v11, %v1998_v48  ;;  %v1906_v42 = vadd.f32 %v1905_v13, %v8389_v28  ;;  %v1970_v59 = vmul.f32 3.140625, %v8476_v36  ;;  %v8490_v50 = vfloor.f32 %v1939_v53 }
 0x36b   : > { %v1973_v0 = vmul.f32 3.140625, %v8480_v24  ;;  %v1928_v43 = vmul.f32 0.31830987, %v8465_v22  ;;  %v1999_v37 = vmul.f32 0.00096702576, %v8452_v29  ;;  %v2031_v26 = vmul.f32 6.277114e-07, %v8452_v29 }
 0x36c   : > { %v8498_v23 = vmul.f32 %v8474_v30, %v8474_v30  ;;  %v2036_v33 = vmul.f32 6.277114e-07, %v8435_v14  ;;  %v8501_v32 = vsub.f32 %v2014_v62, %v2030_v34  ;;  %v1983_v25 = vsub.f32 %v8424_v27, %v1967_v41  ;;  %v1911_v27 = vpop.f32.mrf.mxu1 }
 0x36d   : > { %v2020_v1 = vsub.f32 %v1988_v61, %v2004_v35  ;;  %v1971_v10 = vmul.f32 3.140625, %v8490_v50  ;;  %v2002_v51 = vmul.f32 0.00096702576, %v8476_v36  ;;  %v1989_v58 = vsub.f32 %v8416_v45, %v1973_v0 }
 0x36e   : > { %v2005_v44 = vmul.f32 0.00096702576, %v8480_v24  ;;  %v1926_v21 = vmul.f32 0.31830987, %v1906_v42  ;;  %v1986_v16 = vsub.f32 %v8433_v38, %v1970_v59  ;;  %v2034_v8 = vmul.f32 6.277114e-07, %v8476_v36  ;;  %v1913_v59 = vpop.f32.mrf.mxu1 }
 0x36f   : > { %v1944_v63 = vadd.f32 0.5, %v1928_v43  ;;  %v8511_v31 = vadd.f32 %v1907_v19, %v8389_v28  ;;  %v1987_v46 = vsub.f32 %v8440_v49, %v1971_v10  ;;  %v1825_v17 = vadd.f32 %v1824_v9, %v8391_v18 }
 0x370   : > { %v2021_v7 = vsub.f32 %v1989_v58, %v2005_v44  ;;  %v1942_v11 = vadd.f32 0.5, %v1926_v21  ;;  %v2015_v12 = vsub.f32 %v1983_v25, %v1999_v37  ;;  %v2037_v45 = vmul.f32 6.277114e-07, %v8480_v24 }
 0x371   : > { %v8516_v48 = vfloor.f32 %v1944_v63  ;;  %v1927_v38 = vmul.f32 0.31830987, %v8511_v31  ;;  %v2003_v13 = vmul.f32 0.00096702576, %v8490_v50  ;;  %v1929_v62 = vmul.f32 0.31830987, %v1825_v17 }
 0x372   : > { %v8520_v53 = vfloor.f32 %v1942_v11  ;;  %v1912_v41 = vadd.f32 %v1911_v27, %v8391_v18  ;;  %v2018_v61 = vsub.f32 %v1986_v16, %v2002_v51  ;;  %v8523_v49 = vsub.f32 %v2020_v1, %v2036_v33 }
 0x373   : > { %v8525_v34 = vsub.f32 %v2021_v7, %v2037_v45  ;;  %v1976_v35 = vmul.f32 3.140625, %v8516_v48  ;;  %v2019_v0 = vsub.f32 %v1987_v46, %v2003_v13  ;;  %v2035_v43 = vmul.f32 6.277114e-07, %v8490_v50 }
 0x374   : > { %v1974_v19 = vmul.f32 3.140625, %v8520_v53  ;;  %v2008_v37 = vmul.f32 0.00096702576, %v8516_v48  ;;  %v2040_v10 = vmul.f32 6.277114e-07, %v8516_v48  ;;  %v1943_v9 = vadd.f32 0.5, %v1927_v38 }
 0x375   : > { %v1992_v25 = vsub.f32 %v8465_v22, %v1976_v35  ;;  %v1945_v51 = vadd.f32 0.5, %v1929_v62  ;;  %v2006_v1 = vmul.f32 0.00096702576, %v8520_v53  ;;  %v1930_v58 = vmul.f32 0.31830987, %v1912_v41 }
 0x376   : > { %v1990_v33 = vsub.f32 %v1906_v42, %v1974_v19  ;;  %v1914_v44 = vadd.f32 %v1913_v59, %v8391_v18  ;;  %v8537_v21 = vmul.f32 %v8525_v34, %v8525_v34  ;;  %v8539_v63 = vfloor.f32 %v1943_v9 }
 0x377   : > { %v2024_v16 = vsub.f32 %v1992_v25, %v2008_v37  ;;  %v8541_v27 = vfloor.f32 %v1945_v51  ;;  %v1946_v46 = vadd.f32 0.5, %v1930_v58  ;;  %v2264_v11 = vmul.f32 0.5, %v8516_v48 }
 0x378   : > { %v2022_v22 = vsub.f32 %v1990_v33, %v2006_v1  ;;  %v1931_v7 = vmul.f32 0.31830987, %v1914_v44  ;;  %v8544_v42 = vsub.f32 %v2015_v12, %v2031_v26  ;;  %v8548_v45 = vmul.f32 %v8523_v49, %v8523_v49 }
 0x379   : > { %v8550_v38 = vsub.f32 %v2024_v16, %v2040_v10  ;;  %v1975_v13 = vmul.f32 3.140625, %v8539_v63  ;;  %v8553_v62 = vsub.f32 %v2018_v61, %v2034_v8  ;;  %v8555_v35 = vsub.f32 %v2019_v0, %v2035_v43 }
 0x37a   : > { %v2038_v59 = vmul.f32 6.277114e-07, %v8520_v53  ;;  %v1977_v19 = vmul.f32 3.140625, %v8541_v27  ;;  %v8563_v12 = vfloor.f32 %v1946_v46  ;;  %v1947_v37 = vadd.f32 0.5, %v1931_v7 }
 0x37b   : > { %v8561_v26 = vmul.f32 %v8550_v38, %v8550_v38  ;;  %v2085_v25 = vmul.f32 -2.5052108e-08, %v8537_v21  ;;  %v2009_v8 = vmul.f32 0.00096702576, %v8541_v27  ;;  %v2280_v61 = vfloor.f32 %v2264_v11 }
 0x37c   : > { %v8566_v10 = vsub.f32 %v2022_v22, %v2038_v59  ;;  %v1993_v9 = vsub.f32 %v1825_v17, %v1977_v19  ;;  %v1991_v0 = vsub.f32 %v8511_v31, %v1975_v13  ;;  %v2007_v43 = vmul.f32 0.00096702576, %v8539_v63 }
 0x37d   : > { %v2039_v51 = vmul.f32 6.277114e-07, %v8539_v63  ;;  %v1978_v33 = vmul.f32 3.140625, %v8563_v12  ;;  %v2041_v58 = vmul.f32 6.277114e-07, %v8541_v27  ;;  %v8574_v16 = vfloor.f32 %v1947_v37 }
 0x37e   : > { %v2025_v1 = vsub.f32 %v1993_v9, %v2009_v8  ;;  %v2088_v22 = vmul.f32 -2.5052108e-08, %v8561_v26  ;;  %v2010_v17 = vmul.f32 0.00096702576, %v8563_v12  ;;  %v2265_v7 = vmul.f32 0.5, %v8541_v27 }
 0x37f   : > { %v1994_v46 = vsub.f32 %v1912_v41, %v1978_v33  ;;  %v2101_v11 = vadd.f32 2.7557319e-06, %v2085_v25  ;;  %v8581_v31 = vmul.f32 %v8566_v10, %v8566_v10  ;;  %v1979_v59 = vmul.f32 3.140625, %v8574_v16 }
 0x380   : > { %v8583_v13 = vsub.f32 %v2025_v1, %v2041_v58  ;;  %v8586_v19 = vmul.f32 2.0, %v2280_v61  ;;  %v2023_v37 = vsub.f32 %v1991_v0, %v2007_v43  ;;  %v2042_v8 = vmul.f32 6.277114e-07, %v8563_v12 }
 0x381   : > { %v2026_v9 = vsub.f32 %v1994_v46, %v2010_v17  ;;  %v2104_v41 = vadd.f32 2.7557319e-06, %v2088_v22  ;;  %v1995_v25 = vsub.f32 %v1914_v44, %v1979_v59  ;;  %v2011_v18 = vmul.f32 0.00096702576, %v8574_v16 }
 0x382   : > { %v8591_v33 = vmul.f32 %v8583_v13, %v8583_v13  ;;  %v2117_v28 = vmul.f32 %v2101_v11, %v8537_v21  ;;  %v2043_v1 = vmul.f32 6.277114e-07, %v8574_v16  ;;  %v2281_v58 = vfloor.f32 %v2265_v7 }
 0x383   : > { %v2120_v61 = vmul.f32 %v2104_v41, %v8561_v26  ;;  %v2261_v0 = vmul.f32 0.5, %v8480_v24  ;;  %v2027_v43 = vsub.f32 %v1995_v25, %v2011_v18  ;;  %v2267_v17 = vmul.f32 0.5, %v8574_v16 }
 0x384   : > { %v2089_v46 = vmul.f32 -2.5052108e-08, %v8591_v33  ;;  %v2133_v22 = vadd.f32 -0.0001984127, %v2117_v28  ;;  %v8600_v56 = vsub.f32 %v2023_v37, %v2039_v51  ;;  %v8602_v44 = vsub.f32 %v2026_v9, %v2042_v8 }
 0x385   : > { %v2136_v59 = vadd.f32 -0.0001984127, %v2120_v61  ;;  %v2312_v11 = vsub.f32 %v8516_v48, %v8586_v19  ;;  %v8606_v54 = vsub.f32 %v2027_v43, %v2043_v1  ;;  %v2277_v57 = vfloor.f32 %v2261_v0 }
 0x386   : > { %v2105_v7 = vadd.f32 2.7557319e-06, %v2089_v46  ;;  %v2149_v41 = vmul.f32 %v2133_v22, %v8537_v21  ;;  %v2283_v25 = vfloor.f32 %v2267_v17  ;;  %v2084_v28 = vmul.f32 -2.5052108e-08, %v8548_v45 }
 0x387   : > { %v2152_v18 = vmul.f32 %v2136_v59, %v8561_v26  ;;  %v2260_v51 = vmul.f32 0.5, %v8435_v14  ;;  %v8614_v37 = vmul.f32 %v8606_v54, %v8606_v54  ;;  %v2297_v48 = vmul.f32 2.0, %v2281_v58 }
 0x388   : > { %v2121_v9 = vmul.f32 %v2105_v7, %v8591_v33  ;;  %v2165_v19 = vadd.f32 0.008333334, %v2149_v41  ;;  %v8619_v8 = vmul.f32 %v8602_v44, %v8602_v44  ;;  %v2100_v61 = vadd.f32 2.7557319e-06, %v2084_v28 }
 0x389   : > { %v2168_v1 = vadd.f32 0.008333334, %v2152_v18  ;;  %v2276_v0 = vfloor.f32 %v2260_v51  ;;  %v8623_v43 = vmul.f32 %v8600_v56, %v8600_v56  ;;  %v2091_v17 = vmul.f32 -2.5052108e-08, %v8614_v37 }
 0x38a   : > { %v2137_v46 = vadd.f32 -0.0001984127, %v2121_v9  ;;  %v2181_v22 = vmul.f32 %v2165_v19, %v8537_v21  ;;  %v2293_v58 = vmul.f32 2.0, %v2277_v57  ;;  %v8628_v7 = vmul.f32 2.0, %v2283_v25 }
 0x38b   : > { %v2184_v59 = vmul.f32 %v2168_v1, %v8561_v26  ;;  %v2116_v41 = vmul.f32 %v2100_v61, %v8548_v45  ;;  %v2107_v51 = vadd.f32 2.7557319e-06, %v2091_v17  ;;  %v2292_v52 = vmul.f32 2.0, %v2276_v0 }
 0x38c   : > { %v2153_v18 = vmul.f32 %v2137_v46, %v8591_v33  ;;  %v2197_v28 = vadd.f32 -0.16666667, %v2181_v22  ;;  %v2313_v47 = vsub.f32 %v8541_v27, %v2297_v48  ;;  %v2090_v19 = vmul.f32 -2.5052108e-08, %v8619_v8 }
 0x38d   : > { %v2200_v20 = vadd.f32 -0.16666667, %v2184_v59  ;;  %v2132_v9 = vadd.f32 -0.0001984127, %v2116_v41  ;;  %v2123_v57 = vmul.f32 %v2107_v51, %v8614_v37  ;;  %v2266_v25 = vmul.f32 0.5, %v8563_v12 }
 0x38e   : > { %v2169_v29 = vadd.f32 0.008333334, %v2153_v18  ;;  %v2213_v36 = vmul.f32 %v2197_v28, %v8537_v21  ;;  %v2309_v61 = vsub.f32 %v8480_v24, %v2293_v58  ;;  %v2106_v0 = vadd.f32 2.7557319e-06, %v2090_v19 }
 0x38f   : > { %v2216_v1 = vmul.f32 %v2200_v20, %v8561_v26  ;;  %v2148_v46 = vmul.f32 %v2132_v9, %v8548_v45  ;;  %v2139_v22 = vadd.f32 -0.0001984127, %v2123_v57  ;;  %v2308_v17 = vsub.f32 %v8435_v14, %v2292_v52 }
 0x390   : > { %v2185_v27 = vmul.f32 %v2169_v29, %v8591_v33  ;;  %v2229_v48 = vmul.f32 %v2213_v36, %v8525_v34  ;;  %v2122_v41 = vmul.f32 %v2106_v0, %v8619_v8  ;;  %v2081_v18 = vmul.f32 -2.5052108e-08, %v8498_v23 }
 0x391   : > { %v2232_v21 = vmul.f32 %v2216_v1, %v8550_v38  ;;  %v2164_v59 = vadd.f32 0.008333334, %v2148_v46  ;;  %v2155_v26 = vmul.f32 %v2139_v22, %v8614_v37  ;;  %v2282_v58 = vfloor.f32 %v2266_v25 }
 0x392   : > { %v2201_v20 = vadd.f32 -0.16666667, %v2185_v27  ;;  %v2245_v24 = vadd.f32 %v2229_v48, %v8525_v34  ;;  %vm8649_vm8 = vcmp.gt.f32.partialorder %v2312_v11, 0.5  ;;  %v2138_v52 = vadd.f32 -0.0001984127, %v2122_v41 }
 0x393   : > { %v2248_v29 = vadd.f32 %v2232_v21, %v8550_v38  ;;  %v2180_v14 = vmul.f32 %v2164_v59, %v8548_v45  ;;  %v2097_v28 = vadd.f32 2.7557319e-06, %v2081_v18  ;;  %vm8655_vm9 = vcmp.gt.f32.partialorder %v2313_v47, 0.5 }
 0x394   : > { %v2217_v51 = vmul.f32 %v2201_v20, %v8591_v33  ;;  %v2171_v34 = vadd.f32 0.008333334, %v2155_v26  ;;  %v2315_v19 = vsub.f32 %v8574_v16, %v8628_v7  ;;  %vm8661_vm10 = vcmp.gt.f32.partialorder %v2309_v61, 0.5 }
 0x395   : > { %v2196_v11 = vadd.f32 -0.16666667, %v2180_v14  ;;  %v2154_v57 = vmul.f32 %v2138_v52, %v8619_v8  ;;  %v2113_v25 = vmul.f32 %v2097_v28, %v8498_v23  ;;  %v2341_v33 = vsub.f32 0.0, %v2245_v24 }
 0x396   : > { %v2233_v1 = vmul.f32 %v2217_v51, %v8583_v13  ;;  %v2187_v47 = vmul.f32 %v2171_v34, %v8614_v37  ;;  %vm8669_vm11 = vcmp.gt.f32.partialorder %v2308_v17, 0.5  ;;  %v2298_v0 = vmul.f32 2.0, %v2282_v58 }
 0x397   : > { %v2344_v16 = vsub.f32 0.0, %v2248_v29  ;;  %v2212_v7 = vmul.f32 %v2196_v11, %v8548_v45  ;;  %v2170_v61 = vadd.f32 0.008333334, %v2154_v57  ;;  %v2129_v27 = vadd.f32 -0.0001984127, %v2113_v25 }
 0x398   : > { %v2249_v48 = vadd.f32 %v2233_v1, %v8583_v13  ;;  %v2203_v22 = vadd.f32 -0.16666667, %v2187_v47  ;;  %v2257_v21 = vmul.f32 0.5, %v8420_v3  ;;  %v2087_v59 = vmul.f32 -2.5052108e-08, %v8623_v43 }
 0x399   : > { %v2228_v41 = vmul.f32 %v2212_v7, %v8523_v49  ;;  %v2186_v17 = vmul.f32 %v2170_v61, %v8619_v8  ;;  %v2145_v18 = vmul.f32 %v2129_v27, %v8498_v23  ;;  %v2263_v20 = vmul.f32 0.5, %v8539_v63 }
 0x39a   : > { %v2345_v26 = vsub.f32 0.0, %v2249_v48  ;;  %v2219_v45 = vmul.f32 %v2203_v22, %v8614_v37  ;;  %v2314_v58 = vsub.f32 %v8563_v12, %v2298_v0  ;;  %v2103_v14 = vadd.f32 2.7557319e-06, %v2087_v59 }
 0x39b   : > { %v2244_v13 = vadd.f32 %v2228_v41, %v8523_v49  ;;  %v2202_v52 = vadd.f32 -0.16666667, %v2186_v17  ;;  %v2161_v28 = vadd.f32 0.008333334, %v2145_v18  ;;  %v2273_v51 = vfloor.f32 %v2257_v21 }
 0x39c   : > { %v2361_v34 = vsel %vm8655_vm9, %v2345_v26, %v2249_v48  ;;  %v2360_v11 = vsel %vm8649_vm8, %v2344_v16, %v2248_v29  ;;  %v2235_v57 = vmul.f32 %v2219_v45, %v8606_v54  ;;  %v2119_v25 = vmul.f32 %v2103_v14, %v8623_v43 }
 0x39d   : > { %2396 = vmatprep.subr.mxu0 %v2361_v34  ;;  %v2340_v37 = vsub.f32 0.0, %v2244_v13  ;;  %v2218_v12 = vmul.f32 %v2202_v52, %v8619_v8  ;;  %v2177_v1 = vmul.f32 %v2161_v28, %v8498_v23  ;;  %v2279_v49 = vfloor.f32 %v2263_v20 }
 0x39e   : > { %2397 = vmatpush1.msra.mxu0 %v2360_v11  ;;  %v2357_v47 = vsel %vm8661_vm10, %v2341_v33, %v2245_v24  ;;  %v2251_v9 = vadd.f32 %v2235_v57, %v8606_v54  ;;  %v2135_v0 = vadd.f32 -0.0001984127, %v2119_v25  ;;  %v2080_v29 = vmul.f32 -2.5052108e-08, %v8485_v39 }
 0x39f   : > { %2398 = vmatprep.subr.mxu0 %v2357_v47  ;;  %v2356_v36 = vsel %vm8669_vm11, %v2340_v37, %v2244_v13  ;;  %v2234_v16 = vmul.f32 %v2218_v12, %v8602_v44  ;;  %v2193_v7 = vadd.f32 -0.16666667, %v2177_v1  ;;  %v2289_v8 = vmul.f32 2.0, %v2273_v51 }
 0x3a0   : > { %vm2331_vm12 = vcmp.gt.f32.partialorder %v2315_v19, 0.5  ;;  %v2347_v61 = vsub.f32 0.0, %v2251_v9  ;;  %2399 = vmatpush1.msra.mxu0 %v2356_v36  ;;  %v2151_v27 = vmul.f32 %v2135_v0, %v8623_v43  ;;  %v2096_v38 = vadd.f32 2.7557319e-06, %v2080_v29 }
 0x3a1   : > { %v2250_v24 = vadd.f32 %v2234_v16, %v8602_v44  ;;  %vm8701_vm13 = vcmp.gt.f32.partialorder %v2314_v58, 0.5  ;;  %v2209_v33 = vmul.f32 %v2193_v7, %v8498_v23  ;;  %v2295_v46 = vmul.f32 2.0, %v2279_v49 }
 0x3a2   : > { %v2363_v48 = vsel %vm2331_vm12, %v2347_v61, %v2251_v9  ;;  %v2167_v22 = vadd.f32 0.008333334, %v2151_v27  ;;  %v2112_v21 = vmul.f32 %v2096_v38, %v8485_v39  ;;  %v2086_v19 = vmul.f32 -2.5052108e-08, %v8581_v31 }
 0x3a3   : > { %2467 = vmatprep.subr.mxu1 %v2363_v48  ;;  %v2346_v59 = vsub.f32 0.0, %v2250_v24  ;;  %v2225_v41 = vmul.f32 %v2209_v33, %v8474_v30  ;;  %v2305_v17 = vsub.f32 %v8420_v3, %v2289_v8  ;;  %v2256_v44 = vmul.f32 0.5, %v8410_v2 }
 0x3a4   : > { %v2183_v18 = vmul.f32 %v2167_v22, %v8623_v43  ;;  %v2128_v20 = vadd.f32 -0.0001984127, %v2112_v21  ;;  %v2102_v26 = vadd.f32 2.7557319e-06, %v2086_v19  ;;  %v2077_v23 = vmul.f32 -2.5052108e-08, %v8472_v6 }
 0x3a5   : > { %v8715_v45 = vmul.f32 %v8555_v35, %v8555_v35  ;;  %v2362_v58 = vsel %vm8701_vm13, %v2346_v59, %v2250_v24  ;;  %v2241_v14 = vadd.f32 %v2225_v41, %v8474_v30  ;;  %v2262_v13 = vmul.f32 0.5, %v8520_v53 }
 0x3a6   : > { %2468 = vmatpush1.msra.mxu1 %v2362_v58  ;;  %v2199_v3 = vadd.f32 -0.16666667, %v2183_v18  ;;  %v2144_v52 = vmul.f32 %v2128_v20, %v8485_v39  ;;  %v2118_v28 = vmul.f32 %v2102_v26, %v8581_v31  ;;  %v2093_v51 = vadd.f32 2.7557319e-06, %v2077_v23 }
 0x3a7   : > { %vm2321_vm14 = vcmp.gt.f32.partialorder %v2305_v17, 0.5  ;;  %v2337_v34 = vsub.f32 0.0, %v2241_v14  ;;  %v2311_v11 = vsub.f32 %v8539_v63, %v2295_v46  ;;  %v2272_v57 = vfloor.f32 %v2256_v44 }
 0x3a8   : > { %v2215_v25 = vmul.f32 %v2199_v3, %v8623_v43  ;;  %v2160_v37 = vadd.f32 0.008333334, %v2144_v52  ;;  %v2134_v12 = vadd.f32 -0.0001984127, %v2118_v28  ;;  %v2109_v30 = vmul.f32 %v2093_v51, %v8472_v6 }
 0x3a9   : > { %v8728_v1 = vmul.f32 %v8501_v32, %v8501_v32  ;;  %v8732_v49 = vmul.f32 %v8544_v42, %v8544_v42  ;;  %v2353_v47 = vsel %vm2321_vm14, %v2337_v34, %v2241_v14  ;;  %v2278_v9 = vfloor.f32 %v2262_v13 }
 0x3aa   : > { %2400 = vmatprep.subr.mxu0 %v2353_v47  ;;  %v2231_v63 = vmul.f32 %v2215_v25, %v8600_v56  ;;  %v2176_v0 = vmul.f32 %v2160_v37, %v8485_v39  ;;  %v2150_v43 = vmul.f32 %v2134_v12, %v8581_v31  ;;  %v2125_v29 = vadd.f32 -0.0001984127, %v2109_v30  ;;  %v12171_v37 = vld [vmem:[#allocation13_spill] sm:$0xff] }
 0x3ab   : > { %v8739_v36 = vmul.f32 %v8553_v62, %v8553_v62  ;;  %vm8741_vm2 = vcmp.gt.f32.partialorder %v2311_v11, 0.5  ;;  %v2288_v7 = vmul.f32 2.0, %v2272_v57  ;;  %v2083_v8 = vmul.f32 -2.5052108e-08, %v8715_v45 }
 0x3ac   : > { %v2247_v61 = vadd.f32 %v2231_v63, %v8600_v56  ;;  %v2192_v27 = vadd.f32 -0.16666667, %v2176_v0  ;;  %v2166_v38 = vadd.f32 0.008333334, %v2150_v43  ;;  %v2141_v24 = vmul.f32 %v2125_v29, %v8472_v6 }
 0x3ad   : > { %v2294_v54 = vmul.f32 2.0, %v2278_v9  ;;  %v2269_v33 = vfloor.f32 %v8468_v60  ;;  %v2099_v46 = vadd.f32 2.7557319e-06, %v2083_v8  ;;  %v2076_v48 = vmul.f32 -2.5052108e-08, %v8461_v5 }
 0x3ae   : > { %v2343_v22 = vsub.f32 0.0, %v2247_v61  ;;  %v2208_v21 = vmul.f32 %v2192_v27, %v8485_v39  ;;  %v2182_v19 = vmul.f32 %v2166_v38, %v8581_v31  ;;  %v2157_v59 = vadd.f32 0.008333334, %v2141_v24  ;;  %v12166_v27 = vld [vmem:[#allocation22_spill] sm:$0xff] }
 0x3af   : > { %v2304_v41 = vsub.f32 %v8410_v2, %v2288_v7  ;;  %v2115_v56 = vmul.f32 %v2099_v46, %v8715_v45  ;;  %v2259_v17 = vmul.f32 0.5, %v8490_v50  ;;  %v2092_v44 = vadd.f32 2.7557319e-06, %v2076_v48 }
 0x3b0   : > { %v2359_v18 = vsel %vm8741_vm2, %v2343_v22, %v2247_v61  ;;  %v2224_v60 = vmul.f32 %v2208_v21, %v8456_v4  ;;  %v2198_v20 = vadd.f32 -0.16666667, %v2182_v19  ;;  %v2173_v26 = vmul.f32 %v2157_v59, %v8472_v6  ;;  %v8789_v21 = vld [vmem:[%s7405_s22 + $0x8] sm:$0xff] }
 0x3b1   : > { %2469 = vmatprep.subr.mxu1 %v2359_v18  ;;  %v2310_v39 = vsub.f32 %v8520_v53, %v2294_v54  ;;  %v2285_v23 = vmul.f32 2.0, %v2269_v33  ;;  %v2131_v58 = vadd.f32 -0.0001984127, %v2115_v56  ;;  %v2108_v2 = vmul.f32 %v2092_v44, %v8461_v5 }
 0x3b2   : > { %v2240_v14 = vadd.f32 %v2224_v60, %v8456_v4  ;;  %v2214_v13 = vmul.f32 %v2198_v20, %v8581_v31  ;;  %v2189_v3 = vadd.f32 -0.16666667, %v2173_v26  ;;  %v2082_v52 = vmul.f32 -2.5052108e-08, %v8739_v36 }
 0x3b3   : > { %vm2320_vm3 = vcmp.gt.f32.partialorder %v2304_v41, 0.5  ;;  %v2147_v28 = vmul.f32 %v2131_v58, %v8715_v45  ;;  %v2275_v51 = vfloor.f32 %v2259_v17  ;;  %v2124_v34 = vadd.f32 -0.0001984127, %v2108_v2 }
 0x3b4   : > { %v2336_v11 = vsub.f32 0.0, %v2240_v14  ;;  %v2230_v57 = vmul.f32 %v2214_v13, %v8566_v10  ;;  %v2205_v53 = vmul.f32 %v2189_v3, %v8472_v6  ;;  %v2098_v25 = vadd.f32 2.7557319e-06, %v2082_v52  ;;  %v12170_v3 = vld [vmem:[#allocation8_spill] sm:$0xff] }
 0x3b5   : > { %vm8767_vm4 = vcmp.gt.f32.partialorder %v2310_v39, 0.5  ;;  %v2301_v4 = vsub.f32 %v8404_v15, %v2285_v23  ;;  %v2163_v31 = vadd.f32 0.008333334, %v2147_v28  ;;  %v2140_v12 = vmul.f32 %v2124_v34, %v8461_v5  ;;  %v12168_v23 = vld [vmem:[#allocation14_spill] sm:$0xff] }
 0x3b6   : > { %v2352_v30 = vsel %vm2320_vm3, %v2336_v11, %v2240_v14  ;;  %v2246_v47 = vadd.f32 %v2230_v57, %v8566_v10  ;;  %v2221_v9 = vmul.f32 %v2205_v53, %v8448_v55  ;;  %v2114_v63 = vmul.f32 %v2098_v25, %v8739_v36  ;;  %v12169_v14 = vld [vmem:[#allocation5_spill] sm:$0xff] }
 0x3b7   : > { %2401 = vmatpush1.msra.mxu0 %v2352_v30  ;;  %v2179_v6 = vmul.f32 %v2163_v31, %v8715_v45  ;;  %v2291_v0 = vmul.f32 2.0, %v2275_v51  ;;  %v2156_v43 = vadd.f32 0.008333334, %v2140_v12  ;;  %v2079_v29 = vmul.f32 -2.5052108e-08, %v8732_v49 }
 0x3b8   : > { %v2342_v16 = vsub.f32 0.0, %v2246_v47  ;;  %v2237_v15 = vadd.f32 %v2221_v9, %v8448_v55  ;;  %v2268_v7 = vfloor.f32 %v8446_v40  ;;  %v2130_v8 = vadd.f32 -0.0001984127, %v2114_v63  ;;  %v358_v63 = vld [vmem:[%s11909_s7] sm:$0x7] }
 0x3b9   : > { %v2195_v61 = vadd.f32 -0.16666667, %v2179_v6  ;;  %v2172_v10 = vmul.f32 %v2156_v43, %v8461_v5  ;;  %v2258_v38 = vmul.f32 0.5, %v12166_v27  ;;  %v2095_v24 = vadd.f32 2.7557319e-06, %v2079_v29 }
 0x3ba   : > { %v2358_v54 = vsel %vm8767_vm4, %v2342_v16, %v2246_v47  ;;  %vm2317_vm5 = vcmp.gt.f32.partialorder %v2301_v4, 0.5  ;;  %v2333_v33 = vsub.f32 0.0, %v2237_v15  ;;  %v2146_v46 = vmul.f32 %v2130_v8, %v8739_v36 }
 0x3bb   : > { %2470 = vmatpush1.msra.mxu1 %v2358_v54  ;;  %v2211_v55 = vmul.f32 %v2195_v61, %v8715_v45  ;;  %v2307_v48 = vsub.f32 %v8490_v50, %v2291_v0  ;;  %v2188_v40 = vadd.f32 -0.16666667, %v2172_v10  ;;  %v2111_v22 = vmul.f32 %v2095_v24, %v8732_v49  ;;  %v12167_v50 = vld [vmem:[#allocation20_spill] sm:$0xff] }
 0x3bc   : > { %v2349_v19 = vsel %vm2317_vm5, %v2333_v33, %v2237_v15  ;;  %v2284_v59 = vmul.f32 2.0, %v2268_v7  ;;  %v2162_v41 = vadd.f32 0.008333334, %v2146_v46  ;;  %v2078_v56 = vmul.f32 -2.5052108e-08, %v8728_v1 }
 0x3bd   : > { %2402 = vmatprep.subr.mxu0 %v2349_v19  ;;  %v2227_v17 = vmul.f32 %v2211_v55, %v8555_v35  ;;  %v2204_v44 = vmul.f32 %v2188_v40, %v8461_v5  ;;  %v2274_v18 = vfloor.f32 %v2258_v38  ;;  %v2127_v60 = vadd.f32 -0.0001984127, %v2111_v22  ;;  %v7195_v55 = vld [vmem:[%s11903_s1] sm:$0xff] }
 0x3be   : > { %v2178_v45 = vmul.f32 %v2162_v41, %v8739_v36  ;;  %v2255_v20 = vmul.f32 0.5, %v12167_v50  ;;  %v2094_v26 = vadd.f32 2.7557319e-06, %v2078_v56  ;;  %v2645_v13 = vrot.slane %v8789_v21, %v12169_v14 }
 0x3bf   : > { %v2243_v39 = vadd.f32 %v2227_v17, %v8555_v35  ;;  %v2220_v58 = vmul.f32 %v2204_v44, %v12168_v23  ;;  %v2143_v2 = vmul.f32 %v2127_v60, %v8732_v49  ;;  %vm2323_vm6 = vcmp.gt.f32.partialorder %v2307_v48, 0.5  ;;  %v7197_v17 = vld [vmem:[%s11903_s1 + $0x10] sm:$0xff] }
 0x3c0   : > { %v2300_v52 = vsub.f32 %v12170_v3, %v2284_v59  ;;  %v2194_v5 = vadd.f32 -0.16666667, %v2178_v45  ;;  %v2110_v28 = vmul.f32 %v2094_v26, %v8728_v1  ;;  %v2290_v11 = vmul.f32 2.0, %v2274_v18  ;;  %v7196_v59 = vld [vmem:[%s11903_s1 + $0x8] sm:$0xff]  ;;  %v8862_v18 = vpop.permute.xlu0 %2366 }
 0x3c1   : > { %v2339_v51 = vsub.f32 0.0, %v2243_v39  ;;  %v2236_v34 = vadd.f32 %v2220_v58, %v12168_v23  ;;  %v2159_v57 = vadd.f32 0.008333334, %v2143_v2  ;;  %v2271_v53 = vfloor.f32 %v2255_v20  ;;  %12173 = vst [vmem:[#allocation22_spill] sm:$0xff] %v8862_v18  ;;  %v12174_v2 = vld [vmem:[#allocation7_spill] sm:$0xff] }
 0x3c2   : > { %v2210_v35 = vmul.f32 %v2194_v5, %v8739_v36  ;;  %v2126_v25 = vadd.f32 -0.0001984127, %v2110_v28  ;;  %v2254_v4 = vmul.f32 0.5, %v12171_v37  ;;  %v2653_v47 = vcombine.high %v2645_v13, %v2645_v13 }
 0x3c3   : > { %v2355_v31 = vsel %vm2323_vm6, %v2339_v51, %v2243_v39  ;;  %v2332_v12 = vsub.f32 0.0, %v2236_v34  ;;  %v2175_v30 = vmul.f32 %v2159_v57, %v8732_v49  ;;  %vm2316_vm7 = vcmp.gt.f32.partialorder %v2300_v52, 0.5 }
 0x3c4   : > { %2471 = vmatprep.subr.mxu1 %v2355_v31  ;;  %v2226_v9 = vmul.f32 %v2210_v35, %v8553_v62  ;;  %v2142_v6 = vmul.f32 %v2126_v25, %v8728_v1  ;;  %v2306_v0 = vsub.f32 %v12166_v27, %v2290_v11  ;;  %v2287_v16 = vmul.f32 2.0, %v2271_v53 }
 0x3c5   : > { %v2348_v36 = vsel %vm2316_vm7, %v2332_v12, %v2236_v34  ;;  %v2191_v43 = vadd.f32 -0.16666667, %v2175_v30  ;;  %v2270_v8 = vfloor.f32 %v2254_v4  ;;  %v12172_v38 = vmov 0.0  }
 0x3c6   : > { %2403 = vmatpush1.msra.mxu0 %v2348_v36  ;;  %v2242_v29 = vadd.f32 %v2226_v9, %v8553_v62  ;;  %v2158_v15 = vadd.f32 0.008333334, %v2142_v6  ;;  %vm2322_vm8 = vcmp.gt.f32.partialorder %v2306_v0, 0.5  ;;  %v2638_v62 = vcombine.high %v8789_v21, %v8789_v21 }
 0x3c7   : > { %7081 = vmatmul.mubr.msk.f32.vlgmr.msra.gmra.mxu0 %vm1067_vm15, %v358_v63  ;;  %v2207_v7 = vmul.f32 %v2191_v43, %v8732_v49  ;;  %7083 = vmatprep.subr.msk.mxu0 %vm412_vm0, %v2653_v47  ;;  %v2303_v54 = vsub.f32 %v12167_v50, %v2287_v16  ;;  %v2286_v46 = vmul.f32 2.0, %v2270_v8 }
 0x3c8   : > { %v2338_v61 = vsub.f32 0.0, %v2242_v29  ;;  %v2174_v10 = vmul.f32 %v2158_v15, %v8728_v1  ;;  %7084 = vmatpush1.msk.msra.mxu0 %vm412_vm0, %v2645_v13  ;;  %2727 = vmatprep.mubr.f32.mxu0 %v12172_v38  ;;  %v2652_v21 = vrot.slane %v2638_v62, %v12169_v14 }
 0x3c9   : > { %v2223_v27 = vmul.f32 %v2207_v7, %v8544_v42  ;;  %vm2319_vm9 = vcmp.gt.f32.partialorder %v2303_v54, 0.5 }
 0x3ca   : > { %v2354_v24 = vsel %vm2322_vm8, %v2338_v61, %v2242_v29  ;;  %v2190_v49 = vadd.f32 -0.16666667, %v2174_v10  ;;  %v2654_v56 = vcombine.high %v2652_v21, %v2652_v21 }
 0x3cb   : > { %2472 = vmatpush1.msra.mxu1 %v2354_v24  ;;  %v2239_v33 = vadd.f32 %v2223_v27, %v8544_v42  ;;  %7085 = vmatmul.mubr.msk.f32.vlgmr.msra.gmra.mxu0 %vm399_vm1, %v7195_v55  ;;  %v2302_v42 = vsub.f32 %v12171_v37, %v2286_v46 }
 0x3cc   : > { %v2206_v48 = vmul.f32 %v2190_v49, %v8728_v1  ;;  %2733 = vmatprep.mubr.f32.mxu0 %v12172_v38 }
 0x3cd   : > { %v2335_v40 = vsub.f32 0.0, %v2239_v33  ;;  %vm2318_vm10 = vcmp.gt.f32.partialorder %v2302_v42, 0.5 }
 0x3ce   : > { %v2222_v22 = vmul.f32 %v2206_v48, %v8501_v32  ;;  %v12175_v48 = vld [vmem:[#allocation6_spill] sm:$0xff] }
 0x3cf   : > { %v2351_v19 = vsel %vm2319_vm9, %v2335_v40, %v2239_v33  ;;  %7086 = vmatmul.mubr.msk.f32.gmra.mxu0 %vm399_vm1, %v7196_v59 }
 0x3d0   : > { %2473 = vmatprep.subr.mxu1 %v2351_v19  ;;  %v2238_v1 = vadd.f32 %v2222_v22, %v8501_v32  ;;  %2739 = vmatprep.mubr.f32.mxu0 %v12172_v38  ;;  %v7198_v32 = vld [vmem:[%s11903_s1 + $0x18] sm:$0xff] }
 0x3d2   : > { %v2334_v41 = vsub.f32 0.0, %v2238_v1 }
 0x3d3   : > { %7087 = vmatmul.mubr.msk.f32.gmra.mxu0 %vm399_vm1, %v7197_v17 }
 0x3d4   : > { %v2350_v44 = vsel %vm2318_vm10, %v2334_v41, %v2238_v1  ;;  %2745 = vmatprep.mubr.f32.mxu0 %v12172_v38 }
 0x3d5   : > { %2474 = vmatpush1.msra.mxu1 %v2350_v44 }
 0x3d6   : > { %7082 = vmatmul.mubr.msk.f32.vlgmr.msra.gmra.mxu1 %vm1067_vm15, %v358_v63  ;;  %7089 = vmatprep.subr.msk.mxu1 %vm412_vm0, %v2654_v56 }
 0x3d7   : > { %7090 = vmatpush1.msk.msra.mxu1 %vm412_vm0, %v2652_v21  ;;  %2816 = vmatprep.mubr.f32.mxu1 %v12172_v38 }
 0x3d8   : > { %7088 = vmatmul.mubr.msk.f32.gmra.mxu0 %vm399_vm1, %v7198_v32 }
 0x3d9   : > { %3353 = vmatprep.mubr.f32.mxu0 %v12172_v38 }
 0x3da   : > { %7091 = vmatmul.mubr.msk.f32.vlgmr.msra.gmra.mxu1 %vm399_vm1, %v7195_v55 }
 0x3db   : > { %2822 = vmatprep.mubr.f32.mxu1 %v12172_v38 }
 0x3de   : > { %7092 = vmatmul.mubr.msk.f32.gmra.mxu1 %vm399_vm1, %v7196_v59 }
 0x3df   : > { %2828 = vmatprep.mubr.f32.mxu1 %v12172_v38 }
 0x3e2   : > { %7093 = vmatmul.mubr.msk.f32.gmra.mxu1 %vm399_vm1, %v7197_v17 }
 0x3e3   : > { %2834 = vmatprep.mubr.f32.mxu1 %v12172_v38 }
 0x3e6   : > { %7094 = vmatmul.mubr.msk.f32.gmra.mxu1 %vm399_vm1, %v7198_v32 }
 0x3e7   : > { %3442 = vmatprep.mubr.f32.mxu1 %v12172_v38 }
 0x487   : > { %v2438_v60 = vpop.f32.mrf.mxu0 }
 0x488   : > { %v2439_v45 = vadd.f32 %v2438_v60, %v8862_v18 }
 0x489   : > { %v2440_v50 = vpop.f32.mrf.mxu0 }
 0x48a   : > { %v2514_v20 = vmul.f32 0.31830987, %v2439_v45  ;;  %v2441_v26 = vadd.f32 %v2440_v50, %v8862_v18 }
 0x48b   : > { %v2729_v39 = vpop.f32.mrf.mxu0 }
 0x48c   : > { %v2518_v23 = vadd.f32 0.5, %v2514_v20  ;;  %v2515_v58 = vmul.f32 0.31830987, %v2441_v26  ;;  %v8867_v13 = vadd.f32 %v2729_v39, %v12174_v2 }
 0x48d   : > { %v2731_v3 = vpop.f32.mrf.mxu0 }
 0x48e   : > { %v8869_v52 = vfloor.f32 %v2518_v23  ;;  %v2519_v5 = vadd.f32 0.5, %v2515_v58  ;;  %v2841_v28 = vmul.f32 0.31830987, %v8867_v13  ;;  %v8874_v34 = vadd.f32 %v2731_v3, %v12174_v2 }
 0x48f   : > { %v2735_v63 = vpop.f32.mrf.mxu0 }
 0x490   : > { %v2526_v51 = vmul.f32 3.140625, %v8869_v52  ;;  %v8876_v11 = vfloor.f32 %v2519_v5  ;;  %v2534_v35 = vmul.f32 0.00096702576, %v8869_v52  ;;  %v2598_v53 = vmul.f32 0.5, %v8869_v52 }
 0x491   : > { %v2857_v25 = vadd.f32 0.5, %v2841_v28  ;;  %v2542_v31 = vmul.f32 6.277114e-07, %v8869_v52  ;;  %v2842_v30 = vmul.f32 0.31830987, %v8874_v34  ;;  %v2737_v54 = vpop.f32.mrf.mxu0  ;;  %v8903_v40 = vadd.f32 %v2735_v63, %v12175_v48 }
 0x492   : > { %v2530_v57 = vsub.f32 %v2439_v45, %v2526_v51  ;;  %v2527_v37 = vmul.f32 3.140625, %v8876_v11  ;;  %v2599_v12 = vmul.f32 0.5, %v8876_v11  ;;  %v2535_v9 = vmul.f32 0.00096702576, %v8876_v11 }
 0x493   : > { %v2602_v36 = vfloor.f32 %v2598_v53  ;;  %v8887_v43 = vfloor.f32 %v2857_v25  ;;  %v2543_v16 = vmul.f32 6.277114e-07, %v8876_v11  ;;  %v2858_v10 = vadd.f32 0.5, %v2842_v30 }
 0x494   : > { %v2538_v4 = vsub.f32 %v2530_v57, %v2534_v35  ;;  %v2531_v47 = vsub.f32 %v2441_v26, %v2527_v37  ;;  %v2603_v8 = vfloor.f32 %v2599_v12  ;;  %v8914_v41 = vadd.f32 %v2737_v54, %v12175_v48 }
 0x495   : > { %v8899_v33 = vmul.f32 2.0, %v2602_v36  ;;  %v2889_v46 = vmul.f32 3.140625, %v8887_v43  ;;  %v8911_v1 = vfloor.f32 %v2858_v10  ;;  %v2845_v20 = vmul.f32 0.31830987, %v8903_v40 }
 0x496   : > { %v8885_v6 = vsub.f32 %v2538_v4, %v2542_v31  ;;  %v2509_v0 = vpop.f32.mrf.mxu1  ;;  %v2539_v29 = vsub.f32 %v2531_v47, %v2535_v9  ;;  %v8909_v59 = vmul.f32 2.0, %v2603_v8  ;;  %v2921_v23 = vmul.f32 0.00096702576, %v8887_v43 }
 0x497   : > { %v2510_v15 = vadd.f32 %v2509_v0, %v8862_v18  ;;  %v2610_v45 = vsub.f32 %v8869_v52, %v8899_v33  ;;  %v2905_v50 = vsub.f32 %v8867_v13, %v2889_v46  ;;  %v2953_v58 = vmul.f32 6.277114e-07, %v8887_v43 }
 0x498   : > { %v8893_v7 = vmul.f32 %v8885_v6, %v8885_v6  ;;  %v2511_v61 = vpop.f32.mrf.mxu1  ;;  %v8895_v27 = vsub.f32 %v2539_v29, %v2543_v16  ;;  %v2611_v5 = vsub.f32 %v8876_v11, %v8909_v59  ;;  %v2890_v51 = vmul.f32 3.140625, %v8911_v1 }
 0x499   : > { %v2516_v62 = vmul.f32 0.31830987, %v2510_v15  ;;  %v2512_v24 = vadd.f32 %v2511_v61, %v8862_v18  ;;  %v2937_v4 = vsub.f32 %v2905_v50, %v2921_v23  ;;  %v2861_v30 = vadd.f32 0.5, %v2845_v20 }
 0x49a   : > { %v2554_v49 = vmul.f32 -2.5052108e-08, %v8893_v7  ;;  %v2818_v55 = vpop.f32.mrf.mxu1  ;;  %v8907_v22 = vmul.f32 %v8895_v27, %v8895_v27  ;;  %v2906_v16 = vsub.f32 %v8874_v34, %v2890_v51  ;;  %vm8976_vm11 = vcmp.gt.f32.partialorder %v2610_v45, 0.5 }
 0x49b   : > { %v2520_v21 = vadd.f32 0.5, %v2516_v62  ;;  %v2517_v19 = vmul.f32 0.31830987, %v2512_v24  ;;  %v8920_v32 = vadd.f32 %v2818_v55, %v12174_v2  ;;  %v8955_v33 = vfloor.f32 %v2861_v30 }
 0x49c   : > { %v2558_v42 = vadd.f32 2.7557319e-06, %v2554_v49  ;;  %v2555_v56 = vmul.f32 -2.5052108e-08, %v8907_v22  ;;  %v2922_v49 = vmul.f32 0.00096702576, %v8911_v1  ;;  %v8971_v20 = vsub.f32 %v2937_v4, %v2953_v58 }
 0x49d   : > { %v8917_v17 = vfloor.f32 %v2520_v21  ;;  %v2521_v44 = vadd.f32 0.5, %v2517_v19  ;;  %v2843_v35 = vmul.f32 0.31830987, %v8920_v32  ;;  %v2893_v51 = vmul.f32 3.140625, %v8955_v33 }
 0x49e   : > { %v2562_v60 = vmul.f32 %v2558_v42, %v8893_v7  ;;  %v2559_v26 = vadd.f32 2.7557319e-06, %v2555_v56  ;;  %v2938_v59 = vsub.f32 %v2906_v16, %v2922_v49  ;;  %v2846_v56 = vmul.f32 0.31830987, %v8914_v41  ;;  %12177 = vst [vmem:[#allocation14_spill] sm:$0xff] %v8971_v20 }
 0x49f   : > { %v2528_v39 = vmul.f32 3.140625, %v8917_v17  ;;  %v8932_v28 = vfloor.f32 %v2521_v44  ;;  %v2536_v57 = vmul.f32 0.00096702576, %v8917_v17  ;;  %v2600_v25 = vmul.f32 0.5, %v8917_v17 }
 0x4a0   : > { %v2566_v3 = vadd.f32 -0.0001984127, %v2562_v60  ;;  %v2563_v52 = vmul.f32 %v2559_v26, %v8907_v22  ;;  %v2544_v12 = vmul.f32 6.277114e-07, %v8917_v17  ;;  %v2820_v26 = vpop.f32.mrf.mxu1  ;;  %vm8980_vm12 = vcmp.gt.f32.partialorder %v2611_v5, 0.5 }
 0x4a1   : > { %v2532_v13 = vsub.f32 %v2510_v15, %v2528_v39  ;;  %v2529_v37 = vmul.f32 3.140625, %v8932_v28  ;;  %v2537_v63 = vmul.f32 0.00096702576, %v8932_v28  ;;  %v2601_v36 = vmul.f32 0.5, %v8932_v28 }
 0x4a2   : > { %v2570_v53 = vmul.f32 %v2566_v3, %v8893_v7  ;;  %v2567_v31 = vadd.f32 -0.0001984127, %v2563_v52  ;;  %v2859_v15 = vadd.f32 0.5, %v2843_v35  ;;  %v2604_v61 = vfloor.f32 %v2600_v25 }
 0x4a3   : > { %v2540_v11 = vsub.f32 %v2532_v13, %v2536_v57  ;;  %v2533_v9 = vsub.f32 %v2512_v24, %v2529_v37  ;;  %v2545_v62 = vmul.f32 6.277114e-07, %v8932_v28  ;;  %v2605_v34 = vfloor.f32 %v2601_v36 }
 0x4a4   : > { %v2574_v47 = vadd.f32 0.008333334, %v2570_v53  ;;  %v2571_v0 = vmul.f32 %v2567_v31, %v8907_v22  ;;  %v8959_v21 = vfloor.f32 %v2859_v15  ;;  %v8965_v60 = vmul.f32 2.0, %v2604_v61  ;;  %v2741_v61 = vpop.f32.mrf.mxu0 }
 0x4a5   : > { %v8945_v29 = vsub.f32 %v2540_v11, %v2544_v12  ;;  %v2541_v10 = vsub.f32 %v2533_v9, %v2537_v63  ;;  %v2954_v3 = vmul.f32 6.277114e-07, %v8911_v1  ;;  %v8985_v57 = vmul.f32 2.0, %v2605_v34 }
 0x4a6   : > { %v2578_v8 = vmul.f32 %v2574_v47, %v8893_v7  ;;  %v2575_v54 = vadd.f32 0.008333334, %v2571_v0  ;;  %12176 = vst [vmem:[#allocation20_spill] sm:$0xff] %v8959_v21  ;;  %v2891_v35 = vmul.f32 3.140625, %v8959_v21  ;;  %v8993_v45 = vadd.f32 %v2820_v26, %v12174_v2 }
 0x4a7   : > { %v8952_v24 = vmul.f32 %v8945_v29, %v8945_v29  ;;  %v8957_v55 = vsub.f32 %v2541_v10, %v2545_v62  ;;  %v8990_v37 = vsub.f32 %v2938_v59, %v2954_v3  ;;  %v2612_v4 = vsub.f32 %v8917_v17, %v8965_v60 }
 0x4a8   : > { %v2582_v46 = vadd.f32 -0.16666667, %v2578_v8  ;;  %v2579_v19 = vmul.f32 %v2575_v54, %v8907_v22  ;;  %v2862_v11 = vadd.f32 0.5, %v2846_v56  ;;  %v2844_v47 = vmul.f32 0.31830987, %v8993_v45  ;;  %v2824_v8 = vpop.f32.mrf.mxu1 }
 0x4a9   : > { %v2556_v42 = vmul.f32 -2.5052108e-08, %v8952_v24  ;;  %v8969_v50 = vmul.f32 %v8957_v55, %v8957_v55  ;;  %v2613_v63 = vsub.f32 %v8932_v28, %v8985_v57  ;;  %v2923_v62 = vmul.f32 0.00096702576, %v8959_v21 }
 0x4aa   : > { %v2586_v44 = vmul.f32 %v2582_v46, %v8893_v7  ;;  %v2583_v39 = vadd.f32 -0.16666667, %v2579_v19  ;;  %v9006_v36 = vfloor.f32 %v2862_v11  ;;  %v2955_v54 = vmul.f32 6.277114e-07, %v8959_v21  ;;  %v2826_v3 = vpop.f32.mrf.mxu1 }
 0x4ab   : > { %v2560_v23 = vadd.f32 2.7557319e-06, %v2556_v42  ;;  %v2557_v58 = vmul.f32 -2.5052108e-08, %v8969_v50  ;;  %v2925_v34 = vmul.f32 0.00096702576, %v8955_v33  ;;  %v2957_v59 = vmul.f32 6.277114e-07, %v8955_v33 }
 0x4ac   : > { %v2590_v52 = vmul.f32 %v2586_v44, %v8885_v6  ;;  %v2587_v53 = vmul.f32 %v2583_v39, %v8907_v22  ;;  %v2909_v22 = vsub.f32 %v8903_v40, %v2893_v51  ;;  %v2860_v40 = vadd.f32 0.5, %v2844_v47  ;;  %v2743_v51 = vpop.f32.mrf.mxu0 }
 0x4ad   : > { %v2564_v25 = vmul.f32 %v2560_v23, %v8952_v24  ;;  %v2561_v31 = vadd.f32 2.7557319e-06, %v2557_v58  ;;  %v9023_v56 = vadd.f32 %v2824_v8, %v12175_v48  ;;  %vm2616_vm13 = vcmp.gt.f32.partialorder %v2612_v4, 0.5 }
 0x4ae   : > { %v2594_v5 = vadd.f32 %v2590_v52, %v8885_v6  ;;  %v2591_v12 = vmul.f32 %v2587_v53, %v8895_v27  ;;  %v2907_v6 = vsub.f32 %v8920_v32, %v2891_v35  ;;  %v2894_v32 = vmul.f32 3.140625, %v9006_v36 }
 0x4af   : > { %v2568_v30 = vadd.f32 -0.0001984127, %v2564_v25  ;;  %v2565_v9 = vmul.f32 %v2561_v31, %v8969_v50  ;;  %v9018_v19 = vfloor.f32 %v2860_v40  ;;  %v2941_v35 = vsub.f32 %v2909_v22, %v2925_v34 }
 0x4b0   : > { %v2618_v0 = vsub.f32 0.0, %v2594_v5  ;;  %v2595_v16 = vadd.f32 %v2591_v12, %v8895_v27  ;;  %v2939_v42 = vsub.f32 %v2907_v6, %v2923_v62  ;;  %v2910_v53 = vsub.f32 %v8914_v41, %v2894_v32  ;;  %v2830_v6 = vpop.f32.mrf.mxu1 }
 0x4b1   : > { %v2572_v15 = vmul.f32 %v2568_v30, %v8952_v24  ;;  %v2569_v10 = vadd.f32 -0.0001984127, %v2565_v9  ;;  %12182 = vst [vmem:[#allocation8_spill] sm:$0xff] %v9018_v19  ;;  %v2892_v23 = vmul.f32 3.140625, %v9018_v19  ;;  %v2847_v7 = vmul.f32 0.31830987, %v9023_v56 }
 0x4b2   : > { %v2619_v49 = vsub.f32 0.0, %v2595_v16  ;;  %v2622_v44 = vsel %vm8976_vm11, %v2618_v0, %v2594_v5  ;;  %v12183_v5 = vld [vmem:[#allocation12_spill] sm:$0xff]  ;;  %v2926_v12 = vmul.f32 0.00096702576, %v9006_v36  ;;  %v9044_v30 = vadd.f32 %v2826_v3, %v12175_v48 }
 0x4b3   : > { %v2576_v46 = vadd.f32 0.008333334, %v2572_v15  ;;  %v2573_v27 = vmul.f32 %v2569_v10, %v8969_v50  ;;  %v2908_v31 = vsub.f32 %v8993_v45, %v2892_v23  ;;  %v9035_v11 = vadd.f32 %v2741_v61, %v12183_v5 }
 0x4b4   : > { %v2623_v26 = vsel %vm8980_vm12, %v2619_v49, %v2595_v16  ;;  %v2744_v41 = vadd.f32 %v2743_v51, %v12183_v5  ;;  %v2924_v22 = vmul.f32 0.00096702576, %v9018_v19  ;;  %v2863_v47 = vadd.f32 0.5, %v2847_v7 }
 0x4b5   : > { %v2580_v39 = vmul.f32 %v2576_v46, %v8952_v24  ;;  %v2630_v52 = vcombine.low %v2622_v44, %v2623_v26  ;;  %v2577_v58 = vadd.f32 0.008333334, %v2573_v27  ;;  %v2849_v9 = vmul.f32 0.31830987, %v9035_v11 }
 0x4b6   : > { %v2942_v16 = vsub.f32 %v2910_v53, %v2926_v12  ;;  %v2848_v15 = vmul.f32 0.31830987, %v9044_v30  ;;  %v2850_v40 = vmul.f32 0.31830987, %v2744_v41  ;;  %v9052_v61 = vsub.f32 %v2939_v42, %v2955_v54  ;;  %v2832_v53 = vpop.f32.mrf.mxu1 }
 0x4b7   : > { %v2584_v25 = vadd.f32 -0.16666667, %v2580_v39  ;;  %2634 = vst [vmem:[%s9038_s17] sm:$0x77] %v2630_v52  ;;  %v2581_v13 = vmul.f32 %v2577_v58, %v8969_v50  ;;  %v2940_v10 = vsub.f32 %v2908_v31, %v2924_v22  ;;  %v2865_v62 = vadd.f32 0.5, %v2849_v9 }
 0x4b8   : > { %12184 = vst [vmem:[#allocation13_spill] sm:$0xff] %v9052_v61  ;;  %v2866_v49 = vadd.f32 0.5, %v2850_v40  ;;  %v9057_v46 = vadd.f32 %v2830_v6, %v12183_v5  ;;  %v2956_v27 = vmul.f32 6.277114e-07, %v9018_v19  ;;  %v9061_v44 = vfloor.f32 %v2863_v47  ;;  %v2836_v6 = vpop.f32.mrf.mxu1  ;;  %v12188_v40 = vld [vmem:[#allocation9_spill] sm:$0xff] }
 0x4b9   : > { %v2588_v45 = vmul.f32 %v2584_v25, %v8952_v24  ;;  %v2585_v0 = vadd.f32 -0.16666667, %v2581_v13  ;;  %v2958_v24 = vmul.f32 6.277114e-07, %v9006_v36  ;;  %v2864_v26 = vadd.f32 0.5, %v2848_v15 }
 0x4ba   : > { %v9066_v42 = vmul.f32 %v8971_v20, %v8971_v20  ;;  %v9072_v3 = vsub.f32 %v2940_v10, %v2956_v27  ;;  %v9074_v51 = vfloor.f32 %v2865_v62  ;;  %v9084_v58 = vmul.f32 %v8990_v37, %v8990_v37 }
 0x4bb   : > { %v2592_v8 = vmul.f32 %v2588_v45, %v8945_v29  ;;  %v2589_v32 = vmul.f32 %v2585_v0, %v8969_v50  ;;  %v9068_v50 = vsub.f32 %v2941_v35, %v2957_v59  ;;  %v9070_v39 = vsub.f32 %v2942_v16, %v2958_v24  ;;  %v2747_v35 = vpop.f32.mrf.mxu0 }
 0x4bc   : > { %12185 = vst [vmem:[#allocation23_spill] sm:$0xff] %v9072_v3  ;;  %v2851_v59 = vmul.f32 0.31830987, %v9057_v46  ;;  %vm2617_vm14 = vcmp.gt.f32.partialorder %v2613_v63, 0.5  ;;  %v9092_v25 = vmul.f32 %v9052_v61, %v9052_v61  ;;  %v2895_v17 = vmul.f32 3.140625, %v9061_v44 }
 0x4bd   : > { %v2596_v34 = vadd.f32 %v2592_v8, %v8945_v29  ;;  %v2593_v54 = vmul.f32 %v2589_v32, %v8957_v55  ;;  %v9076_v29 = vfloor.f32 %v2866_v49  ;;  %v9095_v60 = vfloor.f32 %v2864_v26  ;;  %v2749_v9 = vpop.f32.mrf.mxu0 }
 0x4be   : > { %12186 = vst [vmem:[#allocation24_spill] sm:$0xff] %v9092_v25  ;;  %v9099_v4 = vmul.f32 %v9068_v50, %v9068_v50  ;;  %v9103_v31 = vmul.f32 %v9070_v39, %v9070_v39  ;;  %v9108_v63 = vmul.f32 %v9072_v3, %v9072_v3  ;;  %v2927_v7 = vmul.f32 0.00096702576, %v9061_v44 }
 0x4bf   : > { %v2620_v23 = vsub.f32 0.0, %v2596_v34  ;;  %v2597_v52 = vadd.f32 %v2593_v54, %v8957_v55  ;;  %v2898_v28 = vmul.f32 3.140625, %v9076_v29  ;;  %v2897_v13 = vmul.f32 3.140625, %v9074_v51 }
 0x4c0   : > { %12187 = vst [vmem:[#allocation25_spill] sm:$0xff] %v9108_v63  ;;  %v2930_v22 = vmul.f32 0.00096702576, %v9076_v29  ;;  %v2867_v47 = vadd.f32 0.5, %v2851_v59  ;;  %v2911_v16 = vsub.f32 %v9023_v56, %v2895_v17  ;;  %v2896_v15 = vmul.f32 3.140625, %v9095_v60 }
 0x4c1   : > { %v2621_v55 = vsub.f32 0.0, %v2597_v52  ;;  %v2624_v57 = vsel %vm2616_vm13, %v2620_v23, %v2596_v34  ;;  %v2914_v45 = vsub.f32 %v2744_v41, %v2898_v28  ;;  %v2748_v8 = vadd.f32 %v2747_v35, %v12188_v40 }
 0x4c2   : > { %v2962_v62 = vmul.f32 6.277114e-07, %v9076_v29  ;;  %v9117_v32 = vfloor.f32 %v2867_v47  ;;  %v2833_v24 = vadd.f32 %v2832_v53, %v12183_v5  ;;  %v2929_v41 = vmul.f32 0.00096702576, %v9074_v51 }
 0x4c3   : > { %v2625_v12 = vsel %vm2617_vm14, %v2621_v55, %v2597_v52  ;;  %v2946_v10 = vsub.f32 %v2914_v45, %v2930_v22  ;;  %v2853_v49 = vmul.f32 0.31830987, %v2748_v8  ;;  %v2750_v34 = vadd.f32 %v2749_v9, %v12188_v40  ;;  %v2838_v52 = vpop.f32.mrf.mxu1 }
 0x4c4   : > { %v2631_v0 = vcombine.low %v2624_v57, %v2625_v12  ;;  %v2837_v27 = vadd.f32 %v2836_v6, %v12188_v40  ;;  %v2913_v56 = vsub.f32 %v9035_v11, %v2897_v13  ;;  %v2961_v26 = vmul.f32 6.277114e-07, %v9074_v51 }
 0x4c5   : > { %v9126_v54 = vsub.f32 %v2946_v10, %v2962_v62  ;;  %v2899_v23 = vmul.f32 3.140625, %v9117_v32  ;;  %v9129_v59 = vsub.f32 %v2911_v16, %v2927_v7  ;;  %v2912_v35 = vsub.f32 %v9044_v30, %v2896_v15 }
 0x4c6   : > { %2635 = vst [vmem:[%s9038_s17 + $0x8] sm:$0x77] %v2631_v0  ;;  %v2869_v53 = vadd.f32 0.5, %v2853_v49  ;;  %v2852_v17 = vmul.f32 0.31830987, %v2833_v24  ;;  %v2928_v55 = vmul.f32 0.00096702576, %v9095_v60  ;;  %v2839_v22 = vadd.f32 %v2838_v52, %v12188_v40 }
 0x4c7   : > { %v9134_v28 = vmul.f32 6.277114e-07, %v9095_v60  ;;  %v2854_v57 = vmul.f32 0.31830987, %v2750_v34  ;;  %v2855_v11 = vmul.f32 0.31830987, %v2837_v27  ;;  %v2915_v13 = vsub.f32 %v9057_v46, %v2899_v23 }
 0x4c8   : > { %v9137_v12 = vfloor.f32 %v2869_v53  ;;  %v2868_v45 = vadd.f32 0.5, %v2852_v17  ;;  %v2945_v7 = vsub.f32 %v2913_v56, %v2929_v41  ;;  %v9142_v30 = vmul.f32 %v9126_v54, %v9126_v54 }
 0x4c9   : > { %v2870_v47 = vadd.f32 0.5, %v2854_v57  ;;  %v2871_v9 = vadd.f32 0.5, %v2855_v11  ;;  %v9144_v6 = vsub.f32 %v2912_v35, %v2928_v55  ;;  %v2931_v0 = vmul.f32 0.00096702576, %v9117_v32 }
 0x4ca   : > { %v2901_v16 = vmul.f32 3.140625, %v9137_v12  ;;  %v9148_v15 = vfloor.f32 %v2868_v45  ;;  %v2963_v46 = vmul.f32 6.277114e-07, %v9117_v32  ;;  %v2856_v41 = vmul.f32 0.31830987, %v2839_v22 }
 0x4cb   : > { %v9151_v10 = vfloor.f32 %v2870_v47  ;;  %v9153_v62 = vfloor.f32 %v2871_v9  ;;  %v2947_v49 = vsub.f32 %v2915_v13, %v2931_v0  ;;  %v2933_v23 = vmul.f32 0.00096702576, %v9137_v12 }
 0x4cc   : > { %v2917_v56 = vsub.f32 %v2748_v8, %v2901_v16  ;;  %v2900_v52 = vmul.f32 3.140625, %v9148_v15  ;;  %v2965_v35 = vmul.f32 6.277114e-07, %v9137_v12  ;;  %v2932_v53 = vmul.f32 0.00096702576, %v9148_v15 }
 0x4cd   : > { %v2902_v17 = vmul.f32 3.140625, %v9151_v10  ;;  %v3010_v55 = vmul.f32 -2.5052108e-08, %v9142_v30  ;;  %v2934_v45 = vmul.f32 0.00096702576, %v9151_v10  ;;  %v2903_v47 = vmul.f32 3.140625, %v9153_v62 }
 0x4ce   : > { %v2949_v57 = vsub.f32 %v2917_v56, %v2933_v23  ;;  %v2916_v11 = vsub.f32 %v2833_v24, %v2900_v52  ;;  %v2935_v8 = vmul.f32 0.00096702576, %v9153_v62  ;;  %v2872_v9 = vadd.f32 0.5, %v2856_v41 }
 0x4cf   : > { %v2918_v13 = vsub.f32 %v2750_v34, %v2902_v17  ;;  %v3190_v0 = vmul.f32 0.5, %v9151_v10  ;;  %v2919_v5 = vsub.f32 %v2837_v27, %v2903_v47  ;;  %v3189_v48 = vmul.f32 0.5, %v9137_v12 }
 0x4d0   : > { %v9165_v16 = vsub.f32 %v2949_v57, %v2965_v35  ;;  %v2948_v40 = vsub.f32 %v2916_v11, %v2932_v53  ;;  %v2966_v56 = vmul.f32 6.277114e-07, %v9151_v10  ;;  %v9169_v24 = vfloor.f32 %v2872_v9 }
 0x4d1   : > { %v2950_v2 = vsub.f32 %v2918_v13, %v2934_v45  ;;  %v3026_v23 = vadd.f32 2.7557319e-06, %v3010_v55  ;;  %v9171_v52 = vsub.f32 %v2945_v7, %v2961_v26  ;;  %v2964_v41 = vmul.f32 6.277114e-07, %v9148_v15 }
 0x4d2   : > { %v9175_v34 = vmul.f32 %v9165_v16, %v9165_v16  ;;  %v2951_v35 = vsub.f32 %v2919_v5, %v2935_v8  ;;  %v9178_v17 = vsub.f32 %v2947_v49, %v2963_v46  ;;  %v2967_v53 = vmul.f32 6.277114e-07, %v9153_v62 }
 0x4d3   : > { %v9180_v27 = vsub.f32 %v2950_v2, %v2966_v56  ;;  %v2904_v57 = vmul.f32 3.140625, %v9169_v24  ;;  %v9184_v11 = vsub.f32 %v2948_v40, %v2964_v41  ;;  %v3206_v55 = vfloor.f32 %v3190_v0 }
 0x4d4   : > { %v3013_v26 = vmul.f32 -2.5052108e-08, %v9175_v34  ;;  %v3205_v7 = vfloor.f32 %v3189_v48  ;;  %v2936_v5 = vmul.f32 0.00096702576, %v9169_v24  ;;  %v3042_v2 = vmul.f32 %v3026_v23, %v9142_v30 }
 0x4d5   : > { %v9189_v45 = vmul.f32 %v9180_v27, %v9180_v27  ;;  %v2920_v47 = vsub.f32 %v2839_v22, %v2904_v57  ;;  %v9195_v46 = vmul.f32 %v9171_v52, %v9171_v52  ;;  %v9197_v49 = vsub.f32 %v2951_v35, %v2967_v53 }
 0x4d6   : > { %v3029_v40 = vadd.f32 2.7557319e-06, %v3013_v26  ;;  %v3186_v13 = vmul.f32 0.5, %v9076_v29  ;;  %v2968_v48 = vmul.f32 6.277114e-07, %v9169_v24  ;;  %v3058_v0 = vadd.f32 -0.0001984127, %v3042_v2 }
 0x4d7   : > { %v2952_v8 = vsub.f32 %v2920_v47, %v2936_v5  ;;  %v3014_v9 = vmul.f32 -2.5052108e-08, %v9189_v45  ;;  %v9204_v22 = vmul.f32 %v9178_v17, %v9178_v17  ;;  %v9208_v56 = vmul.f32 %v9184_v11, %v9184_v11 }
 0x4d8   : > { %v3222_v23 = vmul.f32 2.0, %v3206_v55  ;;  %v3045_v41 = vmul.f32 %v3029_v40, %v9175_v34  ;;  %v3221_v57 = vmul.f32 2.0, %v3205_v7  ;;  %v3074_v26 = vmul.f32 %v3058_v0, %v9142_v30 }
 0x4d9   : > { %v9211_v35 = vsub.f32 %v2952_v8, %v2968_v48  ;;  %v3030_v53 = vadd.f32 2.7557319e-06, %v3014_v9  ;;  %v9216_v47 = vmul.f32 %v9197_v49, %v9197_v49  ;;  %v3202_v2 = vfloor.f32 %v3186_v13 }
 0x4da   : > { %v3061_v5 = vadd.f32 -0.0001984127, %v3045_v41  ;;  %v3009_v18 = vmul.f32 -2.5052108e-08, %v9195_v46  ;;  %v3090_v40 = vadd.f32 0.008333334, %v3074_v26  ;;  %v3238_v7 = vsub.f32 %v9151_v10, %v3222_v23 }
 0x4db   : > { %v9221_v14 = vmul.f32 %v9211_v35, %v9211_v35  ;;  %v3046_v55 = vmul.f32 %v3030_v53, %v9189_v45  ;;  %v3185_v8 = vmul.f32 0.5, %v9074_v51  ;;  %v3192_v9 = vmul.f32 0.5, %v9169_v24 }
 0x4dc   : > { %v3077_v48 = vmul.f32 %v3061_v5, %v9175_v34  ;;  %v3025_v0 = vadd.f32 2.7557319e-06, %v3009_v18  ;;  %v3106_v13 = vmul.f32 %v3090_v40, %v9142_v30  ;;  %v3237_v21 = vsub.f32 %v9137_v12, %v3221_v57 }
 0x4dd   : > { %v3062_v41 = vadd.f32 -0.0001984127, %v3046_v55  ;;  %v3016_v61 = vmul.f32 -2.5052108e-08, %v9221_v14  ;;  %v3201_v3 = vfloor.f32 %v3185_v8  ;;  %v3015_v26 = vmul.f32 -2.5052108e-08, %v9216_v47 }
 0x4de   : > { %v3093_v38 = vadd.f32 0.008333334, %v3077_v48  ;;  %v3041_v53 = vmul.f32 %v3025_v0, %v9195_v46  ;;  %v3122_v23 = vadd.f32 -0.16666667, %v3106_v13  ;;  %v3218_v5 = vmul.f32 2.0, %v3202_v2 }
 0x4df   : > { %v3078_v10 = vmul.f32 %v3062_v41, %v9189_v45  ;;  %v3032_v20 = vadd.f32 2.7557319e-06, %v3016_v61  ;;  %v3208_v55 = vfloor.f32 %v3192_v9  ;;  %v3031_v40 = vadd.f32 2.7557319e-06, %v3015_v26 }
 0x4e0   : > { %v3109_v18 = vmul.f32 %v3093_v38, %v9175_v34  ;;  %v3057_v19 = vadd.f32 -0.0001984127, %v3041_v53  ;;  %v3138_v8 = vmul.f32 %v3122_v23, %v9142_v30  ;;  %v3217_v12 = vmul.f32 2.0, %v3201_v3 }
 0x4e1   : > { %v3094_v25 = vadd.f32 0.008333334, %v3078_v10  ;;  %v3048_v48 = vmul.f32 %v3032_v20, %v9221_v14  ;;  %v3047_v63 = vmul.f32 %v3031_v40, %v9216_v47  ;;  %v3191_v41 = vmul.f32 0.5, %v9153_v62 }
 0x4e2   : > { %v3125_v57 = vadd.f32 -0.16666667, %v3109_v18  ;;  %v3073_v0 = vmul.f32 %v3057_v19, %v9195_v46  ;;  %v3154_v38 = vmul.f32 %v3138_v8, %v9126_v54  ;;  %v3234_v2 = vsub.f32 %v9076_v29, %v3218_v5 }
 0x4e3   : > { %v3110_v61 = vmul.f32 %v3094_v25, %v9189_v45  ;;  %v3064_v9 = vadd.f32 -0.0001984127, %v3048_v48  ;;  %v3224_v30 = vmul.f32 2.0, %v3208_v55  ;;  %v3063_v20 = vadd.f32 -0.0001984127, %v3047_v63 }
 0x4e4   : > { %v3141_v13 = vmul.f32 %v3125_v57, %v9175_v34  ;;  %v3089_v53 = vadd.f32 0.008333334, %v3073_v0  ;;  %vm9244_vm2 = vcmp.gt.f32.partialorder %v3237_v21, 0.5  ;;  %v3207_v10 = vfloor.f32 %v3191_v41 }
 0x4e5   : > { %v3126_v3 = vadd.f32 -0.16666667, %v3110_v61  ;;  %v3080_v19 = vmul.f32 %v3064_v9, %v9221_v14  ;;  %v3006_v25 = vmul.f32 -2.5052108e-08, %v9103_v31  ;;  %vm9250_vm3 = vcmp.gt.f32.partialorder %v3238_v7, 0.5 }
 0x4e6   : > { %v3157_v29 = vmul.f32 %v3141_v13, %v9165_v16  ;;  %v3105_v34 = vmul.f32 %v3089_v53, %v9195_v46  ;;  %v3233_v63 = vsub.f32 %v9074_v51, %v3217_v12  ;;  %v3079_v21 = vmul.f32 %v3063_v20, %v9216_v47 }
 0x4e7   : > { %v3142_v5 = vmul.f32 %v3126_v3, %v9189_v45  ;;  %v3170_v18 = vadd.f32 %v3154_v38, %v9126_v54  ;;  %v3096_v55 = vadd.f32 0.008333334, %v3080_v19  ;;  %v3022_v40 = vadd.f32 2.7557319e-06, %v3006_v25 }
 0x4e8   : > { %v3173_v8 = vadd.f32 %v3157_v29, %v9165_v16  ;;  %vm9261_vm4 = vcmp.gt.f32.partialorder %v3234_v2, 0.5  ;;  %v3240_v48 = vsub.f32 %v9169_v24, %v3224_v30  ;;  %v3121_v57 = vadd.f32 -0.16666667, %v3105_v34 }
 0x4e9   : > { %v3095_v0 = vadd.f32 0.008333334, %v3079_v21  ;;  %v3158_v51 = vmul.f32 %v3142_v5, %v9180_v27  ;;  %v3112_v12 = vmul.f32 %v3096_v55, %v9221_v14  ;;  %v3223_v41 = vmul.f32 2.0, %v3207_v10 }
 0x4ea   : > { %v3038_v45 = vmul.f32 %v3022_v40, %v9103_v31  ;;  %v3269_v54 = vsub.f32 0.0, %v3173_v8  ;;  %v3137_v61 = vmul.f32 %v3121_v57, %v9195_v46  ;;  %vm9270_vm5 = vcmp.gt.f32.partialorder %v3233_v63, 0.5 }
 0x4eb   : > { %v3111_v38 = vmul.f32 %v3095_v0, %v9216_v47  ;;  %v3174_v24 = vadd.f32 %v3158_v51, %v9180_v27  ;;  %v3266_v2 = vsub.f32 0.0, %v3170_v18  ;;  %v3128_v9 = vadd.f32 -0.16666667, %v3112_v12 }
 0x4ec   : > { %v3054_v13 = vadd.f32 -0.0001984127, %v3038_v45  ;;  %vm9276_vm6 = vcmp.gt.f32.partialorder %v3240_v48, 0.5  ;;  %v3153_v53 = vmul.f32 %v3137_v61, %v9171_v52  ;;  %v3182_v46 = vmul.f32 0.5, %v9006_v36 }
 0x4ed   : > { %v3127_v20 = vadd.f32 -0.16666667, %v3111_v38  ;;  %v3012_v3 = vmul.f32 -2.5052108e-08, %v9208_v56  ;;  %v3270_v19 = vsub.f32 0.0, %v3174_v24  ;;  %v3144_v10 = vmul.f32 %v3128_v9, %v9221_v14 }
 0x4ee   : > { %v3239_v25 = vsub.f32 %v9153_v62, %v3223_v41  ;;  %v3070_v27 = vmul.f32 %v3054_v13, %v9103_v31  ;;  %v3285_v29 = vsel %vm9244_vm2, %v3269_v54, %v3173_v8  ;;  %v3169_v34 = vadd.f32 %v3153_v53, %v9171_v52 }
 0x4ef   : > { %v3143_v63 = vmul.f32 %v3127_v20, %v9216_v47  ;;  %v3028_v21 = vadd.f32 2.7557319e-06, %v3012_v3  ;;  %v3286_v5 = vsel %vm9250_vm3, %v3270_v19, %v3174_v24  ;;  %v3160_v55 = vmul.f32 %v3144_v10, %v9211_v35 }
 0x4f0   : > { %v3086_v40 = vadd.f32 0.008333334, %v3070_v27  ;;  %v3188_v14 = vmul.f32 0.5, %v9148_v15  ;;  %3313 = vmatprep.subr.mxu0 %v3286_v5  ;;  %v3265_v62 = vsub.f32 0.0, %v3169_v34  ;;  %v3198_v57 = vfloor.f32 %v3182_v46 }
 0x4f1   : > { %v3159_v48 = vmul.f32 %v3143_v63, %v9197_v49  ;;  %v3044_v26 = vmul.f32 %v3028_v21, %v9208_v56  ;;  %3314 = vmatpush1.msra.mxu0 %v3285_v29  ;;  %v3282_v52 = vsel %vm9261_vm4, %v3266_v2, %v3170_v18  ;;  %v3176_v47 = vadd.f32 %v3160_v55, %v9211_v35 }
 0x4f2   : > { %v3102_v23 = vmul.f32 %v3086_v40, %v9103_v31  ;;  %v3005_v8 = vmul.f32 -2.5052108e-08, %v9099_v4  ;;  %3315 = vmatprep.subr.mxu0 %v3282_v52  ;;  %v3281_v0 = vsel %vm9270_vm5, %v3265_v62, %v3169_v34  ;;  %vm9304_vm7 = vcmp.gt.f32.partialorder %v3239_v25, 0.5 }
 0x4f3   : > { %v3175_v51 = vadd.f32 %v3159_v48, %v9197_v49  ;;  %v3060_v41 = vadd.f32 -0.0001984127, %v3044_v26  ;;  %v3272_v45 = vsub.f32 0.0, %v3176_v47  ;;  %3316 = vmatpush1.msra.mxu0 %v3281_v0  ;;  %v3204_v7 = vfloor.f32 %v3188_v14 }
 0x4f4   : > { %v3118_v18 = vadd.f32 -0.16666667, %v3102_v23  ;;  %v3021_v35 = vadd.f32 2.7557319e-06, %v3005_v8  ;;  %v3214_v61 = vmul.f32 2.0, %v3198_v57  ;;  %v3181_v24 = vmul.f32 0.5, %v8955_v33 }
 0x4f5   : > { %v3271_v54 = vsub.f32 0.0, %v3175_v51  ;;  %v3076_v38 = vmul.f32 %v3060_v41, %v9208_v56  ;;  %v3288_v16 = vsel %vm9276_vm6, %v3272_v45, %v3176_v47  ;;  %v3011_v9 = vmul.f32 -2.5052108e-08, %v9204_v22 }
 0x4f6   : > { %v3134_v49 = vmul.f32 %v3118_v18, %v9103_v31  ;;  %v3037_v2 = vmul.f32 %v3021_v35, %v9099_v4  ;;  %v2959_v13 = vmul.f32 6.277114e-07, %v9061_v44  ;;  %v9318_v53 = vsub.f32 %v9144_v6, %v9134_v28  ;;  %3402 = vmatprep.subr.mxu1 %v3288_v16 }
 0x4f7   : > { %v3287_v20 = vsel %vm9304_vm7, %v3271_v54, %v3175_v51  ;;  %v3092_v46 = vadd.f32 0.008333334, %v3076_v38  ;;  %v3220_v3 = vmul.f32 2.0, %v3204_v7  ;;  %v3027_v19 = vadd.f32 2.7557319e-06, %v3011_v9 }
 0x4f8   : > { %3403 = vmatpush1.msra.mxu1 %v3287_v20  ;;  %v3150_v30 = vmul.f32 %v3134_v49, %v9070_v39  ;;  %v3053_v31 = vadd.f32 -0.0001984127, %v3037_v2  ;;  %v3230_v10 = vsub.f32 %v9006_v36, %v3214_v61  ;;  %v3197_v27 = vfloor.f32 %v3181_v24 }
 0x4f9   : > { %v3108_v25 = vmul.f32 %v3092_v46, %v9208_v56  ;;  %v3002_v29 = vmul.f32 -2.5052108e-08, %v9084_v58  ;;  %v9327_v28 = vsub.f32 %v9129_v59, %v2959_v13  ;;  %v3043_v63 = vmul.f32 %v3027_v19, %v9204_v22 }
 0x4fa   : > { %v3166_v6 = vadd.f32 %v3150_v30, %v9070_v39  ;;  %v3069_v34 = vmul.f32 %v3053_v31, %v9099_v4  ;;  %v9334_v21 = vmul.f32 %v9318_v53, %v9318_v53  ;;  %v3187_v36 = vmul.f32 0.5, %v9117_v32 }
 0x4fb   : > { %v3124_v5 = vadd.f32 -0.16666667, %v3108_v25  ;;  %v3018_v55 = vadd.f32 2.7557319e-06, %v3002_v29  ;;  %v3236_v14 = vsub.f32 %v9148_v15, %v3220_v3  ;;  %v3059_v59 = vadd.f32 -0.0001984127, %v3043_v63 }
 0x4fc   : > { %v3262_v40 = vsub.f32 0.0, %v3166_v6  ;;  %v3085_v62 = vadd.f32 0.008333334, %v3069_v34  ;;  %vm3246_vm8 = vcmp.gt.f32.partialorder %v3230_v10, 0.5  ;;  %v3213_v48 = vmul.f32 2.0, %v3197_v27 }
 0x4fd   : > { %v3140_v39 = vmul.f32 %v3124_v5, %v9208_v56  ;;  %v3034_v57 = vmul.f32 %v3018_v55, %v9084_v58  ;;  %v3075_v47 = vmul.f32 %v3059_v59, %v9204_v22  ;;  %v3178_v23 = vmul.f32 0.5, %v8911_v1 }
 0x4fe   : > { %v3278_v26 = vsel %vm3246_vm8, %v3262_v40, %v3166_v6  ;;  %v3101_v52 = vmul.f32 %v3085_v62, %v9099_v4  ;;  %v3203_v0 = vfloor.f32 %v3187_v36  ;;  %v3008_v51 = vmul.f32 -2.5052108e-08, %v9334_v21 }
 0x4ff   : > { %3317 = vmatprep.subr.mxu0 %v3278_v26  ;;  %v3156_v8 = vmul.f32 %v3140_v39, %v9184_v11  ;;  %v3050_v15 = vadd.f32 -0.0001984127, %v3034_v57  ;;  %v9347_v56 = vmul.f32 %v9327_v28, %v9327_v28  ;;  %vm9349_vm9 = vcmp.gt.f32.partialorder %v3236_v14, 0.5 }
 0x500   : > { %v3117_v41 = vadd.f32 -0.16666667, %v3101_v52  ;;  %v3091_v45 = vadd.f32 0.008333334, %v3075_v47  ;;  %v3229_v7 = vsub.f32 %v8955_v33, %v3213_v48  ;;  %v3024_v54 = vadd.f32 2.7557319e-06, %v3008_v51 }
 0x501   : > { %v3172_v18 = vadd.f32 %v3156_v8, %v9184_v11  ;;  %v3066_v35 = vmul.f32 %v3050_v15, %v9084_v58  ;;  %v3194_v24 = vfloor.f32 %v3178_v23  ;;  %v3001_v16 = vmul.f32 -2.5052108e-08, %v9066_v42  ;;  %v12205_v8 = vld [vmem:[#allocation25_spill] sm:$0xff] }
 0x502   : > { %v3133_v61 = vmul.f32 %v3117_v41, %v9099_v4  ;;  %v3107_v38 = vmul.f32 %v3091_v45, %v9204_v22  ;;  %v3219_v2 = vmul.f32 2.0, %v3203_v0  ;;  %v3040_v13 = vmul.f32 %v3024_v54, %v9334_v21 }
 0x503   : > { %v3268_v49 = vsub.f32 0.0, %v3172_v18  ;;  %v3082_v9 = vadd.f32 0.008333334, %v3066_v35  ;;  %v3184_v33 = vmul.f32 0.5, %v9095_v60  ;;  %v3017_v46 = vadd.f32 2.7557319e-06, %v3001_v16 }
 0x504   : > { %v3149_v20 = vmul.f32 %v3133_v61, %v9068_v50  ;;  %v3123_v11 = vadd.f32 -0.16666667, %v3107_v38  ;;  %vm9364_vm10 = vcmp.gt.f32.partialorder %v3229_v7, 0.5  ;;  %v3056_v31 = vadd.f32 -0.0001984127, %v3040_v13 }
 0x505   : > { %v3284_v30 = vsel %vm9349_vm9, %v3268_v49, %v3172_v18  ;;  %v3098_v3 = vmul.f32 %v3082_v9, %v9084_v58  ;;  %v3210_v25 = vmul.f32 2.0, %v3194_v24  ;;  %v3033_v27 = vmul.f32 %v3017_v46, %v9066_v42  ;;  %v12206_v24 = vld [vmem:[#allocation24_spill] sm:$0xff] }
 0x506   : > { %3404 = vmatprep.subr.mxu1 %v3284_v30  ;;  %v3165_v19 = vadd.f32 %v3149_v20, %v9068_v50  ;;  %v3139_v10 = vmul.f32 %v3123_v11, %v9204_v22  ;;  %v3235_v29 = vsub.f32 %v9117_v32, %v3219_v2  ;;  %v3072_v34 = vmul.f32 %v3056_v31, %v9334_v21  ;;  %v12207_v30 = vld [vmem:[#allocation8_spill] sm:$0xff] }
 0x507   : > { %v3114_v6 = vadd.f32 -0.16666667, %v3098_v3  ;;  %v3007_v63 = vmul.f32 -2.5052108e-08, %v9347_v56  ;;  %v3200_v55 = vfloor.f32 %v3184_v33  ;;  %v3049_v40 = vadd.f32 -0.0001984127, %v3033_v27 }
 0x508   : > { %v3261_v5 = vsub.f32 0.0, %v3165_v19  ;;  %v3155_v36 = vmul.f32 %v3139_v10, %v9178_v17  ;;  %v3088_v50 = vadd.f32 0.008333334, %v3072_v34  ;;  %v3177_v22 = vmul.f32 0.5, %v8887_v43  ;;  %v12208_v3 = vld [vmem:[#allocation14_spill] sm:$0xff] }
 0x509   : > { %v3130_v14 = vmul.f32 %v3114_v6, %v9084_v58  ;;  %v3023_v62 = vadd.f32 2.7557319e-06, %v3007_v63  ;;  %v3226_v39 = vsub.f32 %v8911_v1, %v3210_v25  ;;  %v3065_v48 = vmul.f32 %v3049_v40, %v9066_v42 }
 0x50a   : > { %v3277_v59 = vsel %vm9364_vm10, %v3261_v5, %v3165_v19  ;;  %v3171_v32 = vadd.f32 %v3155_v36, %v9178_v17  ;;  %vm3251_vm11 = vcmp.gt.f32.partialorder %v3235_v29, 0.5  ;;  %v3104_v26 = vmul.f32 %v3088_v50, %v9334_v21 }
 0x50b   : > { %3318 = vmatpush1.msra.mxu0 %v3277_v59  ;;  %v3146_v57 = vmul.f32 %v3130_v14, %v8990_v37  ;;  %v3039_v58 = vmul.f32 %v3023_v62, %v9347_v56  ;;  %v3216_v47 = vmul.f32 2.0, %v3200_v55  ;;  %v3081_v23 = vadd.f32 0.008333334, %v3065_v48  ;;  %v12209_v55 = vld [vmem:[#allocation20_spill] sm:$0xff] }
 0x50c   : > { %v3267_v52 = vsub.f32 0.0, %v3171_v32  ;;  %v3004_v0 = vmul.f32 -2.5052108e-08, %v12205_v8  ;;  %v3120_v17 = vadd.f32 -0.16666667, %v3104_v26  ;;  %v3193_v51 = vfloor.f32 %v3177_v22  ;;  %v7199_v26 = vld [vmem:[%s11905_s3] sm:$0xff] }
 0x50d   : > { %v3162_v15 = vadd.f32 %v3146_v57, %v8990_v37  ;;  %v3055_v1 = vadd.f32 -0.0001984127, %v3039_v58  ;;  %v3097_v41 = vmul.f32 %v3081_v23, %v9066_v42  ;;  %v3183_v45 = vmul.f32 0.5, %v9061_v44 }
 0x50e   : > { %v3283_v12 = vsel %vm3251_vm11, %v3267_v52, %v3171_v32  ;;  %v3020_v18 = vadd.f32 2.7557319e-06, %v3004_v0  ;;  %vm3242_vm12 = vcmp.gt.f32.partialorder %v3226_v39, 0.5  ;;  %v3136_v35 = vmul.f32 %v3120_v17, %v9334_v21 }
 0x50f   : > { %3405 = vmatpush1.msra.mxu1 %v3283_v12  ;;  %v3258_v7 = vsub.f32 0.0, %v3162_v15  ;;  %v3071_v54 = vmul.f32 %v3055_v1, %v9347_v56  ;;  %v3232_v61 = vsub.f32 %v9095_v60, %v3216_v47  ;;  %v3113_v38 = vadd.f32 -0.16666667, %v3097_v41 }
 0x510   : > { %v3036_v37 = vmul.f32 %v3020_v18, %v12205_v8  ;;  %v3003_v16 = vmul.f32 -2.5052108e-08, %v12206_v24  ;;  %v3152_v2 = vmul.f32 %v3136_v35, %v9318_v53  ;;  %v3209_v9 = vmul.f32 2.0, %v3193_v51 }
 0x511   : > { %v3274_v49 = vsel %vm3242_vm12, %v3258_v7, %v3162_v15  ;;  %v3087_v13 = vadd.f32 0.008333334, %v3071_v54  ;;  %v3129_v20 = vmul.f32 %v3113_v38, %v9066_v42  ;;  %v3199_v11 = vfloor.f32 %v3183_v45  ;;  %v12212_v45 = vld [vmem:[#allocation13_spill] sm:$0xff] }
 0x512   : > { %3319 = vmatprep.subr.mxu0 %v3274_v49  ;;  %v3052_v33 = vadd.f32 -0.0001984127, %v3036_v37  ;;  %v3019_v21 = vadd.f32 2.7557319e-06, %v3003_v16  ;;  %v3168_v46 = vadd.f32 %v3152_v2, %v9318_v53  ;;  %v3180_v4 = vmul.f32 0.5, %v12207_v30  ;;  %v12213_v49 = vld [vmem:[#allocation11_spill] sm:$0xff] }
 0x513   : > { %v3103_v60 = vmul.f32 %v3087_v13, %v9347_v56  ;;  %v3145_v31 = vmul.f32 %v3129_v20, %v12208_v3  ;;  %vm3248_vm13 = vcmp.gt.f32.partialorder %v3232_v61, 0.5  ;;  %v3225_v27 = vsub.f32 %v8887_v43, %v3209_v9  ;;  %v7201_v61 = vld [vmem:[%s11905_s3 + $0x10] sm:$0xff] }
 0x514   : > { %v3068_v19 = vmul.f32 %v3052_v33, %v12205_v8  ;;  %v3035_v10 = vmul.f32 %v3019_v21, %v12206_v24  ;;  %v3264_v25 = vsub.f32 0.0, %v3168_v46  ;;  %v3215_v6 = vmul.f32 2.0, %v3199_v11 }
 0x515   : > { %v3119_v42 = vadd.f32 -0.16666667, %v3103_v60  ;;  %v3161_v29 = vadd.f32 %v3145_v31, %v12208_v3  ;;  %v3196_v36 = vfloor.f32 %v3180_v4  ;;  %v3179_v40 = vmul.f32 0.5, %v12209_v55 }
 0x516   : > { %v3084_v34 = vadd.f32 0.008333334, %v3068_v19  ;;  %v3051_v53 = vadd.f32 -0.0001984127, %v3035_v10  ;;  %v3280_v63 = vsel %vm3248_vm13, %v3264_v25, %v3168_v46  ;;  %vm3241_vm14 = vcmp.gt.f32.partialorder %v3225_v27, 0.5  ;;  %v12214_v46 = vld [vmem:[#allocation10_spill] sm:$0xff] }
 0x517   : > { %v3135_v5 = vmul.f32 %v3119_v42, %v9347_v56  ;;  %3406 = vmatprep.subr.mxu1 %v3280_v63  ;;  %v3257_v14 = vsub.f32 0.0, %v3161_v29  ;;  %v3231_v59 = vsub.f32 %v9061_v44, %v3215_v6  ;;  %v3212_v48 = vmul.f32 2.0, %v3196_v36  ;;  %v12211_v44 = vld [vmem:[#allocation23_spill] sm:$0xff]  ;;  %v12216_v6 = vld [vmem:[#allocation16_spill] sm:$0xff] }
 0x518   : > { %v3100_v50 = vmul.f32 %v3084_v34, %v12205_v8  ;;  %v3067_v22 = vmul.f32 %v3051_v53, %v12206_v24  ;;  %v3195_v57 = vfloor.f32 %v3179_v40  ;;  %v12210_v23 = vmov 0.0  }
 0x519   : > { %v3151_v43 = vmul.f32 %v3135_v5, %v9327_v28  ;;  %v3273_v62 = vsel %vm3241_vm14, %v3257_v14, %v3161_v29  ;;  %vm3247_vm2 = vcmp.gt.f32.partialorder %v3231_v59, 0.5  ;;  %v3228_v17 = vsub.f32 %v12207_v30, %v3212_v48 }
 0x51a   : > { %v3116_v32 = vadd.f32 -0.16666667, %v3100_v50  ;;  %v3083_v39 = vadd.f32 0.008333334, %v3067_v22  ;;  %3320 = vmatpush1.msra.mxu0 %v3273_v62  ;;  %v3211_v51 = vmul.f32 2.0, %v3195_v57 }
 0x51b   : > { %v3167_v56 = vadd.f32 %v3151_v43, %v9327_v28  ;;  %7095 = vmatmul.mubr.msk.f32.vlgmr.msra.gmra.mxu0 %vm1067_vm15, %v7199_v26  ;;  %vm3244_vm3 = vcmp.gt.f32.partialorder %v3228_v17, 0.5 }
 0x51c   : > { %v3132_v58 = vmul.f32 %v3116_v32, %v12205_v8  ;;  %v3099_v52 = vmul.f32 %v3083_v39, %v12206_v24  ;;  %3359 = vmatprep.mubr.f32.mxu0 %v12210_v23  ;;  %v7200_v8 = vld [vmem:[%s11905_s3 + $0x8] sm:$0xff]  ;;  %v3227_v7 = vsub.f32 %v12209_v55, %v3211_v51 }
 0x51d   : > { %v3263_v47 = vsub.f32 0.0, %v3167_v56 }
 0x51e   : > { %v3148_v0 = vmul.f32 %v3132_v58, %v12211_v44  ;;  %v3115_v15 = vadd.f32 -0.16666667, %v3099_v52  ;;  %vm3243_vm4 = vcmp.gt.f32.partialorder %v3227_v7, 0.5 }
 0x51f   : > { %v3279_v28 = vsel %vm3247_vm2, %v3263_v47, %v3167_v56  ;;  %7096 = vmatmul.mubr.msk.f32.gmra.mxu0 %vm1067_vm15, %v7200_v8 }
 0x520   : > { %3407 = vmatpush1.msra.mxu1 %v3279_v28  ;;  %v3164_v1 = vadd.f32 %v3148_v0, %v12211_v44  ;;  %v3131_v12 = vmul.f32 %v3115_v15, %v12206_v24  ;;  %3365 = vmatprep.mubr.f32.mxu0 %v12210_v23  ;;  %v7202_v24 = vld [vmem:[%s11905_s3 + $0x18] sm:$0xff] }
 0x522   : > { %v3260_v41 = vsub.f32 0.0, %v3164_v1  ;;  %v3147_v18 = vmul.f32 %v3131_v12, %v12212_v45 }
 0x523   : > { %7097 = vmatmul.mubr.msk.f32.gmra.mxu0 %vm1067_vm15, %v7201_v61 }
 0x524   : > { %v3276_v35 = vsel %vm3244_vm3, %v3260_v41, %v3164_v1  ;;  %v3163_v54 = vadd.f32 %v3147_v18, %v12212_v45  ;;  %3371 = vmatprep.mubr.f32.mxu0 %v12210_v23 }
 0x525   : > { %3408 = vmatprep.subr.mxu1 %v3276_v35 }
 0x526   : > { %v3259_v38 = vsub.f32 0.0, %v3163_v54 }
 0x527   : > { %7098 = vmatmul.mubr.msk.f32.gmra.mxu0 %vm1067_vm15, %v7202_v24 }
 0x528   : > { %v3275_v37 = vsel %vm3243_vm4, %v3259_v38, %v3163_v54  ;;  %3979 = vmatprep.mubr.f32.mxu0 %v12210_v23 }
 0x529   : > { %3409 = vmatpush1.msra.mxu1 %v3275_v37 }
 0x52a   : > { %7099 = vmatmul.mubr.msk.f32.vlgmr.msra.gmra.mxu1 %vm1067_vm15, %v7199_v26 }
 0x52b   : > { %3448 = vmatprep.mubr.f32.mxu1 %v12210_v23 }
 0x52e   : > { %7100 = vmatmul.mubr.msk.f32.gmra.mxu1 %vm1067_vm15, %v7200_v8 }
 0x52f   : > { %3454 = vmatprep.mubr.f32.mxu1 %v12210_v23 }
 0x532   : > { %7101 = vmatmul.mubr.msk.f32.gmra.mxu1 %vm1067_vm15, %v7201_v61 }
 0x533   : > { %3460 = vmatprep.mubr.f32.mxu1 %v12210_v23 }
 0x536   : > { %7102 = vmatmul.mubr.msk.f32.gmra.mxu1 %vm1067_vm15, %v7202_v24 }
 0x537   : > { %4068 = vmatprep.mubr.f32.mxu1 %v12210_v23 }
 0x5db   : > { %v3355_v16 = vpop.f32.mrf.mxu0 }
 0x5dc   : > { %v3356_v2 = vadd.f32 %v3355_v16, %v12213_v49 }
 0x5dd   : > { %v3357_v9 = vpop.f32.mrf.mxu0 }
 0x5de   : > { %v3467_v13 = vmul.f32 0.31830987, %v3356_v2  ;;  %v3358_v20 = vadd.f32 %v3357_v9, %v12213_v49 }
 0x5df   : > { %v3361_v11 = vpop.f32.mrf.mxu0 }
 0x5e0   : > { %v3483_v33 = vadd.f32 0.5, %v3467_v13  ;;  %v3468_v21 = vmul.f32 0.31830987, %v3358_v20  ;;  %v3362_v60 = vadd.f32 %v3361_v11, %v12214_v46 }
 0x5e1   : > { %v3363_v30 = vpop.f32.mrf.mxu0 }
 0x5e2   : > { %v9452_v4 = vfloor.f32 %v3483_v33  ;;  %v3484_v3 = vadd.f32 0.5, %v3468_v21  ;;  %v3471_v31 = vmul.f32 0.31830987, %v3362_v60  ;;  %v3364_v19 = vadd.f32 %v3363_v30, %v12214_v46  ;;  %v12220_v21 = vld [vmem:[#allocation15_spill] sm:$0xff] }
 0x5e3   : > { %v3367_v10 = vpop.f32.mrf.mxu0 }
 0x5e4   : > { %12215 = vst [vmem:[#allocation25_spill] sm:$0xff] %v9452_v4  ;;  %v9455_v25 = vfloor.f32 %v3484_v3  ;;  %v3515_v27 = vmul.f32 3.140625, %v9452_v4  ;;  %v3487_v42 = vadd.f32 0.5, %v3471_v31  ;;  %v3472_v29 = vmul.f32 0.31830987, %v3364_v19 }
 0x5e5   : > { %v9459_v34 = vadd.f32 %v3367_v10, %v12216_v6  ;;  %v3369_v43 = vpop.f32.mrf.mxu0  ;;  %v3547_v32 = vmul.f32 0.00096702576, %v9452_v4  ;;  %v3579_v8 = vmul.f32 6.277114e-07, %v9452_v4 }
 0x5e6   : > { %v3516_v53 = vmul.f32 3.140625, %v9455_v25  ;;  %v9462_v63 = vfloor.f32 %v3487_v42  ;;  %v3488_v5 = vadd.f32 0.5, %v3472_v29  ;;  %v3531_v55 = vsub.f32 %v3356_v2, %v3515_v27 }
 0x5e7   : > { %v3475_v36 = vmul.f32 0.31830987, %v9459_v34  ;;  %v3548_v39 = vmul.f32 0.00096702576, %v9455_v25  ;;  %v9479_v52 = vadd.f32 %v3369_v43, %v12216_v6  ;;  %v3580_v41 = vmul.f32 6.277114e-07, %v9455_v25  ;;  %v3373_v35 = vpop.f32.mrf.mxu0 }
 0x5e8   : > { %v3532_v40 = vsub.f32 %v3358_v20, %v3516_v53  ;;  %v3519_v50 = vmul.f32 3.140625, %v9462_v63  ;;  %v9466_v22 = vfloor.f32 %v3488_v5  ;;  %v3563_v47 = vsub.f32 %v3531_v55, %v3547_v32 }
 0x5e9   : > { %v3491_v59 = vadd.f32 0.5, %v3475_v36  ;;  %v3551_v0 = vmul.f32 0.00096702576, %v9462_v63  ;;  %v3476_v9 = vmul.f32 0.31830987, %v9479_v52  ;;  %v3583_v13 = vmul.f32 6.277114e-07, %v9462_v63 }
 0x5ea   : > { %v3444_v14 = vpop.f32.mrf.mxu1  ;;  %v3520_v48 = vmul.f32 3.140625, %v9466_v22  ;;  %v3535_v26 = vsub.f32 %v3362_v60, %v3519_v50  ;;  %v3564_v44 = vsub.f32 %v3532_v40, %v3548_v39  ;;  %v3552_v45 = vmul.f32 0.00096702576, %v9466_v22 }
 0x5eb   : > { %v9469_v62 = vadd.f32 %v3444_v14, %v12213_v49  ;;  %v9482_v28 = vfloor.f32 %v3491_v59  ;;  %v9495_v24 = vsub.f32 %v3563_v47, %v3579_v8  ;;  %v9506_v60 = vadd.f32 %v3373_v35, %v12220_v21  ;;  %v3375_v35 = vpop.f32.mrf.mxu0 }
 0x5ec   : > { %v3446_v56 = vpop.f32.mrf.mxu1  ;;  %v3536_v1 = vsub.f32 %v3364_v19, %v3520_v48  ;;  %v3567_v61 = vsub.f32 %v3535_v26, %v3551_v0  ;;  %v9497_v16 = vsub.f32 %v3564_v44, %v3580_v41  ;;  %v9512_v19 = vmul.f32 0.5, %v9452_v4 }
 0x5ed   : > { %v3469_v57 = vmul.f32 0.31830987, %v9469_v62  ;;  %v9476_v58 = vadd.f32 %v3446_v56, %v12213_v49  ;;  %v3523_v18 = vmul.f32 3.140625, %v9482_v28  ;;  %12218 = vst [vmem:[#allocation8_spill] sm:$0xff] %v9495_v24  ;;  %v3584_v27 = vmul.f32 6.277114e-07, %v9466_v22 }
 0x5ee   : > { %v3450_v15 = vpop.f32.mrf.mxu1  ;;  %12219 = vst [vmem:[#allocation14_spill] sm:$0xff] %v9497_v16  ;;  %v3568_v20 = vsub.f32 %v3536_v1, %v3552_v45  ;;  %v9514_v10 = vsub.f32 %v3567_v61, %v3583_v13  ;;  %v3555_v42 = vmul.f32 0.00096702576, %v9482_v28  ;;  %v9525_v53 = vmul.f32 %v9497_v16, %v9497_v16 }
 0x5ef   : > { %v3485_v17 = vadd.f32 0.5, %v3469_v57  ;;  %v3470_v51 = vmul.f32 0.31830987, %v9476_v58  ;;  %v9486_v12 = vadd.f32 %v3450_v15, %v12214_v46  ;;  %v3539_v11 = vsub.f32 %v9459_v34, %v3523_v18 }
 0x5f0   : > { %v3452_v7 = vpop.f32.mrf.mxu1  ;;  %v9521_v34 = vmul.f32 %v9495_v24, %v9495_v24  ;;  %v3492_v5 = vadd.f32 0.5, %v3476_v9  ;;  %v9528_v36 = vmul.f32 0.5, %v9455_v25  ;;  %v9530_v55 = vsub.f32 %v3568_v20, %v3584_v27 }
 0x5f1   : > { %v9492_v54 = vfloor.f32 %v3485_v17  ;;  %v3486_v38 = vadd.f32 0.5, %v3470_v51  ;;  %v3473_v37 = vmul.f32 0.31830987, %v9486_v12  ;;  %v9500_v2 = vadd.f32 %v3452_v7, %v12214_v46 }
 0x5f2   : > { %v3456_v33 = vpop.f32.mrf.mxu1  ;;  %v3571_v40 = vsub.f32 %v3539_v11, %v3555_v42  ;;  %v3479_v50 = vmul.f32 0.31830987, %v9506_v60  ;;  %v3587_v56 = vmul.f32 6.277114e-07, %v9482_v28  ;;  %v9544_v57 = vmul.f32 %v9514_v10, %v9514_v10 }
 0x5f3   : > { %12217 = vst [vmem:[#allocation24_spill] sm:$0xff] %v9492_v54  ;;  %v3517_v30 = vmul.f32 3.140625, %v9492_v54  ;;  %v9509_v3 = vfloor.f32 %v3486_v38  ;;  %v3489_v31 = vadd.f32 0.5, %v3473_v37  ;;  %v3474_v29 = vmul.f32 0.31830987, %v9500_v2 }
 0x5f4   : > { %v9533_v14 = vadd.f32 %v3456_v33, %v12216_v6  ;;  %v3458_v43 = vpop.f32.mrf.mxu1  ;;  %v3549_v48 = vmul.f32 0.00096702576, %v9492_v54  ;;  %v9546_v47 = vfloor.f32 %v3492_v5  ;;  %v3581_v44 = vmul.f32 6.277114e-07, %v9492_v54 }
 0x5f5   : > { %12221 = vst [vmem:[#allocation20_spill] sm:$0xff] %v9509_v3  ;;  %v3533_v59 = vsub.f32 %v9469_v62, %v3517_v30  ;;  %v3518_v32 = vmul.f32 3.140625, %v9509_v3  ;;  %v9538_v39 = vfloor.f32 %v3489_v31  ;;  %v3490_v26 = vadd.f32 0.5, %v3474_v29 }
 0x5f6   : > { %v3477_v0 = vmul.f32 0.31830987, %v9533_v14  ;;  %v3495_v62 = vadd.f32 0.5, %v3479_v50  ;;  %v9551_v15 = vadd.f32 %v3458_v43, %v12216_v6  ;;  %v3550_v17 = vmul.f32 0.00096702576, %v9509_v3  ;;  %v3462_v61 = vpop.f32.mrf.mxu1 }
 0x5f7   : > { %12222 = vst [vmem:[#allocation23_spill] sm:$0xff] %v9538_v39  ;;  %v3582_v51 = vmul.f32 6.277114e-07, %v9509_v3  ;;  %v9557_v1 = vmul.f32 %v9530_v55, %v9530_v55  ;;  %v9559_v8 = vsub.f32 %v3571_v40, %v3587_v56  ;;  %v3565_v41 = vsub.f32 %v3533_v59, %v3549_v48 }
 0x5f8   : > { %v3534_v45 = vsub.f32 %v9476_v58, %v3518_v32  ;;  %v3521_v18 = vmul.f32 3.140625, %v9538_v39  ;;  %v3524_v7 = vmul.f32 3.140625, %v9546_v47  ;;  %v3553_v38 = vmul.f32 0.00096702576, %v9538_v39  ;;  %v3464_v56 = vpop.f32.mrf.mxu1 }
 0x5f9   : > { %v9566_v37 = vmul.f32 6.277114e-07, %v9538_v39  ;;  %v9568_v9 = vfloor.f32 %v3490_v26  ;;  %v3493_v13 = vadd.f32 0.5, %v3477_v0  ;;  %v3556_v11 = vmul.f32 0.00096702576, %v9546_v47 }
 0x5fa   : > { %v3540_v20 = vsub.f32 %v9479_v52, %v3524_v7  ;;  %v9572_v33 = vfloor.f32 %v3495_v62  ;;  %v3478_v58 = vmul.f32 0.31830987, %v9551_v15  ;;  %v9577_v30 = vmul.f32 %v9559_v8, %v9559_v8 }
 0x5fb   : > { %v9579_v31 = vfloor.f32 %v3493_v13  ;;  %v3376_v27 = vadd.f32 %v3375_v35, %v12220_v21  ;;  %v9583_v42 = vadd.f32 %v3462_v61, %v12220_v21  ;;  %v9585_v29 = vsub.f32 %v3565_v41, %v3581_v44 }
 0x5fc   : > { %v3572_v52 = vsub.f32 %v3540_v20, %v3556_v11  ;;  %v3588_v5 = vmul.f32 6.277114e-07, %v9546_v47  ;;  %v3527_v40 = vmul.f32 3.140625, %v9572_v33  ;;  %v3566_v50 = vsub.f32 %v3534_v45, %v3550_v17 }
 0x5fd   : > { %12223 = vst [vmem:[#allocation13_spill] sm:$0xff] %v9585_v29  ;;  %v3537_v43 = vsub.f32 %v9486_v12, %v3521_v18  ;;  %v3522_v59 = vmul.f32 3.140625, %v9568_v9  ;;  %v3525_v32 = vmul.f32 3.140625, %v9579_v31  ;;  %v3559_v44 = vmul.f32 0.00096702576, %v9572_v33 }
 0x5fe   : > { %v9592_v48 = vsub.f32 %v3572_v52, %v3588_v5  ;;  %v3543_v26 = vsub.f32 %v9506_v60, %v3527_v40  ;;  %v3494_v0 = vadd.f32 0.5, %v3478_v58  ;;  %v3591_v41 = vmul.f32 6.277114e-07, %v9572_v33 }
 0x5ff   : > { %v3541_v62 = vsub.f32 %v9533_v14, %v3525_v32  ;;  %v3480_v7 = vmul.f32 0.31830987, %v3376_v27  ;;  %v3481_v17 = vmul.f32 0.31830987, %v9583_v42  ;;  %v3465_v35 = vadd.f32 %v3464_v56, %v12220_v21 }
 0x600   : > { %v9601_v12 = vmul.f32 %v9592_v48, %v9592_v48  ;;  %v3575_v45 = vsub.f32 %v3543_v26, %v3559_v44  ;;  %v9603_v18 = vfloor.f32 %v3494_v0  ;;  %v9608_v60 = vmul.f32 %v9585_v29, %v9585_v29 }
 0x601   : > { %v3538_v14 = vsub.f32 %v9500_v2, %v3522_v59  ;;  %v3496_v61 = vadd.f32 0.5, %v3480_v7  ;;  %v3497_v13 = vadd.f32 0.5, %v3481_v17  ;;  %v9611_v20 = vsub.f32 %v3566_v50, %v3582_v51 }
 0x602   : > { %12224 = vst [vmem:[#allocation26_spill] sm:$0xff] %v9608_v60  ;;  %v3557_v11 = vmul.f32 0.00096702576, %v9579_v31  ;;  %v9614_v58 = vsub.f32 %v3575_v45, %v3591_v41  ;;  %v3526_v52 = vmul.f32 3.140625, %v9603_v18  ;;  %v3554_v5 = vmul.f32 0.00096702576, %v9568_v9 }
 0x603   : > { %v9618_v40 = vfloor.f32 %v3496_v61  ;;  %v9620_v32 = vfloor.f32 %v3497_v13  ;;  %v3482_v56 = vmul.f32 0.31830987, %v3465_v35  ;;  %v9622_v26 = vsub.f32 %v3537_v43, %v3553_v38 }
 0x604   : > { %v3573_v2 = vsub.f32 %v3541_v62, %v3557_v11  ;;  %v9626_v51 = vmul.f32 %v9614_v58, %v9614_v58  ;;  %v3636_v50 = vmul.f32 -2.5052108e-08, %v9601_v12  ;;  %v3570_v59 = vsub.f32 %v3538_v14, %v3554_v5 }
 0x605   : > { %v3586_v44 = vmul.f32 6.277114e-07, %v9568_v9  ;;  %v3589_v0 = vmul.f32 6.277114e-07, %v9579_v31  ;;  %v3528_v41 = vmul.f32 3.140625, %v9618_v40  ;;  %v3542_v7 = vsub.f32 %v9551_v15, %v3526_v52 }
 0x606   : > { %v3558_v17 = vmul.f32 0.00096702576, %v9603_v18  ;;  %v3529_v38 = vmul.f32 3.140625, %v9620_v32  ;;  %v3815_v43 = vmul.f32 0.5, %v9572_v33  ;;  %v3560_v45 = vmul.f32 0.00096702576, %v9618_v40 }
 0x607   : > { %v3544_v62 = vsub.f32 %v3376_v27, %v3528_v41  ;;  %v3498_v61 = vadd.f32 0.5, %v3482_v56  ;;  %v3639_v14 = vmul.f32 -2.5052108e-08, %v9626_v51  ;;  %v9638_v13 = vsub.f32 %v3573_v2, %v3589_v0 }
 0x608   : > { %v3592_v11 = vmul.f32 6.277114e-07, %v9618_v40  ;;  %v3545_v5 = vsub.f32 %v9583_v42, %v3529_v38  ;;  %v3652_v21 = vadd.f32 2.7557319e-06, %v3636_v50  ;;  %v3561_v52 = vmul.f32 0.00096702576, %v9620_v32 }
 0x609   : > { %v3576_v15 = vsub.f32 %v3544_v62, %v3560_v45  ;;  %v9643_v6 = vfloor.f32 %v3498_v61  ;;  %v3655_v46 = vadd.f32 2.7557319e-06, %v3639_v14  ;;  %v9645_v49 = vsub.f32 %v3570_v59, %v3586_v44 }
 0x60a   : > { %v3574_v27 = vsub.f32 %v3542_v7, %v3558_v17  ;;  %v3590_v56 = vmul.f32 6.277114e-07, %v9603_v18  ;;  %v3668_v41 = vmul.f32 %v3652_v21, %v9601_v12  ;;  %v3577_v0 = vsub.f32 %v3545_v5, %v3561_v52 }
 0x60b   : > { %v9649_v2 = vsub.f32 %v3576_v15, %v3592_v11  ;;  %v3530_v29 = vmul.f32 3.140625, %v9643_v6  ;;  %v3831_v42 = vfloor.f32 %v3815_v43  ;;  %v9654_v50 = vmul.f32 %v9638_v13, %v9638_v13 }
 0x60c   : > { %v3593_v38 = vmul.f32 6.277114e-07, %v9620_v32  ;;  %v3816_v59 = vmul.f32 0.5, %v9618_v40  ;;  %v3671_v44 = vmul.f32 %v3655_v46, %v9626_v51  ;;  %v3562_v17 = vmul.f32 0.00096702576, %v9643_v6 }
 0x60d   : > { %v9661_v7 = vmul.f32 %v9649_v2, %v9649_v2  ;;  %v3546_v21 = vsub.f32 %v3465_v35, %v3530_v29  ;;  %v3684_v62 = vadd.f32 -0.0001984127, %v3668_v41  ;;  %v9664_v45 = vsub.f32 %v3574_v27, %v3590_v56 }
 0x60e   : > { %v3594_v43 = vmul.f32 6.277114e-07, %v9643_v6  ;;  %v3687_v61 = vadd.f32 -0.0001984127, %v3671_v44  ;;  %v3812_v14 = vmul.f32 0.5, %v9546_v47  ;;  %v9668_v11 = vsub.f32 %v3577_v0, %v3593_v38 }
 0x60f   : > { %v3578_v5 = vsub.f32 %v3546_v21, %v3562_v17  ;;  %v3640_v46 = vmul.f32 -2.5052108e-08, %v9661_v7  ;;  %v3700_v15 = vmul.f32 %v3684_v62, %v9601_v12  ;;  %v3847_v29 = vmul.f32 2.0, %v3831_v42 }
 0x610   : > { %v3703_v52 = vmul.f32 %v3687_v61, %v9626_v51  ;;  %v3818_v35 = vmul.f32 0.5, %v9643_v6  ;;  %v3635_v27 = vmul.f32 -2.5052108e-08, %v9577_v30  ;;  %v3832_v44 = vfloor.f32 %v3816_v59 }
 0x611   : > { %v9675_v56 = vsub.f32 %v3578_v5, %v3594_v43  ;;  %v3656_v41 = vadd.f32 2.7557319e-06, %v3640_v46  ;;  %v3716_v23 = vadd.f32 0.008333334, %v3700_v15  ;;  %v3828_v0 = vfloor.f32 %v3812_v14 }
 0x612   : > { %v3719_v54 = vadd.f32 0.008333334, %v3703_v52  ;;  %v3651_v38 = vadd.f32 2.7557319e-06, %v3635_v27  ;;  %v3811_v21 = vmul.f32 0.5, %v9482_v28  ;;  %v9680_v17 = vmul.f32 %v9668_v11, %v9668_v11 }
 0x613   : > { %v9684_v42 = vmul.f32 %v9675_v56, %v9675_v56  ;;  %v3672_v62 = vmul.f32 %v3656_v41, %v9661_v7  ;;  %v3732_v43 = vmul.f32 %v3716_v23, %v9601_v12  ;;  %v9690_v59 = vmul.f32 %v9664_v45, %v9664_v45 }
 0x614   : > { %v3735_v61 = vmul.f32 %v3719_v54, %v9626_v51  ;;  %v3834_v14 = vfloor.f32 %v3818_v35  ;;  %v3667_v5 = vmul.f32 %v3651_v38, %v9577_v30  ;;  %v3848_v15 = vmul.f32 2.0, %v3832_v44 }
 0x615   : > { %v3688_v46 = vadd.f32 -0.0001984127, %v3672_v62  ;;  %v3748_v52 = vadd.f32 -0.16666667, %v3732_v43  ;;  %v3827_v27 = vfloor.f32 %v3811_v21  ;;  %v3844_v4 = vmul.f32 2.0, %v3828_v0 }
 0x616   : > { %v3751_v24 = vadd.f32 -0.16666667, %v3735_v61  ;;  %v3642_v3 = vmul.f32 -2.5052108e-08, %v9684_v42  ;;  %v3817_v41 = vmul.f32 0.5, %v9620_v32  ;;  %v3863_v38 = vsub.f32 %v9572_v33, %v3847_v29 }
 0x617   : > { %v3704_v23 = vmul.f32 %v3688_v46, %v9661_v7  ;;  %v3764_v60 = vmul.f32 %v3748_v52, %v9601_v12  ;;  %v3683_v39 = vadd.f32 -0.0001984127, %v3667_v5  ;;  %v3641_v54 = vmul.f32 -2.5052108e-08, %v9680_v17 }
 0x618   : > { %v3767_v35 = vmul.f32 %v3751_v24, %v9626_v51  ;;  %v3658_v44 = vadd.f32 2.7557319e-06, %v3642_v3  ;;  %v3850_v62 = vmul.f32 2.0, %v3834_v14  ;;  %v3843_v43 = vmul.f32 2.0, %v3827_v27 }
 0x619   : > { %v3720_v21 = vadd.f32 0.008333334, %v3704_v23  ;;  %v3699_v0 = vmul.f32 %v3683_v39, %v9577_v30  ;;  %v3657_v61 = vadd.f32 2.7557319e-06, %v3641_v54  ;;  %v3864_v16 = vsub.f32 %v9618_v40, %v3848_v15 }
 0x61a   : > { %v3780_v46 = vmul.f32 %v3764_v60, %v9592_v48  ;;  %v3674_v12 = vmul.f32 %v3658_v44, %v9684_v42  ;;  %v3833_v5 = vfloor.f32 %v3817_v41  ;;  %v3860_v24 = vsub.f32 %v9546_v47, %v3844_v4 }
 0x61b   : > { %v3736_v52 = vmul.f32 %v3720_v21, %v9661_v7  ;;  %v3715_v51 = vadd.f32 0.008333334, %v3699_v0  ;;  %v3673_v3 = vmul.f32 %v3657_v61, %v9680_v17  ;;  %v3783_v33 = vmul.f32 %v3767_v35, %v9614_v58 }
 0x61c   : > { %v3690_v29 = vadd.f32 -0.0001984127, %v3674_v12  ;;  %v3866_v39 = vsub.f32 %v9643_v6, %v3850_v62  ;;  %v3632_v14 = vmul.f32 -2.5052108e-08, %v9557_v1  ;;  %v3859_v15 = vsub.f32 %v9482_v28, %v3843_v43 }
 0x61d   : > { %v3752_v40 = vadd.f32 -0.16666667, %v3736_v52  ;;  %v3731_v60 = vmul.f32 %v3715_v51, %v9577_v30  ;;  %v3689_v27 = vadd.f32 -0.0001984127, %v3673_v3  ;;  %vm9713_vm5 = vcmp.gt.f32.partialorder %v3864_v16, 0.5 }
 0x61e   : > { %v3796_v4 = vadd.f32 %v3780_v46, %v9592_v48  ;;  %v3706_v47 = vmul.f32 %v3690_v29, %v9684_v42  ;;  %v3849_v23 = vmul.f32 2.0, %v3833_v5  ;;  %v3648_v54 = vadd.f32 2.7557319e-06, %v3632_v14 }
 0x61f   : > { %v3768_v6 = vmul.f32 %v3752_v40, %v9661_v7  ;;  %vm9720_vm6 = vcmp.gt.f32.partialorder %v3863_v38, 0.5  ;;  %vm9724_vm7 = vcmp.gt.f32.partialorder %v3860_v24, 0.5  ;;  %v3747_v28 = vadd.f32 -0.16666667, %v3731_v60 }
 0x620   : > { %v3705_v16 = vmul.f32 %v3689_v27, %v9680_v17  ;;  %v3799_v62 = vadd.f32 %v3783_v33, %v9614_v58  ;;  %v3722_v48 = vadd.f32 0.008333334, %v3706_v47  ;;  %v3664_v21 = vmul.f32 %v3648_v54, %v9557_v1 }
 0x621   : > { %v3808_v0 = vmul.f32 0.5, %v9466_v22  ;;  %v3784_v7 = vmul.f32 %v3768_v6, %v9649_v2  ;;  %v3763_v38 = vmul.f32 %v3747_v28, %v9577_v30  ;;  %vm9734_vm8 = vcmp.gt.f32.partialorder %v3859_v15, 0.5 }
 0x622   : > { %v3721_v61 = vadd.f32 0.008333334, %v3705_v16  ;;  %v3638_v46 = vmul.f32 -2.5052108e-08, %v9690_v59  ;;  %v3892_v12 = vsub.f32 0.0, %v3796_v4  ;;  %v3738_v5 = vmul.f32 %v3722_v48, %v9684_v42 }
 0x623   : > { %v3865_v58 = vsub.f32 %v9620_v32, %v3849_v23  ;;  %v3680_v52 = vadd.f32 -0.0001984127, %v3664_v21  ;;  %v3800_v24 = vadd.f32 %v3784_v7, %v9649_v2  ;;  %v3779_v51 = vmul.f32 %v3763_v38, %v9559_v8 }
 0x624   : > { %v3737_v3 = vmul.f32 %v3721_v61, %v9680_v17  ;;  %v3654_v30 = vadd.f32 2.7557319e-06, %v3638_v46  ;;  %v3895_v33 = vsub.f32 0.0, %v3799_v62  ;;  %v3754_v29 = vadd.f32 -0.16666667, %v3738_v5 }
 0x625   : > { %v3696_v14 = vmul.f32 %v3680_v52, %v9557_v1  ;;  %v3824_v40 = vfloor.f32 %v3808_v0  ;;  %v3896_v60 = vsub.f32 0.0, %v3800_v24  ;;  %vm9745_vm9 = vcmp.gt.f32.partialorder %v3866_v39, 0.5 }
 0x626   : > { %v3795_v32 = vadd.f32 %v3779_v51, %v9559_v8  ;;  %v3753_v27 = vadd.f32 -0.16666667, %v3737_v3  ;;  %v3670_v2 = vmul.f32 %v3654_v30, %v9690_v59  ;;  %v3770_v47 = vmul.f32 %v3754_v29, %v9684_v42 }
 0x627   : > { %vm9752_vm10 = vcmp.gt.f32.partialorder %v3865_v58, 0.5  ;;  %v3712_v54 = vadd.f32 0.008333334, %v3696_v14  ;;  %v3814_v6 = vmul.f32 0.5, %v9603_v18  ;;  %v3912_v39 = vsel %vm9713_vm5, %v3896_v60, %v3800_v24 }
 0x628   : > { %v3891_v28 = vsub.f32 0.0, %v3795_v32  ;;  %v3769_v16 = vmul.f32 %v3753_v27, %v9680_v17  ;;  %v3686_v48 = vadd.f32 -0.0001984127, %v3670_v2  ;;  %3939 = vmatprep.subr.mxu0 %v3912_v39  ;;  %v3911_v8 = vsel %vm9720_vm6, %v3895_v33, %v3799_v62 }
 0x629   : > { %v3908_v42 = vsel %vm9724_vm7, %v3892_v12, %v3796_v4  ;;  %v3786_v21 = vmul.f32 %v3770_v47, %v9675_v56  ;;  %v3728_v0 = vmul.f32 %v3712_v54, %v9557_v1  ;;  %3940 = vmatpush1.msra.mxu0 %v3911_v8  ;;  %v3840_v41 = vmul.f32 2.0, %v3824_v40 }
 0x62a   : > { %v3785_v7 = vmul.f32 %v3769_v16, %v9668_v11  ;;  %v3702_v38 = vmul.f32 %v3686_v48, %v9690_v59  ;;  %v3631_v17 = vmul.f32 -2.5052108e-08, %v9544_v57  ;;  %3941 = vmatprep.subr.mxu0 %v3908_v42  ;;  %v3907_v35 = vsel %vm9734_vm8, %v3891_v28, %v3795_v32 }
 0x62b   : > { %v3802_v61 = vadd.f32 %v3786_v21, %v9675_v56  ;;  %v3744_v44 = vadd.f32 -0.16666667, %v3728_v0  ;;  %v3830_v4 = vfloor.f32 %v3814_v6  ;;  %3942 = vmatpush1.msra.mxu0 %v3907_v35  ;;  %v3637_v5 = vmul.f32 -2.5052108e-08, %v9654_v50 }
 0x62c   : > { %v3801_v62 = vadd.f32 %v3785_v7, %v9668_v11  ;;  %v3718_v46 = vadd.f32 0.008333334, %v3702_v38  ;;  %v3647_v12 = vadd.f32 2.7557319e-06, %v3631_v17  ;;  %v3807_v24 = vmul.f32 0.5, %v9462_v63 }
 0x62d   : > { %v3898_v58 = vsub.f32 0.0, %v3802_v61  ;;  %v3760_v52 = vmul.f32 %v3744_v44, %v9557_v1  ;;  %v3813_v51 = vmul.f32 0.5, %v9579_v31  ;;  %v3653_v30 = vadd.f32 2.7557319e-06, %v3637_v5 }
 0x62e   : > { %v3897_v56 = vsub.f32 0.0, %v3801_v62  ;;  %v3734_v43 = vmul.f32 %v3718_v46, %v9690_v59  ;;  %v3663_v3 = vmul.f32 %v3647_v12, %v9544_v57  ;;  %v3856_v29 = vsub.f32 %v9466_v22, %v3840_v41 }
 0x62f   : > { %v3914_v11 = vsel %vm9745_vm9, %v3898_v58, %v3802_v61  ;;  %v3776_v33 = vmul.f32 %v3760_v52, %v9530_v55  ;;  %v3846_v14 = vmul.f32 2.0, %v3830_v4  ;;  %v3669_v32 = vmul.f32 %v3653_v30, %v9654_v50 }
 0x630   : > { %4028 = vmatprep.subr.mxu1 %v3914_v11  ;;  %v3913_v1 = vsel %vm9752_vm10, %v3897_v56, %v3801_v62  ;;  %v3750_v40 = vadd.f32 -0.16666667, %v3734_v43  ;;  %v3679_v60 = vadd.f32 -0.0001984127, %v3663_v3  ;;  %v9788_v27 = vmul.f32 %v9645_v49, %v9645_v49 }
 0x631   : > { %4029 = vmatpush1.msra.mxu1 %v3913_v1  ;;  %v3792_v15 = vadd.f32 %v3776_v33, %v9530_v55  ;;  %v3823_v2 = vfloor.f32 %v3807_v24  ;;  %v3628_v47 = vmul.f32 -2.5052108e-08, %v9525_v53  ;;  %v3685_v23 = vadd.f32 -0.0001984127, %v3669_v32 }
 0x632   : > { %v3766_v22 = vmul.f32 %v3750_v40, %v9690_v59  ;;  %v3695_v54 = vmul.f32 %v3679_v60, %v9544_v57  ;;  %v3829_v6 = vfloor.f32 %v3813_v51  ;;  %v9796_v39 = vsub.f32 %v9622_v26, %v9566_v37 }
 0x633   : > { %vm3872_vm11 = vcmp.gt.f32.partialorder %v3856_v29, 0.5  ;;  %v3888_v28 = vsub.f32 0.0, %v3792_v15  ;;  %v3644_v16 = vadd.f32 2.7557319e-06, %v3628_v47  ;;  %v3862_v55 = vsub.f32 %v9603_v18, %v3846_v14 }
 0x634   : > { %v3782_v48 = vmul.f32 %v3766_v22, %v9664_v45  ;;  %v3711_v8 = vadd.f32 0.008333334, %v3695_v54  ;;  %v3701_v42 = vmul.f32 %v3685_v23, %v9654_v50  ;;  %v3839_v59 = vmul.f32 2.0, %v3823_v2 }
 0x635   : > { %v3904_v21 = vsel %vm3872_vm11, %v3888_v28, %v3792_v15  ;;  %v3660_v0 = vmul.f32 %v3644_v16, %v9525_v53  ;;  %v3634_v7 = vmul.f32 -2.5052108e-08, %v9788_v27  ;;  %v3845_v38 = vmul.f32 2.0, %v3829_v6 }
 0x636   : > { %3943 = vmatprep.subr.mxu0 %v3904_v21  ;;  %v3798_v37 = vadd.f32 %v3782_v48, %v9664_v45  ;;  %v3727_v26 = vmul.f32 %v3711_v8, %v9544_v57  ;;  %v3717_v41 = vadd.f32 0.008333334, %v3701_v42  ;;  %v9807_v17 = vmul.f32 %v9796_v39, %v9796_v39 }
 0x637   : > { %v3676_v18 = vadd.f32 -0.0001984127, %v3660_v0  ;;  %v3820_v61 = vfloor.f32 %v9528_v36  ;;  %v3650_v35 = vadd.f32 2.7557319e-06, %v3634_v7  ;;  %vm3878_vm12 = vcmp.gt.f32.partialorder %v3862_v55, 0.5 }
 0x638   : > { %v3894_v44 = vsub.f32 0.0, %v3798_v37  ;;  %v3743_v4 = vadd.f32 -0.16666667, %v3727_v26  ;;  %v3733_v62 = vmul.f32 %v3717_v41, %v9654_v50  ;;  %v3855_v46 = vsub.f32 %v9462_v63, %v3839_v59  ;;  %v12242_v26 = vld [vmem:[#allocation23_spill] sm:$0xff] }
 0x639   : > { %v3692_v45 = vmul.f32 %v3676_v18, %v9525_v53  ;;  %v3666_v12 = vmul.f32 %v3650_v35, %v9788_v27  ;;  %v3627_v5 = vmul.f32 -2.5052108e-08, %v9521_v34  ;;  %v3861_v36 = vsub.f32 %v9579_v31, %v3845_v38 }
 0x63a   : > { %v3910_v58 = vsel %vm3878_vm12, %v3894_v44, %v3798_v37  ;;  %v3759_v52 = vmul.f32 %v3743_v4, %v9544_v57  ;;  %v3749_v24 = vadd.f32 -0.16666667, %v3733_v62  ;;  %v3836_v56 = vmul.f32 2.0, %v3820_v61  ;;  %v12243_v62 = vld [vmem:[#allocation26_spill] sm:$0xff] }
 0x63b   : > { %4030 = vmatprep.subr.mxu1 %v3910_v58  ;;  %v3708_v51 = vadd.f32 0.008333334, %v3692_v45  ;;  %v3682_v43 = vadd.f32 -0.0001984127, %v3666_v12  ;;  %v3810_v3 = vmul.f32 0.5, %v9568_v9  ;;  %v9820_v63 = vmul.f32 %v9611_v20, %v9611_v20 }
 0x63c   : > { %v3775_v30 = vmul.f32 %v3759_v52, %v9514_v10  ;;  %v3765_v11 = vmul.f32 %v3749_v24, %v9654_v50  ;;  %v3643_v33 = vadd.f32 2.7557319e-06, %v3627_v5  ;;  %vm9824_vm13 = vcmp.gt.f32.partialorder %v3855_v46, 0.5 }
 0x63d   : > { %v3724_v31 = vmul.f32 %v3708_v51, %v9525_v53  ;;  %v3698_v29 = vmul.f32 %v3682_v43, %v9788_v27  ;;  %v3633_v14 = vmul.f32 -2.5052108e-08, %v9807_v17  ;;  %vm9833_vm14 = vcmp.gt.f32.partialorder %v3861_v36, 0.5  ;;  %v12244_v51 = vld [vmem:[#allocation20_spill] sm:$0xff] }
 0x63e   : > { %v3791_v1 = vadd.f32 %v3775_v30, %v9514_v10  ;;  %v3781_v40 = vmul.f32 %v3765_v11, %v9638_v13  ;;  %v3659_v50 = vmul.f32 %v3643_v33, %v9521_v34  ;;  %v3852_v15 = vsub.f32 %v9455_v25, %v3836_v56 }
 0x63f   : > { %v3740_v32 = vadd.f32 -0.16666667, %v3724_v31  ;;  %v3714_v2 = vadd.f32 0.008333334, %v3698_v29  ;;  %v3826_v47 = vfloor.f32 %v3810_v3  ;;  %v3649_v6 = vadd.f32 2.7557319e-06, %v3633_v14 }
 0x640   : > { %v3887_v22 = vsub.f32 0.0, %v3791_v1  ;;  %v3797_v54 = vadd.f32 %v3781_v40, %v9638_v13  ;;  %v3675_v23 = vadd.f32 -0.0001984127, %v3659_v50  ;;  %v3819_v16 = vfloor.f32 %v9512_v19  ;;  %v12241_v13 = vld [vmem:[#allocation14_spill] sm:$0xff]  ;;  %v12245_v31 = vld [vmem:[#allocation25_spill] sm:$0xff] }
 0x641   : > { %v3756_v10 = vmul.f32 %v3740_v32, %v9525_v53  ;;  %v3730_v28 = vmul.f32 %v3714_v2, %v9788_v27  ;;  %v3630_v48 = vmul.f32 -2.5052108e-08, %v9820_v63  ;;  %v3665_v42 = vmul.f32 %v3649_v6, %v9807_v17 }
 0x642   : > { %v3903_v55 = vsel %vm9824_vm13, %v3887_v22, %v3791_v1  ;;  %v3893_v8 = vsub.f32 0.0, %v3797_v54  ;;  %v3691_v25 = vmul.f32 %v3675_v23, %v9521_v34  ;;  %v3842_v0 = vmul.f32 2.0, %v3826_v47  ;;  %v12246_v1 = vld [vmem:[#allocation8_spill] sm:$0xff] }
 0x643   : > { %3944 = vmatpush1.msra.mxu0 %v3903_v55  ;;  %v3772_v21 = vmul.f32 %v3756_v10, %v12241_v13  ;;  %v3746_v59 = vadd.f32 -0.16666667, %v3730_v28  ;;  %v3646_v53 = vadd.f32 2.7557319e-06, %v3630_v48  ;;  %v3681_v37 = vadd.f32 -0.0001984127, %v3665_v42 }
 0x644   : > { %v3909_v7 = vsel %vm9833_vm14, %v3893_v8, %v3797_v54  ;;  %v3707_v19 = vadd.f32 0.008333334, %v3691_v25  ;;  %v3809_v41 = vmul.f32 0.5, %v12242_v26  ;;  %vm3868_vm2 = vcmp.gt.f32.partialorder %v3852_v15, 0.5  ;;  %v12247_v22 = vld [vmem:[#allocation24_spill] sm:$0xff] }
 0x645   : > { %4031 = vmatpush1.msra.mxu1 %v3909_v7  ;;  %v3788_v38 = vadd.f32 %v3772_v21, %v12241_v13  ;;  %v3762_v18 = vmul.f32 %v3746_v59, %v9788_v27  ;;  %v3662_v61 = vmul.f32 %v3646_v53, %v9820_v63  ;;  %v3835_v44 = vmul.f32 2.0, %v3819_v16 }
 0x646   : > { %v3723_v35 = vmul.f32 %v3707_v19, %v9521_v34  ;;  %v3697_v4 = vmul.f32 %v3681_v37, %v9807_v17  ;;  %v3629_v46 = vmul.f32 -2.5052108e-08, %v12243_v62  ;;  %v3858_v5 = vsub.f32 %v9568_v9, %v3842_v0  ;;  %v7203_v0 = vld [vmem:[%s11907_s5] sm:$0xff] }
 0x647   : > { %v3884_v45 = vsub.f32 0.0, %v3788_v38  ;;  %v3778_v12 = vmul.f32 %v3762_v18, %v9645_v49  ;;  %v3678_v58 = vadd.f32 -0.0001984127, %v3662_v61  ;;  %v3825_v36 = vfloor.f32 %v3809_v41  ;;  %v12249_v61 = vld [vmem:[#allocation13_spill] sm:$0xff] }
 0x648   : > { %v3739_v52 = vadd.f32 -0.16666667, %v3723_v35  ;;  %v3713_v24 = vadd.f32 0.008333334, %v3697_v4  ;;  %v3806_v27 = vmul.f32 0.5, %v12244_v51  ;;  %v3851_v9 = vsub.f32 %v12245_v31, %v3835_v44  ;;  %v7205_v4 = vld [vmem:[%s11907_s5 + $0x10] sm:$0xff] }
 0x649   : > { %v3900_v56 = vsel %vm3868_vm2, %v3884_v45, %v3788_v38  ;;  %v3794_v43 = vadd.f32 %v3778_v12, %v9645_v49  ;;  %v3694_v3 = vmul.f32 %v3678_v58, %v9820_v63  ;;  %v3645_v30 = vadd.f32 2.7557319e-06, %v3629_v46  ;;  %v7204_v38 = vld [vmem:[%s11907_s5 + $0x8] sm:$0xff]  ;;  %v7206_v45 = vld [vmem:[%s11907_s5 + $0x18] sm:$0xff] }
 0x64a   : > { %3945 = vmatprep.subr.mxu0 %v3900_v56  ;;  %v3755_v11 = vmul.f32 %v3739_v52, %v9521_v34  ;;  %v3729_v33 = vmul.f32 %v3713_v24, %v9807_v17  ;;  %vm3874_vm3 = vcmp.gt.f32.partialorder %v3858_v5, 0.5  ;;  %v3822_v50 = vfloor.f32 %v3806_v27  ;;  %v12250_v5 = vld [vmem:[#allocation21_spill] sm:$0xff] }
 0x64b   : > { %v3890_v57 = vsub.f32 0.0, %v3794_v43  ;;  %v3710_v29 = vadd.f32 0.008333334, %v3694_v3  ;;  %v3661_v14 = vmul.f32 %v3645_v30, %v12243_v62  ;;  %v3841_v32 = vmul.f32 2.0, %v3825_v36 }
 0x64c   : > { %v3771_v40 = vmul.f32 %v3755_v11, %v12246_v1  ;;  %v3745_v60 = vadd.f32 -0.16666667, %v3729_v33  ;;  %v3805_v54 = vmul.f32 0.5, %v12247_v22  ;;  %v3838_v16 = vmul.f32 2.0, %v3822_v50 }
 0x64d   : > { %v3906_v49 = vsel %vm3874_vm3, %v3890_v57, %v3794_v43  ;;  %v3726_v15 = vmul.f32 %v3710_v29, %v9820_v63  ;;  %v3677_v2 = vadd.f32 -0.0001984127, %v3661_v14  ;;  %vm3867_vm4 = vcmp.gt.f32.partialorder %v3851_v9, 0.5  ;;  %v12251_v43 = vld [vmem:[#allocation18_spill] sm:$0xff] }
 0x64e   : > { %4032 = vmatprep.subr.mxu1 %v3906_v49  ;;  %v3787_v34 = vadd.f32 %v3771_v40, %v12246_v1  ;;  %v3761_v47 = vmul.f32 %v3745_v60, %v9807_v17  ;;  %v3857_v48 = vsub.f32 %v12242_v26, %v3841_v32  ;;  %v3821_v13 = vfloor.f32 %v3805_v54  ;;  %v12253_v60 = vld [vmem:[#allocation17_spill] sm:$0xff] }
 0x64f   : > { %v3742_v23 = vadd.f32 -0.16666667, %v3726_v15  ;;  %v3693_v6 = vmul.f32 %v3677_v2, %v12243_v62  ;;  %v3854_v53 = vsub.f32 %v12244_v51, %v3838_v16 }
 0x650   : > { %v3883_v10 = vsub.f32 0.0, %v3787_v34  ;;  %v3777_v28 = vmul.f32 %v3761_v47, %v9796_v39  ;;  %vm3873_vm5 = vcmp.gt.f32.partialorder %v3857_v48, 0.5  ;;  %v3837_v37 = vmul.f32 2.0, %v3821_v13 }
 0x651   : > { %v3758_v55 = vmul.f32 %v3742_v23, %v9820_v63  ;;  %v3709_v8 = vadd.f32 0.008333334, %v3693_v6  ;;  %vm3870_vm6 = vcmp.gt.f32.partialorder %v3854_v53, 0.5 }
 0x652   : > { %v3899_v25 = vsel %vm3867_vm4, %v3883_v10, %v3787_v34  ;;  %v3793_v42 = vadd.f32 %v3777_v28, %v9796_v39  ;;  %v12248_v39 = vmov 0.0  }
 0x653   : > { %3946 = vmatpush1.msra.mxu0 %v3899_v25  ;;  %v3774_v17 = vmul.f32 %v3758_v55, %v9611_v20  ;;  %v3725_v21 = vmul.f32 %v3709_v8, %v12243_v62 }
 0x654   : > { %v3889_v59 = vsub.f32 0.0, %v3793_v42  ;;  %7103 = vmatmul.mubr.msk.f32.vlgmr.msra.gmra.mxu0 %vm1067_vm15, %v7203_v0 }
 0x655   : > { %v3790_v63 = vadd.f32 %v3774_v17, %v9611_v20  ;;  %v3741_v7 = vadd.f32 -0.16666667, %v3725_v21  ;;  %3985 = vmatprep.mubr.f32.mxu0 %v12248_v39  ;;  %v3853_v20 = vsub.f32 %v12247_v22, %v3837_v37 }
 0x656   : > { %v3905_v19 = vsel %vm3873_vm5, %v3889_v59, %v3793_v42 }
 0x657   : > { %4033 = vmatpush1.msra.mxu1 %v3905_v19  ;;  %v3886_v26 = vsub.f32 0.0, %v3790_v63  ;;  %v3757_v41 = vmul.f32 %v3741_v7, %v12243_v62  ;;  %vm3869_vm7 = vcmp.gt.f32.partialorder %v3853_v20, 0.5 }
 0x658   : > { %7104 = vmatmul.mubr.msk.f32.gmra.mxu0 %vm1067_vm15, %v7204_v38 }
 0x659   : > { %v3902_v18 = vsel %vm3870_vm6, %v3886_v26, %v3790_v63  ;;  %v3773_v35 = vmul.f32 %v3757_v41, %v12249_v61  ;;  %3991 = vmatprep.mubr.f32.mxu0 %v12248_v39 }
 0x65a   : > { %4034 = vmatprep.subr.mxu1 %v3902_v18 }
 0x65b   : > { %v3789_v44 = vadd.f32 %v3773_v35, %v12249_v61 }
 0x65c   : > { %7105 = vmatmul.mubr.msk.f32.gmra.mxu0 %vm1067_vm15, %v7205_v4 }
 0x65d   : > { %v3885_v62 = vsub.f32 0.0, %v3789_v44  ;;  %3997 = vmatprep.mubr.f32.mxu0 %v12248_v39 }
 0x65f   : > { %v3901_v46 = vsel %vm3869_vm7, %v3885_v62, %v3789_v44 }
 0x660   : > { %4035 = vmatpush1.msra.mxu1 %v3901_v46  ;;  %7106 = vmatmul.mubr.msk.f32.gmra.mxu0 %vm1067_vm15, %v7206_v45 }
 0x661   : > { %7107 = vmatmul.mubr.msk.f32.vlgmr.msra.gmra.mxu1 %vm1067_vm15, %v7203_v0  ;;  %4605 = vmatprep.mubr.f32.mxu0 %v12248_v39 }
 0x662   : > { %4074 = vmatprep.mubr.f32.mxu1 %v12248_v39 }
 0x665   : > { %7108 = vmatmul.mubr.msk.f32.gmra.mxu1 %vm1067_vm15, %v7204_v38 }
 0x666   : > { %4080 = vmatprep.mubr.f32.mxu1 %v12248_v39 }
 0x669   : > { %7109 = vmatmul.mubr.msk.f32.gmra.mxu1 %vm1067_vm15, %v7205_v4 }
 0x66a   : > { %4086 = vmatprep.mubr.f32.mxu1 %v12248_v39 }
 0x66d   : > { %7110 = vmatmul.mubr.msk.f32.gmra.mxu1 %vm1067_vm15, %v7206_v45 }
 0x66e   : > { %4676 = vmatprep.mubr.f32.mxu1 %v12248_v39 }
 0x714   : > { %v3981_v12 = vpop.f32.mrf.mxu0 }
 0x715   : > { %v3982_v58 = vadd.f32 %v3981_v12, %v12250_v5 }
 0x716   : > { %v3983_v52 = vpop.f32.mrf.mxu0 }
 0x717   : > { %v4093_v24 = vmul.f32 0.31830987, %v3982_v58  ;;  %v3984_v36 = vadd.f32 %v3983_v52, %v12250_v5 }
 0x718   : > { %v3987_v51 = vpop.f32.mrf.mxu0 }
 0x719   : > { %v4109_v27 = vadd.f32 0.5, %v4093_v24  ;;  %v4094_v56 = vmul.f32 0.31830987, %v3984_v36  ;;  %v3988_v3 = vadd.f32 %v3987_v51, %v12251_v43 }
 0x71a   : > { %v3989_v30 = vpop.f32.mrf.mxu0 }
 0x71b   : > { %v9916_v11 = vfloor.f32 %v4109_v27  ;;  %v4110_v33 = vadd.f32 0.5, %v4094_v56  ;;  %v4097_v57 = vmul.f32 0.31830987, %v3988_v3  ;;  %v3990_v31 = vadd.f32 %v3989_v30, %v12251_v43 }
 0x71c   : > { %v3993_v9 = vpop.f32.mrf.mxu0 }
 0x71d   : > { %12252 = vst [vmem:[#allocation14_spill] sm:$0xff] %v9916_v11  ;;  %v4141_v29 = vmul.f32 3.140625, %v9916_v11  ;;  %v9920_v14 = vfloor.f32 %v4110_v33  ;;  %v4113_v1 = vadd.f32 0.5, %v4097_v57  ;;  %v4098_v40 = vmul.f32 0.31830987, %v3990_v31 }
 0x71e   : > { %v9923_v50 = vadd.f32 %v3993_v9, %v12253_v60  ;;  %v3995_v32 = vpop.f32.mrf.mxu0  ;;  %v4173_v28 = vmul.f32 0.00096702576, %v9916_v11  ;;  %v4205_v16 = vmul.f32 6.277114e-07, %v9916_v11  ;;  %v9962_v12 = vmul.f32 0.5, %v9916_v11 }
 0x71f   : > { %v4142_v49 = vmul.f32 3.140625, %v9920_v14  ;;  %v9926_v15 = vfloor.f32 %v4113_v1  ;;  %v4114_v2 = vadd.f32 0.5, %v4098_v40  ;;  %v4157_v47 = vsub.f32 %v3982_v58, %v4141_v29 }
 0x720   : > { %v4101_v34 = vmul.f32 0.31830987, %v9923_v50  ;;  %v9932_v10 = vadd.f32 %v3995_v32, %v12253_v60  ;;  %v4174_v25 = vmul.f32 0.00096702576, %v9920_v14  ;;  %v4206_v59 = vmul.f32 6.277114e-07, %v9920_v14  ;;  %v3999_v51 = vpop.f32.mrf.mxu0 }
 0x721   : > { %v4070_v22 = vpop.f32.mrf.mxu1  ;;  %v4158_v54 = vsub.f32 %v3984_v36, %v4142_v49  ;;  %v4145_v6 = vmul.f32 3.140625, %v9926_v15  ;;  %v9936_v55 = vfloor.f32 %v4114_v2  ;;  %v4189_v21 = vsub.f32 %v4157_v47, %v4173_v28  ;;  %v12257_v49 = vld [vmem:[#allocation19_spill] sm:$0xff] }
 0x722   : > { %v4071_v23 = vadd.f32 %v4070_v22, %v12250_v5  ;;  %v4117_v8 = vadd.f32 0.5, %v4101_v34  ;;  %v4177_v0 = vmul.f32 0.00096702576, %v9926_v15  ;;  %v4102_v26 = vmul.f32 0.31830987, %v9932_v10 }
 0x723   : > { %v4072_v48 = vpop.f32.mrf.mxu1  ;;  %v4161_v13 = vsub.f32 %v3988_v3, %v4145_v6  ;;  %v4146_v53 = vmul.f32 3.140625, %v9936_v55  ;;  %v4190_v7 = vsub.f32 %v4158_v54, %v4174_v25  ;;  %v4178_v38 = vmul.f32 0.00096702576, %v9936_v55 }
 0x724   : > { %v4095_v42 = vmul.f32 0.31830987, %v4071_v23  ;;  %v9940_v17 = vadd.f32 %v4072_v48, %v12250_v5  ;;  %v9951_v61 = vfloor.f32 %v4117_v8  ;;  %v9958_v46 = vsub.f32 %v4189_v21, %v4205_v16 }
 0x725   : > { %v4076_v63 = vpop.f32.mrf.mxu1  ;;  %v4162_v41 = vsub.f32 %v3990_v31, %v4146_v53  ;;  %v4193_v44 = vsub.f32 %v4161_v13, %v4177_v0  ;;  %v9964_v58 = vsub.f32 %v4190_v7, %v4206_v59  ;;  %v4209_v24 = vmul.f32 6.277114e-07, %v9926_v15 }
 0x726   : > { %v4111_v19 = vadd.f32 0.5, %v4095_v42  ;;  %v4096_v37 = vmul.f32 0.31830987, %v9940_v17  ;;  %v9949_v18 = vadd.f32 %v4076_v63, %v12251_v43  ;;  %12255 = vst [vmem:[#allocation26_spill] sm:$0xff] %v9958_v46  ;;  %v4210_v56 = vmul.f32 6.277114e-07, %v9936_v55 }
 0x727   : > { %v4078_v35 = vpop.f32.mrf.mxu1  ;;  %v4194_v36 = vsub.f32 %v4162_v41, %v4178_v38  ;;  %v4149_v30 = vmul.f32 3.140625, %v9951_v61  ;;  %v9972_v57 = vsub.f32 %v4193_v44, %v4209_v24  ;;  %v4118_v9 = vadd.f32 0.5, %v4102_v26 }
 0x728   : > { %v9953_v20 = vfloor.f32 %v4111_v19  ;;  %v4112_v4 = vadd.f32 0.5, %v4096_v37  ;;  %v9956_v62 = vadd.f32 %v4078_v35, %v12251_v43  ;;  %v4099_v45 = vmul.f32 0.31830987, %v9949_v18  ;;  %v4001_v35 = vpop.f32.mrf.mxu0 }
 0x729   : > { %v9977_v29 = vmul.f32 %v9958_v46, %v9958_v46  ;;  %v4082_v40 = vpop.f32.mrf.mxu1  ;;  %v9981_v32 = vadd.f32 %v3999_v51, %v12257_v49  ;;  %v9984_v2 = vmul.f32 0.5, %v9920_v14  ;;  %v9988_v34 = vmul.f32 %v9964_v58, %v9964_v58 }
 0x72a   : > { %12254 = vst [vmem:[#allocation23_spill] sm:$0xff] %v9953_v20  ;;  %v4143_v52 = vmul.f32 3.140625, %v9953_v20  ;;  %v9968_v27 = vfloor.f32 %v4112_v4  ;;  %v4115_v3 = vadd.f32 0.5, %v4099_v45  ;;  %v4100_v31 = vmul.f32 0.31830987, %v9956_v62 }
 0x72b   : > { %v4175_v1 = vmul.f32 0.00096702576, %v9953_v20  ;;  %v9990_v47 = vsub.f32 %v4194_v36, %v4210_v56  ;;  %v4165_v28 = vsub.f32 %v9923_v50, %v4149_v30  ;;  %v9996_v16 = vfloor.f32 %v4118_v9  ;;  %v4084_v0 = vpop.f32.mrf.mxu1 }
 0x72c   : > { %12256 = vst [vmem:[#allocation20_spill] sm:$0xff] %v9968_v27  ;;  %v4159_v33 = vsub.f32 %v4071_v23, %v4143_v52  ;;  %v9992_v22 = vfloor.f32 %v4115_v3  ;;  %v4116_v54 = vadd.f32 0.5, %v4100_v31  ;;  %v4144_v6 = vmul.f32 3.140625, %v9968_v27 }
 0x72d   : > { %v4207_v48 = vmul.f32 6.277114e-07, %v9953_v20  ;;  %v10001_v8 = vmul.f32 %v9972_v57, %v9972_v57  ;;  %v4181_v25 = vmul.f32 0.00096702576, %v9951_v61  ;;  %v4083_v42 = vadd.f32 %v4082_v40, %v12253_v60 }
 0x72e   : > { %12258 = vst [vmem:[#allocation25_spill] sm:$0xff] %v9992_v22  ;;  %v4191_v23 = vsub.f32 %v4159_v33, %v4175_v1  ;;  %v4147_v13 = vmul.f32 3.140625, %v9992_v22  ;;  %v10006_v21 = vfloor.f32 %v4116_v54  ;;  %v4150_v59 = vmul.f32 3.140625, %v9996_v16 }
 0x72f   : > { %v4105_v50 = vmul.f32 0.31830987, %v9981_v32  ;;  %v4176_v53 = vmul.f32 0.00096702576, %v9968_v27  ;;  %v4208_v63 = vmul.f32 6.277114e-07, %v9968_v27  ;;  %v10014_v7 = vmul.f32 %v9990_v47, %v9990_v47 }
 0x730   : > { %v4213_v19 = vmul.f32 6.277114e-07, %v9951_v61  ;;  %v10017_v37 = vsub.f32 %v4191_v23, %v4207_v48  ;;  %v4160_v26 = vsub.f32 %v9940_v17, %v4144_v6  ;;  %v4197_v41 = vsub.f32 %v4165_v28, %v4181_v25  ;;  %v4088_v17 = vpop.f32.mrf.mxu1 }
 0x731   : > { %v4148_v38 = vmul.f32 3.140625, %v10006_v21  ;;  %v4179_v44 = vmul.f32 0.00096702576, %v9992_v22  ;;  %v4166_v4 = vsub.f32 %v9932_v10, %v4150_v59  ;;  %v4182_v45 = vmul.f32 0.00096702576, %v9996_v16 }
 0x732   : > { %v4103_v52 = vmul.f32 0.31830987, %v4083_v42  ;;  %v4163_v24 = vsub.f32 %v9949_v18, %v4147_v13  ;;  %v4211_v36 = vmul.f32 6.277114e-07, %v9992_v22  ;;  %v4121_v51 = vadd.f32 0.5, %v4105_v50  ;;  %v4090_v13 = vpop.f32.mrf.mxu1 }
 0x733   : > { %v10027_v56 = vadd.f32 %v4084_v0, %v12253_v60  ;;  %v4164_v3 = vsub.f32 %v9956_v62, %v4148_v38  ;;  %v4198_v30 = vsub.f32 %v4166_v4, %v4182_v45  ;;  %v4002_v31 = vadd.f32 %v4001_v35, %v12257_v49 }
 0x734   : > { %v4119_v33 = vadd.f32 0.5, %v4103_v52  ;;  %v4192_v9 = vsub.f32 %v4160_v26, %v4176_v53  ;;  %v4214_v10 = vmul.f32 6.277114e-07, %v9996_v16  ;;  %v10032_v1 = vfloor.f32 %v4121_v51 }
 0x735   : > { %v4104_v18 = vmul.f32 0.31830987, %v10027_v56  ;;  %v4180_v40 = vmul.f32 0.00096702576, %v10006_v21  ;;  %v4106_v23 = vmul.f32 0.31830987, %v4002_v31  ;;  %v4089_v6 = vadd.f32 %v4088_v17, %v12257_v49 }
 0x736   : > { %v10036_v54 = vfloor.f32 %v4119_v33  ;;  %v4195_v28 = vsub.f32 %v4163_v24, %v4179_v44  ;;  %v10039_v62 = vsub.f32 %v4197_v41, %v4213_v19  ;;  %v10041_v48 = vsub.f32 %v4198_v30, %v4214_v10 }
 0x737   : > { %v4153_v25 = vmul.f32 3.140625, %v10032_v1  ;;  %v4196_v59 = vsub.f32 %v4164_v3, %v4180_v40  ;;  %v4212_v50 = vmul.f32 6.277114e-07, %v10006_v21  ;;  %v4185_v53 = vmul.f32 0.00096702576, %v10032_v1 }
 0x738   : > { %v4151_v0 = vmul.f32 3.140625, %v10036_v54  ;;  %v4217_v38 = vmul.f32 6.277114e-07, %v10032_v1  ;;  %v4120_v35 = vadd.f32 0.5, %v4104_v18  ;;  %v4122_v44 = vadd.f32 0.5, %v4106_v23 }
 0x739   : > { %v4169_v26 = vsub.f32 %v9981_v32, %v4153_v25  ;;  %v4183_v41 = vmul.f32 0.00096702576, %v10036_v54  ;;  %v4107_v4 = vmul.f32 0.31830987, %v4089_v6  ;;  %v4091_v45 = vadd.f32 %v4090_v13, %v12257_v49 }
 0x73a   : > { %v4167_v19 = vsub.f32 %v4083_v42, %v4151_v0  ;;  %v10053_v52 = vmul.f32 %v10041_v48, %v10041_v48  ;;  %v10055_v51 = vfloor.f32 %v4120_v35  ;;  %v10057_v17 = vfloor.f32 %v4122_v44 }
 0x73b   : > { %v4201_v24 = vsub.f32 %v4169_v26, %v4185_v53  ;;  %v4123_v3 = vadd.f32 0.5, %v4107_v4  ;;  %v4108_v30 = vmul.f32 0.31830987, %v4091_v45  ;;  %v4441_v33 = vmul.f32 0.5, %v10032_v1 }
 0x73c   : > { %v4199_v32 = vsub.f32 %v4167_v19, %v4183_v41  ;;  %v10060_v42 = vsub.f32 %v4192_v9, %v4208_v63  ;;  %v10064_v10 = vmul.f32 %v10039_v62, %v10039_v62  ;;  %v4152_v40 = vmul.f32 3.140625, %v10055_v51 }
 0x73d   : > { %v10066_v18 = vsub.f32 %v4201_v24, %v4217_v38  ;;  %v10069_v23 = vsub.f32 %v4195_v28, %v4211_v36  ;;  %v10071_v25 = vsub.f32 %v4196_v59, %v4212_v50  ;;  %v4215_v13 = vmul.f32 6.277114e-07, %v10036_v54 }
 0x73e   : > { %v4154_v0 = vmul.f32 3.140625, %v10057_v17  ;;  %v10079_v9 = vfloor.f32 %v4123_v3  ;;  %v4124_v53 = vadd.f32 0.5, %v4108_v30  ;;  %v4262_v26 = vmul.f32 -2.5052108e-08, %v10053_v52 }
 0x73f   : > { %v10077_v63 = vmul.f32 %v10066_v18, %v10066_v18  ;;  %v10082_v38 = vsub.f32 %v4199_v32, %v4215_v13  ;;  %v4186_v36 = vmul.f32 0.00096702576, %v10057_v17  ;;  %v4457_v28 = vfloor.f32 %v4441_v33 }
 0x740   : > { %v4170_v35 = vsub.f32 %v4002_v31, %v4154_v0  ;;  %v4168_v59 = vsub.f32 %v10027_v56, %v4152_v40  ;;  %v4184_v50 = vmul.f32 0.00096702576, %v10055_v51  ;;  %v4216_v44 = vmul.f32 6.277114e-07, %v10055_v51 }
 0x741   : > { %v4155_v19 = vmul.f32 3.140625, %v10079_v9  ;;  %v4218_v4 = vmul.f32 6.277114e-07, %v10057_v17  ;;  %v10090_v24 = vfloor.f32 %v4124_v53  ;;  %v4265_v32 = vmul.f32 -2.5052108e-08, %v10077_v63 }
 0x742   : > { %v4202_v41 = vsub.f32 %v4170_v35, %v4186_v36  ;;  %v4187_v31 = vmul.f32 0.00096702576, %v10079_v9  ;;  %v4442_v30 = vmul.f32 0.5, %v10057_v17  ;;  %v4278_v33 = vadd.f32 2.7557319e-06, %v4262_v26 }
 0x743   : > { %v4171_v3 = vsub.f32 %v4089_v6, %v4155_v19  ;;  %v10097_v56 = vmul.f32 %v10082_v38, %v10082_v38  ;;  %v4156_v13 = vmul.f32 3.140625, %v10090_v24  ;;  %v10102_v0 = vmul.f32 2.0, %v4457_v28 }
 0x744   : > { %v10099_v40 = vsub.f32 %v4202_v41, %v4218_v4  ;;  %v4200_v53 = vsub.f32 %v4168_v59, %v4184_v50  ;;  %v4219_v36 = vmul.f32 6.277114e-07, %v10079_v9  ;;  %v4281_v6 = vadd.f32 2.7557319e-06, %v4265_v32 }
 0x745   : > { %v4203_v35 = vsub.f32 %v4171_v3, %v4187_v31  ;;  %v4172_v26 = vsub.f32 %v4091_v45, %v4156_v13  ;;  %v4188_v49 = vmul.f32 0.00096702576, %v10090_v24  ;;  %v4294_v60 = vmul.f32 %v4278_v33, %v10053_v52 }
 0x746   : > { %v10107_v19 = vmul.f32 %v10099_v40, %v10099_v40  ;;  %v4220_v41 = vmul.f32 6.277114e-07, %v10090_v24  ;;  %v4458_v4 = vfloor.f32 %v4442_v30  ;;  %v4297_v28 = vmul.f32 %v4281_v6, %v10077_v63 }
 0x747   : > { %v4438_v59 = vmul.f32 0.5, %v9996_v16  ;;  %v4204_v50 = vsub.f32 %v4172_v26, %v4188_v49  ;;  %v4310_v32 = vadd.f32 -0.0001984127, %v4294_v60  ;;  %v4444_v31 = vmul.f32 0.5, %v10090_v24 }
 0x748   : > { %v4266_v3 = vmul.f32 -2.5052108e-08, %v10107_v19  ;;  %v10116_v43 = vsub.f32 %v4200_v53, %v4216_v44  ;;  %v10118_v45 = vsub.f32 %v4203_v35, %v4219_v36  ;;  %v4313_v13 = vadd.f32 -0.0001984127, %v4297_v28 }
 0x749   : > { %v4489_v33 = vsub.f32 %v10032_v1, %v10102_v0  ;;  %v10122_v5 = vsub.f32 %v4204_v50, %v4220_v41  ;;  %v4326_v6 = vmul.f32 %v4310_v32, %v10053_v52  ;;  %v4454_v39 = vfloor.f32 %v4438_v59 }
 0x74a   : > { %v4282_v30 = vadd.f32 2.7557319e-06, %v4266_v3  ;;  %v4329_v49 = vmul.f32 %v4313_v13, %v10077_v63  ;;  %v4460_v26 = vfloor.f32 %v4444_v31  ;;  %v4261_v60 = vmul.f32 -2.5052108e-08, %v10064_v10 }
 0x74b   : > { %v4437_v44 = vmul.f32 0.5, %v9951_v61  ;;  %v10130_v53 = vmul.f32 %v10122_v5, %v10122_v5  ;;  %v4474_v1 = vmul.f32 2.0, %v4458_v4  ;;  %v4342_v0 = vadd.f32 0.008333334, %v4326_v6 }
 0x74c   : > { %v4298_v35 = vmul.f32 %v4282_v30, %v10107_v19  ;;  %v10135_v36 = vmul.f32 %v10118_v45, %v10118_v45  ;;  %v4345_v41 = vadd.f32 0.008333334, %v4329_v49  ;;  %v4277_v28 = vadd.f32 2.7557319e-06, %v4261_v60 }
 0x74d   : > { %v4453_v59 = vfloor.f32 %v4437_v44  ;;  %v10139_v50 = vmul.f32 %v10116_v43, %v10116_v43  ;;  %v4358_v32 = vmul.f32 %v4342_v0, %v10053_v52  ;;  %v4268_v31 = vmul.f32 -2.5052108e-08, %v10130_v53 }
 0x74e   : > { %v4314_v3 = vadd.f32 -0.0001984127, %v4298_v35  ;;  %v4361_v13 = vmul.f32 %v4345_v41, %v10077_v63  ;;  %v4470_v4 = vmul.f32 2.0, %v4454_v39  ;;  %v10144_v30 = vmul.f32 2.0, %v4460_v26 }
 0x74f   : > { %v4293_v6 = vmul.f32 %v4277_v28, %v10064_v10  ;;  %v4374_v60 = vadd.f32 -0.16666667, %v4358_v32  ;;  %v4284_v44 = vadd.f32 2.7557319e-06, %v4268_v31  ;;  %v4469_v20 = vmul.f32 2.0, %v4453_v59 }
 0x750   : > { %v4330_v49 = vmul.f32 %v4314_v3, %v10107_v19  ;;  %v4490_v11 = vsub.f32 %v10057_v17, %v4474_v1  ;;  %v4377_v46 = vadd.f32 -0.16666667, %v4361_v13  ;;  %v4267_v0 = vmul.f32 -2.5052108e-08, %v10135_v36 }
 0x751   : > { %v4309_v35 = vadd.f32 -0.0001984127, %v4293_v6  ;;  %v4390_v22 = vmul.f32 %v4374_v60, %v10053_v52  ;;  %v4300_v39 = vmul.f32 %v4284_v44, %v10130_v53  ;;  %v4443_v26 = vmul.f32 0.5, %v10079_v9 }
 0x752   : > { %v4346_v27 = vadd.f32 0.008333334, %v4330_v49  ;;  %v4393_v41 = vmul.f32 %v4377_v46, %v10077_v63  ;;  %v4486_v28 = vsub.f32 %v9996_v16, %v4470_v4  ;;  %v4283_v59 = vadd.f32 2.7557319e-06, %v4267_v0 }
 0x753   : > { %v4325_v3 = vmul.f32 %v4309_v35, %v10064_v10  ;;  %v4406_v1 = vmul.f32 %v4390_v22, %v10041_v48  ;;  %v4316_v32 = vadd.f32 -0.0001984127, %v4300_v39  ;;  %v4485_v31 = vsub.f32 %v9951_v61, %v4469_v20 }
 0x754   : > { %v4362_v17 = vmul.f32 %v4346_v27, %v10107_v19  ;;  %v4409_v52 = vmul.f32 %v4393_v41, %v10066_v18  ;;  %v4299_v6 = vmul.f32 %v4283_v59, %v10135_v36  ;;  %v4258_v49 = vmul.f32 -2.5052108e-08, %v10014_v7 }
 0x755   : > { %v4341_v13 = vadd.f32 0.008333334, %v4325_v3  ;;  %v4422_v16 = vadd.f32 %v4406_v1, %v10041_v48  ;;  %v4332_v63 = vmul.f32 %v4316_v32, %v10130_v53  ;;  %v4459_v4 = vfloor.f32 %v4443_v26 }
 0x756   : > { %v4378_v46 = vadd.f32 -0.16666667, %v4362_v17  ;;  %v4425_v27 = vadd.f32 %v4409_v52, %v10066_v18  ;;  %vm10165_vm8 = vcmp.gt.f32.partialorder %v4489_v33, 0.5  ;;  %v4315_v20 = vadd.f32 -0.0001984127, %v4299_v6 }
 0x757   : > { %v4357_v61 = vmul.f32 %v4341_v13, %v10064_v10  ;;  %v4274_v60 = vadd.f32 2.7557319e-06, %v4258_v49  ;;  %vm10171_vm9 = vcmp.gt.f32.partialorder %v4490_v11, 0.5  ;;  %v4348_v48 = vadd.f32 0.008333334, %v4332_v63 }
 0x758   : > { %v4394_v44 = vmul.f32 %v4378_v46, %v10107_v19  ;;  %v4492_v0 = vsub.f32 %v10090_v24, %v10144_v30  ;;  %vm10177_vm10 = vcmp.gt.f32.partialorder %v4486_v28, 0.5  ;;  %v4331_v39 = vmul.f32 %v4315_v20, %v10135_v36 }
 0x759   : > { %v4373_v33 = vadd.f32 -0.16666667, %v4357_v61  ;;  %v4290_v26 = vmul.f32 %v4274_v60, %v10014_v7  ;;  %v4518_v19 = vsub.f32 0.0, %v4422_v16  ;;  %v4364_v11 = vmul.f32 %v4348_v48, %v10130_v53 }
 0x75a   : > { %v4410_v41 = vmul.f32 %v4394_v44, %v10099_v40  ;;  %vm10185_vm11 = vcmp.gt.f32.partialorder %v4485_v31, 0.5  ;;  %v4475_v59 = vmul.f32 2.0, %v4459_v4  ;;  %v4521_v24 = vsub.f32 0.0, %v4425_v27 }
 0x75b   : > { %v4389_v30 = vmul.f32 %v4373_v33, %v10064_v10  ;;  %v4347_v28 = vadd.f32 0.008333334, %v4331_v39  ;;  %v4306_v17 = vadd.f32 -0.0001984127, %v4290_v26  ;;  %v4380_v32 = vadd.f32 -0.16666667, %v4364_v11 }
 0x75c   : > { %v4426_v1 = vadd.f32 %v4410_v41, %v10099_v40  ;;  %v4434_v52 = vmul.f32 0.5, %v9936_v55  ;;  %v4264_v13 = vmul.f32 -2.5052108e-08, %v10139_v50  ;;  %v4440_v46 = vmul.f32 0.5, %v10055_v51 }
 0x75d   : > { %v4405_v6 = vmul.f32 %v4389_v30, %v10039_v62  ;;  %v4363_v31 = vmul.f32 %v4347_v28, %v10135_v36  ;;  %v4322_v49 = vmul.f32 %v4306_v17, %v10014_v7  ;;  %v4396_v10 = vmul.f32 %v4380_v32, %v10130_v53 }
 0x75e   : > { %v4522_v63 = vsub.f32 0.0, %v4426_v1  ;;  %v4491_v4 = vsub.f32 %v10079_v9, %v4475_v59  ;;  %v4280_v61 = vadd.f32 2.7557319e-06, %v4264_v13  ;;  %v4450_v44 = vfloor.f32 %v4434_v52 }
 0x75f   : > { %v4421_v40 = vadd.f32 %v4405_v6, %v10039_v62  ;;  %v4379_v20 = vadd.f32 -0.16666667, %v4363_v31  ;;  %v4338_v60 = vadd.f32 0.008333334, %v4322_v49  ;;  %v4537_v33 = vsel %vm10165_vm8, %v4521_v24, %v4425_v27 }
 0x760   : > { %v4538_v48 = vsel %vm10171_vm9, %v4522_v63, %v4426_v1  ;;  %v4412_v39 = vmul.f32 %v4396_v10, %v10122_v5  ;;  %v4296_v26 = vmul.f32 %v4280_v61, %v10139_v50  ;;  %v4456_v62 = vfloor.f32 %v4440_v46 }
 0x761   : > { %4565 = vmatprep.subr.mxu0 %v4538_v48  ;;  %v4517_v53 = vsub.f32 0.0, %v4421_v40  ;;  %v4395_v9 = vmul.f32 %v4379_v20, %v10135_v36  ;;  %v4354_v41 = vmul.f32 %v4338_v60, %v10014_v7  ;;  %v4534_v11 = vsel %vm10177_vm10, %v4518_v19, %v4422_v16 }
 0x762   : > { %4566 = vmatpush1.msra.mxu0 %v4537_v33  ;;  %v4428_v35 = vadd.f32 %v4412_v39, %v10122_v5  ;;  %v4312_v59 = vadd.f32 -0.0001984127, %v4296_v26  ;;  %v4257_v27 = vmul.f32 -2.5052108e-08, %v10001_v8  ;;  %v4466_v36 = vmul.f32 2.0, %v4450_v44 }
 0x763   : > { %4567 = vmatprep.subr.mxu0 %v4534_v11  ;;  %v4533_v22 = vsel %vm10185_vm11, %v4517_v53, %v4421_v40  ;;  %v4411_v24 = vmul.f32 %v4395_v9, %v10118_v45  ;;  %v4370_v30 = vadd.f32 -0.16666667, %v4354_v41  ;;  %vm4508_vm12 = vcmp.gt.f32.partialorder %v4492_v0, 0.5 }
 0x764   : > { %v4524_v28 = vsub.f32 0.0, %v4428_v35  ;;  %4568 = vmatpush1.msra.mxu0 %v4533_v22  ;;  %v4328_v17 = vmul.f32 %v4312_v59, %v10139_v50  ;;  %v4273_v18 = vadd.f32 2.7557319e-06, %v4257_v27  ;;  %vm10217_vm13 = vcmp.gt.f32.partialorder %v4491_v4, 0.5 }
 0x765   : > { %v4427_v16 = vadd.f32 %v4411_v24, %v10118_v45  ;;  %v4386_v19 = vmul.f32 %v4370_v30, %v10014_v7  ;;  %v4472_v3 = vmul.f32 2.0, %v4456_v62  ;;  %v4263_v0 = vmul.f32 -2.5052108e-08, %v10097_v56 }
 0x766   : > { %v4540_v1 = vsel %vm4508_vm12, %v4524_v28, %v4428_v35  ;;  %v4344_v32 = vadd.f32 0.008333334, %v4328_v17  ;;  %v4289_v52 = vmul.f32 %v4273_v18, %v10001_v8  ;;  %v4482_v31 = vsub.f32 %v9936_v55, %v4466_v36 }
 0x767   : > { %4636 = vmatprep.subr.mxu1 %v4540_v1  ;;  %v4523_v13 = vsub.f32 0.0, %v4427_v16  ;;  %v4402_v6 = vmul.f32 %v4386_v19, %v9990_v47  ;;  %v4433_v45 = vmul.f32 0.5, %v9926_v15  ;;  %v4279_v63 = vadd.f32 2.7557319e-06, %v4263_v0 }
 0x768   : > { %v4360_v49 = vmul.f32 %v4344_v32, %v10139_v50  ;;  %v4305_v46 = vadd.f32 -0.0001984127, %v4289_v52  ;;  %v4254_v7 = vmul.f32 -2.5052108e-08, %v9988_v34  ;;  %v10231_v10 = vmul.f32 %v10071_v25, %v10071_v25 }
 0x769   : > { %v4539_v4 = vsel %vm10217_vm13, %v4523_v13, %v4427_v16  ;;  %v4418_v61 = vadd.f32 %v4402_v6, %v9990_v47  ;;  %v4439_v40 = vmul.f32 0.5, %v10036_v54  ;;  %v4295_v60 = vmul.f32 %v4279_v63, %v10097_v56 }
 0x76a   : > { %4637 = vmatpush1.msra.mxu1 %v4539_v4  ;;  %v4376_v55 = vadd.f32 -0.16666667, %v4360_v49  ;;  %v4321_v20 = vmul.f32 %v4305_v46, %v10001_v8  ;;  %v4270_v44 = vadd.f32 2.7557319e-06, %v4254_v7  ;;  %vm4498_vm14 = vcmp.gt.f32.partialorder %v4482_v31, 0.5 }
 0x76b   : > { %v4514_v48 = vsub.f32 0.0, %v4418_v61  ;;  %v4488_v33 = vsub.f32 %v10055_v51, %v4472_v3  ;;  %v4449_v39 = vfloor.f32 %v4433_v45  ;;  %v4311_v9 = vadd.f32 -0.0001984127, %v4295_v60 }
 0x76c   : > { %v4392_v26 = vmul.f32 %v4376_v55, %v10139_v50  ;;  %v4337_v53 = vadd.f32 0.008333334, %v4321_v20  ;;  %v4286_v47 = vmul.f32 %v4270_v44, %v9988_v34  ;;  %v10244_v41 = vmul.f32 %v10017_v37, %v10017_v37 }
 0x76d   : > { %v10248_v62 = vmul.f32 %v10060_v42, %v10060_v42  ;;  %v4530_v11 = vsel %vm4498_vm14, %v4514_v48, %v4418_v61  ;;  %v4455_v35 = vfloor.f32 %v4439_v40  ;;  %v4327_v50 = vmul.f32 %v4311_v9, %v10097_v56 }
 0x76e   : > { %4569 = vmatprep.subr.mxu0 %v4530_v11  ;;  %v4408_v51 = vmul.f32 %v4392_v26, %v10116_v43  ;;  %v4353_v59 = vmul.f32 %v4337_v53, %v10001_v8  ;;  %v4302_v27 = vadd.f32 -0.0001984127, %v4286_v47  ;;  %v10255_v22 = vmul.f32 %v10069_v23, %v10069_v23  ;;  %v12278_v53 = vld [vmem:[#allocation23_spill] sm:$0xff] }
 0x76f   : > { %vm10257_vm2 = vcmp.gt.f32.partialorder %v4488_v33, 0.5  ;;  %v4465_v30 = vmul.f32 2.0, %v4449_v39  ;;  %v4260_v36 = vmul.f32 -2.5052108e-08, %v10231_v10  ;;  %v4343_v18 = vadd.f32 0.008333334, %v4327_v50 }
 0x770   : > { %v4424_v28 = vadd.f32 %v4408_v51, %v10116_v43  ;;  %v4369_v17 = vadd.f32 -0.16666667, %v4353_v59  ;;  %v4318_v16 = vmul.f32 %v4302_v27, %v9988_v34  ;;  %v4471_v5 = vmul.f32 2.0, %v4455_v35 }
 0x771   : > { %v4446_v19 = vfloor.f32 %v9984_v2  ;;  %v4276_v3 = vadd.f32 2.7557319e-06, %v4260_v36  ;;  %v4253_v1 = vmul.f32 -2.5052108e-08, %v9977_v29  ;;  %v4359_v0 = vmul.f32 %v4343_v18, %v10097_v56 }
 0x772   : > { %v4520_v32 = vsub.f32 0.0, %v4424_v28  ;;  %v4385_v52 = vmul.f32 %v4369_v17, %v10001_v8  ;;  %v4334_v13 = vadd.f32 0.008333334, %v4318_v16  ;;  %v4481_v6 = vsub.f32 %v9926_v15, %v4465_v30  ;;  %v12273_v17 = vld [vmem:[#allocation25_spill] sm:$0xff] }
 0x773   : > { %v4292_v43 = vmul.f32 %v4276_v3, %v10231_v10  ;;  %v4436_v31 = vmul.f32 0.5, %v10006_v21  ;;  %v4269_v45 = vadd.f32 2.7557319e-06, %v4253_v1  ;;  %v4375_v46 = vadd.f32 -0.16666667, %v4359_v0 }
 0x774   : > { %v4536_v49 = vsel %vm10257_vm2, %v4520_v32, %v4424_v28  ;;  %v4401_v2 = vmul.f32 %v4385_v52, %v9972_v57  ;;  %v4350_v63 = vmul.f32 %v4334_v13, %v9988_v34  ;;  %v4487_v8 = vsub.f32 %v10036_v54, %v4471_v5  ;;  %v10305_v52 = vld [vmem:[%s7405_s22 + $0x10] sm:$0xff] }
 0x775   : > { %4638 = vmatprep.subr.mxu1 %v4536_v49  ;;  %v4462_v7 = vmul.f32 2.0, %v4446_v19  ;;  %v4308_v4 = vadd.f32 -0.0001984127, %v4292_v43  ;;  %v4285_v15 = vmul.f32 %v4269_v45, %v9977_v29  ;;  %v4391_v40 = vmul.f32 %v4375_v46, %v10097_v56 }
 0x776   : > { %v4417_v61 = vadd.f32 %v4401_v2, %v9972_v57  ;;  %v4366_v55 = vadd.f32 -0.16666667, %v4350_v63  ;;  %v4259_v20 = vmul.f32 -2.5052108e-08, %v10255_v22  ;;  %vm4497_vm3 = vcmp.gt.f32.partialorder %v4481_v6, 0.5 }
 0x777   : > { %v4324_v60 = vmul.f32 %v4308_v4, %v10231_v10  ;;  %v4452_v44 = vfloor.f32 %v4436_v31  ;;  %v4301_v48 = vadd.f32 -0.0001984127, %v4285_v15  ;;  %v4407_v39 = vmul.f32 %v4391_v40, %v10082_v38 }
 0x778   : > { %v4513_v33 = vsub.f32 0.0, %v4417_v61  ;;  %v4382_v54 = vmul.f32 %v4366_v55, %v9988_v34  ;;  %v4275_v26 = vadd.f32 2.7557319e-06, %v4259_v20  ;;  %vm10283_vm4 = vcmp.gt.f32.partialorder %v4487_v8, 0.5  ;;  %v12277_v55 = vld [vmem:[#allocation14_spill] sm:$0xff] }
 0x779   : > { %v4478_v57 = vsub.f32 %v9920_v14, %v4462_v7  ;;  %v4340_v56 = vadd.f32 0.008333334, %v4324_v60  ;;  %v4317_v9 = vmul.f32 %v4301_v48, %v9977_v29  ;;  %v4423_v11 = vadd.f32 %v4407_v39, %v10082_v38  ;;  %v12275_v7 = vld [vmem:[#allocation26_spill] sm:$0xff] }
 0x77a   : > { %v4529_v47 = vsel %vm4497_vm3, %v4513_v33, %v4417_v61  ;;  %v4398_v35 = vmul.f32 %v4382_v54, %v9964_v58  ;;  %v4291_v51 = vmul.f32 %v4275_v26, %v10255_v22  ;;  %v4468_v59 = vmul.f32 2.0, %v4452_v44  ;;  %v12276_v61 = vld [vmem:[#allocation5_spill] sm:$0xff] }
 0x77b   : > { %4570 = vmatpush1.msra.mxu0 %v4529_v47  ;;  %v4356_v34 = vmul.f32 %v4340_v56, %v10231_v10  ;;  %v4333_v50 = vadd.f32 0.008333334, %v4317_v9  ;;  %v4256_v27 = vmul.f32 -2.5052108e-08, %v10248_v62  ;;  %v4519_v24 = vsub.f32 0.0, %v4423_v11 }
 0x77c   : > { %v4414_v14 = vadd.f32 %v4398_v35, %v9964_v58  ;;  %v4445_v30 = vfloor.f32 %v9962_v12  ;;  %v4307_v36 = vadd.f32 -0.0001984127, %v4291_v51  ;;  %v4435_v18 = vmul.f32 0.5, %v12273_v17 }
 0x77d   : > { %v4372_v28 = vadd.f32 -0.16666667, %v4356_v34  ;;  %v4349_v38 = vmul.f32 %v4333_v50, %v9977_v29  ;;  %v4272_v16 = vadd.f32 2.7557319e-06, %v4256_v27  ;;  %v4535_v5 = vsel %vm10283_vm4, %v4519_v24, %v4423_v11 }
 0x77e   : > { %vm4494_vm5 = vcmp.gt.f32.partialorder %v4478_v57, 0.5  ;;  %v4510_v19 = vsub.f32 0.0, %v4414_v14  ;;  %v4323_v3 = vmul.f32 %v4307_v36, %v10255_v22  ;;  %4639 = vmatpush1.msra.mxu1 %v4535_v5  ;;  %v4484_v1 = vsub.f32 %v10006_v21, %v4468_v59  ;;  %v12274_v21 = vld [vmem:[#allocation20_spill] sm:$0xff] }
 0x77f   : > { %v4388_v58 = vmul.f32 %v4372_v28, %v10231_v10  ;;  %v4365_v12 = vadd.f32 -0.16666667, %v4349_v38  ;;  %v4288_v32 = vmul.f32 %v4272_v16, %v10248_v62  ;;  %v4461_v13 = vmul.f32 2.0, %v4445_v30 }
 0x780   : > { %v4526_v0 = vsel %vm4494_vm5, %v4510_v19, %v4414_v14  ;;  %v4339_v6 = vadd.f32 0.008333334, %v4323_v3  ;;  %v4255_v43 = vmul.f32 -2.5052108e-08, %v10244_v41  ;;  %v4451_v49 = vfloor.f32 %v4435_v18  ;;  %v7207_v14 = vld [vmem:[%s11909_s7] sm:$0x7] }
 0x781   : > { %4571 = vmatprep.subr.mxu0 %v4526_v0  ;;  %v4404_v31 = vmul.f32 %v4388_v58, %v10071_v25  ;;  %v4381_v45 = vmul.f32 %v4365_v12, %v9977_v29  ;;  %v4304_v2 = vadd.f32 -0.0001984127, %v4288_v32  ;;  %v4432_v46 = vmul.f32 0.5, %v12274_v21  ;;  %v7208_v58 = vld [vmem:[%s11903_s1] sm:$0xff] }
 0x782   : > { %v4355_v10 = vmul.f32 %v4339_v6, %v10255_v22  ;;  %v4271_v63 = vadd.f32 2.7557319e-06, %v4255_v43  ;;  %v4814_v40 = vrot.slane %v10305_v52, %v12276_v61  ;;  %vm4500_vm6 = vcmp.gt.f32.partialorder %v4484_v1, 0.5 }
 0x783   : > { %v4420_v8 = vadd.f32 %v4404_v31, %v10071_v25  ;;  %v4397_v4 = vmul.f32 %v4381_v45, %v12275_v7  ;;  %v4320_v15 = vmul.f32 %v4304_v2, %v10248_v62  ;;  %v4477_v20 = vsub.f32 %v12277_v55, %v4461_v13  ;;  %v7209_v13 = vld [vmem:[%s11903_s1 + $0x8] sm:$0xff]  ;;  %v7210_v31 = vld [vmem:[%s11903_s1 + $0x10] sm:$0xff] }
 0x784   : > { %v4371_v29 = vadd.f32 -0.16666667, %v4355_v10  ;;  %v4287_v60 = vmul.f32 %v4271_v63, %v10244_v41  ;;  %v4467_v33 = vmul.f32 2.0, %v4451_v49  ;;  %v4448_v54 = vfloor.f32 %v4432_v46  ;;  %v12280_v2 = vld [vmem:[#allocation22_spill] sm:$0xff] }
 0x785   : > { %v4516_v44 = vsub.f32 0.0, %v4420_v8  ;;  %v4413_v48 = vadd.f32 %v4397_v4, %v12275_v7  ;;  %v4336_v39 = vadd.f32 0.008333334, %v4320_v15  ;;  %v4431_v57 = vmul.f32 0.5, %v12278_v53  ;;  %v12281_v15 = vld [vmem:[#allocation7_spill] sm:$0xff] }
 0x786   : > { %v4387_v25 = vmul.f32 %v4371_v29, %v10255_v22  ;;  %v4303_v26 = vadd.f32 -0.0001984127, %v4287_v60  ;;  %v4822_v11 = vcombine.high %v4814_v40, %v4814_v40  ;;  %vm4493_vm7 = vcmp.gt.f32.partialorder %v4477_v20, 0.5 }
 0x787   : > { %v4532_v56 = vsel %vm4500_vm6, %v4516_v44, %v4420_v8  ;;  %v4509_v9 = vsub.f32 0.0, %v4413_v48  ;;  %v4352_v47 = vmul.f32 %v4336_v39, %v10248_v62  ;;  %v4483_v59 = vsub.f32 %v12273_v17, %v4467_v33 }
 0x788   : > { %4640 = vmatprep.subr.mxu1 %v4532_v56  ;;  %v4403_v35 = vmul.f32 %v4387_v25, %v10069_v23  ;;  %v4319_v51 = vmul.f32 %v4303_v26, %v10244_v41  ;;  %v4464_v27 = vmul.f32 2.0, %v4448_v54  ;;  %v4447_v36 = vfloor.f32 %v4431_v57 }
 0x789   : > { %v4525_v34 = vsel %vm4493_vm7, %v4509_v9, %v4413_v48  ;;  %v4368_v50 = vadd.f32 -0.16666667, %v4352_v47  ;;  %v12279_v17 = vmov 0.0   ;;  %vm4499_vm8 = vcmp.gt.f32.partialorder %v4483_v59, 0.5 }
 0x78a   : > { %4572 = vmatpush1.msra.mxu0 %v4525_v34  ;;  %v4419_v22 = vadd.f32 %v4403_v35, %v10069_v23  ;;  %v4335_v24 = vadd.f32 0.008333334, %v4319_v51  ;;  %v4807_v18 = vcombine.high %v10305_v52, %v10305_v52  ;;  %v4480_v5 = vsub.f32 %v12274_v21, %v4464_v27 }
 0x78b   : > { %7111 = vmatmul.mubr.msk.f32.vlgmr.msra.gmra.mxu0 %vm1067_vm15, %v7207_v14  ;;  %v4384_v30 = vmul.f32 %v4368_v50, %v10248_v62  ;;  %7113 = vmatprep.subr.msk.mxu0 %vm412_vm0, %v4822_v11  ;;  %v4463_v3 = vmul.f32 2.0, %v4447_v36 }
 0x78c   : > { %v4515_v28 = vsub.f32 0.0, %v4419_v22  ;;  %v4351_v38 = vmul.f32 %v4335_v24, %v10244_v41  ;;  %7114 = vmatpush1.msk.msra.mxu0 %vm412_vm0, %v4814_v40  ;;  %4896 = vmatprep.mubr.f32.mxu0 %v12279_v17  ;;  %vm4496_vm9 = vcmp.gt.f32.partialorder %v4480_v5, 0.5  ;;  %v4821_v52 = vrot.slane %v4807_v18, %v12276_v61 }
 0x78d   : > { %v4400_v23 = vmul.f32 %v4384_v30, %v10060_v42 }
 0x78e   : > { %v4531_v16 = vsel %vm4499_vm8, %v4515_v28, %v4419_v22  ;;  %v4367_v62 = vadd.f32 -0.16666667, %v4351_v38  ;;  %v4823_v43 = vcombine.high %v4821_v52, %v4821_v52 }
 0x78f   : > { %4641 = vmatpush1.msra.mxu1 %v4531_v16  ;;  %v4416_v19 = vadd.f32 %v4400_v23, %v10060_v42  ;;  %7115 = vmatmul.mubr.msk.f32.vlgmr.msra.gmra.mxu0 %vm399_vm1, %v7208_v58  ;;  %v4479_v42 = vsub.f32 %v12278_v53, %v4463_v3 }
 0x790   : > { %v4383_v1 = vmul.f32 %v4367_v62, %v10244_v41  ;;  %4902 = vmatprep.mubr.f32.mxu0 %v12279_v17 }
 0x791   : > { %v4512_v12 = vsub.f32 0.0, %v4416_v19  ;;  %vm4495_vm10 = vcmp.gt.f32.partialorder %v4479_v42, 0.5 }
 0x792   : > { %v4399_v32 = vmul.f32 %v4383_v1, %v10017_v37 }
 0x793   : > { %v4528_v0 = vsel %vm4496_vm9, %v4512_v12, %v4416_v19  ;;  %7116 = vmatmul.mubr.msk.f32.gmra.mxu0 %vm399_vm1, %v7209_v13 }
 0x794   : > { %4642 = vmatprep.subr.mxu1 %v4528_v0  ;;  %v4415_v41 = vadd.f32 %v4399_v32, %v10017_v37  ;;  %4908 = vmatprep.mubr.f32.mxu0 %v12279_v17  ;;  %v7211_v37 = vld [vmem:[%s11903_s1 + $0x18] sm:$0xff] }
 0x796   : > { %v4511_v6 = vsub.f32 0.0, %v4415_v41 }
 0x797   : > { %7117 = vmatmul.mubr.msk.f32.gmra.mxu0 %vm399_vm1, %v7210_v31 }
 0x798   : > { %v4527_v45 = vsel %vm4495_vm10, %v4511_v6, %v4415_v41  ;;  %4914 = vmatprep.mubr.f32.mxu0 %v12279_v17 }
 0x799   : > { %4643 = vmatpush1.msra.mxu1 %v4527_v45 }
 0x79a   : > { %7112 = vmatmul.mubr.msk.f32.vlgmr.msra.gmra.mxu1 %vm1067_vm15, %v7207_v14  ;;  %7119 = vmatprep.subr.msk.mxu1 %vm412_vm0, %v4823_v43 }
 0x79b   : > { %7120 = vmatpush1.msk.msra.mxu1 %vm412_vm0, %v4821_v52  ;;  %4985 = vmatprep.mubr.f32.mxu1 %v12279_v17 }
 0x79c   : > { %7118 = vmatmul.mubr.msk.f32.gmra.mxu0 %vm399_vm1, %v7211_v37 }
 0x79d   : > { %5522 = vmatprep.mubr.f32.mxu0 %v12279_v17 }
 0x79e   : > { %7121 = vmatmul.mubr.msk.f32.vlgmr.msra.gmra.mxu1 %vm399_vm1, %v7208_v58  ;;  %v12282_v58 = vld [vmem:[#allocation6_spill] sm:$0xff] }
 0x79f   : > { %4991 = vmatprep.mubr.f32.mxu1 %v12279_v17 }
 0x7a2   : > { %7122 = vmatmul.mubr.msk.f32.gmra.mxu1 %vm399_vm1, %v7209_v13 }
 0x7a3   : > { %4997 = vmatprep.mubr.f32.mxu1 %v12279_v17 }
 0x7a6   : > { %7123 = vmatmul.mubr.msk.f32.gmra.mxu1 %vm399_vm1, %v7210_v31 }
 0x7a7   : > { %5003 = vmatprep.mubr.f32.mxu1 %v12279_v17 }
 0x7aa   : > { %7124 = vmatmul.mubr.msk.f32.gmra.mxu1 %vm399_vm1, %v7211_v37 }
 0x7ab   : > { %5611 = vmatprep.mubr.f32.mxu1 %v12279_v17 }
 0x84b   : > { %v4607_v49 = vpop.f32.mrf.mxu0 }
 0x84c   : > { %v4608_v10 = vadd.f32 %v4607_v49, %v12280_v2 }
 0x84d   : > { %v4609_v21 = vpop.f32.mrf.mxu0 }
 0x84e   : > { %v4683_v46 = vmul.f32 0.31830987, %v4608_v10  ;;  %v4610_v63 = vadd.f32 %v4609_v21, %v12280_v2 }
 0x84f   : > { %v4898_v8 = vpop.f32.mrf.mxu0 }
 0x850   : > { %v4687_v7 = vadd.f32 0.5, %v4683_v46  ;;  %v4684_v4 = vmul.f32 0.31830987, %v4610_v63  ;;  %v10381_v61 = vadd.f32 %v4898_v8, %v12281_v15 }
 0x851   : > { %v4900_v40 = vpop.f32.mrf.mxu0 }
 0x852   : > { %v10383_v55 = vfloor.f32 %v4687_v7  ;;  %v4688_v20 = vadd.f32 0.5, %v4684_v4  ;;  %v5010_v29 = vmul.f32 0.31830987, %v10381_v61  ;;  %v10388_v44 = vadd.f32 %v4900_v40, %v12281_v15 }
 0x853   : > { %v4904_v35 = vpop.f32.mrf.mxu0 }
 0x854   : > { %v4695_v60 = vmul.f32 3.140625, %v10383_v55  ;;  %v10390_v48 = vfloor.f32 %v4688_v20  ;;  %v4703_v39 = vmul.f32 0.00096702576, %v10383_v55  ;;  %v4767_v25 = vmul.f32 0.5, %v10383_v55 }
 0x855   : > { %v5026_v54 = vadd.f32 0.5, %v5010_v29  ;;  %v4711_v57 = vmul.f32 6.277114e-07, %v10383_v55  ;;  %v5011_v9 = vmul.f32 0.31830987, %v10388_v44  ;;  %v4906_v16 = vpop.f32.mrf.mxu0  ;;  %v10417_v1 = vadd.f32 %v4904_v35, %v12282_v58 }
 0x856   : > { %v4699_v33 = vsub.f32 %v4608_v10, %v4695_v60  ;;  %v4696_v26 = vmul.f32 3.140625, %v10390_v48  ;;  %v4768_v56 = vmul.f32 0.5, %v10390_v48  ;;  %v4704_v11 = vmul.f32 0.00096702576, %v10390_v48 }
 0x857   : > { %v4771_v34 = vfloor.f32 %v4767_v25  ;;  %v10401_v50 = vfloor.f32 %v5026_v54  ;;  %v4712_v27 = vmul.f32 6.277114e-07, %v10390_v48  ;;  %v5027_v28 = vadd.f32 0.5, %v5011_v9 }
 0x858   : > { %v4707_v53 = vsub.f32 %v4699_v33, %v4703_v39  ;;  %v4700_v47 = vsub.f32 %v4610_v63, %v4696_v26  ;;  %v4772_v30 = vfloor.f32 %v4768_v56  ;;  %v10428_v41 = vadd.f32 %v4906_v16, %v12282_v58 }
 0x859   : > { %v10413_v62 = vmul.f32 2.0, %v4771_v34  ;;  %v5058_v19 = vmul.f32 3.140625, %v10401_v50  ;;  %v10425_v13 = vfloor.f32 %v5027_v28  ;;  %v5014_v21 = vmul.f32 0.31830987, %v10417_v1 }
 0x85a   : > { %v10399_v51 = vsub.f32 %v4707_v53, %v4711_v57  ;;  %v4678_v59 = vpop.f32.mrf.mxu1  ;;  %v4708_v22 = vsub.f32 %v4700_v47, %v4704_v11  ;;  %v10423_v42 = vmul.f32 2.0, %v4772_v30  ;;  %v5090_v8 = vmul.f32 0.00096702576, %v10401_v50 }
 0x85b   : > { %v4679_v24 = vadd.f32 %v4678_v59, %v12280_v2  ;;  %v4779_v49 = vsub.f32 %v10383_v55, %v10413_v62  ;;  %v5074_v10 = vsub.f32 %v10381_v61, %v5058_v19  ;;  %v5122_v7 = vmul.f32 6.277114e-07, %v10401_v50 }
 0x85c   : > { %v10407_v14 = vmul.f32 %v10399_v51, %v10399_v51  ;;  %v4680_v36 = vpop.f32.mrf.mxu1  ;;  %v10409_v38 = vsub.f32 %v4708_v22, %v4712_v27  ;;  %v4780_v40 = vsub.f32 %v10390_v48, %v10423_v42  ;;  %v5059_v29 = vmul.f32 3.140625, %v10425_v13 }
 0x85d   : > { %v4685_v23 = vmul.f32 0.31830987, %v4679_v24  ;;  %v4681_v18 = vadd.f32 %v4680_v36, %v12280_v2  ;;  %v5106_v26 = vsub.f32 %v5074_v10, %v5090_v8  ;;  %v5030_v56 = vadd.f32 0.5, %v5014_v21 }
 0x85e   : > { %v4723_v5 = vmul.f32 -2.5052108e-08, %v10407_v14  ;;  %v4987_v3 = vpop.f32.mrf.mxu1  ;;  %v10421_v12 = vmul.f32 %v10409_v38, %v10409_v38  ;;  %v5075_v22 = vsub.f32 %v10388_v44, %v5059_v29  ;;  %v5091_v16 = vmul.f32 0.00096702576, %v10425_v13 }
 0x85f   : > { %v4689_v32 = vadd.f32 0.5, %v4685_v23  ;;  %v4686_v52 = vmul.f32 0.31830987, %v4681_v18  ;;  %v10434_v45 = vadd.f32 %v4987_v3, %v12281_v15  ;;  %v5015_v42 = vmul.f32 0.31830987, %v10428_v41 }
 0x860   : > { %v4727_v0 = vadd.f32 2.7557319e-06, %v4723_v5  ;;  %v4724_v6 = vmul.f32 -2.5052108e-08, %v10421_v12  ;;  %v10469_v5 = vfloor.f32 %v5030_v56  ;;  %v10485_v10 = vsub.f32 %v5106_v26, %v5122_v7  ;;  %v4989_v21 = vpop.f32.mrf.mxu1 }
 0x861   : > { %v10431_v43 = vfloor.f32 %v4689_v32  ;;  %v4690_v31 = vadd.f32 0.5, %v4686_v52  ;;  %v5012_v33 = vmul.f32 0.31830987, %v10434_v45  ;;  %v5123_v8 = vmul.f32 6.277114e-07, %v10425_v13 }
 0x862   : > { %v4731_v37 = vmul.f32 %v4727_v0, %v10407_v14  ;;  %v4728_v46 = vadd.f32 2.7557319e-06, %v4724_v6  ;;  %v5107_v0 = vsub.f32 %v5075_v22, %v5091_v16  ;;  %12284 = vst [vmem:[#allocation24_spill] sm:$0xff] %v10485_v10  ;;  %vm10490_vm0 = vcmp.gt.f32.partialorder %v4779_v49, 0.5 }
 0x863   : > { %v4697_v63 = vmul.f32 3.140625, %v10431_v43  ;;  %v10446_v20 = vfloor.f32 %v4690_v31  ;;  %v4705_v60 = vmul.f32 0.00096702576, %v10431_v43  ;;  %v4769_v25 = vmul.f32 0.5, %v10431_v43 }
 0x864   : > { %v4735_v4 = vadd.f32 -0.0001984127, %v4731_v37  ;;  %v4732_v55 = vmul.f32 %v4728_v46, %v10421_v12  ;;  %v4713_v57 = vmul.f32 6.277114e-07, %v10431_v43  ;;  %v5028_v27 = vadd.f32 0.5, %v5012_v33 }
 0x865   : > { %v4701_v61 = vsub.f32 %v4679_v24, %v4697_v63  ;;  %v4698_v54 = vmul.f32 3.140625, %v10446_v20  ;;  %v4706_v11 = vmul.f32 0.00096702576, %v10446_v20  ;;  %v4770_v35 = vmul.f32 0.5, %v10446_v20 }
 0x866   : > { %v4739_v39 = vmul.f32 %v4735_v4, %v10407_v14  ;;  %v4736_v53 = vadd.f32 -0.0001984127, %v4732_v55  ;;  %v4773_v30 = vfloor.f32 %v4769_v25  ;;  %v4714_v28 = vmul.f32 6.277114e-07, %v10446_v20  ;;  %v12290_v55 = vld [vmem:[#allocation12_spill] sm:$0xff] }
 0x867   : > { %v4709_v48 = vsub.f32 %v4701_v61, %v4705_v60  ;;  %v4702_v47 = vsub.f32 %v4681_v18, %v4698_v54  ;;  %v4774_v44 = vfloor.f32 %v4770_v35  ;;  %v10473_v3 = vfloor.f32 %v5028_v27  ;;  %v4993_v27 = vpop.f32.mrf.mxu1 }
 0x868   : > { %v4743_v9 = vadd.f32 0.008333334, %v4739_v39  ;;  %v4740_v34 = vmul.f32 %v4736_v53, %v10421_v12  ;;  %v10479_v31 = vmul.f32 2.0, %v4773_v30  ;;  %v5062_v4 = vmul.f32 3.140625, %v10469_v5 }
 0x869   : > { %v10459_v59 = vsub.f32 %v4709_v48, %v4713_v57  ;;  %v4710_v36 = vsub.f32 %v4702_v47, %v4706_v11  ;;  %12283 = vst [vmem:[#allocation8_spill] sm:$0xff] %v10473_v3  ;;  %vm10494_vm1 = vcmp.gt.f32.partialorder %v4780_v40, 0.5  ;;  %v10499_v61 = vmul.f32 2.0, %v4774_v44 }
 0x86a   : > { %v4747_v24 = vmul.f32 %v4743_v9, %v10407_v14  ;;  %v4744_v23 = vadd.f32 0.008333334, %v4740_v34  ;;  %v5060_v60 = vmul.f32 3.140625, %v10473_v3  ;;  %v10504_v25 = vsub.f32 %v5107_v0, %v5123_v8 }
 0x86b   : > { %v10466_v18 = vmul.f32 %v10459_v59, %v10459_v59  ;;  %v10471_v19 = vsub.f32 %v4710_v36, %v4714_v28  ;;  %v4990_v49 = vadd.f32 %v4989_v21, %v12281_v15  ;;  %v4781_v40 = vsub.f32 %v10431_v43, %v10479_v31 }
 0x86c   : > { %v4751_v62 = vadd.f32 -0.16666667, %v4747_v24  ;;  %v4748_v32 = vmul.f32 %v4744_v23, %v10421_v12  ;;  %v5031_v53 = vadd.f32 0.5, %v5015_v42  ;;  %v5078_v56 = vsub.f32 %v10417_v1, %v5062_v4  ;;  %v4910_v24 = vpop.f32.mrf.mxu0 }
 0x86d   : > { %v4725_v52 = vmul.f32 -2.5052108e-08, %v10466_v18  ;;  %v10483_v37 = vmul.f32 %v10471_v19, %v10471_v19  ;;  %v5013_v9 = vmul.f32 0.31830987, %v4990_v49  ;;  %v4782_v47 = vsub.f32 %v10446_v20, %v10499_v61 }
 0x86e   : > { %v4755_v6 = vmul.f32 %v4751_v62, %v10407_v14  ;;  %v4752_v46 = vadd.f32 -0.16666667, %v4748_v32  ;;  %v5076_v15 = vsub.f32 %v10434_v45, %v5060_v60  ;;  %v10516_v11 = vfloor.f32 %v5031_v53 }
 0x86f   : > { %v4729_v63 = vadd.f32 2.7557319e-06, %v4725_v52  ;;  %v4726_v7 = vmul.f32 -2.5052108e-08, %v10483_v37  ;;  %v5029_v22 = vadd.f32 0.5, %v5013_v9  ;;  %v5092_v1 = vmul.f32 0.00096702576, %v10473_v3 }
 0x870   : > { %v4759_v29 = vmul.f32 %v4755_v6, %v10399_v51  ;;  %v4756_v33 = vmul.f32 %v4752_v46, %v10421_v12  ;;  %v5124_v36 = vmul.f32 6.277114e-07, %v10473_v3  ;;  %v5063_v28 = vmul.f32 3.140625, %v10516_v11  ;;  %v4995_v46 = vpop.f32.mrf.mxu1 }
 0x871   : > { %v4733_v39 = vmul.f32 %v4729_v63, %v10466_v18  ;;  %v4730_v26 = vadd.f32 2.7557319e-06, %v4726_v7  ;;  %v5094_v45 = vmul.f32 0.00096702576, %v10469_v5  ;;  %v10524_v62 = vfloor.f32 %v5029_v22  ;;  %v4912_v63 = vpop.f32.mrf.mxu0 }
 0x872   : > { %v4763_v54 = vadd.f32 %v4759_v29, %v10399_v51  ;;  %v4760_v48 = vmul.f32 %v4756_v33, %v10409_v38  ;;  %v5108_v44 = vsub.f32 %v5076_v15, %v5092_v1  ;;  %v5126_v32 = vmul.f32 6.277114e-07, %v10469_v5  ;;  %v4999_v9 = vpop.f32.mrf.mxu1 }
 0x873   : > { %v4737_v57 = vadd.f32 -0.0001984127, %v4733_v39  ;;  %v4734_v12 = vmul.f32 %v4730_v26, %v10483_v37  ;;  %12289 = vst [vmem:[#allocation13_spill] sm:$0xff] %v10524_v62  ;;  %v10529_v52 = vadd.f32 %v4993_v27, %v12282_v58  ;;  %v5061_v21 = vmul.f32 3.140625, %v10524_v62 }
 0x874   : > { %v4787_v51 = vsub.f32 0.0, %v4763_v54  ;;  %v4764_v35 = vadd.f32 %v4760_v48, %v10409_v38  ;;  %v5110_v29 = vsub.f32 %v5078_v56, %v5094_v45  ;;  %v5079_v7 = vsub.f32 %v10428_v41, %v5063_v28 }
 0x875   : > { %v4741_v34 = vmul.f32 %v4737_v57, %v10466_v18  ;;  %v4738_v30 = vadd.f32 -0.0001984127, %v4734_v12  ;;  %v5077_v33 = vsub.f32 %v4990_v49, %v5061_v21  ;;  %v5016_v39 = vmul.f32 0.31830987, %v10529_v52 }
 0x876   : > { %v4788_v23 = vsub.f32 0.0, %v4764_v35  ;;  %v4791_v0 = vsel %vm10490_vm0, %v4787_v51, %v4763_v54  ;;  %v10540_v54 = vadd.f32 %v4910_v24, %v12290_v55  ;;  %v5095_v26 = vmul.f32 0.00096702576, %v10516_v11 }
 0x877   : > { %v4745_v16 = vadd.f32 0.008333334, %v4741_v34  ;;  %v4742_v38 = vmul.f32 %v4738_v30, %v10483_v37  ;;  %v10546_v53 = vadd.f32 %v4995_v46, %v12282_v58  ;;  %v4913_v48 = vadd.f32 %v4912_v63, %v12290_v55  ;;  %v4916_v63 = vpop.f32.mrf.mxu0 }
 0x878   : > { %v4792_v42 = vsel %vm10494_vm1, %v4788_v23, %v4764_v35  ;;  %v5093_v41 = vmul.f32 0.00096702576, %v10524_v62  ;;  %v5032_v49 = vadd.f32 0.5, %v5016_v39  ;;  %v5018_v56 = vmul.f32 0.31830987, %v10540_v54 }
 0x879   : > { %v4749_v6 = vmul.f32 %v4745_v16, %v10466_v18  ;;  %v4799_v8 = vcombine.low %v4791_v0, %v4792_v42  ;;  %v4746_v4 = vadd.f32 0.008333334, %v4742_v38  ;;  %v5111_v15 = vsub.f32 %v5079_v7, %v5095_v26 }
 0x87a   : > { %v5017_v51 = vmul.f32 0.31830987, %v10546_v53  ;;  %v5019_v35 = vmul.f32 0.31830987, %v4913_v48  ;;  %v10554_v22 = vsub.f32 %v5108_v44, %v5124_v36  ;;  %v5109_v58 = vsub.f32 %v5077_v33, %v5093_v41 }
 0x87b   : > { %v4753_v60 = vadd.f32 -0.16666667, %v4749_v6  ;;  %4803 = vst [vmem:[%s9038_s17 + $0x10] sm:$0x77] %v4799_v8  ;;  %v4750_v14 = vmul.f32 %v4746_v4, %v10483_v37  ;;  %v5034_v27 = vadd.f32 0.5, %v5018_v56  ;;  %v10559_v1 = vadd.f32 %v4999_v9, %v12290_v55  ;;  %v5001_v8 = vpop.f32.mrf.mxu1 }
 0x87c   : > { %12291 = vst [vmem:[#allocation25_spill] sm:$0xff] %v10554_v22  ;;  %v5035_v30 = vadd.f32 0.5, %v5019_v35  ;;  %v5125_v23 = vmul.f32 6.277114e-07, %v10524_v62  ;;  %v10563_v16 = vfloor.f32 %v5032_v49  ;;  %v5033_v45 = vadd.f32 0.5, %v5017_v51 }
 0x87d   : > { %v4757_v57 = vmul.f32 %v4753_v60, %v10466_v18  ;;  %v4754_v12 = vadd.f32 -0.16666667, %v4750_v14  ;;  %v5127_v18 = vmul.f32 6.277114e-07, %v10516_v11  ;;  %v10568_v38 = vmul.f32 %v10485_v10, %v10485_v10  ;;  %v5005_v41 = vpop.f32.mrf.mxu1 }
 0x87e   : > { %v10574_v42 = vsub.f32 %v5109_v58, %v5125_v23  ;;  %v10576_v6 = vfloor.f32 %v5034_v27  ;;  %vm4785_vm11 = vcmp.gt.f32.partialorder %v4781_v40, 0.5  ;;  %v10586_v46 = vmul.f32 %v10504_v25, %v10504_v25 }
 0x87f   : > { %v4761_v34 = vmul.f32 %v4757_v57, %v10459_v59  ;;  %v4758_v24 = vmul.f32 %v4754_v12, %v10483_v37  ;;  %v10570_v37 = vsub.f32 %v5110_v29, %v5126_v32  ;;  %v10572_v44 = vsub.f32 %v5111_v15, %v5127_v18  ;;  %v4918_v57 = vpop.f32.mrf.mxu0  ;;  %v12295_v12 = vld [vmem:[#allocation9_spill] sm:$0xff] }
 0x880   : > { %12292 = vst [vmem:[#allocation20_spill] sm:$0xff] %v10574_v42  ;;  %v5020_v32 = vmul.f32 0.31830987, %v10559_v1  ;;  %vm4786_vm12 = vcmp.gt.f32.partialorder %v4782_v47, 0.5  ;;  %v10594_v4 = vmul.f32 %v10554_v22, %v10554_v22  ;;  %v5064_v43 = vmul.f32 3.140625, %v10563_v16 }
 0x881   : > { %v4765_v28 = vadd.f32 %v4761_v34, %v10459_v59  ;;  %v4762_v36 = vmul.f32 %v4758_v24, %v10471_v19  ;;  %v10578_v59 = vfloor.f32 %v5035_v30  ;;  %v10597_v31 = vfloor.f32 %v5033_v45  ;;  %v5007_v45 = vpop.f32.mrf.mxu1 }
 0x882   : > { %12293 = vst [vmem:[#allocation26_spill] sm:$0xff] %v10594_v4  ;;  %v10601_v40 = vmul.f32 %v10570_v37, %v10570_v37  ;;  %v10605_v29 = vmul.f32 %v10572_v44, %v10572_v44  ;;  %v10610_v47 = vmul.f32 %v10574_v42, %v10574_v42  ;;  %v5096_v7 = vmul.f32 0.00096702576, %v10563_v16 }
 0x883   : > { %v4789_v0 = vsub.f32 0.0, %v4765_v28  ;;  %v4766_v21 = vadd.f32 %v4762_v36, %v10471_v19  ;;  %v5067_v20 = vmul.f32 3.140625, %v10578_v59  ;;  %v5066_v60 = vmul.f32 3.140625, %v10576_v6 }
 0x884   : > { %12294 = vst [vmem:[#allocation5_spill] sm:$0xff] %v10610_v47  ;;  %v5099_v14 = vmul.f32 0.00096702576, %v10578_v59  ;;  %v5036_v26 = vadd.f32 0.5, %v5020_v32  ;;  %v5080_v56 = vsub.f32 %v10529_v52, %v5064_v43  ;;  %v5065_v9 = vmul.f32 3.140625, %v10597_v31 }
 0x885   : > { %v4790_v19 = vsub.f32 0.0, %v4766_v21  ;;  %v4793_v61 = vsel %vm4785_vm11, %v4789_v0, %v4765_v28  ;;  %v5083_v39 = vsub.f32 %v4913_v48, %v5067_v20  ;;  %v4917_v15 = vadd.f32 %v4916_v63, %v12295_v12 }
 0x886   : > { %v5131_v35 = vmul.f32 6.277114e-07, %v10578_v59  ;;  %v10619_v34 = vfloor.f32 %v5036_v26  ;;  %v5002_v58 = vadd.f32 %v5001_v8, %v12290_v55  ;;  %v5098_v48 = vmul.f32 0.00096702576, %v10576_v6 }
 0x887   : > { %v4794_v33 = vsel %vm4786_vm12, %v4790_v19, %v4766_v21  ;;  %v5115_v51 = vsub.f32 %v5083_v39, %v5099_v14  ;;  %v5022_v27 = vmul.f32 0.31830987, %v4917_v15  ;;  %v4919_v24 = vadd.f32 %v4918_v57, %v12295_v12 }
 0x888   : > { %v4800_v49 = vcombine.low %v4793_v61, %v4794_v33  ;;  %v5006_v18 = vadd.f32 %v5005_v41, %v12295_v12  ;;  %v5082_v52 = vsub.f32 %v10540_v54, %v5066_v60  ;;  %v5130_v30 = vmul.f32 6.277114e-07, %v10576_v6 }
 0x889   : > { %v10628_v28 = vsub.f32 %v5115_v51, %v5131_v35  ;;  %v5068_v23 = vmul.f32 3.140625, %v10619_v34  ;;  %v10631_v36 = vsub.f32 %v5080_v56, %v5096_v7  ;;  %v5081_v55 = vsub.f32 %v10546_v53, %v5065_v9 }
 0x88a   : > { %4804 = vst [vmem:[%s9038_s17 + $0x18] sm:$0x77] %v4800_v49  ;;  %v5038_v0 = vadd.f32 0.5, %v5022_v27  ;;  %v5021_v21 = vmul.f32 0.31830987, %v5002_v58  ;;  %v5097_v32 = vmul.f32 0.00096702576, %v10597_v31  ;;  %v5008_v61 = vadd.f32 %v5007_v45, %v12295_v12 }
 0x88b   : > { %v10636_v63 = vmul.f32 6.277114e-07, %v10597_v31  ;;  %v5023_v8 = vmul.f32 0.31830987, %v4919_v24  ;;  %v5024_v54 = vmul.f32 0.31830987, %v5006_v18  ;;  %v5084_v43 = vsub.f32 %v10559_v1, %v5068_v23 }
 0x88c   : > { %v10639_v19 = vfloor.f32 %v5038_v0  ;;  %v5037_v20 = vadd.f32 0.5, %v5021_v21  ;;  %v5114_v7 = vsub.f32 %v5082_v52, %v5098_v48  ;;  %v10644_v53 = vmul.f32 %v10628_v28, %v10628_v28 }
 0x88d   : > { %v5039_v60 = vadd.f32 0.5, %v5023_v8  ;;  %v5040_v33 = vadd.f32 0.5, %v5024_v54  ;;  %v10646_v39 = vsub.f32 %v5081_v55, %v5097_v32  ;;  %v5100_v14 = vmul.f32 0.00096702576, %v10619_v34 }
 0x88e   : > { %v5070_v26 = vmul.f32 3.140625, %v10639_v19  ;;  %v10650_v57 = vfloor.f32 %v5037_v20  ;;  %v5132_v1 = vmul.f32 6.277114e-07, %v10619_v34  ;;  %v5025_v56 = vmul.f32 0.31830987, %v5008_v61 }
 0x88f   : > { %v10653_v41 = vfloor.f32 %v5039_v60  ;;  %v10655_v49 = vfloor.f32 %v5040_v33  ;;  %v5116_v9 = vsub.f32 %v5084_v43, %v5100_v14  ;;  %v5102_v51 = vmul.f32 0.00096702576, %v10639_v19 }
 0x890   : > { %v5086_v12 = vsub.f32 %v4917_v15, %v5070_v26  ;;  %v5069_v35 = vmul.f32 3.140625, %v10650_v57  ;;  %v5134_v48 = vmul.f32 6.277114e-07, %v10639_v19  ;;  %v5101_v27 = vmul.f32 0.00096702576, %v10650_v57 }
 0x891   : > { %v5071_v52 = vmul.f32 3.140625, %v10653_v41  ;;  %v5179_v23 = vmul.f32 -2.5052108e-08, %v10644_v53  ;;  %v5103_v0 = vmul.f32 0.00096702576, %v10653_v41  ;;  %v5072_v21 = vmul.f32 3.140625, %v10655_v49 }
 0x892   : > { %v5118_v45 = vsub.f32 %v5086_v12, %v5102_v51  ;;  %v5085_v55 = vsub.f32 %v5002_v58, %v5069_v35  ;;  %v5104_v15 = vmul.f32 0.00096702576, %v10655_v49  ;;  %v5041_v8 = vadd.f32 0.5, %v5025_v56 }
 0x893   : > { %v5087_v32 = vsub.f32 %v4919_v24, %v5071_v52  ;;  %v5359_v54 = vmul.f32 0.5, %v10653_v41  ;;  %v5088_v60 = vsub.f32 %v5006_v18, %v5072_v21  ;;  %v5358_v33 = vmul.f32 0.5, %v10639_v19 }
 0x894   : > { %v10667_v43 = vsub.f32 %v5118_v45, %v5134_v48  ;;  %v5117_v20 = vsub.f32 %v5085_v55, %v5101_v27  ;;  %v5135_v26 = vmul.f32 6.277114e-07, %v10653_v41  ;;  %v10671_v58 = vfloor.f32 %v5041_v8 }
 0x895   : > { %v5119_v14 = vsub.f32 %v5087_v32, %v5103_v0  ;;  %v5195_v12 = vadd.f32 2.7557319e-06, %v5179_v23  ;;  %v10673_v51 = vsub.f32 %v5114_v7, %v5130_v30  ;;  %v5133_v56 = vmul.f32 6.277114e-07, %v10650_v57 }
 0x896   : > { %v10677_v24 = vmul.f32 %v10667_v43, %v10667_v43  ;;  %v5120_v35 = vsub.f32 %v5088_v60, %v5104_v15  ;;  %v10680_v48 = vsub.f32 %v5116_v9, %v5132_v1  ;;  %v5136_v27 = vmul.f32 6.277114e-07, %v10655_v49 }
 0x897   : > { %v10682_v18 = vsub.f32 %v5119_v14, %v5135_v26  ;;  %v5073_v52 = vmul.f32 3.140625, %v10671_v58  ;;  %v10686_v45 = vsub.f32 %v5117_v20, %v5133_v56  ;;  %v5375_v23 = vfloor.f32 %v5359_v54 }
 0x898   : > { %v5182_v30 = vmul.f32 -2.5052108e-08, %v10677_v24  ;;  %v5374_v7 = vfloor.f32 %v5358_v33  ;;  %v5105_v1 = vmul.f32 0.00096702576, %v10671_v58  ;;  %v5211_v9 = vmul.f32 %v5195_v12, %v10644_v53 }
 0x899   : > { %v10691_v55 = vmul.f32 %v10682_v18, %v10682_v18  ;;  %v5089_v0 = vsub.f32 %v5008_v61, %v5073_v52  ;;  %v10697_v21 = vmul.f32 %v10673_v51, %v10673_v51  ;;  %v10699_v32 = vsub.f32 %v5120_v35, %v5136_v27 }
 0x89a   : > { %v5198_v15 = vadd.f32 2.7557319e-06, %v5182_v30  ;;  %v5355_v8 = vmul.f32 0.5, %v10578_v59  ;;  %v5137_v20 = vmul.f32 6.277114e-07, %v10671_v58  ;;  %v5227_v33 = vadd.f32 -0.0001984127, %v5211_v9 }
 0x89b   : > { %v5121_v54 = vsub.f32 %v5089_v0, %v5105_v1  ;;  %v5183_v60 = vmul.f32 -2.5052108e-08, %v10691_v55  ;;  %v10706_v61 = vmul.f32 %v10680_v48, %v10680_v48  ;;  %v10710_v14 = vmul.f32 %v10686_v45, %v10686_v45 }
 0x89c   : > { %v5391_v26 = vmul.f32 2.0, %v5375_v23  ;;  %v5214_v12 = vmul.f32 %v5198_v15, %v10677_v24  ;;  %v5390_v27 = vmul.f32 2.0, %v5374_v7  ;;  %v5243_v52 = vmul.f32 %v5227_v33, %v10644_v53 }
 0x89d   : > { %v10713_v56 = vsub.f32 %v5121_v54, %v5137_v20  ;;  %v5199_v35 = vadd.f32 2.7557319e-06, %v5183_v60  ;;  %v10718_v30 = vmul.f32 %v10699_v32, %v10699_v32  ;;  %v5371_v1 = vfloor.f32 %v5355_v8 }
 0x89e   : > { %v5230_v0 = vadd.f32 -0.0001984127, %v5214_v12  ;;  %v5178_v9 = vmul.f32 -2.5052108e-08, %v10697_v21  ;;  %v5259_v15 = vadd.f32 0.008333334, %v5243_v52  ;;  %v5407_v7 = vsub.f32 %v10653_v41, %v5391_v26 }
 0x89f   : > { %v10723_v2 = vmul.f32 %v10713_v56, %v10713_v56  ;;  %v5215_v23 = vmul.f32 %v5199_v35, %v10691_v55  ;;  %v5354_v54 = vmul.f32 0.5, %v10576_v6  ;;  %v5361_v60 = vmul.f32 0.5, %v10671_v58 }
 0x8a0   : > { %v5246_v20 = vmul.f32 %v5230_v0, %v10677_v24  ;;  %v5194_v33 = vadd.f32 2.7557319e-06, %v5178_v9  ;;  %v5275_v8 = vmul.f32 %v5259_v15, %v10644_v53  ;;  %v5406_v3 = vsub.f32 %v10639_v19, %v5390_v27 }
 0x8a1   : > { %v5231_v12 = vadd.f32 -0.0001984127, %v5215_v23  ;;  %v5185_v22 = vmul.f32 -2.5052108e-08, %v10723_v2  ;;  %v5370_v42 = vfloor.f32 %v5354_v54  ;;  %v5184_v52 = vmul.f32 -2.5052108e-08, %v10718_v30 }
 0x8a2   : > { %v5262_v17 = vadd.f32 0.008333334, %v5246_v20  ;;  %v5210_v35 = vmul.f32 %v5194_v33, %v10697_v21  ;;  %v5291_v26 = vadd.f32 -0.16666667, %v5275_v8  ;;  %v5387_v0 = vmul.f32 2.0, %v5371_v1 }
 0x8a3   : > { %v5247_v41 = vmul.f32 %v5231_v12, %v10691_v55  ;;  %v5201_v10 = vadd.f32 2.7557319e-06, %v5185_v22  ;;  %v5377_v23 = vfloor.f32 %v5361_v60  ;;  %v5200_v15 = vadd.f32 2.7557319e-06, %v5184_v52 }
 0x8a4   : > { %v5278_v9 = vmul.f32 %v5262_v17, %v10677_v24  ;;  %v5226_v62 = vadd.f32 -0.0001984127, %v5210_v35  ;;  %v5307_v54 = vmul.f32 %v5291_v26, %v10644_v53  ;;  %v5386_v19 = vmul.f32 2.0, %v5370_v42 }
 0x8a5   : > { %v5263_v4 = vadd.f32 0.008333334, %v5247_v41  ;;  %v5217_v20 = vmul.f32 %v5201_v10, %v10723_v2  ;;  %v5216_v47 = vmul.f32 %v5200_v15, %v10718_v30  ;;  %v5360_v12 = vmul.f32 0.5, %v10655_v49 }
 0x8a6   : > { %v5294_v27 = vadd.f32 -0.16666667, %v5278_v9  ;;  %v5242_v33 = vmul.f32 %v5226_v62, %v10697_v21  ;;  %v5323_v17 = vmul.f32 %v5307_v54, %v10628_v28  ;;  %v5403_v1 = vsub.f32 %v10578_v59, %v5387_v0 }
 0x8a7   : > { %v5279_v22 = vmul.f32 %v5263_v4, %v10691_v55  ;;  %v5233_v60 = vadd.f32 -0.0001984127, %v5217_v20  ;;  %v5393_v53 = vmul.f32 2.0, %v5377_v23  ;;  %v5232_v10 = vadd.f32 -0.0001984127, %v5216_v47 }
 0x8a8   : > { %v5310_v8 = vmul.f32 %v5294_v27, %v10677_v24  ;;  %v5258_v35 = vadd.f32 0.008333334, %v5242_v33  ;;  %vm10746_vm13 = vcmp.gt.f32.partialorder %v5406_v3, 0.5  ;;  %v5376_v41 = vfloor.f32 %v5360_v12 }
 0x8a9   : > { %v5295_v42 = vadd.f32 -0.16666667, %v5279_v22  ;;  %v5249_v62 = vmul.f32 %v5233_v60, %v10723_v2  ;;  %v5175_v4 = vmul.f32 -2.5052108e-08, %v10605_v29  ;;  %vm10752_vm14 = vcmp.gt.f32.partialorder %v5407_v7, 0.5 }
 0x8aa   : > { %v5326_v59 = vmul.f32 %v5310_v8, %v10667_v43  ;;  %v5274_v24 = vmul.f32 %v5258_v35, %v10697_v21  ;;  %v5402_v47 = vsub.f32 %v10576_v6, %v5386_v19  ;;  %v5248_v3 = vmul.f32 %v5232_v10, %v10718_v30 }
 0x8ab   : > { %v5311_v0 = vmul.f32 %v5295_v42, %v10691_v55  ;;  %v5339_v9 = vadd.f32 %v5323_v17, %v10628_v28  ;;  %v5265_v23 = vadd.f32 0.008333334, %v5249_v62  ;;  %v5191_v15 = vadd.f32 2.7557319e-06, %v5175_v4 }
 0x8ac   : > { %v5342_v54 = vadd.f32 %v5326_v59, %v10667_v43  ;;  %vm10763_vm2 = vcmp.gt.f32.partialorder %v5403_v1, 0.5  ;;  %v5409_v20 = vsub.f32 %v10671_v58, %v5393_v53  ;;  %v5290_v27 = vadd.f32 -0.16666667, %v5274_v24 }
 0x8ad   : > { %v5264_v33 = vadd.f32 0.008333334, %v5248_v3  ;;  %v5327_v6 = vmul.f32 %v5311_v0, %v10682_v18  ;;  %v5281_v19 = vmul.f32 %v5265_v23, %v10723_v2  ;;  %v5392_v12 = vmul.f32 2.0, %v5376_v41 }
 0x8ae   : > { %v5207_v55 = vmul.f32 %v5191_v15, %v10605_v29  ;;  %v5438_v28 = vsub.f32 0.0, %v5342_v54  ;;  %v5306_v22 = vmul.f32 %v5290_v27, %v10697_v21  ;;  %vm10772_vm3 = vcmp.gt.f32.partialorder %v5402_v47, 0.5 }
 0x8af   : > { %v5280_v17 = vmul.f32 %v5264_v33, %v10718_v30  ;;  %v5343_v58 = vadd.f32 %v5327_v6, %v10682_v18  ;;  %v5435_v1 = vsub.f32 0.0, %v5339_v9  ;;  %v5297_v60 = vadd.f32 -0.16666667, %v5281_v19 }
 0x8b0   : > { %v5223_v8 = vadd.f32 -0.0001984127, %v5207_v55  ;;  %vm10778_vm4 = vcmp.gt.f32.partialorder %v5409_v20, 0.5  ;;  %v5322_v35 = vmul.f32 %v5306_v22, %v10673_v51  ;;  %v5351_v21 = vmul.f32 0.5, %v10516_v11 }
 0x8b1   : > { %v5296_v10 = vadd.f32 -0.16666667, %v5280_v17  ;;  %v5181_v42 = vmul.f32 -2.5052108e-08, %v10710_v14  ;;  %v5439_v62 = vsub.f32 0.0, %v5343_v58  ;;  %v5313_v41 = vmul.f32 %v5297_v60, %v10723_v2 }
 0x8b2   : > { %v5408_v4 = vsub.f32 %v10655_v49, %v5392_v12  ;;  %v5239_v18 = vmul.f32 %v5223_v8, %v10605_v29  ;;  %v5454_v59 = vsel %vm10746_vm13, %v5438_v28, %v5342_v54  ;;  %v5338_v24 = vadd.f32 %v5322_v35, %v10673_v51 }
 0x8b3   : > { %v5312_v47 = vmul.f32 %v5296_v10, %v10718_v30  ;;  %v5197_v3 = vadd.f32 2.7557319e-06, %v5181_v42  ;;  %v5455_v0 = vsel %vm10752_vm14, %v5439_v62, %v5343_v58  ;;  %v5329_v23 = vmul.f32 %v5313_v41, %v10713_v56 }
 0x8b4   : > { %v5255_v15 = vadd.f32 0.008333334, %v5239_v18  ;;  %v5357_v2 = vmul.f32 0.5, %v10650_v57  ;;  %5482 = vmatprep.subr.mxu0 %v5455_v0  ;;  %v5434_v49 = vsub.f32 0.0, %v5338_v24  ;;  %v5367_v27 = vfloor.f32 %v5351_v21 }
 0x8b5   : > { %v5328_v20 = vmul.f32 %v5312_v47, %v10699_v32  ;;  %v5213_v52 = vmul.f32 %v5197_v3, %v10710_v14  ;;  %5483 = vmatpush1.msra.mxu0 %v5454_v59  ;;  %v5451_v51 = vsel %vm10763_vm2, %v5435_v1, %v5339_v9  ;;  %v5345_v30 = vadd.f32 %v5329_v23, %v10713_v56 }
 0x8b6   : > { %v5271_v26 = vmul.f32 %v5255_v15, %v10605_v29  ;;  %v5174_v54 = vmul.f32 -2.5052108e-08, %v10601_v40  ;;  %5484 = vmatprep.subr.mxu0 %v5451_v51  ;;  %v5450_v33 = vsel %vm10772_vm3, %v5434_v49, %v5338_v24  ;;  %vm10806_vm5 = vcmp.gt.f32.partialorder %v5408_v4, 0.5 }
 0x8b7   : > { %v5344_v6 = vadd.f32 %v5328_v20, %v10699_v32  ;;  %v5229_v12 = vadd.f32 -0.0001984127, %v5213_v52  ;;  %v5441_v55 = vsub.f32 0.0, %v5345_v30  ;;  %5485 = vmatpush1.msra.mxu0 %v5450_v33  ;;  %v5373_v7 = vfloor.f32 %v5357_v2 }
 0x8b8   : > { %v5287_v9 = vadd.f32 -0.16666667, %v5271_v26  ;;  %v5190_v56 = vadd.f32 2.7557319e-06, %v5174_v54  ;;  %v5383_v22 = vmul.f32 2.0, %v5367_v27  ;;  %v5350_v58 = vmul.f32 0.5, %v10469_v5 }
 0x8b9   : > { %v5440_v28 = vsub.f32 0.0, %v5344_v6  ;;  %v5245_v17 = vmul.f32 %v5229_v12, %v10710_v14  ;;  %v5457_v43 = vsel %vm10778_vm4, %v5441_v55, %v5345_v30  ;;  %v5180_v60 = vmul.f32 -2.5052108e-08, %v10706_v61 }
 0x8ba   : > { %v5303_v32 = vmul.f32 %v5287_v9, %v10605_v29  ;;  %v5206_v1 = vmul.f32 %v5190_v56, %v10601_v40  ;;  %v5128_v8 = vmul.f32 6.277114e-07, %v10563_v16  ;;  %v10820_v35 = vsub.f32 %v10646_v39, %v10636_v63  ;;  %5571 = vmatprep.subr.mxu1 %v5457_v43 }
 0x8bb   : > { %v5456_v10 = vsel %vm10806_vm5, %v5440_v28, %v5344_v6  ;;  %v5261_v21 = vadd.f32 0.008333334, %v5245_v17  ;;  %v5389_v42 = vmul.f32 2.0, %v5373_v7  ;;  %v5196_v62 = vadd.f32 2.7557319e-06, %v5180_v60 }
 0x8bc   : > { %5572 = vmatpush1.msra.mxu1 %v5456_v10  ;;  %v5319_v53 = vmul.f32 %v5303_v32, %v10572_v44  ;;  %v5222_v29 = vadd.f32 -0.0001984127, %v5206_v1  ;;  %v5399_v41 = vsub.f32 %v10516_v11, %v5383_v22  ;;  %v5366_v18 = vfloor.f32 %v5350_v58 }
 0x8bd   : > { %v5277_v4 = vmul.f32 %v5261_v21, %v10710_v14  ;;  %v5171_v59 = vmul.f32 -2.5052108e-08, %v10586_v46  ;;  %v10829_v63 = vsub.f32 %v10631_v36, %v5128_v8  ;;  %v5212_v47 = vmul.f32 %v5196_v62, %v10706_v61 }
 0x8be   : > { %v5335_v39 = vadd.f32 %v5319_v53, %v10572_v44  ;;  %v5238_v24 = vmul.f32 %v5222_v29, %v10601_v40  ;;  %v10836_v3 = vmul.f32 %v10820_v35, %v10820_v35  ;;  %v5356_v11 = vmul.f32 0.5, %v10619_v34 }
 0x8bf   : > { %v5293_v0 = vadd.f32 -0.16666667, %v5277_v4  ;;  %v5187_v23 = vadd.f32 2.7557319e-06, %v5171_v59  ;;  %v5405_v2 = vsub.f32 %v10650_v57, %v5389_v42  ;;  %v5228_v36 = vadd.f32 -0.0001984127, %v5212_v47 }
 0x8c0   : > { %v5431_v15 = vsub.f32 0.0, %v5335_v39  ;;  %v5254_v49 = vadd.f32 0.008333334, %v5238_v24  ;;  %vm5415_vm6 = vcmp.gt.f32.partialorder %v5399_v41, 0.5  ;;  %v5382_v20 = vmul.f32 2.0, %v5366_v18 }
 0x8c1   : > { %v5309_v44 = vmul.f32 %v5293_v0, %v10710_v14  ;;  %v5203_v27 = vmul.f32 %v5187_v23, %v10586_v46  ;;  %v5244_v30 = vmul.f32 %v5228_v36, %v10706_v61  ;;  %v5347_v26 = vmul.f32 0.5, %v10425_v13 }
 0x8c2   : > { %v5447_v52 = vsel %vm5415_vm6, %v5431_v15, %v5335_v39  ;;  %v5270_v51 = vmul.f32 %v5254_v49, %v10601_v40  ;;  %v5372_v33 = vfloor.f32 %v5356_v11  ;;  %v5177_v6 = vmul.f32 -2.5052108e-08, %v10836_v3 }
 0x8c3   : > { %5486 = vmatprep.subr.mxu0 %v5447_v52  ;;  %v5325_v54 = vmul.f32 %v5309_v44, %v10686_v45  ;;  %v5219_v57 = vadd.f32 -0.0001984127, %v5203_v27  ;;  %v10849_v14 = vmul.f32 %v10829_v63, %v10829_v63  ;;  %vm10851_vm7 = vcmp.gt.f32.partialorder %v5405_v2, 0.5 }
 0x8c4   : > { %v5286_v12 = vadd.f32 -0.16666667, %v5270_v51  ;;  %v5260_v55 = vadd.f32 0.008333334, %v5244_v30  ;;  %v5398_v7 = vsub.f32 %v10469_v5, %v5382_v20  ;;  %v5193_v28 = vadd.f32 2.7557319e-06, %v5177_v6 }
 0x8c5   : > { %v5341_v9 = vadd.f32 %v5325_v54, %v10686_v45  ;;  %v5235_v56 = vmul.f32 %v5219_v57, %v10586_v46  ;;  %v5363_v58 = vfloor.f32 %v5347_v26  ;;  %v5170_v43 = vmul.f32 -2.5052108e-08, %v10568_v38  ;;  %v12312_v54 = vld [vmem:[#allocation5_spill] sm:$0xff] }
 0x8c6   : > { %v5302_v22 = vmul.f32 %v5286_v12, %v10601_v40  ;;  %v5276_v17 = vmul.f32 %v5260_v55, %v10706_v61  ;;  %v5388_v1 = vmul.f32 2.0, %v5372_v33  ;;  %v5209_v8 = vmul.f32 %v5193_v28, %v10836_v3 }
 0x8c7   : > { %v5437_v32 = vsub.f32 0.0, %v5341_v9  ;;  %v5251_v60 = vadd.f32 0.008333334, %v5235_v56  ;;  %v5353_v5 = vmul.f32 0.5, %v10597_v31  ;;  %v5186_v21 = vadd.f32 2.7557319e-06, %v5170_v43 }
 0x8c8   : > { %v5318_v10 = vmul.f32 %v5302_v22, %v10570_v37  ;;  %v5292_v45 = vadd.f32 -0.16666667, %v5276_v17  ;;  %vm10866_vm8 = vcmp.gt.f32.partialorder %v5398_v7, 0.5  ;;  %v5225_v29 = vadd.f32 -0.0001984127, %v5209_v8 }
 0x8c9   : > { %v5453_v53 = vsel %vm10851_vm7, %v5437_v32, %v5341_v9  ;;  %v5267_v42 = vmul.f32 %v5251_v60, %v10586_v46  ;;  %v5379_v4 = vmul.f32 2.0, %v5363_v58  ;;  %v5202_v18 = vmul.f32 %v5186_v21, %v10568_v38  ;;  %v12313_v58 = vld [vmem:[#allocation26_spill] sm:$0xff] }
 0x8ca   : > { %5573 = vmatprep.subr.mxu1 %v5453_v53  ;;  %v5334_v62 = vadd.f32 %v5318_v10, %v10570_v37  ;;  %v5308_v41 = vmul.f32 %v5292_v45, %v10706_v61  ;;  %v5404_v59 = vsub.f32 %v10619_v34, %v5388_v1  ;;  %v5241_v24 = vmul.f32 %v5225_v29, %v10836_v3  ;;  %v12314_v53 = vld [vmem:[#allocation13_spill] sm:$0xff] }
 0x8cb   : > { %v5283_v39 = vadd.f32 -0.16666667, %v5267_v42  ;;  %v5176_v47 = vmul.f32 -2.5052108e-08, %v10849_v14  ;;  %v5369_v23 = vfloor.f32 %v5353_v5  ;;  %v5218_v15 = vadd.f32 -0.0001984127, %v5202_v18 }
 0x8cc   : > { %v5430_v0 = vsub.f32 0.0, %v5334_v62  ;;  %v5324_v11 = vmul.f32 %v5308_v41, %v10680_v48  ;;  %v5257_v37 = vadd.f32 0.008333334, %v5241_v24  ;;  %v5346_v61 = vmul.f32 0.5, %v10401_v50  ;;  %v12315_v42 = vld [vmem:[#allocation24_spill] sm:$0xff] }
 0x8cd   : > { %v5299_v2 = vmul.f32 %v5283_v39, %v10586_v46  ;;  %v5192_v49 = vadd.f32 2.7557319e-06, %v5176_v47  ;;  %v5395_v44 = vsub.f32 %v10425_v13, %v5379_v4  ;;  %v5234_v20 = vmul.f32 %v5218_v15, %v10568_v38 }
 0x8ce   : > { %v5446_v36 = vsel %vm10866_vm8, %v5430_v0, %v5334_v62  ;;  %v5340_v34 = vadd.f32 %v5324_v11, %v10680_v48  ;;  %vm5420_vm9 = vcmp.gt.f32.partialorder %v5404_v59, 0.5  ;;  %v5273_v52 = vmul.f32 %v5257_v37, %v10836_v3 }
 0x8cf   : > { %5487 = vmatpush1.msra.mxu0 %v5446_v36  ;;  %v5315_v27 = vmul.f32 %v5299_v2, %v10504_v25  ;;  %v5208_v46 = vmul.f32 %v5192_v49, %v10849_v14  ;;  %v5385_v30 = vmul.f32 2.0, %v5369_v23  ;;  %v5250_v26 = vadd.f32 0.008333334, %v5234_v20  ;;  %v12316_v23 = vld [vmem:[#allocation8_spill] sm:$0xff] }
 0x8d0   : > { %v5436_v51 = vsub.f32 0.0, %v5340_v34  ;;  %v5173_v33 = vmul.f32 -2.5052108e-08, %v12312_v54  ;;  %v5289_v48 = vadd.f32 -0.16666667, %v5273_v52  ;;  %v5362_v6 = vfloor.f32 %v5346_v61  ;;  %v7212_v52 = vld [vmem:[%s11905_s3] sm:$0xff] }
 0x8d1   : > { %v5331_v57 = vadd.f32 %v5315_v27, %v10504_v25  ;;  %v5224_v13 = vadd.f32 -0.0001984127, %v5208_v46  ;;  %v5266_v12 = vmul.f32 %v5250_v26, %v10568_v38  ;;  %v5352_v55 = vmul.f32 0.5, %v10563_v16 }
 0x8d2   : > { %v5452_v19 = vsel %vm5420_vm9, %v5436_v51, %v5340_v34  ;;  %v5189_v9 = vadd.f32 2.7557319e-06, %v5173_v33  ;;  %vm5411_vm10 = vcmp.gt.f32.partialorder %v5395_v44, 0.5  ;;  %v5305_v56 = vmul.f32 %v5289_v48, %v10836_v3 }
 0x8d3   : > { %5574 = vmatpush1.msra.mxu1 %v5452_v19  ;;  %v5427_v7 = vsub.f32 0.0, %v5331_v57  ;;  %v5240_v28 = vmul.f32 %v5224_v13, %v10849_v14  ;;  %v5401_v22 = vsub.f32 %v10597_v31, %v5385_v30  ;;  %v5282_v17 = vadd.f32 -0.16666667, %v5266_v12 }
 0x8d4   : > { %v5205_v25 = vmul.f32 %v5189_v9, %v12312_v54  ;;  %v5172_v43 = vmul.f32 -2.5052108e-08, %v12313_v58  ;;  %v5321_v1 = vmul.f32 %v5305_v56, %v10820_v35  ;;  %v5378_v60 = vmul.f32 2.0, %v5362_v6 }
 0x8d5   : > { %v5443_v32 = vsel %vm5411_vm10, %v5427_v7, %v5331_v57  ;;  %v5256_v8 = vadd.f32 0.008333334, %v5240_v28  ;;  %v5298_v10 = vmul.f32 %v5282_v17, %v10568_v38  ;;  %v5368_v45 = vfloor.f32 %v5352_v55  ;;  %v12319_v55 = vld [vmem:[#allocation25_spill] sm:$0xff] }
 0x8d6   : > { %5488 = vmatprep.subr.mxu0 %v5443_v32  ;;  %v5221_v5 = vadd.f32 -0.0001984127, %v5205_v25  ;;  %v5188_v3 = vadd.f32 2.7557319e-06, %v5172_v43  ;;  %v5337_v21 = vadd.f32 %v5321_v1, %v10820_v35  ;;  %v5349_v40 = vmul.f32 0.5, %v12314_v53  ;;  %v12320_v32 = vld [vmem:[#allocation11_spill] sm:$0xff] }
 0x8d7   : > { %v5272_v31 = vmul.f32 %v5256_v8, %v10849_v14  ;;  %v5314_v29 = vmul.f32 %v5298_v10, %v12315_v42  ;;  %vm5417_vm0 = vcmp.gt.f32.partialorder %v5401_v22, 0.5  ;;  %v5394_v18 = vsub.f32 %v10401_v50, %v5378_v60  ;;  %v7214_v22 = vld [vmem:[%s11905_s3 + $0x10] sm:$0xff] }
 0x8d8   : > { %v5237_v62 = vmul.f32 %v5221_v5, %v12312_v54  ;;  %v5204_v41 = vmul.f32 %v5188_v3, %v12313_v58  ;;  %v5433_v4 = vsub.f32 0.0, %v5337_v21  ;;  %v5384_v39 = vmul.f32 2.0, %v5368_v45 }
 0x8d9   : > { %v5288_v38 = vadd.f32 -0.16666667, %v5272_v31  ;;  %v5330_v59 = vadd.f32 %v5314_v29, %v12315_v42  ;;  %v5365_v11 = vfloor.f32 %v5349_v40  ;;  %v5348_v15 = vmul.f32 0.5, %v12316_v23 }
 0x8da   : > { %v5253_v24 = vadd.f32 0.008333334, %v5237_v62  ;;  %v5220_v35 = vadd.f32 -0.0001984127, %v5204_v41  ;;  %v5449_v47 = vsel %vm5417_vm0, %v5433_v4, %v5337_v21  ;;  %vm5410_vm1 = vcmp.gt.f32.partialorder %v5394_v18, 0.5  ;;  %v12321_v21 = vld [vmem:[#allocation10_spill] sm:$0xff] }
 0x8db   : > { %v5304_v0 = vmul.f32 %v5288_v38, %v10849_v14  ;;  %5575 = vmatprep.subr.mxu1 %v5449_v47  ;;  %v5426_v2 = vsub.f32 0.0, %v5330_v59  ;;  %v5400_v36 = vsub.f32 %v10563_v16, %v5384_v39  ;;  %v5381_v20 = vmul.f32 2.0, %v5365_v11  ;;  %v12318_v16 = vld [vmem:[#allocation20_spill] sm:$0xff] }
 0x8dc   : > { %v5269_v37 = vmul.f32 %v5253_v24, %v12312_v54  ;;  %v5236_v61 = vmul.f32 %v5220_v35, %v12313_v58  ;;  %v5364_v27 = vfloor.f32 %v5348_v15  ;;  %v12317_v26 = vmov 0.0   ;;  %v12323_v39 = vld [vmem:[#allocation16_spill] sm:$0xff] }
 0x8dd   : > { %v5320_v50 = vmul.f32 %v5304_v0, %v10829_v63  ;;  %v5442_v49 = vsel %vm5410_vm1, %v5426_v2, %v5330_v59  ;;  %vm5416_vm11 = vcmp.gt.f32.partialorder %v5400_v36, 0.5  ;;  %v5397_v48 = vsub.f32 %v12314_v53, %v5381_v20 }
 0x8de   : > { %v5285_v34 = vadd.f32 -0.16666667, %v5269_v37  ;;  %v5252_v44 = vadd.f32 0.008333334, %v5236_v61  ;;  %5489 = vmatpush1.msra.mxu0 %v5442_v49  ;;  %v5380_v6 = vmul.f32 2.0, %v5364_v27 }
 0x8df   : > { %v5336_v14 = vadd.f32 %v5320_v50, %v10829_v63  ;;  %7125 = vmatmul.mubr.msk.f32.vlgmr.msra.gmra.mxu0 %vm1067_vm15, %v7212_v52  ;;  %vm5413_vm12 = vcmp.gt.f32.partialorder %v5397_v48, 0.5 }
 0x8e0   : > { %v5301_v46 = vmul.f32 %v5285_v34, %v12312_v54  ;;  %v5268_v51 = vmul.f32 %v5252_v44, %v12313_v58  ;;  %5528 = vmatprep.mubr.f32.mxu0 %v12317_v26  ;;  %v7213_v54 = vld [vmem:[%s11905_s3 + $0x8] sm:$0xff]  ;;  %v5396_v7 = vsub.f32 %v12316_v23, %v5380_v6 }
 0x8e1   : > { %v5432_v30 = vsub.f32 0.0, %v5336_v14 }
 0x8e2   : > { %v5317_v33 = vmul.f32 %v5301_v46, %v12318_v16  ;;  %v5284_v57 = vadd.f32 -0.16666667, %v5268_v51  ;;  %vm5412_vm13 = vcmp.gt.f32.partialorder %v5396_v7, 0.5 }
 0x8e3   : > { %v5448_v63 = vsel %vm5416_vm11, %v5432_v30, %v5336_v14  ;;  %7126 = vmatmul.mubr.msk.f32.gmra.mxu0 %vm1067_vm15, %v7213_v54 }
 0x8e4   : > { %5576 = vmatpush1.msra.mxu1 %v5448_v63  ;;  %v5333_v13 = vadd.f32 %v5317_v33, %v12318_v16  ;;  %v5300_v19 = vmul.f32 %v5284_v57, %v12313_v58  ;;  %5534 = vmatprep.mubr.f32.mxu0 %v12317_v26  ;;  %v7215_v58 = vld [vmem:[%s11905_s3 + $0x18] sm:$0xff] }
 0x8e6   : > { %v5429_v12 = vsub.f32 0.0, %v5333_v13  ;;  %v5316_v9 = vmul.f32 %v5300_v19, %v12319_v55 }
 0x8e7   : > { %7127 = vmatmul.mubr.msk.f32.gmra.mxu0 %vm1067_vm15, %v7214_v22 }
 0x8e8   : > { %v5445_v56 = vsel %vm5413_vm12, %v5429_v12, %v5333_v13  ;;  %v5332_v28 = vadd.f32 %v5316_v9, %v12319_v55  ;;  %5540 = vmatprep.mubr.f32.mxu0 %v12317_v26 }
 0x8e9   : > { %5577 = vmatprep.subr.mxu1 %v5445_v56 }
 0x8ea   : > { %v5428_v17 = vsub.f32 0.0, %v5332_v28 }
 0x8eb   : > { %7128 = vmatmul.mubr.msk.f32.gmra.mxu0 %vm1067_vm15, %v7215_v58 }
 0x8ec   : > { %v5444_v25 = vsel %vm5412_vm13, %v5428_v17, %v5332_v28  ;;  %6148 = vmatprep.mubr.f32.mxu0 %v12317_v26 }
 0x8ed   : > { %5578 = vmatpush1.msra.mxu1 %v5444_v25 }
 0x8ee   : > { %7129 = vmatmul.mubr.msk.f32.vlgmr.msra.gmra.mxu1 %vm1067_vm15, %v7212_v52 }
 0x8ef   : > { %5617 = vmatprep.mubr.f32.mxu1 %v12317_v26 }
 0x8f2   : > { %7130 = vmatmul.mubr.msk.f32.gmra.mxu1 %vm1067_vm15, %v7213_v54 }
 0x8f3   : > { %5623 = vmatprep.mubr.f32.mxu1 %v12317_v26 }
 0x8f6   : > { %7131 = vmatmul.mubr.msk.f32.gmra.mxu1 %vm1067_vm15, %v7214_v22 }
 0x8f7   : > { %5629 = vmatprep.mubr.f32.mxu1 %v12317_v26 }
 0x8fa   : > { %7132 = vmatmul.mubr.msk.f32.gmra.mxu1 %vm1067_vm15, %v7215_v58 }
 0x8fb   : > { %6237 = vmatprep.mubr.f32.mxu1 %v12317_v26 }
 0x99f   : > { %v5524_v43 = vpop.f32.mrf.mxu0 }
 0x9a0   : > { %v5525_v1 = vadd.f32 %v5524_v43, %v12320_v32 }
 0x9a1   : > { %v5526_v60 = vpop.f32.mrf.mxu0 }
 0x9a2   : > { %v5636_v8 = vmul.f32 0.31830987, %v5525_v1  ;;  %v5527_v10 = vadd.f32 %v5526_v60, %v12320_v32 }
 0x9a3   : > { %v5530_v45 = vpop.f32.mrf.mxu0 }
 0x9a4   : > { %v5652_v5 = vadd.f32 0.5, %v5636_v8  ;;  %v5637_v3 = vmul.f32 0.31830987, %v5527_v10  ;;  %v5531_v31 = vadd.f32 %v5530_v45, %v12321_v21 }
 0x9a5   : > { %v5532_v53 = vpop.f32.mrf.mxu0 }
 0x9a6   : > { %v10954_v40 = vfloor.f32 %v5652_v5  ;;  %v5653_v42 = vadd.f32 0.5, %v5637_v3  ;;  %v5640_v29 = vmul.f32 0.31830987, %v5531_v31  ;;  %v5533_v62 = vadd.f32 %v5532_v53, %v12321_v21  ;;  %v12327_v5 = vld [vmem:[#allocation15_spill] sm:$0xff] }
 0x9a7   : > { %v5536_v41 = vpop.f32.mrf.mxu0 }
 0x9a8   : > { %12322 = vst [vmem:[#allocation14_spill] sm:$0xff] %v10954_v40  ;;  %v10957_v4 = vfloor.f32 %v5653_v42  ;;  %v5684_v18 = vmul.f32 3.140625, %v10954_v40  ;;  %v5656_v38 = vadd.f32 0.5, %v5640_v29  ;;  %v5641_v59 = vmul.f32 0.31830987, %v5533_v62 }
 0x9a9   : > { %v10961_v24 = vadd.f32 %v5536_v41, %v12323_v39  ;;  %v5538_v50 = vpop.f32.mrf.mxu0  ;;  %v5716_v34 = vmul.f32 0.00096702576, %v10954_v40  ;;  %v5748_v54 = vmul.f32 6.277114e-07, %v10954_v40  ;;  %v11014_v29 = vmul.f32 0.5, %v10954_v40 }
 0x9aa   : > { %v5685_v35 = vmul.f32 3.140625, %v10957_v4  ;;  %v10964_v47 = vfloor.f32 %v5656_v38  ;;  %v5657_v0 = vadd.f32 0.5, %v5641_v59  ;;  %v5700_v23 = vsub.f32 %v5525_v1, %v5684_v18 }
 0x9ab   : > { %v5644_v11 = vmul.f32 0.31830987, %v10961_v24  ;;  %v5717_v44 = vmul.f32 0.00096702576, %v10957_v4  ;;  %v10981_v51 = vadd.f32 %v5538_v50, %v12323_v39  ;;  %v5749_v12 = vmul.f32 6.277114e-07, %v10957_v4  ;;  %v5542_v56 = vpop.f32.mrf.mxu0 }
 0x9ac   : > { %v5701_v15 = vsub.f32 %v5527_v10, %v5685_v35  ;;  %v5688_v37 = vmul.f32 3.140625, %v10964_v47  ;;  %v10968_v61 = vfloor.f32 %v5657_v0  ;;  %v5732_v30 = vsub.f32 %v5700_v23, %v5716_v34 }
 0x9ad   : > { %v5660_v36 = vadd.f32 0.5, %v5644_v11  ;;  %v5720_v33 = vmul.f32 0.00096702576, %v10964_v47  ;;  %v5645_v1 = vmul.f32 0.31830987, %v10981_v51  ;;  %v5752_v60 = vmul.f32 6.277114e-07, %v10964_v47 }
 0x9ae   : > { %v5613_v2 = vpop.f32.mrf.mxu1  ;;  %v5689_v20 = vmul.f32 3.140625, %v10968_v61  ;;  %v5704_v52 = vsub.f32 %v5531_v31, %v5688_v37  ;;  %v5733_v16 = vsub.f32 %v5701_v15, %v5717_v44  ;;  %v5721_v55 = vmul.f32 0.00096702576, %v10968_v61 }
 0x9af   : > { %v10971_v49 = vadd.f32 %v5613_v2, %v12320_v32  ;;  %v10984_v63 = vfloor.f32 %v5660_v36  ;;  %v10997_v58 = vsub.f32 %v5732_v30, %v5748_v54  ;;  %v11008_v3 = vadd.f32 %v5542_v56, %v12327_v5 }
 0x9b0   : > { %v5615_v14 = vpop.f32.mrf.mxu1  ;;  %v5705_v13 = vsub.f32 %v5533_v62, %v5689_v20  ;;  %v5736_v22 = vsub.f32 %v5704_v52, %v5720_v33  ;;  %v10999_v43 = vsub.f32 %v5733_v16, %v5749_v12  ;;  %v5753_v62 = vmul.f32 6.277114e-07, %v10968_v61 }
 0x9b1   : > { %v5638_v27 = vmul.f32 0.31830987, %v10971_v49  ;;  %v10978_v46 = vadd.f32 %v5615_v14, %v12320_v32  ;;  %v5692_v9 = vmul.f32 3.140625, %v10984_v63  ;;  %12325 = vst [vmem:[#allocation7_spill] sm:$0xff] %v10997_v58  ;;  %v5724_v41 = vmul.f32 0.00096702576, %v10984_v63 }
 0x9b2   : > { %v5619_v57 = vpop.f32.mrf.mxu1  ;;  %12326 = vst [vmem:[#allocation6_spill] sm:$0xff] %v10999_v43  ;;  %v5737_v8 = vsub.f32 %v5705_v13, %v5721_v55  ;;  %v11023_v38 = vmul.f32 %v10997_v58, %v10997_v58  ;;  %v11027_v59 = vmul.f32 %v10999_v43, %v10999_v43  ;;  %v11030_v35 = vmul.f32 0.5, %v10957_v4 }
 0x9b3   : > { %v5654_v48 = vadd.f32 0.5, %v5638_v27  ;;  %v5639_v6 = vmul.f32 0.31830987, %v10978_v46  ;;  %v10988_v19 = vadd.f32 %v5619_v57, %v12321_v21  ;;  %v5708_v10 = vsub.f32 %v10961_v24, %v5692_v9  ;;  %v5544_v9 = vpop.f32.mrf.mxu0 }
 0x9b4   : > { %v5621_v7 = vpop.f32.mrf.mxu1  ;;  %v5661_v24 = vadd.f32 0.5, %v5645_v1  ;;  %v11032_v0 = vsub.f32 %v5737_v8, %v5753_v62  ;;  %v5648_v15 = vmul.f32 0.31830987, %v11008_v3  ;;  %v5756_v34 = vmul.f32 6.277114e-07, %v10984_v63 }
 0x9b5   : > { %v10994_v28 = vfloor.f32 %v5654_v48  ;;  %v5655_v17 = vadd.f32 0.5, %v5639_v6  ;;  %v5642_v25 = vmul.f32 0.31830987, %v10988_v19  ;;  %v11002_v32 = vadd.f32 %v5621_v7, %v12321_v21 }
 0x9b6   : > { %v5625_v45 = vpop.f32.mrf.mxu1  ;;  %v11016_v21 = vsub.f32 %v5736_v22, %v5752_v60  ;;  %v5740_v11 = vsub.f32 %v5708_v10, %v5724_v41  ;;  %v11048_v27 = vfloor.f32 %v5661_v24  ;;  %v11059_v48 = vmul.f32 %v11032_v0, %v11032_v0 }
 0x9b7   : > { %12324 = vst [vmem:[#allocation23_spill] sm:$0xff] %v10994_v28  ;;  %v5686_v31 = vmul.f32 3.140625, %v10994_v28  ;;  %v11011_v53 = vfloor.f32 %v5655_v17  ;;  %v5658_v42 = vadd.f32 0.5, %v5642_v25  ;;  %v5643_v18 = vmul.f32 0.31830987, %v11002_v32 }
 0x9b8   : > { %v11035_v23 = vadd.f32 %v5625_v45, %v12323_v39  ;;  %v5627_v2 = vpop.f32.mrf.mxu1  ;;  %v5718_v44 = vmul.f32 0.00096702576, %v10994_v28  ;;  %v11046_v14 = vmul.f32 %v11016_v21, %v11016_v21  ;;  %v5750_v52 = vmul.f32 6.277114e-07, %v10994_v28 }
 0x9b9   : > { %12328 = vst [vmem:[#allocation12_spill] sm:$0xff] %v11011_v53  ;;  %v5702_v37 = vsub.f32 %v10971_v49, %v5686_v31  ;;  %v5687_v50 = vmul.f32 3.140625, %v11011_v53  ;;  %v11040_v36 = vfloor.f32 %v5658_v42  ;;  %v5659_v20 = vadd.f32 0.5, %v5643_v18 }
 0x9ba   : > { %v5646_v30 = vmul.f32 0.31830987, %v11035_v23  ;;  %v5664_v49 = vadd.f32 0.5, %v5648_v15  ;;  %v11053_v16 = vadd.f32 %v5627_v2, %v12323_v39  ;;  %v5719_v33 = vmul.f32 0.00096702576, %v11011_v53  ;;  %v5631_v39 = vpop.f32.mrf.mxu1 }
 0x9bb   : > { %12329 = vst [vmem:[#allocation9_spill] sm:$0xff] %v11040_v36  ;;  %v5751_v57 = vmul.f32 6.277114e-07, %v11011_v53  ;;  %v11061_v6 = vsub.f32 %v5740_v11, %v5756_v34  ;;  %v5734_v13 = vsub.f32 %v5702_v37, %v5718_v44  ;;  %v5703_v54 = vsub.f32 %v10978_v46, %v5687_v50 }
 0x9bc   : > { %v5690_v12 = vmul.f32 3.140625, %v11040_v36  ;;  %v5693_v55 = vmul.f32 3.140625, %v11048_v27  ;;  %v5722_v7 = vmul.f32 0.00096702576, %v11040_v36  ;;  %v11068_v56 = vmul.f32 6.277114e-07, %v11040_v36  ;;  %v5633_v2 = vpop.f32.mrf.mxu1 }
 0x9bd   : > { %v11070_v22 = vfloor.f32 %v5659_v20  ;;  %v5662_v17 = vadd.f32 0.5, %v5646_v30  ;;  %v5725_v1 = vmul.f32 0.00096702576, %v11048_v27  ;;  %v11074_v60 = vfloor.f32 %v5664_v49 }
 0x9be   : > { %v5709_v25 = vsub.f32 %v10981_v51, %v5693_v55  ;;  %v5647_v46 = vmul.f32 0.31830987, %v11053_v16  ;;  %v11079_v8 = vmul.f32 %v11061_v6, %v11061_v6  ;;  %v5545_v45 = vadd.f32 %v5544_v9, %v12327_v5 }
 0x9bf   : > { %v11081_v10 = vfloor.f32 %v5662_v17  ;;  %v11085_v31 = vadd.f32 %v5631_v39, %v12327_v5  ;;  %v11087_v42 = vsub.f32 %v5734_v13, %v5750_v52  ;;  %v5757_v62 = vmul.f32 6.277114e-07, %v11048_v27 }
 0x9c0   : > { %v5741_v51 = vsub.f32 %v5709_v25, %v5725_v1  ;;  %v5696_v41 = vmul.f32 3.140625, %v11074_v60  ;;  %v5735_v18 = vsub.f32 %v5703_v54, %v5719_v33  ;;  %v5706_v24 = vsub.f32 %v10988_v19, %v5690_v12 }
 0x9c1   : > { %12330 = vst [vmem:[#allocation5_spill] sm:$0xff] %v11087_v42  ;;  %v5691_v11 = vmul.f32 3.140625, %v11070_v22  ;;  %v5694_v15 = vmul.f32 3.140625, %v11081_v10  ;;  %v5728_v34 = vmul.f32 0.00096702576, %v11074_v60  ;;  %v5663_v44 = vadd.f32 0.5, %v5647_v46 }
 0x9c2   : > { %v11094_v37 = vsub.f32 %v5741_v51, %v5757_v62  ;;  %v5712_v50 = vsub.f32 %v11008_v3, %v5696_v41  ;;  %v5760_v52 = vmul.f32 6.277114e-07, %v11074_v60  ;;  %v5649_v30 = vmul.f32 0.31830987, %v5545_v45 }
 0x9c3   : > { %v5710_v20 = vsub.f32 %v11035_v23, %v5694_v15  ;;  %v5650_v49 = vmul.f32 0.31830987, %v11085_v31  ;;  %v11105_v13 = vfloor.f32 %v5663_v44  ;;  %v5634_v54 = vadd.f32 %v5633_v2, %v12327_v5 }
 0x9c4   : > { %v11103_v19 = vmul.f32 %v11094_v37, %v11094_v37  ;;  %v5744_v33 = vsub.f32 %v5712_v50, %v5728_v34  ;;  %v11110_v3 = vmul.f32 %v11087_v42, %v11087_v42  ;;  %v5707_v23 = vsub.f32 %v11002_v32, %v5691_v11 }
 0x9c5   : > { %v5665_v12 = vadd.f32 0.5, %v5649_v30  ;;  %v5666_v55 = vadd.f32 0.5, %v5650_v49  ;;  %v11113_v9 = vsub.f32 %v5735_v18, %v5751_v57  ;;  %v5726_v39 = vmul.f32 0.00096702576, %v11081_v10 }
 0x9c6   : > { %12331 = vst [vmem:[#allocation26_spill] sm:$0xff] %v11110_v3  ;;  %v11116_v17 = vsub.f32 %v5744_v33, %v5760_v52  ;;  %v5695_v25 = vmul.f32 3.140625, %v11105_v13  ;;  %v5723_v1 = vmul.f32 0.00096702576, %v11070_v22  ;;  %v5651_v51 = vmul.f32 0.31830987, %v5634_v54 }
 0x9c7   : > { %v11120_v46 = vfloor.f32 %v5665_v12  ;;  %v11122_v5 = vfloor.f32 %v5666_v55  ;;  %v11124_v62 = vsub.f32 %v5706_v24, %v5722_v7  ;;  %v5742_v32 = vsub.f32 %v5710_v20, %v5726_v39 }
 0x9c8   : > { %v11128_v57 = vmul.f32 %v11116_v17, %v11116_v17  ;;  %v5805_v41 = vmul.f32 -2.5052108e-08, %v11103_v19  ;;  %v5739_v18 = vsub.f32 %v5707_v23, %v5723_v1  ;;  %v5755_v11 = vmul.f32 6.277114e-07, %v11070_v22 }
 0x9c9   : > { %v5758_v15 = vmul.f32 6.277114e-07, %v11081_v10  ;;  %v5697_v2 = vmul.f32 3.140625, %v11120_v46  ;;  %v5711_v50 = vsub.f32 %v11053_v16, %v5695_v25  ;;  %v5727_v34 = vmul.f32 0.00096702576, %v11105_v13 }
 0x9ca   : > { %v5698_v7 = vmul.f32 3.140625, %v11122_v5  ;;  %v5984_v24 = vmul.f32 0.5, %v11074_v60  ;;  %v5729_v20 = vmul.f32 0.00096702576, %v11120_v46  ;;  %v5667_v52 = vadd.f32 0.5, %v5651_v51 }
 0x9cb   : > { %v5713_v44 = vsub.f32 %v5545_v45, %v5697_v2  ;;  %v5808_v30 = vmul.f32 -2.5052108e-08, %v11128_v57  ;;  %v11140_v49 = vsub.f32 %v5742_v32, %v5758_v15  ;;  %v5761_v33 = vmul.f32 6.277114e-07, %v11120_v46 }
 0x9cc   : > { %v5714_v23 = vsub.f32 %v11085_v31, %v5698_v7  ;;  %v5821_v12 = vadd.f32 2.7557319e-06, %v5805_v41  ;;  %v5730_v55 = vmul.f32 0.00096702576, %v11122_v5  ;;  %v11145_v39 = vfloor.f32 %v5667_v52 }
 0x9cd   : > { %v5745_v16 = vsub.f32 %v5713_v44, %v5729_v20  ;;  %v5824_v25 = vadd.f32 2.7557319e-06, %v5808_v30  ;;  %v11147_v1 = vsub.f32 %v5739_v18, %v5755_v11  ;;  %v5743_v45 = vsub.f32 %v5711_v50, %v5727_v34 }
 0x9ce   : > { %v5759_v51 = vmul.f32 6.277114e-07, %v11105_v13  ;;  %v5837_v2 = vmul.f32 %v5821_v12, %v11103_v19  ;;  %v5746_v15 = vsub.f32 %v5714_v23, %v5730_v55  ;;  %v5699_v42 = vmul.f32 3.140625, %v11145_v39 }
 0x9cf   : > { %v11151_v32 = vsub.f32 %v5745_v16, %v5761_v33  ;;  %v6000_v31 = vfloor.f32 %v5984_v24  ;;  %v11156_v41 = vmul.f32 %v11140_v49, %v11140_v49  ;;  %v5762_v7 = vmul.f32 6.277114e-07, %v11122_v5 }
 0x9d0   : > { %v5985_v18 = vmul.f32 0.5, %v11120_v46  ;;  %v5840_v11 = vmul.f32 %v5824_v25, %v11128_v57  ;;  %v5715_v34 = vsub.f32 %v5634_v54, %v5699_v42  ;;  %v5731_v44 = vmul.f32 0.00096702576, %v11145_v39 }
 0x9d1   : > { %v11163_v50 = vmul.f32 %v11151_v32, %v11151_v32  ;;  %v5853_v20 = vadd.f32 -0.0001984127, %v5837_v2  ;;  %v11166_v52 = vsub.f32 %v5743_v45, %v5759_v51  ;;  %v5763_v24 = vmul.f32 6.277114e-07, %v11145_v39 }
 0x9d2   : > { %v5856_v30 = vadd.f32 -0.0001984127, %v5840_v11  ;;  %v5981_v33 = vmul.f32 0.5, %v11048_v27  ;;  %v11170_v23 = vsub.f32 %v5746_v15, %v5762_v7  ;;  %v5747_v12 = vsub.f32 %v5715_v34, %v5731_v44 }
 0x9d3   : > { %v5809_v16 = vmul.f32 -2.5052108e-08, %v11163_v50  ;;  %v5869_v55 = vmul.f32 %v5853_v20, %v11103_v19  ;;  %v6016_v42 = vmul.f32 2.0, %v6000_v31  ;;  %v5987_v54 = vmul.f32 0.5, %v11145_v39 }
 0x9d4   : > { %v5872_v25 = vmul.f32 %v5856_v30, %v11128_v57  ;;  %v5804_v45 = vmul.f32 -2.5052108e-08, %v11079_v8  ;;  %v11177_v51 = vsub.f32 %v5747_v12, %v5763_v24  ;;  %v6001_v11 = vfloor.f32 %v5985_v18 }
 0x9d5   : > { %v5825_v2 = vadd.f32 2.7557319e-06, %v5809_v16  ;;  %v5885_v26 = vadd.f32 0.008333334, %v5869_v55  ;;  %v5997_v15 = vfloor.f32 %v5981_v33  ;;  %v5980_v34 = vmul.f32 0.5, %v10984_v63 }
 0x9d6   : > { %v5888_v28 = vadd.f32 0.008333334, %v5872_v25  ;;  %v5820_v7 = vadd.f32 2.7557319e-06, %v5804_v45  ;;  %v11182_v44 = vmul.f32 %v11170_v23, %v11170_v23  ;;  %v11186_v31 = vmul.f32 %v11177_v51, %v11177_v51 }
 0x9d7   : > { %v5841_v20 = vmul.f32 %v5825_v2, %v11163_v50  ;;  %v5901_v24 = vmul.f32 %v5885_v26, %v11103_v19  ;;  %v11192_v18 = vmul.f32 %v11166_v52, %v11166_v52  ;;  %v6003_v33 = vfloor.f32 %v5987_v54 }
 0x9d8   : > { %v5904_v30 = vmul.f32 %v5888_v28, %v11128_v57  ;;  %v5836_v12 = vmul.f32 %v5820_v7, %v11079_v8  ;;  %v6017_v55 = vmul.f32 2.0, %v6001_v11  ;;  %v5996_v45 = vfloor.f32 %v5980_v34 }
 0x9d9   : > { %v5857_v16 = vadd.f32 -0.0001984127, %v5841_v20  ;;  %v5917_v25 = vadd.f32 -0.16666667, %v5901_v24  ;;  %v6013_v40 = vmul.f32 2.0, %v5997_v15  ;;  %v5986_v2 = vmul.f32 0.5, %v11122_v5 }
 0x9da   : > { %v5920_v58 = vadd.f32 -0.16666667, %v5904_v30  ;;  %v5811_v53 = vmul.f32 -2.5052108e-08, %v11186_v31  ;;  %v5852_v36 = vadd.f32 -0.0001984127, %v5836_v12  ;;  %v6032_v7 = vsub.f32 %v11074_v60, %v6016_v42 }
 0x9db   : > { %v5873_v26 = vmul.f32 %v5857_v16, %v11163_v50  ;;  %v5933_v3 = vmul.f32 %v5917_v25, %v11103_v19  ;;  %v5810_v28 = vmul.f32 -2.5052108e-08, %v11182_v44  ;;  %v6019_v20 = vmul.f32 2.0, %v6003_v33 }
 0x9dc   : > { %v5936_v54 = vmul.f32 %v5920_v58, %v11128_v57  ;;  %v5827_v11 = vadd.f32 2.7557319e-06, %v5811_v53  ;;  %v5868_v15 = vmul.f32 %v5852_v36, %v11079_v8  ;;  %v6012_v24 = vmul.f32 2.0, %v5996_v45 }
 0x9dd   : > { %v5889_v34 = vadd.f32 0.008333334, %v5873_v26  ;;  %v5826_v30 = vadd.f32 2.7557319e-06, %v5810_v28  ;;  %v6033_v43 = vsub.f32 %v11120_v46, %v6017_v55  ;;  %v5949_v16 = vmul.f32 %v5933_v3, %v11094_v37 }
 0x9de   : > { %v5843_v19 = vmul.f32 %v5827_v11, %v11186_v31  ;;  %v6002_v12 = vfloor.f32 %v5986_v2  ;;  %v6029_v58 = vsub.f32 %v11048_v27, %v6013_v40  ;;  %v5884_v57 = vadd.f32 0.008333334, %v5868_v15 }
 0x9df   : > { %v5905_v25 = vmul.f32 %v5889_v34, %v11163_v50  ;;  %v5842_v53 = vmul.f32 %v5826_v30, %v11182_v44  ;;  %v5952_v60 = vmul.f32 %v5936_v54, %v11116_v17  ;;  %v6035_v36 = vsub.f32 %v11145_v39, %v6019_v20 }
 0x9e0   : > { %v5859_v42 = vadd.f32 -0.0001984127, %v5843_v19  ;;  %v5801_v33 = vmul.f32 -2.5052108e-08, %v11059_v48  ;;  %v5900_v3 = vmul.f32 %v5884_v57, %v11079_v8  ;;  %v6028_v55 = vsub.f32 %v10984_v63, %v6012_v24 }
 0x9e1   : > { %v5921_v46 = vadd.f32 -0.16666667, %v5905_v25  ;;  %v5858_v45 = vadd.f32 -0.0001984127, %v5842_v53  ;;  %vm11215_vm14 = vcmp.gt.f32.partialorder %v6033_v43, 0.5  ;;  %v5965_v40 = vadd.f32 %v5949_v16, %v11094_v37 }
 0x9e2   : > { %v5875_v27 = vmul.f32 %v5859_v42, %v11186_v31  ;;  %v6018_v26 = vmul.f32 2.0, %v6002_v12  ;;  %v5817_v28 = vadd.f32 2.7557319e-06, %v5801_v33  ;;  %vm11222_vm2 = vcmp.gt.f32.partialorder %v6032_v7, 0.5 }
 0x9e3   : > { %v5937_v39 = vmul.f32 %v5921_v46, %v11163_v50  ;;  %vm11226_vm3 = vcmp.gt.f32.partialorder %v6029_v58, 0.5  ;;  %v5916_v63 = vadd.f32 -0.16666667, %v5900_v3  ;;  %v5874_v43 = vmul.f32 %v5858_v45, %v11182_v44 }
 0x9e4   : > { %v5968_v20 = vadd.f32 %v5952_v60, %v11116_v17  ;;  %v5891_v37 = vadd.f32 0.008333334, %v5875_v27  ;;  %v5833_v34 = vmul.f32 %v5817_v28, %v11059_v48  ;;  %v5977_v15 = vmul.f32 0.5, %v10968_v61 }
 0x9e5   : > { %v5953_v50 = vmul.f32 %v5937_v39, %v11151_v32  ;;  %v5932_v7 = vmul.f32 %v5916_v63, %v11079_v8  ;;  %vm11236_vm4 = vcmp.gt.f32.partialorder %v6028_v55, 0.5  ;;  %v5890_v30 = vadd.f32 0.008333334, %v5874_v43 }
 0x9e6   : > { %v5807_v16 = vmul.f32 -2.5052108e-08, %v11192_v18  ;;  %v6061_v19 = vsub.f32 0.0, %v5965_v40  ;;  %v5907_v12 = vmul.f32 %v5891_v37, %v11186_v31  ;;  %v6034_v17 = vsub.f32 %v11122_v5, %v6018_v26 }
 0x9e7   : > { %v5849_v25 = vadd.f32 -0.0001984127, %v5833_v34  ;;  %v5969_v58 = vadd.f32 %v5953_v50, %v11151_v32  ;;  %v5948_v57 = vmul.f32 %v5932_v7, %v11061_v6  ;;  %v5906_v53 = vmul.f32 %v5890_v30, %v11182_v44 }
 0x9e8   : > { %v5823_v8 = vadd.f32 2.7557319e-06, %v5807_v16  ;;  %v6064_v60 = vsub.f32 0.0, %v5968_v20  ;;  %v5923_v42 = vadd.f32 -0.16666667, %v5907_v12  ;;  %v5993_v46 = vfloor.f32 %v5977_v15 }
 0x9e9   : > { %v5865_v33 = vmul.f32 %v5849_v25, %v11059_v48  ;;  %v6065_v3 = vsub.f32 0.0, %v5969_v58  ;;  %vm11247_vm5 = vcmp.gt.f32.partialorder %v6035_v36, 0.5  ;;  %v5964_v5 = vadd.f32 %v5948_v57, %v11061_v6 }
 0x9ea   : > { %v5922_v45 = vadd.f32 -0.16666667, %v5906_v53  ;;  %v5839_v32 = vmul.f32 %v5823_v8, %v11192_v18  ;;  %v5939_v27 = vmul.f32 %v5923_v42, %v11186_v31  ;;  %vm11254_vm6 = vcmp.gt.f32.partialorder %v6034_v17, 0.5 }
 0x9eb   : > { %v5881_v28 = vadd.f32 0.008333334, %v5865_v33  ;;  %v5983_v39 = vmul.f32 0.5, %v11105_v13  ;;  %v6081_v36 = vsel %vm11215_vm14, %v6065_v3, %v5969_v58  ;;  %v6060_v63 = vsub.f32 0.0, %v5964_v5 }
 0x9ec   : > { %v5938_v43 = vmul.f32 %v5922_v45, %v11182_v44  ;;  %v5855_v37 = vadd.f32 -0.0001984127, %v5839_v32  ;;  %6108 = vmatprep.subr.mxu0 %v6081_v36  ;;  %v6080_v6 = vsel %vm11222_vm2, %v6064_v60, %v5968_v20  ;;  %v6077_v31 = vsel %vm11226_vm3, %v6061_v19, %v5965_v40 }
 0x9ed   : > { %v5955_v34 = vmul.f32 %v5939_v27, %v11177_v51  ;;  %v5897_v15 = vmul.f32 %v5881_v28, %v11059_v48  ;;  %6109 = vmatpush1.msra.mxu0 %v6080_v6  ;;  %v6009_v2 = vmul.f32 2.0, %v5993_v46  ;;  %v5800_v44 = vmul.f32 -2.5052108e-08, %v11046_v14 }
 0x9ee   : > { %v5954_v50 = vmul.f32 %v5938_v43, %v11170_v23  ;;  %v5871_v7 = vmul.f32 %v5855_v37, %v11192_v18  ;;  %6110 = vmatprep.subr.mxu0 %v6077_v31  ;;  %v6076_v54 = vsel %vm11236_vm4, %v6060_v63, %v5964_v5  ;;  %v5999_v40 = vfloor.f32 %v5983_v39 }
 0x9ef   : > { %v5971_v30 = vadd.f32 %v5955_v34, %v11177_v51  ;;  %v5913_v11 = vadd.f32 -0.16666667, %v5897_v15  ;;  %6111 = vmatpush1.msra.mxu0 %v6076_v54  ;;  %v5816_v19 = vadd.f32 2.7557319e-06, %v5800_v44  ;;  %v5806_v12 = vmul.f32 -2.5052108e-08, %v11156_v41 }
 0x9f0   : > { %v5970_v20 = vadd.f32 %v5954_v50, %v11170_v23  ;;  %v5887_v16 = vadd.f32 0.008333334, %v5871_v7  ;;  %v5976_v58 = vmul.f32 0.5, %v10964_v47  ;;  %v5982_v57 = vmul.f32 0.5, %v11081_v10 }
 0x9f1   : > { %v6067_v17 = vsub.f32 0.0, %v5971_v30  ;;  %v5929_v25 = vmul.f32 %v5913_v11, %v11059_v48  ;;  %v5832_v53 = vmul.f32 %v5816_v19, %v11046_v14  ;;  %v5822_v8 = vadd.f32 2.7557319e-06, %v5806_v12 }
 0x9f2   : > { %v6066_v51 = vsub.f32 0.0, %v5970_v20  ;;  %v5903_v24 = vmul.f32 %v5887_v16, %v11192_v18  ;;  %v6025_v42 = vsub.f32 %v10968_v61, %v6009_v2  ;;  %v6015_v33 = vmul.f32 2.0, %v5999_v40 }
 0x9f3   : > { %v6083_v23 = vsel %vm11247_vm5, %v6067_v17, %v5971_v30  ;;  %v5945_v60 = vmul.f32 %v5929_v25, %v11032_v0  ;;  %v5848_v3 = vadd.f32 -0.0001984127, %v5832_v53  ;;  %v5838_v5 = vmul.f32 %v5822_v8, %v11156_v41 }
 0x9f4   : > { %6197 = vmatprep.subr.mxu1 %v6083_v23  ;;  %v6082_v48 = vsel %vm11254_vm6, %v6066_v51, %v5970_v20  ;;  %v5919_v46 = vadd.f32 -0.16666667, %v5903_v24  ;;  %v11290_v45 = vmul.f32 %v11147_v1, %v11147_v1  ;;  %v5992_v32 = vfloor.f32 %v5976_v58 }
 0x9f5   : > { %6198 = vmatpush1.msra.mxu1 %v6082_v48  ;;  %v5961_v55 = vadd.f32 %v5945_v60, %v11032_v0  ;;  %v5797_v27 = vmul.f32 -2.5052108e-08, %v11027_v59  ;;  %v5864_v28 = vmul.f32 %v5848_v3, %v11046_v14  ;;  %v5854_v26 = vadd.f32 -0.0001984127, %v5838_v5 }
 0x9f6   : > { %v5935_v61 = vmul.f32 %v5919_v46, %v11192_v18  ;;  %v5998_v39 = vfloor.f32 %v5982_v57  ;;  %v11298_v36 = vsub.f32 %v11124_v62, %v11068_v56  ;;  %vm6041_vm7 = vcmp.gt.f32.partialorder %v6025_v42, 0.5 }
 0x9f7   : > { %v6057_v63 = vsub.f32 0.0, %v5961_v55  ;;  %v5813_v43 = vadd.f32 2.7557319e-06, %v5797_v27  ;;  %v6031_v0 = vsub.f32 %v11105_v13, %v6015_v33  ;;  %v5880_v6 = vadd.f32 0.008333334, %v5864_v28 }
 0x9f8   : > { %v5951_v37 = vmul.f32 %v5935_v61, %v11166_v52  ;;  %v5870_v31 = vmul.f32 %v5854_v26, %v11156_v41  ;;  %v6008_v18 = vmul.f32 2.0, %v5992_v32  ;;  %v5803_v50 = vmul.f32 -2.5052108e-08, %v11290_v45 }
 0x9f9   : > { %v6073_v34 = vsel %vm6041_vm7, %v6057_v63, %v5961_v55  ;;  %v5829_v15 = vmul.f32 %v5813_v43, %v11027_v59  ;;  %v5896_v62 = vmul.f32 %v5880_v6, %v11046_v14  ;;  %v6014_v7 = vmul.f32 2.0, %v5998_v39 }
 0x9fa   : > { %6112 = vmatprep.subr.mxu0 %v6073_v34  ;;  %v5967_v56 = vadd.f32 %v5951_v37, %v11166_v52  ;;  %v5886_v2 = vadd.f32 0.008333334, %v5870_v31  ;;  %v11309_v44 = vmul.f32 %v11298_v36, %v11298_v36  ;;  %v5989_v30 = vfloor.f32 %v11030_v35 }
 0x9fb   : > { %v5845_v13 = vadd.f32 -0.0001984127, %v5829_v15  ;;  %v5819_v54 = vadd.f32 2.7557319e-06, %v5803_v50  ;;  %vm6047_vm8 = vcmp.gt.f32.partialorder %v6031_v0, 0.5  ;;  %v6024_v16 = vsub.f32 %v10964_v47, %v6008_v18 }
 0x9fc   : > { %v6063_v11 = vsub.f32 0.0, %v5967_v56  ;;  %v5912_v40 = vadd.f32 -0.16666667, %v5896_v62  ;;  %v5902_v20 = vmul.f32 %v5886_v2, %v11156_v41  ;;  %v5796_v12 = vmul.f32 -2.5052108e-08, %v11023_v38  ;;  %v12349_v62 = vld [vmem:[#allocation9_spill] sm:$0xff] }
 0x9fd   : > { %v5861_v52 = vmul.f32 %v5845_v13, %v11027_v59  ;;  %v5835_v19 = vmul.f32 %v5819_v54, %v11290_v45  ;;  %v6030_v35 = vsub.f32 %v11081_v10, %v6014_v7  ;;  %v6005_v51 = vmul.f32 2.0, %v5989_v30 }
 0x9fe   : > { %v6079_v17 = vsel %vm6047_vm8, %v6063_v11, %v5967_v56  ;;  %v5928_v25 = vmul.f32 %v5912_v40, %v11046_v14  ;;  %v5918_v58 = vadd.f32 -0.16666667, %v5902_v20  ;;  %v5979_v53 = vmul.f32 0.5, %v11070_v22  ;;  %v12350_v20 = vld [vmem:[#allocation26_spill] sm:$0xff] }
 0x9ff   : > { %6199 = vmatprep.subr.mxu1 %v6079_v17  ;;  %v5877_v57 = vadd.f32 0.008333334, %v5861_v52  ;;  %v5851_v24 = vadd.f32 -0.0001984127, %v5835_v19  ;;  %v11322_v47 = vmul.f32 %v11113_v9, %v11113_v9  ;;  %v5812_v60 = vadd.f32 2.7557319e-06, %v5796_v12 }
 0xa00   : > { %v5944_v8 = vmul.f32 %v5928_v25, %v11016_v21  ;;  %v5934_v23 = vmul.f32 %v5918_v58, %v11156_v41  ;;  %vm11326_vm9 = vcmp.gt.f32.partialorder %v6024_v16, 0.5  ;;  %v5802_v33 = vmul.f32 -2.5052108e-08, %v11309_v44 }
 0xa01   : > { %v5893_v10 = vmul.f32 %v5877_v57, %v11027_v59  ;;  %v5867_v42 = vmul.f32 %v5851_v24, %v11290_v45  ;;  %vm11335_vm10 = vcmp.gt.f32.partialorder %v6030_v35, 0.5  ;;  %v5828_v41 = vmul.f32 %v5812_v60, %v11023_v38  ;;  %v12351_v57 = vld [vmem:[#allocation12_spill] sm:$0xff] }
 0xa02   : > { %v5960_v48 = vadd.f32 %v5944_v8, %v11016_v21  ;;  %v5950_v46 = vmul.f32 %v5934_v23, %v11140_v49  ;;  %v6021_v55 = vsub.f32 %v10957_v4, %v6005_v51  ;;  %v5995_v27 = vfloor.f32 %v5979_v53 }
 0xa03   : > { %v5909_v5 = vadd.f32 -0.16666667, %v5893_v10  ;;  %v5883_v32 = vadd.f32 0.008333334, %v5867_v42  ;;  %v5844_v26 = vadd.f32 -0.0001984127, %v5828_v41  ;;  %v5988_v43 = vfloor.f32 %v11014_v29 }
 0xa04   : > { %v6056_v61 = vsub.f32 0.0, %v5960_v48  ;;  %v5966_v28 = vadd.f32 %v5950_v46, %v11140_v49  ;;  %v5818_v39 = vadd.f32 2.7557319e-06, %v5802_v33  ;;  %v5799_v37 = vmul.f32 -2.5052108e-08, %v11322_v47  ;;  %v12348_v49 = vld [vmem:[#allocation6_spill] sm:$0xff] }
 0xa05   : > { %v5925_v21 = vmul.f32 %v5909_v5, %v11027_v59  ;;  %v5899_v63 = vmul.f32 %v5883_v32, %v11290_v45  ;;  %v5860_v4 = vmul.f32 %v5844_v26, %v11023_v38  ;;  %v6011_v15 = vmul.f32 2.0, %v5995_v27  ;;  %v12352_v10 = vld [vmem:[#allocation14_spill] sm:$0xff] }
 0xa06   : > { %v6072_v0 = vsel %vm11326_vm9, %v6056_v61, %v5960_v48  ;;  %v6062_v6 = vsub.f32 0.0, %v5966_v28  ;;  %v5834_v31 = vmul.f32 %v5818_v39, %v11309_v44  ;;  %v5815_v59 = vadd.f32 2.7557319e-06, %v5799_v37  ;;  %v12353_v48 = vld [vmem:[#allocation7_spill] sm:$0xff] }
 0xa07   : > { %6113 = vmatpush1.msra.mxu0 %v6072_v0  ;;  %v5941_v34 = vmul.f32 %v5925_v21, %v12348_v49  ;;  %v5915_v18 = vadd.f32 -0.16666667, %v5899_v63  ;;  %v5876_v29 = vadd.f32 0.008333334, %v5860_v4  ;;  %v5978_v2 = vmul.f32 0.5, %v12349_v62  ;;  %v12354_v61 = vld [vmem:[#allocation23_spill] sm:$0xff] }
 0xa08   : > { %v6078_v50 = vsel %vm11335_vm10, %v6062_v6, %v5966_v28  ;;  %v5850_v56 = vadd.f32 -0.0001984127, %v5834_v31  ;;  %vm6037_vm0 = vcmp.gt.f32.partialorder %v6021_v55, 0.5  ;;  %v5831_v30 = vmul.f32 %v5815_v59, %v11322_v47 }
 0xa09   : > { %6200 = vmatpush1.msra.mxu1 %v6078_v50  ;;  %v5957_v7 = vadd.f32 %v5941_v34, %v12348_v49  ;;  %v5931_v13 = vmul.f32 %v5915_v18, %v11290_v45  ;;  %v5892_v54 = vmul.f32 %v5876_v29, %v11023_v38  ;;  %v6004_v11 = vmul.f32 2.0, %v5988_v43 }
 0xa0a   : > { %v5866_v40 = vmul.f32 %v5850_v56, %v11309_v44  ;;  %v5798_v16 = vmul.f32 -2.5052108e-08, %v12350_v20  ;;  %v6027_v12 = vsub.f32 %v11070_v22, %v6011_v15  ;;  %v5847_v17 = vadd.f32 -0.0001984127, %v5831_v30  ;;  %v7216_v15 = vld [vmem:[%s11907_s5] sm:$0xff] }
 0xa0b   : > { %v6053_v52 = vsub.f32 0.0, %v5957_v7  ;;  %v5947_v19 = vmul.f32 %v5931_v13, %v11147_v1  ;;  %v5908_v25 = vadd.f32 -0.16666667, %v5892_v54  ;;  %v5994_v35 = vfloor.f32 %v5978_v2  ;;  %v12356_v30 = vld [vmem:[#allocation5_spill] sm:$0xff] }
 0xa0c   : > { %v5882_v58 = vadd.f32 0.008333334, %v5866_v40  ;;  %v5975_v45 = vmul.f32 0.5, %v12351_v57  ;;  %v5863_v53 = vmul.f32 %v5847_v17, %v11322_v47  ;;  %v5814_v8 = vadd.f32 2.7557319e-06, %v5798_v16  ;;  %v7218_v40 = vld [vmem:[%s11907_s5 + $0x10] sm:$0xff] }
 0xa0d   : > { %v6069_v51 = vsel %vm6037_vm0, %v6053_v52, %v5957_v7  ;;  %v5963_v24 = vadd.f32 %v5947_v19, %v11147_v1  ;;  %v5924_v23 = vmul.f32 %v5908_v25, %v11023_v38  ;;  %v6020_v22 = vsub.f32 %v12352_v10, %v6004_v11  ;;  %v7217_v7 = vld [vmem:[%s11907_s5 + $0x8] sm:$0xff]  ;;  %v7219_v52 = vld [vmem:[%s11907_s5 + $0x18] sm:$0xff] }
 0xa0e   : > { %6114 = vmatprep.subr.mxu0 %v6069_v51  ;;  %v5898_v60 = vmul.f32 %v5882_v58, %v11309_v44  ;;  %v5879_v42 = vadd.f32 0.008333334, %v5863_v53  ;;  %v5830_v33 = vmul.f32 %v5814_v8, %v12350_v20  ;;  %vm6043_vm1 = vcmp.gt.f32.partialorder %v6027_v12, 0.5  ;;  %v12357_v12 = vld [vmem:[#allocation21_spill] sm:$0xff] }
 0xa0f   : > { %v6059_v14 = vsub.f32 0.0, %v5963_v24  ;;  %v5940_v46 = vmul.f32 %v5924_v23, %v12353_v48  ;;  %v5991_v41 = vfloor.f32 %v5975_v45  ;;  %v6010_v5 = vmul.f32 2.0, %v5994_v35 }
 0xa10   : > { %v5914_v3 = vadd.f32 -0.16666667, %v5898_v60  ;;  %v5895_v55 = vmul.f32 %v5879_v42, %v11322_v47  ;;  %v5846_v32 = vadd.f32 -0.0001984127, %v5830_v33  ;;  %v5974_v28 = vmul.f32 0.5, %v12354_v61 }
 0xa11   : > { %v6075_v1 = vsel %vm6043_vm1, %v6059_v14, %v5963_v24  ;;  %v5956_v38 = vadd.f32 %v5940_v46, %v12353_v48  ;;  %v6007_v43 = vmul.f32 2.0, %v5991_v41  ;;  %vm6036_vm11 = vcmp.gt.f32.partialorder %v6020_v22, 0.5  ;;  %v12358_v24 = vld [vmem:[#allocation18_spill] sm:$0xff] }
 0xa12   : > { %6201 = vmatprep.subr.mxu1 %v6075_v1  ;;  %v5930_v27 = vmul.f32 %v5914_v3, %v11309_v44  ;;  %v5911_v26 = vadd.f32 -0.16666667, %v5895_v55  ;;  %v5862_v39 = vmul.f32 %v5846_v32, %v12350_v20  ;;  %v6026_v37 = vsub.f32 %v12349_v62, %v6010_v5  ;;  %v12360_v3 = vld [vmem:[#allocation17_spill] sm:$0xff] }
 0xa13   : > { %v6052_v21 = vsub.f32 0.0, %v5956_v38  ;;  %v5990_v49 = vfloor.f32 %v5974_v28  ;;  %v6023_v59 = vsub.f32 %v12351_v57, %v6007_v43 }
 0xa14   : > { %v5946_v63 = vmul.f32 %v5930_v27, %v11298_v36  ;;  %v5927_v0 = vmul.f32 %v5911_v26, %v11322_v47  ;;  %v5878_v6 = vadd.f32 0.008333334, %v5862_v39  ;;  %vm6042_vm12 = vcmp.gt.f32.partialorder %v6026_v37, 0.5 }
 0xa15   : > { %v6068_v4 = vsel %vm6036_vm11, %v6052_v21, %v5956_v38  ;;  %v6006_v56 = vmul.f32 2.0, %v5990_v49  ;;  %vm6039_vm13 = vcmp.gt.f32.partialorder %v6023_v59, 0.5 }
 0xa16   : > { %v5962_v31 = vadd.f32 %v5946_v63, %v11298_v36  ;;  %6115 = vmatpush1.msra.mxu0 %v6068_v4  ;;  %v5943_v44 = vmul.f32 %v5927_v0, %v11113_v9  ;;  %v5894_v34 = vmul.f32 %v5878_v6, %v12350_v20  ;;  %v12355_v36 = vmov 0.0  }
 0xa17   : > { %7133 = vmatmul.mubr.msk.f32.vlgmr.msra.gmra.mxu0 %vm1067_vm15, %v7216_v15 }
 0xa18   : > { %v6058_v18 = vsub.f32 0.0, %v5962_v31  ;;  %v5959_v47 = vadd.f32 %v5943_v44, %v11113_v9  ;;  %v5910_v50 = vadd.f32 -0.16666667, %v5894_v34  ;;  %6154 = vmatprep.mubr.f32.mxu0 %v12355_v36  ;;  %v6022_v9 = vsub.f32 %v12354_v61, %v6006_v56 }
 0xa1a   : > { %v6074_v29 = vsel %vm6042_vm12, %v6058_v18, %v5962_v31  ;;  %v6055_v62 = vsub.f32 0.0, %v5959_v47  ;;  %v5926_v2 = vmul.f32 %v5910_v50, %v12350_v20  ;;  %vm6038_vm14 = vcmp.gt.f32.partialorder %v6022_v9, 0.5 }
 0xa1b   : > { %6202 = vmatpush1.msra.mxu1 %v6074_v29  ;;  %7134 = vmatmul.mubr.msk.f32.gmra.mxu0 %vm1067_vm15, %v7217_v7 }
 0xa1c   : > { %v6071_v13 = vsel %vm6039_vm13, %v6055_v62, %v5959_v47  ;;  %v5942_v54 = vmul.f32 %v5926_v2, %v12356_v30  ;;  %6160 = vmatprep.mubr.f32.mxu0 %v12355_v36 }
 0xa1d   : > { %6203 = vmatprep.subr.mxu1 %v6071_v13 }
 0xa1e   : > { %v5958_v11 = vadd.f32 %v5942_v54, %v12356_v30 }
 0xa1f   : > { %7135 = vmatmul.mubr.msk.f32.gmra.mxu0 %vm1067_vm15, %v7218_v40 }
 0xa20   : > { %v6054_v20 = vsub.f32 0.0, %v5958_v11  ;;  %6166 = vmatprep.mubr.f32.mxu0 %v12355_v36 }
 0xa22   : > { %v6070_v16 = vsel %vm6038_vm14, %v6054_v20, %v5958_v11 }
 0xa23   : > { %6204 = vmatpush1.msra.mxu1 %v6070_v16  ;;  %7136 = vmatmul.mubr.msk.f32.gmra.mxu0 %vm1067_vm15, %v7219_v52 }
 0xa24   : > { %7137 = vmatmul.mubr.msk.f32.vlgmr.msra.gmra.mxu1 %vm1067_vm15, %v7216_v15  ;;  %6774 = vmatprep.mubr.f32.mxu0 %v12355_v36 }
 0xa25   : > { %6243 = vmatprep.mubr.f32.mxu1 %v12355_v36 }
 0xa28   : > { %7138 = vmatmul.mubr.msk.f32.gmra.mxu1 %vm1067_vm15, %v7217_v7 }
 0xa29   : > { %6249 = vmatprep.mubr.f32.mxu1 %v12355_v36 }
 0xa2c   : > { %7139 = vmatmul.mubr.msk.f32.gmra.mxu1 %vm1067_vm15, %v7218_v40 }
 0xa2d   : > { %6255 = vmatprep.mubr.f32.mxu1 %v12355_v36 }
 0xa30   : > { %7140 = vmatmul.mubr.msk.f32.gmra.mxu1 %vm1067_vm15, %v7219_v52  ;;  %v12362_v52 = vld [vmem:[#allocation19_spill] sm:$0xff] }
 0xa31   : > { %6845 = vmatprep.mubr.f32.mxu1 %v12355_v36 }
 0xad7   : > { %v6150_v19 = vpop.f32.mrf.mxu0 }
 0xad8   : > { %v6151_v17 = vadd.f32 %v6150_v19, %v12357_v12 }
 0xad9   : > { %v6152_v25 = vpop.f32.mrf.mxu0 }
 0xada   : > { %v6262_v58 = vmul.f32 0.31830987, %v6151_v17  ;;  %v6153_v35 = vadd.f32 %v6152_v25, %v12357_v12 }
 0xadb   : > { %v6156_v57 = vpop.f32.mrf.mxu0 }
 0xadc   : > { %v6278_v45 = vadd.f32 0.5, %v6262_v58  ;;  %v6263_v51 = vmul.f32 0.31830987, %v6153_v35  ;;  %v6157_v53 = vadd.f32 %v6156_v57, %v12358_v24 }
 0xadd   : > { %v6158_v8 = vpop.f32.mrf.mxu0 }
 0xade   : > { %v11418_v23 = vfloor.f32 %v6278_v45  ;;  %v6279_v60 = vadd.f32 0.5, %v6263_v51  ;;  %v6266_v14 = vmul.f32 0.31830987, %v6157_v53  ;;  %v6159_v10 = vadd.f32 %v6158_v8, %v12358_v24 }
 0xadf   : > { %v6162_v22 = vpop.f32.mrf.mxu0 }
 0xae0   : > { %12359 = vst [vmem:[#allocation13_spill] sm:$0xff] %v11418_v23  ;;  %v6310_v42 = vmul.f32 3.140625, %v11418_v23  ;;  %v11422_v33 = vfloor.f32 %v6279_v60  ;;  %v6282_v48 = vadd.f32 0.5, %v6266_v14  ;;  %v6267_v46 = vmul.f32 0.31830987, %v6159_v10 }
 0xae1   : > { %v11425_v41 = vadd.f32 %v6162_v22, %v12360_v3  ;;  %v6164_v61 = vpop.f32.mrf.mxu0  ;;  %v6342_v39 = vmul.f32 0.00096702576, %v11418_v23  ;;  %v6374_v0 = vmul.f32 6.277114e-07, %v11418_v23  ;;  %v11446_v15 = vmul.f32 0.5, %v11418_v23 }
 0xae2   : > { %v6311_v1 = vmul.f32 3.140625, %v11422_v33  ;;  %v11428_v5 = vfloor.f32 %v6282_v48  ;;  %v6283_v55 = vadd.f32 0.5, %v6267_v46  ;;  %v6326_v38 = vsub.f32 %v6151_v17, %v6310_v42 }
 0xae3   : > { %v6270_v32 = vmul.f32 0.31830987, %v11425_v41  ;;  %v11441_v31 = vadd.f32 %v6164_v61, %v12360_v3  ;;  %v6343_v44 = vmul.f32 0.00096702576, %v11422_v33  ;;  %v6168_v29 = vpop.f32.mrf.mxu0  ;;  %v6375_v40 = vmul.f32 6.277114e-07, %v11422_v33 }
 0xae4   : > { %v6239_v27 = vpop.f32.mrf.mxu1  ;;  %v6314_v26 = vmul.f32 3.140625, %v11428_v5  ;;  %v6327_v21 = vsub.f32 %v6153_v35, %v6311_v1  ;;  %v11434_v43 = vfloor.f32 %v6283_v55  ;;  %v6358_v49 = vsub.f32 %v6326_v38, %v6342_v39 }
 0xae5   : > { %v6240_v28 = vadd.f32 %v6239_v27, %v12357_v12  ;;  %v6286_v37 = vadd.f32 0.5, %v6270_v32  ;;  %v6346_v50 = vmul.f32 0.00096702576, %v11428_v5  ;;  %v6271_v11 = vmul.f32 0.31830987, %v11441_v31 }
 0xae6   : > { %v6241_v63 = vpop.f32.mrf.mxu1  ;;  %v6315_v34 = vmul.f32 3.140625, %v11434_v43  ;;  %v6330_v47 = vsub.f32 %v6157_v53, %v6314_v26  ;;  %v6359_v56 = vsub.f32 %v6327_v21, %v6343_v44  ;;  %v6347_v20 = vmul.f32 0.00096702576, %v11434_v43 }
 0xae7   : > { %v6264_v6 = vmul.f32 0.31830987, %v6240_v28  ;;  %v11438_v4 = vadd.f32 %v6241_v63, %v12357_v12  ;;  %v11453_v7 = vfloor.f32 %v6286_v37  ;;  %v11465_v19 = vadd.f32 %v6168_v29, %v12362_v52  ;;  %v6170_v29 = vpop.f32.mrf.mxu0 }
 0xae8   : > { %v6245_v18 = vpop.f32.mrf.mxu1  ;;  %v6331_v62 = vsub.f32 %v6159_v10, %v6315_v34  ;;  %v11467_v12 = vsub.f32 %v6358_v49, %v6374_v0  ;;  %v6362_v25 = vsub.f32 %v6330_v47, %v6346_v50  ;;  %v6378_v58 = vmul.f32 6.277114e-07, %v11428_v5 }
 0xae9   : > { %v6280_v59 = vadd.f32 0.5, %v6264_v6  ;;  %v6265_v36 = vmul.f32 0.31830987, %v11438_v4  ;;  %v11451_v2 = vadd.f32 %v6245_v18, %v12358_v24  ;;  %v6318_v51 = vmul.f32 3.140625, %v11453_v7 }
 0xaea   : > { %v6247_v13 = vpop.f32.mrf.mxu1  ;;  %12363 = vst [vmem:[#allocation8_spill] sm:$0xff] %v11467_v12  ;;  %v6363_v57 = vsub.f32 %v6331_v62, %v6347_v20  ;;  %v6287_v60 = vadd.f32 0.5, %v6271_v11  ;;  %v6379_v22 = vmul.f32 6.277114e-07, %v11434_v43  ;;  %v11481_v48 = vmul.f32 0.5, %v11422_v33 }
 0xaeb   : > { %v11455_v30 = vfloor.f32 %v6280_v59  ;;  %v6281_v54 = vadd.f32 0.5, %v6265_v36  ;;  %v11458_v9 = vadd.f32 %v6247_v13, %v12358_v24  ;;  %v6268_v16 = vmul.f32 0.31830987, %v11451_v2 }
 0xaec   : > { %v11474_v24 = vsub.f32 %v6359_v56, %v6375_v40  ;;  %v6251_v42 = vpop.f32.mrf.mxu1  ;;  %v11485_v46 = vmul.f32 %v11467_v12, %v11467_v12  ;;  %v11487_v1 = vsub.f32 %v6362_v25, %v6378_v58  ;;  %v11491_v27 = vsub.f32 %v6363_v57, %v6379_v22 }
 0xaed   : > { %12361 = vst [vmem:[#allocation24_spill] sm:$0xff] %v11455_v30  ;;  %v6312_v17 = vmul.f32 3.140625, %v11455_v30  ;;  %v11471_v35 = vfloor.f32 %v6281_v54  ;;  %v6284_v45 = vadd.f32 0.5, %v6268_v16  ;;  %v6269_v8 = vmul.f32 0.31830987, %v11458_v9 }
 0xaee   : > { %v6344_v14 = vmul.f32 0.00096702576, %v11455_v30  ;;  %v6334_v61 = vsub.f32 %v11425_v41, %v6318_v51  ;;  %v11498_v26 = vmul.f32 %v11474_v24, %v11474_v24  ;;  %v6376_v39 = vmul.f32 6.277114e-07, %v11455_v30  ;;  %v6253_v49 = vpop.f32.mrf.mxu1 }
 0xaef   : > { %12364 = vst [vmem:[#allocation20_spill] sm:$0xff] %v11471_v35  ;;  %v6328_v53 = vsub.f32 %v6240_v28, %v6312_v17  ;;  %v6313_v10 = vmul.f32 3.140625, %v11471_v35  ;;  %v11489_v55 = vfloor.f32 %v6284_v45  ;;  %v6285_v32 = vadd.f32 0.5, %v6269_v8 }
 0xaf0   : > { %v11494_v28 = vfloor.f32 %v6287_v60  ;;  %v6350_v21 = vmul.f32 0.00096702576, %v11453_v7  ;;  %v6252_v63 = vadd.f32 %v6251_v42, %v12360_v3  ;;  %v6274_v41 = vmul.f32 0.31830987, %v11465_v19  ;;  %v6257_v17 = vpop.f32.mrf.mxu1 }
 0xaf1   : > { %12365 = vst [vmem:[#allocation25_spill] sm:$0xff] %v11489_v55  ;;  %v6360_v38 = vsub.f32 %v6328_v53, %v6344_v14  ;;  %v6329_v37 = vsub.f32 %v11438_v4, %v6313_v10  ;;  %v6316_v0 = vmul.f32 3.140625, %v11489_v55  ;;  %v11509_v44 = vmul.f32 %v11487_v1, %v11487_v1 }
 0xaf2   : > { %v6319_v6 = vmul.f32 3.140625, %v11494_v28  ;;  %v6345_v34 = vmul.f32 0.00096702576, %v11471_v35  ;;  %v6382_v18 = vmul.f32 6.277114e-07, %v11453_v7  ;;  %v11513_v59 = vfloor.f32 %v6285_v32 }
 0xaf3   : > { %v11515_v47 = vsub.f32 %v6360_v38, %v6376_v39  ;;  %v6377_v4 = vmul.f32 6.277114e-07, %v11471_v35  ;;  %v11520_v50 = vmul.f32 %v11491_v27, %v11491_v27  ;;  %v6366_v36 = vsub.f32 %v6334_v61, %v6350_v21  ;;  %v6259_v38 = vpop.f32.mrf.mxu1 }
 0xaf4   : > { %v6348_v56 = vmul.f32 0.00096702576, %v11489_v55  ;;  %v6335_v62 = vsub.f32 %v11441_v31, %v6319_v6  ;;  %v6351_v13 = vmul.f32 0.00096702576, %v11494_v28  ;;  %v6272_v54 = vmul.f32 0.31830987, %v6252_v63 }
 0xaf5   : > { %v6361_v11 = vsub.f32 %v6329_v37, %v6345_v34  ;;  %v6332_v40 = vsub.f32 %v11451_v2, %v6316_v0  ;;  %v6290_v20 = vadd.f32 0.5, %v6274_v41  ;;  %v11527_v16 = vadd.f32 %v6253_v49, %v12360_v3 }
 0xaf6   : > { %v6317_v25 = vmul.f32 3.140625, %v11513_v59  ;;  %v6367_v58 = vsub.f32 %v6335_v62, %v6351_v13  ;;  %v6288_v57 = vadd.f32 0.5, %v6272_v54  ;;  %v6171_v45 = vadd.f32 %v6170_v29, %v12362_v52 }
 0xaf7   : > { %v6380_v51 = vmul.f32 6.277114e-07, %v11489_v55  ;;  %v6383_v31 = vmul.f32 6.277114e-07, %v11494_v28  ;;  %v11533_v53 = vfloor.f32 %v6290_v20  ;;  %v6273_v8 = vmul.f32 0.31830987, %v11527_v16 }
 0xaf8   : > { %v11536_v2 = vsub.f32 %v6366_v36, %v6382_v18  ;;  %v11538_v60 = vfloor.f32 %v6288_v57  ;;  %v6275_v3 = vmul.f32 0.31830987, %v6171_v45  ;;  %v6258_v14 = vadd.f32 %v6257_v17, %v12362_v52 }
 0xaf9   : > { %v11541_v10 = vsub.f32 %v6361_v11, %v6377_v4  ;;  %v6349_v22 = vmul.f32 0.00096702576, %v11513_v59  ;;  %v11544_v42 = vsub.f32 %v6367_v58, %v6383_v31  ;;  %v6322_v32 = vmul.f32 3.140625, %v11533_v53 }
 0xafa   : > { %v6364_v61 = vsub.f32 %v6332_v40, %v6348_v56  ;;  %v6333_v39 = vsub.f32 %v11458_v9, %v6317_v25  ;;  %v6320_v21 = vmul.f32 3.140625, %v11538_v60  ;;  %v6354_v37 = vmul.f32 0.00096702576, %v11533_v53 }
 0xafb   : > { %v6338_v0 = vsub.f32 %v11465_v19, %v6322_v32  ;;  %v6386_v6 = vmul.f32 6.277114e-07, %v11533_v53  ;;  %v6289_v41 = vadd.f32 0.5, %v6273_v8  ;;  %v6291_v49 = vadd.f32 0.5, %v6275_v3 }
 0xafc   : > { %v6336_v34 = vsub.f32 %v6252_v63, %v6320_v21  ;;  %v6352_v18 = vmul.f32 0.00096702576, %v11538_v60  ;;  %v6276_v4 = vmul.f32 0.31830987, %v6258_v14  ;;  %v6260_v36 = vadd.f32 %v6259_v38, %v12362_v52 }
 0xafd   : > { %v11556_v29 = vmul.f32 %v11544_v42, %v11544_v42  ;;  %v6370_v9 = vsub.f32 %v6338_v0, %v6354_v37  ;;  %v11558_v56 = vfloor.f32 %v6289_v41  ;;  %v11560_v62 = vfloor.f32 %v6291_v49 }
 0xafe   : > { %v6365_v19 = vsub.f32 %v6333_v39, %v6349_v22  ;;  %v6368_v13 = vsub.f32 %v6336_v34, %v6352_v18  ;;  %v6292_v54 = vadd.f32 0.5, %v6276_v4  ;;  %v6277_v11 = vmul.f32 0.31830987, %v6260_v36 }
 0xaff   : > { %v11564_v63 = vmul.f32 %v11536_v2, %v11536_v2  ;;  %v11566_v40 = vsub.f32 %v6370_v9, %v6386_v6  ;;  %v6321_v52 = vmul.f32 3.140625, %v11558_v56  ;;  %v6610_v20 = vmul.f32 0.5, %v11533_v53 }
 0xb00   : > { %v11570_v17 = vsub.f32 %v6364_v61, %v6380_v51  ;;  %v6381_v25 = vmul.f32 6.277114e-07, %v11513_v59  ;;  %v6384_v58 = vmul.f32 6.277114e-07, %v11538_v60  ;;  %v6323_v57 = vmul.f32 3.140625, %v11560_v62 }
 0xb01   : > { %v11577_v31 = vmul.f32 %v11566_v40, %v11566_v40  ;;  %v11579_v8 = vfloor.f32 %v6292_v54  ;;  %v6293_v3 = vadd.f32 0.5, %v6277_v11  ;;  %v6431_v22 = vmul.f32 -2.5052108e-08, %v11556_v29 }
 0xb02   : > { %v11582_v32 = vsub.f32 %v6365_v19, %v6381_v25  ;;  %v11584_v38 = vsub.f32 %v6368_v13, %v6384_v58  ;;  %v6339_v51 = vsub.f32 %v6171_v45, %v6323_v57  ;;  %v6355_v61 = vmul.f32 0.00096702576, %v11560_v62 }
 0xb03   : > { %v6337_v39 = vsub.f32 %v11527_v16, %v6321_v52  ;;  %v6353_v21 = vmul.f32 0.00096702576, %v11558_v56  ;;  %v6324_v37 = vmul.f32 3.140625, %v11579_v8  ;;  %v6626_v0 = vfloor.f32 %v6610_v20 }
 0xb04   : > { %v6371_v6 = vsub.f32 %v6339_v51, %v6355_v61  ;;  %v6387_v41 = vmul.f32 6.277114e-07, %v11560_v62  ;;  %v11591_v49 = vfloor.f32 %v6293_v3  ;;  %v6434_v34 = vmul.f32 -2.5052108e-08, %v11577_v31 }
 0xb05   : > { %v6340_v18 = vsub.f32 %v6258_v14, %v6324_v37  ;;  %v6356_v4 = vmul.f32 0.00096702576, %v11579_v8  ;;  %v6611_v45 = vmul.f32 0.5, %v11560_v62  ;;  %v6447_v9 = vadd.f32 2.7557319e-06, %v6431_v22 }
 0xb06   : > { %v11598_v16 = vmul.f32 %v11584_v38, %v11584_v38  ;;  %v6385_v19 = vmul.f32 6.277114e-07, %v11558_v56  ;;  %v11601_v13 = vsub.f32 %v6371_v6, %v6387_v41  ;;  %v6325_v54 = vmul.f32 3.140625, %v11591_v49 }
 0xb07   : > { %v6369_v11 = vsub.f32 %v6337_v39, %v6353_v21  ;;  %v6372_v52 = vsub.f32 %v6340_v18, %v6356_v4  ;;  %v6450_v20 = vadd.f32 2.7557319e-06, %v6434_v34  ;;  %v11604_v25 = vmul.f32 2.0, %v6626_v0 }
 0xb08   : > { %v11608_v14 = vmul.f32 %v11601_v13, %v11601_v13  ;;  %v6341_v58 = vsub.f32 %v6260_v36, %v6325_v54  ;;  %v6357_v57 = vmul.f32 0.00096702576, %v11591_v49  ;;  %v6463_v3 = vmul.f32 %v6447_v9, %v11556_v29 }
 0xb09   : > { %v6388_v22 = vmul.f32 6.277114e-07, %v11579_v8  ;;  %v6627_v51 = vfloor.f32 %v6611_v45  ;;  %v6466_v61 = vmul.f32 %v6450_v20, %v11577_v31  ;;  %v6607_v39 = vmul.f32 0.5, %v11494_v28 }
 0xb0a   : > { %v6373_v21 = vsub.f32 %v6341_v58, %v6357_v57  ;;  %v6389_v37 = vmul.f32 6.277114e-07, %v11591_v49  ;;  %v6435_v0 = vmul.f32 -2.5052108e-08, %v11608_v14  ;;  %v6479_v6 = vadd.f32 -0.0001984127, %v6463_v3 }
 0xb0b   : > { %v11617_v41 = vsub.f32 %v6369_v11, %v6385_v19  ;;  %v11619_v36 = vsub.f32 %v6372_v52, %v6388_v22  ;;  %v6482_v34 = vadd.f32 -0.0001984127, %v6466_v61  ;;  %v6658_v18 = vsub.f32 %v11533_v53, %v11604_v25 }
 0xb0c   : > { %v11623_v4 = vsub.f32 %v6373_v21, %v6389_v37  ;;  %v6451_v45 = vadd.f32 2.7557319e-06, %v6435_v0  ;;  %v6495_v9 = vmul.f32 %v6479_v6, %v11556_v29  ;;  %v6613_v54 = vmul.f32 0.5, %v11591_v49 }
 0xb0d   : > { %v6498_v20 = vmul.f32 %v6482_v34, %v11577_v31  ;;  %v6623_v58 = vfloor.f32 %v6607_v39  ;;  %v6430_v57 = vmul.f32 -2.5052108e-08, %v11564_v63  ;;  %v6606_v19 = vmul.f32 0.5, %v11453_v7 }
 0xb0e   : > { %v11632_v11 = vmul.f32 %v11623_v4, %v11623_v4  ;;  %v6467_v53 = vmul.f32 %v6451_v45, %v11608_v14  ;;  %v6643_v52 = vmul.f32 2.0, %v6627_v51  ;;  %v6511_v25 = vadd.f32 0.008333334, %v6495_v9 }
 0xb0f   : > { %v11637_v3 = vmul.f32 %v11619_v36, %v11619_v36  ;;  %v6514_v22 = vadd.f32 0.008333334, %v6498_v20  ;;  %v6446_v61 = vadd.f32 2.7557319e-06, %v6430_v57  ;;  %v6622_v21 = vfloor.f32 %v6606_v19 }
 0xb10   : > { %v11641_v39 = vmul.f32 %v11617_v41, %v11617_v41  ;;  %v6483_v37 = vadd.f32 -0.0001984127, %v6467_v53  ;;  %v6527_v0 = vmul.f32 %v6511_v25, %v11556_v29  ;;  %v6437_v6 = vmul.f32 -2.5052108e-08, %v11632_v11 }
 0xb11   : > { %v6530_v34 = vmul.f32 %v6514_v22, %v11577_v31  ;;  %v6639_v51 = vmul.f32 2.0, %v6623_v58  ;;  %v6629_v45 = vfloor.f32 %v6613_v54  ;;  %v6462_v9 = vmul.f32 %v6446_v61, %v11564_v63 }
 0xb12   : > { %v6499_v30 = vmul.f32 %v6483_v37, %v11608_v14  ;;  %v6543_v20 = vadd.f32 -0.16666667, %v6527_v0  ;;  %v6453_v57 = vadd.f32 2.7557319e-06, %v6437_v6  ;;  %v6638_v19 = vmul.f32 2.0, %v6622_v21 }
 0xb13   : > { %v6659_v23 = vsub.f32 %v11560_v62, %v6643_v52  ;;  %v6546_v12 = vadd.f32 -0.16666667, %v6530_v34  ;;  %v6478_v35 = vadd.f32 -0.0001984127, %v6462_v9  ;;  %v6436_v53 = vmul.f32 -2.5052108e-08, %v11637_v3 }
 0xb14   : > { %v6515_v25 = vadd.f32 0.008333334, %v6499_v30  ;;  %v6559_v55 = vmul.f32 %v6543_v20, %v11556_v29  ;;  %v6469_v22 = vmul.f32 %v6453_v57, %v11632_v11  ;;  %v6612_v54 = vmul.f32 0.5, %v11579_v8 }
 0xb15   : > { %v6562_v58 = vmul.f32 %v6546_v12, %v11577_v31  ;;  %v11654_v61 = vmul.f32 2.0, %v6629_v45  ;;  %v6494_v37 = vmul.f32 %v6478_v35, %v11564_v63  ;;  %v6452_v21 = vadd.f32 2.7557319e-06, %v6436_v53 }
 0xb16   : > { %v6531_v62 = vmul.f32 %v6515_v25, %v11608_v14  ;;  %v6575_v52 = vmul.f32 %v6559_v55, %v11544_v42  ;;  %v6655_v0 = vsub.f32 %v11494_v28, %v6639_v51  ;;  %v6485_v30 = vadd.f32 -0.0001984127, %v6469_v22 }
 0xb17   : > { %v6578_v29 = vmul.f32 %v6562_v58, %v11566_v40  ;;  %v6510_v6 = vadd.f32 0.008333334, %v6494_v37  ;;  %v6468_v34 = vmul.f32 %v6452_v21, %v11637_v3  ;;  %v6427_v9 = vmul.f32 -2.5052108e-08, %v11520_v50 }
 0xb18   : > { %v6547_v12 = vadd.f32 -0.16666667, %v6531_v62  ;;  %v6501_v31 = vmul.f32 %v6485_v30, %v11632_v11  ;;  %v6654_v35 = vsub.f32 %v11453_v7, %v6638_v19  ;;  %v6628_v45 = vfloor.f32 %v6612_v54 }
 0xb19   : > { %v6594_v20 = vadd.f32 %v6578_v29, %v11566_v40  ;;  %vm11666_vm2 = vcmp.gt.f32.partialorder %v6658_v18, 0.5  ;;  %v6526_v28 = vmul.f32 %v6510_v6, %v11564_v63  ;;  %v6484_v51 = vadd.f32 -0.0001984127, %v6468_v34 }
 0xb1a   : > { %v6443_v57 = vadd.f32 2.7557319e-06, %v6427_v9  ;;  %v6563_v53 = vmul.f32 %v6547_v12, %v11608_v14  ;;  %vm11672_vm3 = vcmp.gt.f32.partialorder %v6659_v23, 0.5  ;;  %v6517_v22 = vadd.f32 0.008333334, %v6501_v31 }
 0xb1b   : > { %v6661_v7 = vsub.f32 %v11591_v49, %v11654_v61  ;;  %v6591_v40 = vadd.f32 %v6575_v52, %v11544_v42  ;;  %vm11679_vm4 = vcmp.gt.f32.partialorder %v6655_v0, 0.5  ;;  %v6542_v19 = vadd.f32 -0.16666667, %v6526_v28 }
 0xb1c   : > { %v6500_v54 = vmul.f32 %v6484_v51, %v11637_v3  ;;  %v6459_v58 = vmul.f32 %v6443_v57, %v11520_v50  ;;  %v6579_v23 = vmul.f32 %v6563_v53, %v11601_v13  ;;  %v6533_v14 = vmul.f32 %v6517_v22, %v11632_v11 }
 0xb1d   : > { %vm11687_vm5 = vcmp.gt.f32.partialorder %v6654_v35, 0.5  ;;  %v6644_v49 = vmul.f32 2.0, %v6628_v45  ;;  %v6690_v61 = vsub.f32 0.0, %v6594_v20  ;;  %v6558_v42 = vmul.f32 %v6542_v19, %v11564_v63 }
 0xb1e   : > { %v6516_v21 = vadd.f32 0.008333334, %v6500_v54  ;;  %v6475_v62 = vadd.f32 -0.0001984127, %v6459_v58  ;;  %v6595_v52 = vadd.f32 %v6579_v23, %v11601_v13  ;;  %v6549_v0 = vadd.f32 -0.16666667, %v6533_v14 }
 0xb1f   : > { %v6603_v30 = vmul.f32 0.5, %v11434_v43  ;;  %v6433_v29 = vmul.f32 -2.5052108e-08, %v11641_v39  ;;  %v6687_v6 = vsub.f32 0.0, %v6591_v40  ;;  %v6574_v34 = vmul.f32 %v6558_v42, %v11536_v2 }
 0xb20   : > { %v6532_v9 = vmul.f32 %v6516_v21, %v11637_v3  ;;  %v6491_v12 = vmul.f32 %v6475_v62, %v11520_v50  ;;  %v6691_v31 = vsub.f32 0.0, %v6595_v52  ;;  %v6565_v35 = vmul.f32 %v6549_v0, %v11632_v11 }
 0xb21   : > { %v6660_v63 = vsub.f32 %v11579_v8, %v6644_v49  ;;  %v6449_v45 = vadd.f32 2.7557319e-06, %v6433_v29  ;;  %v6590_v13 = vadd.f32 %v6574_v34, %v11536_v2  ;;  %v6619_v57 = vfloor.f32 %v6603_v30 }
 0xb22   : > { %v6548_v28 = vadd.f32 -0.16666667, %v6532_v9  ;;  %v6507_v51 = vadd.f32 0.008333334, %v6491_v12  ;;  %v6707_v53 = vsel %vm11672_vm3, %v6691_v31, %v6595_v52  ;;  %v6706_v22 = vsel %vm11666_vm2, %v6690_v61, %v6594_v20 }
 0xb23   : > { %v6581_v19 = vmul.f32 %v6565_v35, %v11623_v4  ;;  %v6465_v54 = vmul.f32 %v6449_v45, %v11641_v39  ;;  %6734 = vmatprep.subr.mxu0 %v6707_v53  ;;  %v6686_v11 = vsub.f32 0.0, %v6590_v13  ;;  %v6609_v2 = vmul.f32 0.5, %v11558_v56 }
 0xb24   : > { %v6564_v8 = vmul.f32 %v6548_v28, %v11637_v3  ;;  %v6523_v58 = vmul.f32 %v6507_v51, %v11520_v50  ;;  %6735 = vmatpush1.msra.mxu0 %v6706_v22  ;;  %v6703_v25 = vsel %vm11679_vm4, %v6687_v6, %v6591_v40  ;;  %v6426_v20 = vmul.f32 -2.5052108e-08, %v11509_v44 }
 0xb25   : > { %v6597_v23 = vadd.f32 %v6581_v19, %v11623_v4  ;;  %v6481_v55 = vadd.f32 -0.0001984127, %v6465_v54  ;;  %6736 = vmatprep.subr.mxu0 %v6703_v25  ;;  %v6702_v14 = vsel %vm11687_vm5, %v6686_v11, %v6590_v13  ;;  %v6635_v61 = vmul.f32 2.0, %v6619_v57 }
 0xb26   : > { %v6580_v49 = vmul.f32 %v6564_v8, %v11619_v36  ;;  %v6539_v3 = vadd.f32 -0.16666667, %v6523_v58  ;;  %vm6677_vm6 = vcmp.gt.f32.partialorder %v6661_v7, 0.5  ;;  %6737 = vmatpush1.msra.mxu0 %v6702_v14  ;;  %v6442_v18 = vadd.f32 2.7557319e-06, %v6426_v20 }
 0xb27   : > { %v6693_v42 = vsub.f32 0.0, %v6597_v23  ;;  %v6497_v21 = vmul.f32 %v6481_v55, %v11641_v39  ;;  %vm11719_vm7 = vcmp.gt.f32.partialorder %v6660_v63, 0.5  ;;  %v6625_v37 = vfloor.f32 %v6609_v2 }
 0xb28   : > { %v6596_v40 = vadd.f32 %v6580_v49, %v11619_v36  ;;  %v6555_v62 = vmul.f32 %v6539_v3, %v11520_v50  ;;  %v6458_v30 = vmul.f32 %v6442_v18, %v11509_v44  ;;  %v6432_v7 = vmul.f32 -2.5052108e-08, %v11598_v16 }
 0xb29   : > { %v6709_v52 = vsel %vm6677_vm6, %v6693_v42, %v6597_v23  ;;  %v6513_v0 = vadd.f32 0.008333334, %v6497_v21  ;;  %v6651_v34 = vsub.f32 %v11434_v43, %v6635_v61  ;;  %v6602_v36 = vmul.f32 0.5, %v11428_v5 }
 0xb2a   : > { %6805 = vmatprep.subr.mxu1 %v6709_v52  ;;  %v6692_v29 = vsub.f32 0.0, %v6596_v40  ;;  %v6571_v6 = vmul.f32 %v6555_v62, %v11491_v27  ;;  %v6474_v12 = vadd.f32 -0.0001984127, %v6458_v30  ;;  %v6448_v31 = vadd.f32 2.7557319e-06, %v6432_v7 }
 0xb2b   : > { %v6529_v9 = vmul.f32 %v6513_v0, %v11641_v39  ;;  %v6423_v50 = vmul.f32 -2.5052108e-08, %v11498_v26  ;;  %v6641_v45 = vmul.f32 2.0, %v6625_v37  ;;  %v6608_v13 = vmul.f32 0.5, %v11538_v60 }
 0xb2c   : > { %v6708_v35 = vsel %vm11719_vm7, %v6692_v29, %v6596_v40  ;;  %v6587_v63 = vadd.f32 %v6571_v6, %v11491_v27  ;;  %v6490_v43 = vmul.f32 %v6474_v12, %v11509_v44  ;;  %v6464_v51 = vmul.f32 %v6448_v31, %v11598_v16 }
 0xb2d   : > { %6806 = vmatpush1.msra.mxu1 %v6708_v35  ;;  %v6545_v28 = vadd.f32 -0.16666667, %v6529_v9  ;;  %v6439_v57 = vadd.f32 2.7557319e-06, %v6423_v50  ;;  %v11739_v53 = vmul.f32 %v11582_v32, %v11582_v32  ;;  %vm6667_vm8 = vcmp.gt.f32.partialorder %v6651_v34, 0.5 }
 0xb2e   : > { %v6683_v22 = vsub.f32 0.0, %v6587_v63  ;;  %v6618_v19 = vfloor.f32 %v6602_v36  ;;  %v6506_v27 = vadd.f32 0.008333334, %v6490_v43  ;;  %v6480_v11 = vadd.f32 -0.0001984127, %v6464_v51 }
 0xb2f   : > { %v6561_v54 = vmul.f32 %v6545_v28, %v11641_v39  ;;  %v6455_v8 = vmul.f32 %v6439_v57, %v11498_v26  ;;  %v11745_v58 = vmul.f32 %v11515_v47, %v11515_v47  ;;  %v6657_v25 = vsub.f32 %v11558_v56, %v6641_v45 }
 0xb30   : > { %v6699_v2 = vsel %vm6667_vm8, %v6683_v22, %v6587_v63  ;;  %v6624_v23 = vfloor.f32 %v6608_v13  ;;  %v6522_v20 = vmul.f32 %v6506_v27, %v11509_v44  ;;  %v6496_v14 = vmul.f32 %v6480_v11, %v11598_v16 }
 0xb31   : > { %6738 = vmatprep.subr.mxu0 %v6699_v2  ;;  %v6577_v55 = vmul.f32 %v6561_v54, %v11617_v41  ;;  %v6471_v39 = vadd.f32 -0.0001984127, %v6455_v8  ;;  %v11753_v49 = vmul.f32 %v11541_v10, %v11541_v10  ;;  %v11757_v3 = vmul.f32 %v11570_v17, %v11570_v17 }
 0xb32   : > { %v6634_v61 = vmul.f32 2.0, %v6618_v19  ;;  %v6429_v56 = vmul.f32 -2.5052108e-08, %v11739_v53  ;;  %v6538_v21 = vadd.f32 -0.16666667, %v6522_v20  ;;  %vm6673_vm9 = vcmp.gt.f32.partialorder %v6657_v25, 0.5 }
 0xb33   : > { %v6593_v42 = vadd.f32 %v6577_v55, %v11617_v41  ;;  %v6512_v18 = vadd.f32 0.008333334, %v6496_v14  ;;  %v6487_v40 = vmul.f32 %v6471_v39, %v11498_v26  ;;  %v6640_v4 = vmul.f32 2.0, %v6624_v23 }
 0xb34   : > { %v6445_v62 = vadd.f32 2.7557319e-06, %v6429_v56  ;;  %v6422_v37 = vmul.f32 -2.5052108e-08, %v11485_v46  ;;  %v6554_v0 = vmul.f32 %v6538_v21, %v11509_v44  ;;  %v6650_v29 = vsub.f32 %v11428_v5, %v6634_v61  ;;  %v12378_v21 = vld [vmem:[#allocation25_spill] sm:$0xff] }
 0xb35   : > { %v6689_v52 = vsub.f32 0.0, %v6593_v42  ;;  %v6528_v30 = vmul.f32 %v6512_v18, %v11598_v16  ;;  %v6503_v7 = vadd.f32 0.008333334, %v6487_v40  ;;  %v6615_v6 = vfloor.f32 %v11481_v48 }
 0xb36   : > { %v6461_v41 = vmul.f32 %v6445_v62, %v11739_v53  ;;  %v6438_v34 = vadd.f32 2.7557319e-06, %v6422_v37  ;;  %v6570_v9 = vmul.f32 %v6554_v0, %v11487_v1  ;;  %v6656_v50 = vsub.f32 %v11538_v60, %v6640_v4 }
 0xb37   : > { %v6705_v36 = vsel %vm6673_vm9, %v6689_v52, %v6593_v42  ;;  %v6544_v12 = vadd.f32 -0.16666667, %v6528_v30  ;;  %v6519_v31 = vmul.f32 %v6503_v7, %v11498_v26  ;;  %v6605_v35 = vmul.f32 0.5, %v11513_v59 }
 0xb38   : > { %6807 = vmatprep.subr.mxu1 %v6705_v36  ;;  %v6477_v44 = vadd.f32 -0.0001984127, %v6461_v41  ;;  %v6454_v63 = vmul.f32 %v6438_v34, %v11485_v46  ;;  %v6586_v5 = vadd.f32 %v6570_v9, %v11487_v1  ;;  %v6428_v13 = vmul.f32 -2.5052108e-08, %v11757_v3 }
 0xb39   : > { %v6560_v48 = vmul.f32 %v6544_v12, %v11598_v16  ;;  %v6535_v45 = vadd.f32 -0.16666667, %v6519_v31  ;;  %vm6666_vm10 = vcmp.gt.f32.partialorder %v6650_v29, 0.5  ;;  %v6631_v28 = vmul.f32 2.0, %v6615_v6 }
 0xb3a   : > { %v6493_v43 = vmul.f32 %v6477_v44, %v11739_v53  ;;  %v6470_v51 = vadd.f32 -0.0001984127, %v6454_v63  ;;  %v6682_v57 = vsub.f32 0.0, %v6586_v5  ;;  %v6444_v19 = vadd.f32 2.7557319e-06, %v6428_v13 }
 0xb3b   : > { %v6576_v60 = vmul.f32 %v6560_v48, %v11584_v38  ;;  %v6551_v22 = vmul.f32 %v6535_v45, %v11498_v26  ;;  %vm11779_vm0 = vcmp.gt.f32.partialorder %v6656_v50, 0.5  ;;  %v6621_v16 = vfloor.f32 %v6605_v35  ;;  %v12380_v35 = vld [vmem:[#allocation8_spill] sm:$0xff]  ;;  %v12381_v48 = vld [vmem:[#allocation13_spill] sm:$0xff] }
 0xb3c   : > { %v6509_v1 = vadd.f32 0.008333334, %v6493_v43  ;;  %v6486_v27 = vmul.f32 %v6470_v51, %v11485_v46  ;;  %v6698_v11 = vsel %vm6666_vm10, %v6682_v57, %v6586_v5  ;;  %v6460_v25 = vmul.f32 %v6444_v19, %v11757_v3 }
 0xb3d   : > { %v6592_v8 = vadd.f32 %v6576_v60, %v11584_v38  ;;  %v6567_v2 = vmul.f32 %v6551_v22, %v11474_v24  ;;  %6739 = vmatpush1.msra.mxu0 %v6698_v11  ;;  %v6647_v23 = vsub.f32 %v11422_v33, %v6631_v28  ;;  %v6425_v20 = vmul.f32 -2.5052108e-08, %v11753_v49 }
 0xb3e   : > { %v6525_v26 = vmul.f32 %v6509_v1, %v11739_v53  ;;  %v6502_v55 = vadd.f32 0.008333334, %v6486_v27  ;;  %v6614_v61 = vfloor.f32 %v11446_v15  ;;  %v6476_v56 = vadd.f32 -0.0001984127, %v6460_v25  ;;  %v12382_v1 = vld [vmem:[#allocation24_spill] sm:$0xff] }
 0xb3f   : > { %v6688_v14 = vsub.f32 0.0, %v6592_v8  ;;  %v6583_v39 = vadd.f32 %v6567_v2, %v11474_v24  ;;  %v6604_v18 = vmul.f32 0.5, %v12378_v21  ;;  %v6441_v40 = vadd.f32 2.7557319e-06, %v6425_v20 }
 0xb40   : > { %v6541_v42 = vadd.f32 -0.16666667, %v6525_v26  ;;  %v6518_v38 = vmul.f32 %v6502_v55, %v11485_v46  ;;  %v6637_v62 = vmul.f32 2.0, %v6621_v16  ;;  %v6492_v37 = vmul.f32 %v6476_v56, %v11757_v3  ;;  %v7220_v55 = vld [vmem:[%s11909_s7] sm:$0x7] }
 0xb41   : > { %v6704_v33 = vsel %vm11779_vm0, %v6688_v14, %v6592_v8  ;;  %v6679_v4 = vsub.f32 0.0, %v6583_v39  ;;  %vm6663_vm1 = vcmp.gt.f32.partialorder %v6647_v23, 0.5  ;;  %v6457_v15 = vmul.f32 %v6441_v40, %v11753_v49 }
 0xb42   : > { %6808 = vmatpush1.msra.mxu1 %v6704_v33  ;;  %v6557_v24 = vmul.f32 %v6541_v42, %v11739_v53  ;;  %v6534_v52 = vadd.f32 -0.16666667, %v6518_v38  ;;  %v6630_v30 = vmul.f32 2.0, %v6614_v61  ;;  %v6508_v7 = vadd.f32 0.008333334, %v6492_v37  ;;  %v12379_v53 = vld [vmem:[#allocation20_spill] sm:$0xff] }
 0xb43   : > { %v6695_v0 = vsel %vm6663_vm1, %v6679_v4, %v6583_v39  ;;  %v6424_v29 = vmul.f32 -2.5052108e-08, %v11745_v58  ;;  %v6620_v34 = vfloor.f32 %v6604_v18  ;;  %v6473_v36 = vadd.f32 -0.0001984127, %v6457_v15  ;;  %v12383_v15 = vld [vmem:[#allocation22_spill] sm:$0xff] }
 0xb44   : > { %6740 = vmatprep.subr.mxu0 %v6695_v0  ;;  %v6573_v6 = vmul.f32 %v6557_v24, %v11582_v32  ;;  %v6550_v41 = vmul.f32 %v6534_v52, %v11485_v46  ;;  %v6653_v9 = vsub.f32 %v11513_v59, %v6637_v62  ;;  %v6524_v12 = vmul.f32 %v6508_v7, %v11757_v3 }
 0xb45   : > { %v6601_v31 = vmul.f32 0.5, %v12379_v53  ;;  %v6440_v50 = vadd.f32 2.7557319e-06, %v6424_v29  ;;  %v6489_v5 = vmul.f32 %v6473_v36, %v11753_v49  ;;  %v6646_v45 = vsub.f32 %v12381_v48, %v6630_v30 }
 0xb46   : > { %v6589_v44 = vadd.f32 %v6573_v6, %v11582_v32  ;;  %v6566_v63 = vmul.f32 %v6550_v41, %v12380_v35  ;;  %v6540_v13 = vadd.f32 -0.16666667, %v6524_v12  ;;  %v6636_v59 = vmul.f32 2.0, %v6620_v34 }
 0xb47   : > { %v6456_v46 = vmul.f32 %v6440_v50, %v11745_v58  ;;  %v6505_v51 = vadd.f32 0.008333334, %v6489_v5  ;;  %vm6669_vm11 = vcmp.gt.f32.partialorder %v6653_v9, 0.5  ;;  %v6617_v60 = vfloor.f32 %v6601_v31 }
 0xb48   : > { %v6685_v28 = vsub.f32 0.0, %v6589_v44  ;;  %v6582_v43 = vadd.f32 %v6566_v63, %v12380_v35  ;;  %v6556_v57 = vmul.f32 %v6540_v13, %v11757_v3  ;;  %v6600_v16 = vmul.f32 0.5, %v12382_v1 }
 0xb49   : > { %v6472_v22 = vadd.f32 -0.0001984127, %v6456_v46  ;;  %v6521_v54 = vmul.f32 %v6505_v51, %v11753_v49  ;;  %vm6662_vm12 = vcmp.gt.f32.partialorder %v6646_v45, 0.5  ;;  %v6652_v2 = vsub.f32 %v12378_v21, %v6636_v59 }
 0xb4a   : > { %v6701_v32 = vsel %vm6669_vm11, %v6685_v28, %v6589_v44  ;;  %v6678_v19 = vsub.f32 0.0, %v6582_v43  ;;  %v6572_v27 = vmul.f32 %v6556_v57, %v11570_v17  ;;  %v6633_v23 = vmul.f32 2.0, %v6617_v60 }
 0xb4b   : > { %6809 = vmatprep.subr.mxu1 %v6701_v32  ;;  %v6488_v11 = vmul.f32 %v6472_v22, %v11745_v58  ;;  %v6537_v25 = vadd.f32 -0.16666667, %v6521_v54  ;;  %v6616_v14 = vfloor.f32 %v6600_v16  ;;  %vm6668_vm13 = vcmp.gt.f32.partialorder %v6652_v2, 0.5 }
 0xb4c   : > { %v6694_v8 = vsel %vm6662_vm12, %v6678_v19, %v6582_v43  ;;  %v6588_v3 = vadd.f32 %v6572_v27, %v11570_v17  ;;  %v6649_v17 = vsub.f32 %v12379_v53, %v6633_v23 }
 0xb4d   : > { %6741 = vmatpush1.msra.mxu0 %v6694_v8  ;;  %v6504_v26 = vadd.f32 0.008333334, %v6488_v11  ;;  %v6553_v20 = vmul.f32 %v6537_v25, %v11753_v49  ;;  %v6632_v18 = vmul.f32 2.0, %v6616_v14 }
 0xb4e   : > { %7141 = vmatmul.mubr.msk.f32.vlgmr.msra.gmra.mxu0 %vm1067_vm15, %v7220_v55  ;;  %v6684_v39 = vsub.f32 0.0, %v6588_v3  ;;  %vm6665_vm14 = vcmp.gt.f32.partialorder %v6649_v17, 0.5 }
 0xb4f   : > { %v6520_v61 = vmul.f32 %v6504_v26, %v11745_v58  ;;  %v6569_v56 = vmul.f32 %v6553_v20, %v11541_v10  ;;  %v6648_v62 = vsub.f32 %v12382_v1, %v6632_v18 }
 0xb50   : > { %v6700_v42 = vsel %vm6668_vm13, %v6684_v39, %v6588_v3 }
 0xb51   : > { %v6536_v38 = vadd.f32 -0.16666667, %v6520_v61  ;;  %6810 = vmatpush1.msra.mxu1 %v6700_v42  ;;  %v6585_v21 = vadd.f32 %v6569_v56, %v11541_v10  ;;  %vm6664_vm2 = vcmp.gt.f32.partialorder %v6648_v62, 0.5 }
 0xb53   : > { %v6552_v40 = vmul.f32 %v6536_v38, %v11745_v58  ;;  %v6681_v33 = vsub.f32 0.0, %v6585_v21 }
 0xb55   : > { %v6568_v49 = vmul.f32 %v6552_v40, %v11515_v47  ;;  %v6697_v4 = vsel %vm6665_vm14, %v6681_v33, %v6585_v21 }
 0xb56   : > { %6811 = vmatprep.subr.mxu1 %v6697_v4 }
 0xb57   : > { %v6584_v37 = vadd.f32 %v6568_v49, %v11515_v47 }
 0xb59   : > { %v6680_v24 = vsub.f32 0.0, %v6584_v37 }
 0xb5b   : > { %v6696_v52 = vsel %vm6664_vm2, %v6680_v24, %v6584_v37 }
 0xb5c   : > { %6812 = vmatpush1.msra.mxu1 %v6696_v52 }
 0xb5d   : > { %7142 = vmatmul.mubr.msk.f32.vlgmr.msra.gmra.mxu1 %vm1067_vm15, %v7220_v55 }
 0xc0e   : > { %v6776_v10 = vpop.f32.mrf.mxu0 }
 0xc0f   : > { %v6777_v0 = vadd.f32 %v6776_v10, %v12383_v15 }
 0xc10   : > { %v6778_v58 = vpop.f32.mrf.mxu0 }
 0xc11   : > { %v6852_v30 = vmul.f32 0.31830987, %v6777_v0  ;;  %v6779_v7 = vadd.f32 %v6778_v58, %v12383_v15 }
 0xc13   : > { %v6856_v29 = vadd.f32 0.5, %v6852_v30  ;;  %v6853_v6 = vmul.f32 0.31830987, %v6779_v7 }
 0xc15   : > { %v11834_v41 = vfloor.f32 %v6856_v29  ;;  %v6857_v34 = vadd.f32 0.5, %v6853_v6 }
 0xc17   : > { %v6864_v47 = vmul.f32 3.140625, %v11834_v41  ;;  %v11837_v36 = vfloor.f32 %v6857_v34  ;;  %v6872_v12 = vmul.f32 0.00096702576, %v11834_v41  ;;  %v6880_v50 = vmul.f32 6.277114e-07, %v11834_v41 }
 0xc18   : > { %v6936_v14 = vmul.f32 0.5, %v11834_v41 }
 0xc19   : > { %v6868_v9 = vsub.f32 %v6777_v0, %v6864_v47  ;;  %v6865_v53 = vmul.f32 3.140625, %v11837_v36  ;;  %v6873_v35 = vmul.f32 0.00096702576, %v11837_v36  ;;  %v6881_v45 = vmul.f32 6.277114e-07, %v11837_v36 }
 0xc1a   : > { %v6937_v17 = vmul.f32 0.5, %v11837_v36  ;;  %v6940_v52 = vfloor.f32 %v6936_v14 }
 0xc1b   : > { %v6876_v31 = vsub.f32 %v6868_v9, %v6872_v12  ;;  %v6869_v44 = vsub.f32 %v6779_v7, %v6865_v53 }
 0xc1c   : > { %v6941_v10 = vfloor.f32 %v6937_v17  ;;  %v6944_v47 = vmul.f32 2.0, %v6940_v52 }
 0xc1d   : > { %v6884_v63 = vsub.f32 %v6876_v31, %v6880_v50  ;;  %v6847_v5 = vpop.f32.mrf.mxu1  ;;  %v6877_v48 = vsub.f32 %v6869_v44, %v6873_v35 }
 0xc1e   : > { %v6848_v13 = vadd.f32 %v6847_v5, %v12383_v15  ;;  %v6945_v9 = vmul.f32 2.0, %v6941_v10 }
 0xc1f   : > { %v6888_v46 = vmul.f32 %v6884_v63, %v6884_v63  ;;  %v6849_v28 = vpop.f32.mrf.mxu1  ;;  %v6885_v43 = vsub.f32 %v6877_v48, %v6881_v45  ;;  %v6948_v48 = vsub.f32 %v11834_v41, %v6944_v47 }
 0xc20   : > { %v6854_v59 = vmul.f32 0.31830987, %v6848_v13  ;;  %v6850_v51 = vadd.f32 %v6849_v28, %v12383_v15  ;;  %v6949_v45 = vsub.f32 %v11837_v36, %v6945_v9 }
 0xc21   : > { %v6892_v57 = vmul.f32 -2.5052108e-08, %v6888_v46  ;;  %v6889_v60 = vmul.f32 %v6885_v43, %v6885_v43  ;;  %vm6952_vm15 = vcmp.gt.f32.partialorder %v6948_v48, 0.5 }
 0xc22   : > { %v6858_v22 = vadd.f32 0.5, %v6854_v59  ;;  %v6855_v32 = vmul.f32 0.31830987, %v6850_v51  ;;  %vm6953_vm3 = vcmp.gt.f32.partialorder %v6949_v45, 0.5 }
 0xc23   : > { %v6896_v19 = vadd.f32 2.7557319e-06, %v6892_v57  ;;  %v6893_v54 = vmul.f32 -2.5052108e-08, %v6889_v60 }
 0xc24   : > { %v11846_v1 = vfloor.f32 %v6858_v22  ;;  %v6859_v16 = vadd.f32 0.5, %v6855_v32 }
 0xc25   : > { %v6900_v27 = vmul.f32 %v6896_v19, %v6888_v46  ;;  %v6897_v11 = vadd.f32 2.7557319e-06, %v6893_v54 }
 0xc26   : > { %v6866_v8 = vmul.f32 3.140625, %v11846_v1  ;;  %v11849_v25 = vfloor.f32 %v6859_v16  ;;  %v6874_v26 = vmul.f32 0.00096702576, %v11846_v1  ;;  %v6882_v56 = vmul.f32 6.277114e-07, %v11846_v1 }
 0xc27   : > { %v6904_v2 = vadd.f32 -0.0001984127, %v6900_v27  ;;  %v6901_v3 = vmul.f32 %v6897_v11, %v6889_v60  ;;  %v6938_v32 = vmul.f32 0.5, %v11846_v1 }
 0xc28   : > { %v6870_v23 = vsub.f32 %v6848_v13, %v6866_v8  ;;  %v6867_v20 = vmul.f32 3.140625, %v11849_v25  ;;  %v6875_v21 = vmul.f32 0.00096702576, %v11849_v25  ;;  %v6883_v4 = vmul.f32 6.277114e-07, %v11849_v25 }
 0xc29   : > { %v6908_v55 = vmul.f32 %v6904_v2, %v6888_v46  ;;  %v6905_v39 = vadd.f32 -0.0001984127, %v6901_v3  ;;  %v6942_v11 = vfloor.f32 %v6938_v32 }
 0xc2a   : > { %v6878_v61 = vsub.f32 %v6870_v23, %v6874_v26  ;;  %v6871_v38 = vsub.f32 %v6850_v51, %v6867_v20 }
 0xc2b   : > { %v6912_v42 = vadd.f32 0.008333334, %v6908_v55  ;;  %v6909_v18 = vmul.f32 %v6905_v39, %v6889_v60  ;;  %v6946_v26 = vmul.f32 2.0, %v6942_v11 }
 0xc2c   : > { %v6886_v40 = vsub.f32 %v6878_v61, %v6882_v56  ;;  %v6879_v49 = vsub.f32 %v6871_v38, %v6875_v21 }
 0xc2d   : > { %v6916_v33 = vmul.f32 %v6912_v42, %v6888_v46  ;;  %v6913_v62 = vadd.f32 0.008333334, %v6909_v18  ;;  %v6950_v61 = vsub.f32 %v11846_v1, %v6946_v26 }
 0xc2e   : > { %v6890_v37 = vmul.f32 %v6886_v40, %v6886_v40  ;;  %v6887_v15 = vsub.f32 %v6879_v49, %v6883_v4 }
 0xc2f   : > { %v6920_v24 = vadd.f32 -0.16666667, %v6916_v33  ;;  %v6917_v0 = vmul.f32 %v6913_v62, %v6889_v60  ;;  %vm6954_vm4 = vcmp.gt.f32.partialorder %v6950_v61, 0.5 }
 0xc30   : > { %v6894_v58 = vmul.f32 -2.5052108e-08, %v6890_v37  ;;  %v6891_v7 = vmul.f32 %v6887_v15, %v6887_v15 }
 0xc31   : > { %v6924_v30 = vmul.f32 %v6920_v24, %v6888_v46  ;;  %v6921_v29 = vadd.f32 -0.16666667, %v6917_v0 }
 0xc32   : > { %v6898_v6 = vadd.f32 2.7557319e-06, %v6894_v58  ;;  %v6895_v12 = vmul.f32 -2.5052108e-08, %v6891_v7 }
 0xc33   : > { %v6928_v34 = vmul.f32 %v6924_v30, %v6884_v63  ;;  %v6925_v53 = vmul.f32 %v6921_v29, %v6889_v60  ;;  %v6939_v60 = vmul.f32 0.5, %v11849_v25 }
 0xc34   : > { %v6902_v31 = vmul.f32 %v6898_v6, %v6890_v37  ;;  %v6899_v44 = vadd.f32 2.7557319e-06, %v6895_v12 }
 0xc35   : > { %v6932_v50 = vadd.f32 %v6928_v34, %v6884_v63  ;;  %v6929_v35 = vmul.f32 %v6925_v53, %v6885_v43 }
 0xc36   : > { %v6906_v5 = vadd.f32 -0.0001984127, %v6902_v31  ;;  %v6903_v13 = vmul.f32 %v6899_v44, %v6891_v7 }
 0xc37   : > { %v6956_v28 = vsub.f32 0.0, %v6932_v50  ;;  %v6933_v46 = vadd.f32 %v6929_v35, %v6885_v43  ;;  %v6943_v43 = vfloor.f32 %v6939_v60 }
 0xc38   : > { %v6910_v59 = vmul.f32 %v6906_v5, %v6890_v37  ;;  %v6907_v51 = vadd.f32 -0.0001984127, %v6903_v13 }
 0xc39   : > { %v6957_v57 = vsub.f32 0.0, %v6933_v46  ;;  %v6960_v19 = vsel %vm6952_vm15, %v6956_v28, %v6932_v50  ;;  %v6947_v55 = vmul.f32 2.0, %v6943_v43 }
 0xc3a   : > { %v6914_v22 = vadd.f32 0.008333334, %v6910_v59  ;;  %v6911_v63 = vmul.f32 %v6907_v51, %v6891_v7 }
 0xc3b   : > { %v6961_v54 = vsel %vm6953_vm3, %v6957_v57, %v6933_v46  ;;  %v6951_v56 = vsub.f32 %v11849_v25, %v6947_v55 }
 0xc3c   : > { %v6918_v41 = vmul.f32 %v6914_v22, %v6890_v37  ;;  %v6968_v16 = vcombine.low %v6960_v19, %v6961_v54  ;;  %v6915_v36 = vadd.f32 0.008333334, %v6911_v63 }
 0xc3d   : > { %vm6955_vm5 = vcmp.gt.f32.partialorder %v6951_v56, 0.5 }
 0xc3e   : > { %v6922_v27 = vadd.f32 -0.16666667, %v6918_v41  ;;  %6972 = vst [vmem:[%s9038_s17 + $0x20] sm:$0x77] %v6968_v16  ;;  %v6919_v8 = vmul.f32 %v6915_v36, %v6891_v7 }
 0xc40   : > { %v6926_v2 = vmul.f32 %v6922_v27, %v6890_v37  ;;  %v6923_v3 = vadd.f32 -0.16666667, %v6919_v8 }
 0xc42   : > { %v6930_v23 = vmul.f32 %v6926_v2, %v6886_v40  ;;  %v6927_v20 = vmul.f32 %v6923_v3, %v6891_v7 }
 0xc44   : > { %v6934_v14 = vadd.f32 %v6930_v23, %v6886_v40  ;;  %v6931_v39 = vmul.f32 %v6927_v20, %v6887_v15 }
 0xc46   : > { %v6958_v42 = vsub.f32 0.0, %v6934_v14  ;;  %v6935_v17 = vadd.f32 %v6931_v39, %v6887_v15 }
 0xc48   : > { %v6959_v38 = vsub.f32 0.0, %v6935_v17  ;;  %v6962_v21 = vsel %vm6954_vm4, %v6958_v42, %v6934_v14 }
 0xc4a   : > { %v6963_v18 = vsel %vm6955_vm5, %v6959_v38, %v6935_v17 }
 0xc4b   : > { %v6969_v33 = vcombine.low %v6962_v21, %v6963_v18 }
 0xc4d   : > { %6973 = vst [vmem:[%s9038_s17 + $0x28] sm:$0x77] %v6969_v33 }
 0xc4e   : > { %7234 = shalt.err (!%p7231_p3)
}
 0xc4f   : > { %s7235_s21 = scalar_lea.hbm %s6987_s16, 768  ;;  %s7239_s27 = scalar_lea.hbm %s11911_s9, 1536 }
 0xc50   : > { %p7236_p4 = scmp.ne.s32.totalorder %s6987_s16, %s7235_s21  ;;  %p7240_p9 = scmp.lt.s32.totalorder %s6987_s16, %s11911_s9 }
 0xc51   : > { %p7241_p10 = scmp.lt.s32.totalorder %s7239_s27, %s7235_s21 }
 0xc52   : > { %p7237_p7 = pnand %p7236_p4, %p7375_p5 }
 0xc53   : > { %p7242_p11 = por %p7241_p10, %p7240_p9 }
 0xc54   : > { %p7238_p8 = pneg %p7237_p7 }
 0xc56   : > { %p7243_p12 = pnand %p7242_p11, %p7238_p8 }
 0xc58   : > { %7246 = shalt.err (!%p7243_p12)
}
 0xc59   : > { %7148 = dma.vmem_to_hbm [thread:$0]  (%p7375_p5), %s6990_s28, 768, %s6987_s16, %s6975_s23  }
 0xc5a PF: > { %p7154_p13 = scmp.ge.s32.totalorder %s7281_s12, 2  ;;  %s7001_s24 = sand.u32 1, %s7269_s30  }
 0xc5b   : > { %s7002_s13 = scalar_lea.sflag [#allocation3], %s7001_s24 }
 0xc5c   : > { %p7151_p0 = pnand %p7154_p13, %p7379_p6 }
 0xc5e   : > { %p7152_p1 = pneg %p7151_p0 }
 0xc60   : > { %7264 = dma.done.wait (%p7152_p1), %s7002_s13, 768  }
 0xc61   : > { %7266 = vsyncadd (%p7152_p1), %s7002_s13, 4294966528  ;;  %p19_p2 = scmp.ge.s32.totalorder %s7362_s15, 4   ;;  %s12384_s30 = smov %s7273_s10 }
 0xc62   : > { %s12385_s10 = smov %s7277_s11  ;;  %s12386_s11 = smov %s7373_s18 }
 0xc63   : > { %s12387_s12 = smov %s7362_s15  ;;  %21 = sbr.rel (!%p19_p2) target bundleno = 3 (0x3), region = 91 }
 0xc68   :  { %7007 = vsyncpa [#allocation3], 1 }
 0xc69   :  { %7009 = vsyncpa [#allocation3 + $0x1], 1 }

</bundles_post_ra>
